<compile_context>
chip_gen: v5e
topology: v5e:2x2
jax: 0.10.0
libtpu: 0.0.40
codegen_flags: <defaults>
</compile_context>

<pallas_src>
from functools import partial

import numpy as np
import jax
import jax.numpy as jnp
from jax import lax
from jax.experimental import pallas as pl
from jax.experimental.pallas import tpu as pltpu


_VMEM_LIMIT = 32 * 1024 * 1024       # explicit budget, fits v5e/v6e/v7x


def _aligned(i, m):
    """Alignment hint that tolerates both Python ints and traced scalars."""
    return i if isinstance(i, (int, np.integer)) else pl.multiple_of(i, m)


def _fs(shape):
    """Full-array BlockSpec for grid=(1,) calls."""
    return pl.BlockSpec(shape, lambda *_: (0,) * len(shape))


# ----------------------------------------------------------------------------
# Kernels
# ----------------------------------------------------------------------------
def _enc_bilstm_kernel(x_ref, wih_ref, b_ref, whh_ref, m_ref, out_ref,
                       g_scr, h_scr, c_scr):
    """One bidirectional masked LSTM encoder per grid step (grid=(3,))."""
    T, Bp, _ = m_ref.shape
    H = out_ref.shape[2]
    G = 4 * H

    # merged fwd+bwd input projection (hoisted out of the serial loop)
    g_scr[...] = (jnp.dot(x_ref[...], wih_ref[...],
                          preferred_element_type=jnp.float32) + b_ref[...])
    h_scr[...] = jnp.zeros_like(h_scr)
    c_scr[...] = jnp.zeros_like(c_scr)

    whh_f = whh_ref[:, :G]
    whh_b = whh_ref[:, G:]

    def cell(gx, m, h, c, whh):
        gates = gx + jnp.dot(h.astype(jnp.bfloat16), whh,
                             preferred_element_type=jnp.float32)
        s = jax.nn.sigmoid(gates)                  # one EUP pass over (B, 4H)
        i_g = s[:, 0:H]
        f_g = s[:, H:2 * H]
        g_g = 2.0 * s[:, 2 * H:3 * H] - 1.0        # == tanh (g cols prescaled x2)
        o_g = s[:, 3 * H:4 * H]
        c_new = f_g * c + i_g * g_g
        h_new = o_g * jnp.tanh(c_new)
        return m * h_new + (1.0 - m) * h, m * c_new + (1.0 - m) * c

    @pl.loop(0, T, unroll=True)
    def _(t):
        # forward direction: position t
        off_f = _aligned(t * Bp, Bp)
        gx_f = g_scr[pl.ds(off_f, Bp), :]
        h_f, c_f = cell(gx_f[:, :G], m_ref[t], h_scr[0], c_scr[0], whh_f)
        h_scr[0] = h_f
        c_scr[0] = c_f
        # backward direction: position T-1-t (pack_padded semantics via mask)
        tb = T - 1 - t
        off_b = _aligned(tb * Bp, Bp)
        gx_b = g_scr[pl.ds(off_b, Bp), :]
        h_b, c_b = cell(gx_b[:, G:], m_ref[tb], h_scr[1], c_scr[1], whh_b)
        h_scr[1] = h_b
        c_scr[1] = c_b

    out_ref[0] = h_scr[0]
    out_ref[1] = h_scr[1]


def _dense_head_kernel(yenc_ref, cenc_ref, eps_ref,
                       wry_ref, wrc_ref, br_ref, gr_ref, br2_ref, wrm_ref, brm_ref,
                       wp_ref, bp_ref, gp_ref, bp2_ref, wpm_ref, bpm_ref,
                       wb1z_ref, wb1c_ref, bb1_ref, wb2_ref, bb2_ref,
                       wlz_ref, wlc_ref, bl_ref,
                       r_ref, p_ref, bow_ref, h0_ref):
    """recognition/prior heads + reparameterize + bow + latent2hidden, fused."""
    latent = eps_ref.shape[1]

    def tanh_ln(h, g, beta):
        h = jnp.tanh(h)
        mu = jnp.mean(h, axis=-1, keepdims=True)
        var = jnp.mean(jnp.square(h - mu), axis=-1, keepdims=True)
        return (h - mu) * lax.rsqrt(var + 1e-5) * g + beta

    yenc = yenc_ref[...]
    cenc = cenc_ref[...]

    # recognition(hidden_in=[y_enc, c_enc]) -> tanh -> LN -> r_mu_log_var
    rec = tanh_ln(jnp.dot(yenc, wry_ref[...], preferred_element_type=jnp.float32)
                  + jnp.dot(cenc, wrc_ref[...], preferred_element_type=jnp.float32)
                  + br_ref[...], gr_ref[...], br2_ref[...])
    r = (jnp.dot(rec.astype(jnp.bfloat16), wrm_ref[...],
                 preferred_element_type=jnp.float32) + brm_ref[...])
    r_ref[...] = r                                      # lane-padded to 128

    # prior(c_enc) -> tanh -> LN -> p_mu_log_var
    pri = tanh_ln(jnp.dot(cenc, wp_ref[...], preferred_element_type=jnp.float32)
                  + bp_ref[...], gp_ref[...], bp2_ref[...])
    p_ref[...] = (jnp.dot(pri.astype(jnp.bfloat16), wpm_ref[...],
                          preferred_element_type=jnp.float32) + bpm_ref[...])

    # reparameterize: z = r_mu + eps * exp(0.5 * r_log_var)
    z = r[:, :latent] + eps_ref[...] * jnp.exp(0.5 * r[:, latent:2 * latent])
    zb = z.astype(jnp.bfloat16)

    # bow1 -> tanh -> bow2 and latent2hidden over to_decode = [z, c_enc]
    # (split matmuls, no in-kernel concatenation)
    h1 = jnp.tanh(jnp.dot(zb, wb1z_ref[...], preferred_element_type=jnp.float32)
                  + jnp.dot(cenc, wb1c_ref[...], preferred_element_type=jnp.float32)
                  + bb1_ref[...])
    bow_ref[...] = (jnp.dot(h1.astype(jnp.bfloat16), wb2_ref[...],
                            preferred_element_type=jnp.float32) + bb2_ref[...])
    h0_ref[...] = (jnp.dot(zb, wlz_ref[...], preferred_element_type=jnp.float32)
                   + jnp.dot(cenc, wlc_ref[...], preferred_element_type=jnp.float32)
                   + bl_ref[...])


def _dec_kernel(tf_ref, wih_ref, b_ref, whh_ref, h0_ref, m_ref, wout_ref, bout_ref,
                out_ref, gx_scr, hseq_scr, h_scr, c_scr):
    """Fused decoder: input projection + masked LSTM + out-proj + log_softmax."""
    Td, Bp, _ = m_ref.shape
    H = h0_ref.shape[1]

    # hoisted input projection over all timesteps (one MXU matmul)
    gx_scr[...] = (jnp.dot(tf_ref[...], wih_ref[...],
                           preferred_element_type=jnp.float32) + b_ref[...])
    h_scr[...] = h0_ref[...]
    c_scr[...] = h0_ref[...]            # reference: to_decode = (hidden, hidden)
    whh = whh_ref[...]

    @pl.loop(0, Td, unroll=True)
    def _(t):
        off = _aligned(t * Bp, Bp)
        gates = gx_scr[pl.ds(off, Bp), :] + jnp.dot(
            h_scr[...].astype(jnp.bfloat16), whh,
            preferred_element_type=jnp.float32)
        s = jax.nn.sigmoid(gates)
        i_g = s[:, 0:H]
        f_g = s[:, H:2 * H]
        g_g = 2.0 * s[:, 2 * H:3 * H] - 1.0
        o_g = s[:, 3 * H:4 * H]
        c_new = f_g * c_scr[...] + i_g * g_g
        h_new = o_g * jnp.tanh(c_new)
        m = m_ref[t]
        hseq_scr[pl.ds(off, Bp), :] = m * h_new     # pad_packed pads with zeros
        h_scr[...] = m * h_new + (1.0 - m) * h_scr[...]
        c_scr[...] = m * c_new + (1.0 - m) * c_scr[...]

    # fused out-projection + log_softmax over the whole sequence (lane-dense V)
    logits = (jnp.dot(hseq_scr[...].astype(jnp.bfloat16), wout_ref[...],
                      preferred_element_type=jnp.float32) + bout_ref[...])
    mx = jnp.max(logits, axis=-1, keepdims=True)
    lse = jnp.log(jnp.sum(jnp.exp(logits - mx), axis=-1, keepdims=True)) + mx
    out_ref[...] = logits - lse


# ----------------------------------------------------------------------------
# Pallas wrappers
# ----------------------------------------------------------------------------
def encode_bilstm(x3, wih8, b8, whh8, mask3):
    """3 bidirectional masked LSTM encoders in one call; returns (3, 2, Bp, H)."""
    R, TB, E = x3.shape
    _, T, Bp, _ = mask3.shape
    H = whh8.shape[1]
    G8 = whh8.shape[2]
    return pl.pallas_call(
        _enc_bilstm_kernel,
        grid=(R,),
        in_specs=[pl.BlockSpec((None, TB, E), lambda r: (r, 0, 0)),
                  pl.BlockSpec((None, E, G8), lambda r: (r, 0, 0)),
                  pl.BlockSpec((None, 1, G8), lambda r: (r, 0, 0)),
                  pl.BlockSpec((None, H, G8), lambda r: (r, 0, 0)),
                  pl.BlockSpec((None, T, Bp, 1), lambda r: (r, 0, 0, 0))],
        out_specs=pl.BlockSpec((None, 2, Bp, H), lambda r: (r, 0, 0, 0)),
        out_shape=jax.ShapeDtypeStruct((R, 2, Bp, H), jnp.float32),
        scratch_shapes=[pltpu.VMEM((TB, G8), jnp.float32),
                        pltpu.VMEM((2, Bp, H), jnp.float32),
                        pltpu.VMEM((2, Bp, H), jnp.float32)],
        compiler_params=pltpu.CompilerParams(
            dimension_semantics=("parallel",),
            vmem_limit_bytes=_VMEM_LIMIT),
    )(x3, wih8, b8, whh8, mask3)


def dense_head(y_enc, c_enc, eps, params, latent):
    """Fused recognition/prior heads + reparameterize + bow + latent2hidden."""
    Bp, H2 = y_enc.shape
    H4 = c_enc.shape[1]
    H = H4 // 4
    wr, br = params['recognition']
    gr, br2 = params['recoglnorm']
    wrm, brm = params['r_mu_log_var']
    wp, bp = params['prior']
    gp, bp2 = params['priorlnorm']
    wpm, bpm = params['p_mu_log_var']
    wb1, bb1 = params['bow1']
    wb2, bb2 = params['bow2']
    wl, bl = params['latent2hidden']
    L2 = 2 * latent
    L2P = max(128, -(-L2 // 128) * 128)          # lane-dense padded head width
    V = wb2.shape[1]
    bf = jnp.bfloat16

    def padcols(w, n):
        return jnp.pad(w, ((0, 0), (0, n - w.shape[-1])))

    wrm_p = padcols(wrm, L2P).astype(bf)
    brm_p = padcols(brm.reshape(1, -1), L2P)
    wpm_p = padcols(wpm, L2P).astype(bf)
    bpm_p = padcols(bpm.reshape(1, -1), L2P)

    args = (y_enc.astype(bf), c_enc.astype(bf), eps,
            wr[:H2].astype(bf), wr[H2:].astype(bf), br.reshape(1, -1),
            gr.reshape(1, -1), br2.reshape(1, -1), wrm_p, brm_p,
            wp.astype(bf), bp.reshape(1, -1), gp.reshape(1, -1), bp2.reshape(1, -1),
            wpm_p, bpm_p,
            wb1[:latent].astype(bf), wb1[latent:].astype(bf), bb1.reshape(1, -1),
            wb2.astype(bf), bb2.reshape(1, -1),
            wl[:latent].astype(bf), wl[latent:].astype(bf), bl.reshape(1, -1))
    out_shapes = (jax.ShapeDtypeStruct((Bp, L2P), jnp.float32),
                  jax.ShapeDtypeStruct((Bp, L2P), jnp.float32),
                  jax.ShapeDtypeStruct((Bp, V), jnp.float32),
                  jax.ShapeDtypeStruct((Bp, H), jnp.float32))
    return pl.pallas_call(
        _dense_head_kernel,
        grid=(1,),
        in_specs=[_fs(a.shape) for a in args],
        out_specs=tuple(_fs(s.shape) for s in out_shapes),
        out_shape=out_shapes,
        compiler_params=pltpu.CompilerParams(
            dimension_semantics=("arbitrary",),
            vmem_limit_bytes=_VMEM_LIMIT),
    )(*args)


def decode_fused(tf_tm, mask_d, h0, dec_weights, w_out, b_out, H):
    """Fused decoder (projection + masked LSTM + out-projection + log_softmax)."""
    TdBp, _ = tf_tm.shape
    Td, Bp, _ = mask_d.shape
    V = w_out.shape[1]
    wih_d, whh_d, bd = dec_weights
    args = (tf_tm, wih_d, bd, whh_d, h0, mask_d, w_out, b_out)
    return pl.pallas_call(
        _dec_kernel,
        grid=(1,),
        in_specs=[_fs(a.shape) for a in args],
        out_specs=_fs((TdBp, V)),
        out_shape=jax.ShapeDtypeStruct((TdBp, V), jnp.float32),
        scratch_shapes=[pltpu.VMEM((TdBp, 4 * H), jnp.float32),
                        pltpu.VMEM((TdBp, H), jnp.float32),
                        pltpu.VMEM((Bp, H), jnp.float32),
                        pltpu.VMEM((Bp, H), jnp.float32)],
        compiler_params=pltpu.CompilerParams(
            dimension_semantics=("arbitrary",),
            vmem_limit_bytes=_VMEM_LIMIT),
    )(*args)


# ----------------------------------------------------------------------------
# Parameters (deterministic synthetic init, shapes from CVAE.__init__)
# ----------------------------------------------------------------------------
def init_params(key, vocab, emb_dim, hidden, latent):
    keys = iter(jax.random.split(key, 32))

    def lin(kk, fan_in, fan_out):
        bound = 1.0 / np.sqrt(fan_in)
        kw, kb = jax.random.split(kk)
        return (jax.random.uniform(kw, (fan_in, fan_out), jnp.float32, -bound, bound),
                jax.random.uniform(kb, (fan_out,), jnp.float32, -bound, bound))

    def lstm(kk, in_dim, h):
        bound = 1.0 / np.sqrt(h)
        k1, k2, k3 = jax.random.split(kk, 3)
        w_ih = jax.random.uniform(k1, (in_dim, 4 * h), jnp.float32, -bound, bound)
        w_hh = jax.random.uniform(k2, (h, 4 * h), jnp.float32, -bound, bound)
        bias = jax.random.uniform(k3, (4 * h,), jnp.float32, -bound, bound)
        return (w_ih, w_hh, bias)

    p = {}
    p['emb'] = jax.random.uniform(next(keys), (vocab, emb_dim), jnp.float32, -0.1, 0.1)
    for name in ('x_enc', 'p_enc', 'y_enc'):
        p[name + '_fwd'] = lstm(next(keys), emb_dim, hidden)
        p[name + '_bwd'] = lstm(next(keys), emb_dim, hidden)
    p['recognition'] = lin(next(keys), 6 * hidden, 2 * hidden)
    p['r_mu_log_var'] = lin(next(keys), 2 * hidden, 2 * latent)
    p['prior'] = lin(next(keys), 4 * hidden, 2 * hidden)
    p['p_mu_log_var'] = lin(next(keys), 2 * hidden, 2 * latent)
    p['latent2hidden'] = lin(next(keys), latent + 4 * hidden, hidden)
    p['bow1'] = lin(next(keys), latent + 4 * hidden, hidden)
    p['bow2'] = lin(next(keys), hidden, vocab)
    p['decoder'] = lstm(next(keys), emb_dim, hidden)
    p['out'] = lin(next(keys), hidden, vocab)
    p['recoglnorm'] = (jnp.ones((2 * hidden,), jnp.float32),
                       jnp.zeros((2 * hidden,), jnp.float32))
    p['priorlnorm'] = (jnp.ones((2 * hidden,), jnp.float32),
                       jnp.zeros((2 * hidden,), jnp.float32))
    return p


# ----------------------------------------------------------------------------
# Forward pass (mirrors CVAE.forward with rnn='lstm', teacher_ratio=1)
# ----------------------------------------------------------------------------
@partial(jax.jit, static_argnames=('hidden_size', 'latent_dim', 'max_y_len'))
def cvae_forward(params, x, x_lengths, p, p_lengths, y, y_lengths, eps_key, *,
                 hidden_size, latent_dim, max_y_len):
    H = hidden_size
    L = latent_dim
    emb = params['emb']
    V, E = emb.shape
    B, T = x.shape
    Bp = max(8, -(-B // 8) * 8)            # pad batch to full sublanes
    bf = jnp.bfloat16

    def pad_b(a):
        return jnp.pad(a, [(0, Bp - B)] + [(0, 0)] * (a.ndim - 1))

    def g_scale(n, h):
        # pre-scale the g-gate (cell candidate) columns by 2 so that inside the
        # kernels tanh(x) == 2*sigmoid(2x) - 1 comes from a single sigmoid pass.
        s = np.ones((n,), np.float32)
        for off in range(0, n, 4 * h):
            s[off + 2 * h: off + 3 * h] = 2.0
        return jnp.asarray(s)

    x_emb = emb[x]                         # emb_dropout == identity (eval mode)
    p_emb = emb[p]
    y_emb = emb[y]

    def to_tm(a):                          # (B,T,E) -> (T*Bp, E) bf16, time-major
        return jnp.transpose(pad_b(a), (1, 0, 2)).reshape(T * Bp, E).astype(bf)

    enc_in = jnp.stack([to_tm(x_emb), to_tm(p_emb), to_tm(y_emb)], 0)   # (3,T*Bp,E)

    xlp = pad_b(x_lengths.astype(jnp.int32))
    plp = pad_b(p_lengths.astype(jnp.int32))
    ylp = pad_b(y_lengths.astype(jnp.int32))
    lens3 = jnp.stack([xlp, plp, ylp], 0)                               # (3, Bp)
    t_ar = jnp.arange(T, dtype=jnp.int32)
    mask3 = (t_ar[None, :, None] < lens3[:, None, :]).astype(jnp.float32)[..., None]

    # ---- encoder weights: fwd/bwd concatenated to an 8H-wide RHS, g cols x2 --
    sc8 = g_scale(8 * H, H)

    def pack_enc(name):
        wf, hf, bfwd = params[name + '_fwd']
        wb, hb, bbwd = params[name + '_bwd']
        wih = (jnp.concatenate([wf, wb], 1) * sc8).astype(bf)           # (E, 8H)
        whh = (jnp.concatenate([hf, hb], 1) * sc8).astype(bf)           # (H, 8H)
        b = (jnp.concatenate([bfwd, bbwd], 0) * sc8).reshape(1, 8 * H)  # f32
        return wih, whh, b

    packs = [pack_enc(n) for n in ('x_enc', 'p_enc', 'y_enc')]
    wih8 = jnp.stack([pk[0] for pk in packs], 0)
    whh8 = jnp.stack([pk[1] for pk in packs], 0)
    b8 = jnp.stack([pk[2] for pk in packs], 0)

    h_enc = encode_bilstm(enc_in, wih8, b8, whh8, mask3)                # (3,2,Bp,H)

    x_hn = jnp.concatenate([h_enc[0, 0], h_enc[0, 1]], -1)              # (Bp, 2H)
    p_hn = jnp.concatenate([h_enc[1, 0], h_enc[1, 1]], -1)
    y_hn = jnp.concatenate([h_enc[2, 0], h_enc[2, 1]], -1)
    # reference quirk: rows stay in length-sorted (never un-sorted) order;
    # padded zero-length rows always sort last, so rows [:B] match the reference
    x_enc = x_hn[jnp.argsort(-xlp, stable=True)]
    p_enc = p_hn[jnp.argsort(-plp, stable=True)]
    y_enc = y_hn[jnp.argsort(-ylp, stable=True)]
    c_enc = jnp.concatenate([x_enc, p_enc], -1)                         # (Bp, 4H)

    # ---- fused dense head (recognition/prior + reparameterize + bow + l2h) --
    eps = jax.random.normal(eps_key, (Bp, L), jnp.float32)
    r_out, pr_out, bow, dec_h0 = dense_head(y_enc, c_enc, eps, params, L)
    r_mu, r_log_var = r_out[:B, :L], r_out[:B, L:2 * L]
    p_mu, p_log_var = pr_out[:B, :L], pr_out[:B, L:2 * L]

    # bow_logits(...): repeat_interleave over the (static) max target length
    bow_log = jnp.broadcast_to(bow[:B, None, :], (B, max_y_len, V))

    # ---- decoder (teacher forcing) ------------------------------------------
    max_dec = max_y_len + 1
    dec_lens = jnp.where(jnp.arange(Bp) < B, ylp + 1, 0).astype(jnp.int32)
    sorted_idx = jnp.argsort(-dec_lens, stable=True)
    reversed_idx = jnp.argsort(sorted_idx, stable=True)
    # Reference sorts the inputs but NOT the initial hidden, then un-sorts the
    # output; running UNSORTED with h0 permuted by reversed_idx is equivalent
    # and lets the kernel emit outputs directly in original batch order.
    h0 = dec_h0[reversed_idx]

    sos_emb = jnp.broadcast_to(emb[1][None, None, :], (B, 1, E))
    teacher = jnp.concatenate([sos_emb, y_emb], 1)[:, :max_dec]         # (B,md,E)
    tf_tm = jnp.transpose(pad_b(teacher), (1, 0, 2)).reshape(max_dec * Bp, E).astype(bf)
    mask_d = (jnp.arange(max_dec, dtype=jnp.int32)[:, None]
              < dec_lens[None, :]).astype(jnp.float32)[..., None]       # (md,Bp,1)

    sc4 = g_scale(4 * H, H)
    w_ih_d, w_hh_d, b_d = params['decoder']
    dec_weights = ((w_ih_d * sc4).astype(bf),
                   (w_hh_d * sc4).astype(bf),
                   (b_d * sc4).reshape(1, 4 * H))
    w_out, b_out = params['out']

    out_tm = decode_fused(tf_tm, mask_d, h0, dec_weights,
                          w_out.astype(bf), b_out.reshape(1, V), H)
    # TODO(synk): at realistic vocab emit the output batch-major from the kernel
    #             to avoid this (small here) host transpose.
    out_seq = jnp.transpose(out_tm.reshape(max_dec, Bp, V), (1, 0, 2))[:B]

    return out_seq, bow_log, r_mu, r_log_var, p_mu, p_log_var


# ----------------------------------------------------------------------------
if __name__ == "__main__":
    VOCAB, EMB, HID, LAT = 128, 32, 32, 16
    B, T = 2, 8

    key = jax.random.PRNGKey(0)
    kp, kx, kpk, ky, keps = jax.random.split(key, 5)
    params = init_params(kp, VOCAB, EMB, HID, LAT)

    x = jax.random.randint(kx, (B, T), 0, VOCAB, dtype=jnp.int32)
    p = jax.random.randint(kpk, (B, T), 0, VOCAB, dtype=jnp.int32)
    y = jax.random.randint(ky, (B, T), 0, VOCAB, dtype=jnp.int32)
    x_len = jnp.array([8, 5], jnp.int32)
    p_len = jnp.array([6, 8], jnp.int32)
    y_len = jnp.array([8, 7], jnp.int32)
    max_y_len = 8   # static max(y_lengths)

    outs = cvae_forward(params, x, x_len, p, p_len, y, y_len, keps,
                        hidden_size=HID, latent_dim=LAT, max_y_len=max_y_len)
    outs = jax.block_until_ready(outs)
    out_seq, bow_log, r_mu, r_log_var, p_mu, p_log_var = outs

    assert out_seq.shape == (B, max_y_len + 1, VOCAB)
    assert bow_log.shape == (B, max_y_len, VOCAB)
    assert r_mu.shape == (B, LAT) and r_log_var.shape == (B, LAT)
    assert p_mu.shape == (B, LAT) and p_log_var.shape == (B, LAT)
    assert bool(jnp.all(jnp.isfinite(out_seq)))
    assert bool(jnp.all(jnp.isfinite(bow_log)))
    # log_softmax rows must sum to ~1 in prob space
    assert bool(jnp.allclose(jnp.sum(jnp.exp(out_seq), axis=-1), 1.0, atol=1e-3))
    print("KERNEL_OK")
</pallas_src>

<mosaic_0001>
module attributes {stable_mosaic.version = 11 : i64} {
  func.func @_enc_bilstm_kernel(%arg0: i32, %arg1: memref<1x64x32xbf16, #tpu.memory_space<vmem>>, %arg2: memref<1x32x256xbf16, #tpu.memory_space<vmem>>, %arg3: memref<1x1x256xf32, #tpu.memory_space<vmem>>, %arg4: memref<1x32x256xbf16, #tpu.memory_space<vmem>>, %arg5: memref<1x8x8x1xf32, #tpu.memory_space<vmem>>, %arg6: memref<1x2x8x32xf32, #tpu.memory_space<vmem>>, %arg7: memref<64x256xf32, #tpu.memory_space<vmem>>, %arg8: memref<2x8x32xf32, #tpu.memory_space<vmem>>, %arg9: memref<2x8x32xf32, #tpu.memory_space<vmem>>) attributes {dimension_semantics = [#tpu.dimension_semantics<parallel>], iteration_bounds = array<i64: 3>, scalar_prefetch = 0 : i64, scratch_operands = 3 : i64, tpu.core_type = #tpu.core_type<tc>, window_params = [{transform_indices = @transform_0, window_bounds = array<i64: 1, 64, 32>}, {transform_indices = @transform_1, window_bounds = array<i64: 1, 32, 256>}, {transform_indices = @transform_2, window_bounds = array<i64: 1, 1, 256>}, {transform_indices = @transform_3, window_bounds = array<i64: 1, 32, 256>}, {transform_indices = @transform_4, window_bounds = array<i64: 1, 8, 8, 1>}, {transform_indices = @transform_5, window_bounds = array<i64: 1, 2, 8, 32>}]} {
    %c0 = arith.constant 0 : index
    %c0_0 = arith.constant 0 : index
    %c0_1 = arith.constant 0 : index
    %0 = vector.load %arg1[%c0, %c0_0, %c0_1] : memref<1x64x32xbf16, #tpu.memory_space<vmem>>, vector<1x64x32xbf16>
    %1 = vector.shape_cast %0 : vector<1x64x32xbf16> to vector<64x32xbf16>
    %c0_2 = arith.constant 0 : index
    %c0_3 = arith.constant 0 : index
    %c0_4 = arith.constant 0 : index
    %2 = vector.load %arg2[%c0_2, %c0_3, %c0_4] : memref<1x32x256xbf16, #tpu.memory_space<vmem>>, vector<1x32x256xbf16>
    %3 = vector.shape_cast %2 : vector<1x32x256xbf16> to vector<32x256xbf16>
    %cst = arith.constant dense<0.000000e+00> : vector<64x256xf32>
    %4 = tpu.matmul %1, %3, %cst {dimension_numbers = #tpu.dot_dimension_numbers<[1], [0], [0], [1], [0, 0, 1, 1], [], []>} : vector<64x32xbf16>, vector<32x256xbf16>, vector<64x256xf32> -> vector<64x256xf32>
    %c0_5 = arith.constant 0 : index
    %c0_6 = arith.constant 0 : index
    %c0_7 = arith.constant 0 : index
    %5 = vector.load %arg3[%c0_5, %c0_6, %c0_7] : memref<1x1x256xf32, #tpu.memory_space<vmem>>, vector<1x1x256xf32>
    %6 = vector.shape_cast %5 : vector<1x1x256xf32> to vector<1x256xf32>
    %7 = vector.broadcast %6 : vector<1x256xf32> to vector<64x256xf32>
    %8 = arith.addf %4, %7 : vector<64x256xf32>
    %c0_8 = arith.constant 0 : index
    %c0_9 = arith.constant 0 : index
    %9 = vector.load %arg7[%c0_8, %c0_9] : memref<64x256xf32, #tpu.memory_space<vmem>>, vector<64x256xf32>
    tpu.vector_store %arg7[%c0_8, %c0_9], %8 {strides = array<i32>} : memref<64x256xf32, #tpu.memory_space<vmem>>, vector<64x256xf32>,
    %cst_10 = arith.constant 0.000000e+00 : f32
    %10 = vector.broadcast %cst_10 : f32 to vector<2x8x32xf32>
    %c0_11 = arith.constant 0 : index
    %c0_12 = arith.constant 0 : index
    %c0_13 = arith.constant 0 : index
    %11 = vector.load %arg8[%c0_11, %c0_12, %c0_13] : memref<2x8x32xf32, #tpu.memory_space<vmem>>, vector<2x8x32xf32>
    tpu.vector_store %arg8[%c0_11, %c0_12, %c0_13], %10 {strides = array<i32>} : memref<2x8x32xf32, #tpu.memory_space<vmem>>, vector<2x8x32xf32>,
    %cst_14 = arith.constant 0.000000e+00 : f32
    %12 = vector.broadcast %cst_14 : f32 to vector<2x8x32xf32>
    %c0_15 = arith.constant 0 : index
    %c0_16 = arith.constant 0 : index
    %c0_17 = arith.constant 0 : index
    %13 = vector.load %arg9[%c0_15, %c0_16, %c0_17] : memref<2x8x32xf32, #tpu.memory_space<vmem>>, vector<2x8x32xf32>
    tpu.vector_store %arg9[%c0_15, %c0_16, %c0_17], %12 {strides = array<i32>} : memref<2x8x32xf32, #tpu.memory_space<vmem>>, vector<2x8x32xf32>,
    %c0_18 = arith.constant 0 : index
    %c0_19 = arith.constant 0 : index
    %c0_20 = arith.constant 0 : index
    %14 = vector.load %arg4[%c0_18, %c0_19, %c0_20] : memref<1x32x256xbf16, #tpu.memory_space<vmem>>, vector<1x32x128xbf16>
    %15 = vector.shape_cast %14 : vector<1x32x128xbf16> to vector<32x128xbf16>
    %c0_21 = arith.constant 0 : index
    %c0_22 = arith.constant 0 : index
    %c128 = arith.constant 128 : index
    %16 = vector.load %arg4[%c0_21, %c0_22, %c128] : memref<1x32x256xbf16, #tpu.memory_space<vmem>>, vector<1x32x128xbf16>
    %17 = vector.shape_cast %16 : vector<1x32x128xbf16> to vector<32x128xbf16>
    %c0_i32 = arith.constant 0 : i32
    %c1_i32 = arith.constant 1 : i32
    %18 = arith.muli %c0_i32, %c1_i32 : i32
    %c0_i32_23 = arith.constant 0 : i32
    %19 = arith.addi %c0_i32_23, %18 : i32
    %c8_i32 = arith.constant 8 : i32
    %20 = arith.muli %19, %c8_i32 : i32
    %21 = tpu.assume_multiple %20, 8 : i32
    %22 = arith.index_cast %21 : i32 to index
    %c0_24 = arith.constant 0 : index
    %23 = vector.load %arg7[%22, %c0_24] : memref<64x256xf32, #tpu.memory_space<vmem>>, vector<8x256xf32>
    %24 = vector.extract_strided_slice %23 {offsets = [0, 0], sizes = [8, 128], strides = [1, 1]} : vector<8x256xf32> to vector<8x128xf32>
    %c0_25 = arith.constant 0 : index
    %25 = arith.index_cast %19 : i32 to index
    %c0_26 = arith.constant 0 : index
    %c0_27 = arith.constant 0 : index
    %26 = vector.load %arg5[%c0_25, %25, %c0_26, %c0_27] : memref<1x8x8x1xf32, #tpu.memory_space<vmem>>, vector<1x1x8x1xf32>
    %27 = vector.shape_cast %26 : vector<1x1x8x1xf32> to vector<8x1xf32>
    %c0_28 = arith.constant 0 : index
    %c0_29 = arith.constant 0 : index
    %c0_30 = arith.constant 0 : index
    %28 = vector.load %arg8[%c0_28, %c0_29, %c0_30] : memref<2x8x32xf32, #tpu.memory_space<vmem>>, vector<1x8x32xf32>
    %29 = vector.shape_cast %28 : vector<1x8x32xf32> to vector<8x32xf32>
    %c0_31 = arith.constant 0 : index
    %c0_32 = arith.constant 0 : index
    %c0_33 = arith.constant 0 : index
    %30 = vector.load %arg9[%c0_31, %c0_32, %c0_33] : memref<2x8x32xf32, #tpu.memory_space<vmem>>, vector<1x8x32xf32>
    %31 = vector.shape_cast %30 : vector<1x8x32xf32> to vector<8x32xf32>
    %32 = arith.truncf %29 : vector<8x32xf32> to vector<8x32xbf16>
    %cst_34 = arith.constant dense<0.000000e+00> : vector<8x128xf32>
    %33 = tpu.matmul %32, %15, %cst_34 {dimension_numbers = #tpu.dot_dimension_numbers<[1], [0], [0], [1], [0, 0, 1, 1], [], []>} : vector<8x32xbf16>, vector<32x128xbf16>, vector<8x128xf32> -> vector<8x128xf32>
    %34 = arith.addf %24, %33 : vector<8x128xf32>
    %35 = arith.negf %34 : vector<8x128xf32>
    %36 = math.exp %35 : vector<8x128xf32>
    %cst_35 = arith.constant 1.000000e+00 : f32
    %37 = vector.broadcast %cst_35 : f32 to vector<8x128xf32>
    %38 = arith.addf %37, %36 : vector<8x128xf32>
    %39 = arith.divf %37, %38 : vector<8x128xf32>
    %40 = vector.extract_strided_slice %39 {offsets = [0, 0], sizes = [8, 32], strides = [1, 1]} : vector<8x128xf32> to vector<8x32xf32>
    %41 = vector.extract_strided_slice %39 {offsets = [0, 32], sizes = [8, 32], strides = [1, 1]} : vector<8x128xf32> to vector<8x32xf32>
    %42 = vector.extract_strided_slice %39 {offsets = [0, 64], sizes = [8, 32], strides = [1, 1]} : vector<8x128xf32> to vector<8x32xf32>
    %cst_36 = arith.constant 2.000000e+00 : f32
    %43 = vector.broadcast %cst_36 : f32 to vector<8x32xf32>
    %44 = arith.mulf %43, %42 : vector<8x32xf32>
    %cst_37 = arith.constant 1.000000e+00 : f32
    %45 = vector.broadcast %cst_37 : f32 to vector<8x32xf32>
    %46 = arith.subf %44, %45 : vector<8x32xf32>
    %47 = vector.extract_strided_slice %39 {offsets = [0, 96], sizes = [8, 32], strides = [1, 1]} : vector<8x128xf32> to vector<8x32xf32>
    %48 = arith.mulf %41, %31 : vector<8x32xf32>
    %49 = arith.mulf %40, %46 : vector<8x32xf32>
    %50 = arith.addf %48, %49 : vector<8x32xf32>
    %51 = math.tanh %50 : vector<8x32xf32>
    %52 = arith.mulf %47, %51 : vector<8x32xf32>
    %53 = vector.broadcast %27 : vector<8x1xf32> to vector<8x32xf32>
    %54 = arith.mulf %53, %52 : vector<8x32xf32>
    %cst_38 = arith.constant 1.000000e+00 : f32
    %55 = vector.broadcast %cst_38 : f32 to vector<8x1xf32>
    %56 = arith.subf %55, %27 : vector<8x1xf32>
    %57 = vector.broadcast %56 : vector<8x1xf32> to vector<8x32xf32>
    %58 = arith.mulf %57, %29 : vector<8x32xf32>
    %59 = arith.addf %54, %58 : vector<8x32xf32>
    %60 = vector.broadcast %27 : vector<8x1xf32> to vector<8x32xf32>
    %61 = arith.mulf %60, %50 : vector<8x32xf32>
    %cst_39 = arith.constant 1.000000e+00 : f32
    %62 = vector.broadcast %cst_39 : f32 to vector<8x1xf32>
    %63 = arith.subf %62, %27 : vector<8x1xf32>
    %64 = vector.broadcast %63 : vector<8x1xf32> to vector<8x32xf32>
    %65 = arith.mulf %64, %31 : vector<8x32xf32>
    %66 = arith.addf %61, %65 : vector<8x32xf32>
    %c0_40 = arith.constant 0 : index
    %c0_41 = arith.constant 0 : index
    %c0_42 = arith.constant 0 : index
    %67 = vector.load %arg8[%c0_40, %c0_41, %c0_42] : memref<2x8x32xf32, #tpu.memory_space<vmem>>, vector<1x8x32xf32>
    %68 = vector.shape_cast %67 : vector<1x8x32xf32> to vector<8x32xf32>
    %69 = vector.shape_cast %59 : vector<8x32xf32> to vector<1x8x32xf32>
    tpu.vector_store %arg8[%c0_40, %c0_41, %c0_42], %69 {strides = array<i32>} : memref<2x8x32xf32, #tpu.memory_space<vmem>>, vector<1x8x32xf32>,
    %c0_43 = arith.constant 0 : index
    %c0_44 = arith.constant 0 : index
    %c0_45 = arith.constant 0 : index
    %70 = vector.load %arg9[%c0_43, %c0_44, %c0_45] : memref<2x8x32xf32, #tpu.memory_space<vmem>>, vector<1x8x32xf32>
    %71 = vector.shape_cast %70 : vector<1x8x32xf32> to vector<8x32xf32>
    %72 = vector.shape_cast %66 : vector<8x32xf32> to vector<1x8x32xf32>
    tpu.vector_store %arg9[%c0_43, %c0_44, %c0_45], %72 {strides = array<i32>} : memref<2x8x32xf32, #tpu.memory_space<vmem>>, vector<1x8x32xf32>,
    %c7_i32 = arith.constant 7 : i32
    %73 = arith.subi %c7_i32, %19 : i32
    %c8_i32_46 = arith.constant 8 : i32
    %74 = arith.muli %73, %c8_i32_46 : i32
    %75 = tpu.assume_multiple %74, 8 : i32
    %76 = arith.index_cast %75 : i32 to index
    %c0_47 = arith.constant 0 : index
    %77 = vector.load %arg7[%76, %c0_47] : memref<64x256xf32, #tpu.memory_space<vmem>>, vector<8x256xf32>
    %78 = vector.extract_strided_slice %77 {offsets = [0, 128], sizes = [8, 128], strides = [1, 1]} : vector<8x256xf32> to vector<8x128xf32>
    %c0_48 = arith.constant 0 : index
    %79 = arith.index_cast %73 : i32 to index
    %c0_49 = arith.constant 0 : index
    %c0_50 = arith.constant 0 : index
    %80 = vector.load %arg5[%c0_48, %79, %c0_49, %c0_50] : memref<1x8x8x1xf32, #tpu.memory_space<vmem>>, vector<1x1x8x1xf32>
    %81 = vector.shape_cast %80 : vector<1x1x8x1xf32> to vector<8x1xf32>
    %c1 = arith.constant 1 : index
    %c0_51 = arith.constant 0 : index
    %c0_52 = arith.constant 0 : index
    %82 = vector.load %arg8[%c1, %c0_51, %c0_52] : memref<2x8x32xf32, #tpu.memory_space<vmem>>, vector<1x8x32xf32>
    %83 = vector.shape_cast %82 : vector<1x8x32xf32> to vector<8x32xf32>
    %c1_53 = arith.constant 1 : index
    %c0_54 = arith.constant 0 : index
    %c0_55 = arith.constant 0 : index
    %84 = vector.load %arg9[%c1_53, %c0_54, %c0_55] : memref<2x8x32xf32, #tpu.memory_space<vmem>>, vector<1x8x32xf32>
    %85 = vector.shape_cast %84 : vector<1x8x32xf32> to vector<8x32xf32>
    %86 = arith.truncf %83 : vector<8x32xf32> to vector<8x32xbf16>
    %cst_56 = arith.constant dense<0.000000e+00> : vector<8x128xf32>
    %87 = tpu.matmul %86, %17, %cst_56 {dimension_numbers = #tpu.dot_dimension_numbers<[1], [0], [0], [1], [0, 0, 1, 1], [], []>} : vector<8x32xbf16>, vector<32x128xbf16>, vector<8x128xf32> -> vector<8x128xf32>
    %88 = arith.addf %78, %87 : vector<8x128xf32>
    %89 = arith.negf %88 : vector<8x128xf32>
    %90 = math.exp %89 : vector<8x128xf32>
    %cst_57 = arith.constant 1.000000e+00 : f32
    %91 = vector.broadcast %cst_57 : f32 to vector<8x128xf32>
    %92 = arith.addf %91, %90 : vector<8x128xf32>
    %93 = arith.divf %91, %92 : vector<8x128xf32>
    %94 = vector.extract_strided_slice %93 {offsets = [0, 0], sizes = [8, 32], strides = [1, 1]} : vector<8x128xf32> to vector<8x32xf32>
    %95 = vector.extract_strided_slice %93 {offsets = [0, 32], sizes = [8, 32], strides = [1, 1]} : vector<8x128xf32> to vector<8x32xf32>
    %96 = vector.extract_strided_slice %93 {offsets = [0, 64], sizes = [8, 32], strides = [1, 1]} : vector<8x128xf32> to vector<8x32xf32>
    %cst_58 = arith.constant 2.000000e+00 : f32
    %97 = vector.broadcast %cst_58 : f32 to vector<8x32xf32>
    %98 = arith.mulf %97, %96 : vector<8x32xf32>
    %cst_59 = arith.constant 1.000000e+00 : f32
    %99 = vector.broadcast %cst_59 : f32 to vector<8x32xf32>
    %100 = arith.subf %98, %99 : vector<8x32xf32>
    %101 = vector.extract_strided_slice %93 {offsets = [0, 96], sizes = [8, 32], strides = [1, 1]} : vector<8x128xf32> to vector<8x32xf32>
    %102 = arith.mulf %95, %85 : vector<8x32xf32>
    %103 = arith.mulf %94, %100 : vector<8x32xf32>
    %104 = arith.addf %102, %103 : vector<8x32xf32>
    %105 = math.tanh %104 : vector<8x32xf32>
    %106 = arith.mulf %101, %105 : vector<8x32xf32>
    %107 = vector.broadcast %81 : vector<8x1xf32> to vector<8x32xf32>
    %108 = arith.mulf %107, %106 : vector<8x32xf32>
    %cst_60 = arith.constant 1.000000e+00 : f32
    %109 = vector.broadcast %cst_60 : f32 to vector<8x1xf32>
    %110 = arith.subf %109, %81 : vector<8x1xf32>
    %111 = vector.broadcast %110 : vector<8x1xf32> to vector<8x32xf32>
    %112 = arith.mulf %111, %83 : vector<8x32xf32>
    %113 = arith.addf %108, %112 : vector<8x32xf32>
    %114 = vector.broadcast %81 : vector<8x1xf32> to vector<8x32xf32>
    %115 = arith.mulf %114, %104 : vector<8x32xf32>
    %cst_61 = arith.constant 1.000000e+00 : f32
    %116 = vector.broadcast %cst_61 : f32 to vector<8x1xf32>
    %117 = arith.subf %116, %81 : vector<8x1xf32>
    %118 = vector.broadcast %117 : vector<8x1xf32> to vector<8x32xf32>
    %119 = arith.mulf %118, %85 : vector<8x32xf32>
    %120 = arith.addf %115, %119 : vector<8x32xf32>
    %c1_62 = arith.constant 1 : index
    %c0_63 = arith.constant 0 : index
    %c0_64 = arith.constant 0 : index
    %121 = vector.load %arg8[%c1_62, %c0_63, %c0_64] : memref<2x8x32xf32, #tpu.memory_space<vmem>>, vector<1x8x32xf32>
    %122 = vector.shape_cast %121 : vector<1x8x32xf32> to vector<8x32xf32>
    %123 = vector.shape_cast %113 : vector<8x32xf32> to vector<1x8x32xf32>
    tpu.vector_store %arg8[%c1_62, %c0_63, %c0_64], %123 {strides = array<i32>} : memref<2x8x32xf32, #tpu.memory_space<vmem>>, vector<1x8x32xf32>,
    %c1_65 = arith.constant 1 : index
    %c0_66 = arith.constant 0 : index
    %c0_67 = arith.constant 0 : index
    %124 = vector.load %arg9[%c1_65, %c0_66, %c0_67] : memref<2x8x32xf32, #tpu.memory_space<vmem>>, vector<1x8x32xf32>
    %125 = vector.shape_cast %124 : vector<1x8x32xf32> to vector<8x32xf32>
    %126 = vector.shape_cast %120 : vector<8x32xf32> to vector<1x8x32xf32>
    tpu.vector_store %arg9[%c1_65, %c0_66, %c0_67], %126 {strides = array<i32>} : memref<2x8x32xf32, #tpu.memory_space<vmem>>, vector<1x8x32xf32>,
    %c1_i32_68 = arith.constant 1 : i32
    %c1_i32_69 = arith.constant 1 : i32
    %127 = arith.muli %c1_i32_68, %c1_i32_69 : i32
    %c0_i32_70 = arith.constant 0 : i32
    %128 = arith.addi %c0_i32_70, %127 : i32
    %c8_i32_71 = arith.constant 8 : i32
    %129 = arith.muli %128, %c8_i32_71 : i32
    %130 = tpu.assume_multiple %129, 8 : i32
    %131 = arith.index_cast %130 : i32 to index
    %c0_72 = arith.constant 0 : index
    %132 = vector.load %arg7[%131, %c0_72] : memref<64x256xf32, #tpu.memory_space<vmem>>, vector<8x256xf32>
    %133 = vector.extract_strided_slice %132 {offsets = [0, 0], sizes = [8, 128], strides = [1, 1]} : vector<8x256xf32> to vector<8x128xf32>
    %c0_73 = arith.constant 0 : index
    %134 = arith.index_cast %128 : i32 to index
    %c0_74 = arith.constant 0 : index
    %c0_75 = arith.constant 0 : index
    %135 = vector.load %arg5[%c0_73, %134, %c0_74, %c0_75] : memref<1x8x8x1xf32, #tpu.memory_space<vmem>>, vector<1x1x8x1xf32>
    %136 = vector.shape_cast %135 : vector<1x1x8x1xf32> to vector<8x1xf32>
    %c0_76 = arith.constant 0 : index
    %c0_77 = arith.constant 0 : index
    %c0_78 = arith.constant 0 : index
    %137 = vector.load %arg8[%c0_76, %c0_77, %c0_78] : memref<2x8x32xf32, #tpu.memory_space<vmem>>, vector<1x8x32xf32>
    %138 = vector.shape_cast %137 : vector<1x8x32xf32> to vector<8x32xf32>
    %c0_79 = arith.constant 0 : index
    %c0_80 = arith.constant 0 : index
    %c0_81 = arith.constant 0 : index
    %139 = vector.load %arg9[%c0_79, %c0_80, %c0_81] : memref<2x8x32xf32, #tpu.memory_space<vmem>>, vector<1x8x32xf32>
    %140 = vector.shape_cast %139 : vector<1x8x32xf32> to vector<8x32xf32>
    %141 = arith.truncf %138 : vector<8x32xf32> to vector<8x32xbf16>
    %cst_82 = arith.constant dense<0.000000e+00> : vector<8x128xf32>
    %142 = tpu.matmul %141, %15, %cst_82 {dimension_numbers = #tpu.dot_dimension_numbers<[1], [0], [0], [1], [0, 0, 1, 1], [], []>} : vector<8x32xbf16>, vector<32x128xbf16>, vector<8x128xf32> -> vector<8x128xf32>
    %143 = arith.addf %133, %142 : vector<8x128xf32>
    %144 = arith.negf %143 : vector<8x128xf32>
    %145 = math.exp %144 : vector<8x128xf32>
    %cst_83 = arith.constant 1.000000e+00 : f32
    %146 = vector.broadcast %cst_83 : f32 to vector<8x128xf32>
    %147 = arith.addf %146, %145 : vector<8x128xf32>
    %148 = arith.divf %146, %147 : vector<8x128xf32>
    %149 = vector.extract_strided_slice %148 {offsets = [0, 0], sizes = [8, 32], strides = [1, 1]} : vector<8x128xf32> to vector<8x32xf32>
    %150 = vector.extract_strided_slice %148 {offsets = [0, 32], sizes = [8, 32], strides = [1, 1]} : vector<8x128xf32> to vector<8x32xf32>
    %151 = vector.extract_strided_slice %148 {offsets = [0, 64], sizes = [8, 32], strides = [1, 1]} : vector<8x128xf32> to vector<8x32xf32>
    %cst_84 = arith.constant 2.000000e+00 : f32
    %152 = vector.broadcast %cst_84 : f32 to vector<8x32xf32>
    %153 = arith.mulf %152, %151 : vector<8x32xf32>
    %cst_85 = arith.constant 1.000000e+00 : f32
    %154 = vector.broadcast %cst_85 : f32 to vector<8x32xf32>
    %155 = arith.subf %153, %154 : vector<8x32xf32>
    %156 = vector.extract_strided_slice %148 {offsets = [0, 96], sizes = [8, 32], strides = [1, 1]} : vector<8x128xf32> to vector<8x32xf32>
    %157 = arith.mulf %150, %140 : vector<8x32xf32>
    %158 = arith.mulf %149, %155 : vector<8x32xf32>
    %159 = arith.addf %157, %158 : vector<8x32xf32>
    %160 = math.tanh %159 : vector<8x32xf32>
    %161 = arith.mulf %156, %160 : vector<8x32xf32>
    %162 = vector.broadcast %136 : vector<8x1xf32> to vector<8x32xf32>
    %163 = arith.mulf %162, %161 : vector<8x32xf32>
    %cst_86 = arith.constant 1.000000e+00 : f32
    %164 = vector.broadcast %cst_86 : f32 to vector<8x1xf32>
    %165 = arith.subf %164, %136 : vector<8x1xf32>
    %166 = vector.broadcast %165 : vector<8x1xf32> to vector<8x32xf32>
    %167 = arith.mulf %166, %138 : vector<8x32xf32>
    %168 = arith.addf %163, %167 : vector<8x32xf32>
    %169 = vector.broadcast %136 : vector<8x1xf32> to vector<8x32xf32>
    %170 = arith.mulf %169, %159 : vector<8x32xf32>
    %cst_87 = arith.constant 1.000000e+00 : f32
    %171 = vector.broadcast %cst_87 : f32 to vector<8x1xf32>
    %172 = arith.subf %171, %136 : vector<8x1xf32>
    %173 = vector.broadcast %172 : vector<8x1xf32> to vector<8x32xf32>
    %174 = arith.mulf %173, %140 : vector<8x32xf32>
    %175 = arith.addf %170, %174 : vector<8x32xf32>
    %c0_88 = arith.constant 0 : index
    %c0_89 = arith.constant 0 : index
    %c0_90 = arith.constant 0 : index
    %176 = vector.load %arg8[%c0_88, %c0_89, %c0_90] : memref<2x8x32xf32, #tpu.memory_space<vmem>>, vector<1x8x32xf32>
    %177 = vector.shape_cast %176 : vector<1x8x32xf32> to vector<8x32xf32>
    %178 = vector.shape_cast %168 : vector<8x32xf32> to vector<1x8x32xf32>
    tpu.vector_store %arg8[%c0_88, %c0_89, %c0_90], %178 {strides = array<i32>} : memref<2x8x32xf32, #tpu.memory_space<vmem>>, vector<1x8x32xf32>,
    %c0_91 = arith.constant 0 : index
    %c0_92 = arith.constant 0 : index
    %c0_93 = arith.constant 0 : index
    %179 = vector.load %arg9[%c0_91, %c0_92, %c0_93] : memref<2x8x32xf32, #tpu.memory_space<vmem>>, vector<1x8x32xf32>
    %180 = vector.shape_cast %179 : vector<1x8x32xf32> to vector<8x32xf32>
    %181 = vector.shape_cast %175 : vector<8x32xf32> to vector<1x8x32xf32>
    tpu.vector_store %arg9[%c0_91, %c0_92, %c0_93], %181 {strides = array<i32>} : memref<2x8x32xf32, #tpu.memory_space<vmem>>, vector<1x8x32xf32>,
    %c7_i32_94 = arith.constant 7 : i32
    %182 = arith.subi %c7_i32_94, %128 : i32
    %c8_i32_95 = arith.constant 8 : i32
    %183 = arith.muli %182, %c8_i32_95 : i32
    %184 = tpu.assume_multiple %183, 8 : i32
    %185 = arith.index_cast %184 : i32 to index
    %c0_96 = arith.constant 0 : index
    %186 = vector.load %arg7[%185, %c0_96] : memref<64x256xf32, #tpu.memory_space<vmem>>, vector<8x256xf32>
    %187 = vector.extract_strided_slice %186 {offsets = [0, 128], sizes = [8, 128], strides = [1, 1]} : vector<8x256xf32> to vector<8x128xf32>
    %c0_97 = arith.constant 0 : index
    %188 = arith.index_cast %182 : i32 to index
    %c0_98 = arith.constant 0 : index
    %c0_99 = arith.constant 0 : index
    %189 = vector.load %arg5[%c0_97, %188, %c0_98, %c0_99] : memref<1x8x8x1xf32, #tpu.memory_space<vmem>>, vector<1x1x8x1xf32>
    %190 = vector.shape_cast %189 : vector<1x1x8x1xf32> to vector<8x1xf32>
    %c1_100 = arith.constant 1 : index
    %c0_101 = arith.constant 0 : index
    %c0_102 = arith.constant 0 : index
    %191 = vector.load %arg8[%c1_100, %c0_101, %c0_102] : memref<2x8x32xf32, #tpu.memory_space<vmem>>, vector<1x8x32xf32>
    %192 = vector.shape_cast %191 : vector<1x8x32xf32> to vector<8x32xf32>
    %c1_103 = arith.constant 1 : index
    %c0_104 = arith.constant 0 : index
    %c0_105 = arith.constant 0 : index
    %193 = vector.load %arg9[%c1_103, %c0_104, %c0_105] : memref<2x8x32xf32, #tpu.memory_space<vmem>>, vector<1x8x32xf32>
    %194 = vector.shape_cast %193 : vector<1x8x32xf32> to vector<8x32xf32>
    %195 = arith.truncf %192 : vector<8x32xf32> to vector<8x32xbf16>
    %cst_106 = arith.constant dense<0.000000e+00> : vector<8x128xf32>
    %196 = tpu.matmul %195, %17, %cst_106 {dimension_numbers = #tpu.dot_dimension_numbers<[1], [0], [0], [1], [0, 0, 1, 1], [], []>} : vector<8x32xbf16>, vector<32x128xbf16>, vector<8x128xf32> -> vector<8x128xf32>
    %197 = arith.addf %187, %196 : vector<8x128xf32>
    %198 = arith.negf %197 : vector<8x128xf32>
    %199 = math.exp %198 : vector<8x128xf32>
    %cst_107 = arith.constant 1.000000e+00 : f32
    %200 = vector.broadcast %cst_107 : f32 to vector<8x128xf32>
    %201 = arith.addf %200, %199 : vector<8x128xf32>
    %202 = arith.divf %200, %201 : vector<8x128xf32>
    %203 = vector.extract_strided_slice %202 {offsets = [0, 0], sizes = [8, 32], strides = [1, 1]} : vector<8x128xf32> to vector<8x32xf32>
    %204 = vector.extract_strided_slice %202 {offsets = [0, 32], sizes = [8, 32], strides = [1, 1]} : vector<8x128xf32> to vector<8x32xf32>
    %205 = vector.extract_strided_slice %202 {offsets = [0, 64], sizes = [8, 32], strides = [1, 1]} : vector<8x128xf32> to vector<8x32xf32>
    %cst_108 = arith.constant 2.000000e+00 : f32
    %206 = vector.broadcast %cst_108 : f32 to vector<8x32xf32>
    %207 = arith.mulf %206, %205 : vector<8x32xf32>
    %cst_109 = arith.constant 1.000000e+00 : f32
    %208 = vector.broadcast %cst_109 : f32 to vector<8x32xf32>
    %209 = arith.subf %207, %208 : vector<8x32xf32>
    %210 = vector.extract_strided_slice %202 {offsets = [0, 96], sizes = [8, 32], strides = [1, 1]} : vector<8x128xf32> to vector<8x32xf32>
    %211 = arith.mulf %204, %194 : vector<8x32xf32>
    %212 = arith.mulf %203, %209 : vector<8x32xf32>
    %213 = arith.addf %211, %212 : vector<8x32xf32>
    %214 = math.tanh %213 : vector<8x32xf32>
    %215 = arith.mulf %210, %214 : vector<8x32xf32>
    %216 = vector.broadcast %190 : vector<8x1xf32> to vector<8x32xf32>
    %217 = arith.mulf %216, %215 : vector<8x32xf32>
    %cst_110 = arith.constant 1.000000e+00 : f32
    %218 = vector.broadcast %cst_110 : f32 to vector<8x1xf32>
    %219 = arith.subf %218, %190 : vector<8x1xf32>
    %220 = vector.broadcast %219 : vector<8x1xf32> to vector<8x32xf32>
    %221 = arith.mulf %220, %192 : vector<8x32xf32>
    %222 = arith.addf %217, %221 : vector<8x32xf32>
    %223 = vector.broadcast %190 : vector<8x1xf32> to vector<8x32xf32>
    %224 = arith.mulf %223, %213 : vector<8x32xf32>
    %cst_111 = arith.constant 1.000000e+00 : f32
    %225 = vector.broadcast %cst_111 : f32 to vector<8x1xf32>
    %226 = arith.subf %225, %190 : vector<8x1xf32>
    %227 = vector.broadcast %226 : vector<8x1xf32> to vector<8x32xf32>
    %228 = arith.mulf %227, %194 : vector<8x32xf32>
    %229 = arith.addf %224, %228 : vector<8x32xf32>
    %c1_112 = arith.constant 1 : index
    %c0_113 = arith.constant 0 : index
    %c0_114 = arith.constant 0 : index
    %230 = vector.load %arg8[%c1_112, %c0_113, %c0_114] : memref<2x8x32xf32, #tpu.memory_space<vmem>>, vector<1x8x32xf32>
    %231 = vector.shape_cast %230 : vector<1x8x32xf32> to vector<8x32xf32>
    %232 = vector.shape_cast %222 : vector<8x32xf32> to vector<1x8x32xf32>
    tpu.vector_store %arg8[%c1_112, %c0_113, %c0_114], %232 {strides = array<i32>} : memref<2x8x32xf32, #tpu.memory_space<vmem>>, vector<1x8x32xf32>,
    %c1_115 = arith.constant 1 : index
    %c0_116 = arith.constant 0 : index
    %c0_117 = arith.constant 0 : index
    %233 = vector.load %arg9[%c1_115, %c0_116, %c0_117] : memref<2x8x32xf32, #tpu.memory_space<vmem>>, vector<1x8x32xf32>
    %234 = vector.shape_cast %233 : vector<1x8x32xf32> to vector<8x32xf32>
    %235 = vector.shape_cast %229 : vector<8x32xf32> to vector<1x8x32xf32>
    tpu.vector_store %arg9[%c1_115, %c0_116, %c0_117], %235 {strides = array<i32>} : memref<2x8x32xf32, #tpu.memory_space<vmem>>, vector<1x8x32xf32>,
    %c2_i32 = arith.constant 2 : i32
    %c1_i32_118 = arith.constant 1 : i32
    %236 = arith.muli %c2_i32, %c1_i32_118 : i32
    %c0_i32_119 = arith.constant 0 : i32
    %237 = arith.addi %c0_i32_119, %236 : i32
    %c8_i32_120 = arith.constant 8 : i32
    %238 = arith.muli %237, %c8_i32_120 : i32
    %239 = tpu.assume_multiple %238, 8 : i32
    %240 = arith.index_cast %239 : i32 to index
    %c0_121 = arith.constant 0 : index
    %241 = vector.load %arg7[%240, %c0_121] : memref<64x256xf32, #tpu.memory_space<vmem>>, vector<8x256xf32>
    %242 = vector.extract_strided_slice %241 {offsets = [0, 0], sizes = [8, 128], strides = [1, 1]} : vector<8x256xf32> to vector<8x128xf32>
    %c0_122 = arith.constant 0 : index
    %243 = arith.index_cast %237 : i32 to index
    %c0_123 = arith.constant 0 : index
    %c0_124 = arith.constant 0 : index
    %244 = vector.load %arg5[%c0_122, %243, %c0_123, %c0_124] : memref<1x8x8x1xf32, #tpu.memory_space<vmem>>, vector<1x1x8x1xf32>
    %245 = vector.shape_cast %244 : vector<1x1x8x1xf32> to vector<8x1xf32>
    %c0_125 = arith.constant 0 : index
    %c0_126 = arith.constant 0 : index
    %c0_127 = arith.constant 0 : index
    %246 = vector.load %arg8[%c0_125, %c0_126, %c0_127] : memref<2x8x32xf32, #tpu.memory_space<vmem>>, vector<1x8x32xf32>
    %247 = vector.shape_cast %246 : vector<1x8x32xf32> to vector<8x32xf32>
    %c0_128 = arith.constant 0 : index
    %c0_129 = arith.constant 0 : index
    %c0_130 = arith.constant 0 : index
    %248 = vector.load %arg9[%c0_128, %c0_129, %c0_130] : memref<2x8x32xf32, #tpu.memory_space<vmem>>, vector<1x8x32xf32>
    %249 = vector.shape_cast %248 : vector<1x8x32xf32> to vector<8x32xf32>
    %250 = arith.truncf %247 : vector<8x32xf32> to vector<8x32xbf16>
    %cst_131 = arith.constant dense<0.000000e+00> : vector<8x128xf32>
    %251 = tpu.matmul %250, %15, %cst_131 {dimension_numbers = #tpu.dot_dimension_numbers<[1], [0], [0], [1], [0, 0, 1, 1], [], []>} : vector<8x32xbf16>, vector<32x128xbf16>, vector<8x128xf32> -> vector<8x128xf32>
    %252 = arith.addf %242, %251 : vector<8x128xf32>
    %253 = arith.negf %252 : vector<8x128xf32>
    %254 = math.exp %253 : vector<8x128xf32>
    %cst_132 = arith.constant 1.000000e+00 : f32
    %255 = vector.broadcast %cst_132 : f32 to vector<8x128xf32>
    %256 = arith.addf %255, %254 : vector<8x128xf32>
    %257 = arith.divf %255, %256 : vector<8x128xf32>
    %258 = vector.extract_strided_slice %257 {offsets = [0, 0], sizes = [8, 32], strides = [1, 1]} : vector<8x128xf32> to vector<8x32xf32>
    %259 = vector.extract_strided_slice %257 {offsets = [0, 32], sizes = [8, 32], strides = [1, 1]} : vector<8x128xf32> to vector<8x32xf32>
    %260 = vector.extract_strided_slice %257 {offsets = [0, 64], sizes = [8, 32], strides = [1, 1]} : vector<8x128xf32> to vector<8x32xf32>
    %cst_133 = arith.constant 2.000000e+00 : f32
    %261 = vector.broadcast %cst_133 : f32 to vector<8x32xf32>
    %262 = arith.mulf %261, %260 : vector<8x32xf32>
    %cst_134 = arith.constant 1.000000e+00 : f32
    %263 = vector.broadcast %cst_134 : f32 to vector<8x32xf32>
    %264 = arith.subf %262, %263 : vector<8x32xf32>
    %265 = vector.extract_strided_slice %257 {offsets = [0, 96], sizes = [8, 32], strides = [1, 1]} : vector<8x128xf32> to vector<8x32xf32>
    %266 = arith.mulf %259, %249 : vector<8x32xf32>
    %267 = arith.mulf %258, %264 : vector<8x32xf32>
    %268 = arith.addf %266, %267 : vector<8x32xf32>
    %269 = math.tanh %268 : vector<8x32xf32>
    %270 = arith.mulf %265, %269 : vector<8x32xf32>
    %271 = vector.broadcast %245 : vector<8x1xf32> to vector<8x32xf32>
    %272 = arith.mulf %271, %270 : vector<8x32xf32>
    %cst_135 = arith.constant 1.000000e+00 : f32
    %273 = vector.broadcast %cst_135 : f32 to vector<8x1xf32>
    %274 = arith.subf %273, %245 : vector<8x1xf32>
    %275 = vector.broadcast %274 : vector<8x1xf32> to vector<8x32xf32>
    %276 = arith.mulf %275, %247 : vector<8x32xf32>
    %277 = arith.addf %272, %276 : vector<8x32xf32>
    %278 = vector.broadcast %245 : vector<8x1xf32> to vector<8x32xf32>
    %279 = arith.mulf %278, %268 : vector<8x32xf32>
    %cst_136 = arith.constant 1.000000e+00 : f32
    %280 = vector.broadcast %cst_136 : f32 to vector<8x1xf32>
    %281 = arith.subf %280, %245 : vector<8x1xf32>
    %282 = vector.broadcast %281 : vector<8x1xf32> to vector<8x32xf32>
    %283 = arith.mulf %282, %249 : vector<8x32xf32>
    %284 = arith.addf %279, %283 : vector<8x32xf32>
    %c0_137 = arith.constant 0 : index
    %c0_138 = arith.constant 0 : index
    %c0_139 = arith.constant 0 : index
    %285 = vector.load %arg8[%c0_137, %c0_138, %c0_139] : memref<2x8x32xf32, #tpu.memory_space<vmem>>, vector<1x8x32xf32>
    %286 = vector.shape_cast %285 : vector<1x8x32xf32> to vector<8x32xf32>
    %287 = vector.shape_cast %277 : vector<8x32xf32> to vector<1x8x32xf32>
    tpu.vector_store %arg8[%c0_137, %c0_138, %c0_139], %287 {strides = array<i32>} : memref<2x8x32xf32, #tpu.memory_space<vmem>>, vector<1x8x32xf32>,
    %c0_140 = arith.constant 0 : index
    %c0_141 = arith.constant 0 : index
    %c0_142 = arith.constant 0 : index
    %288 = vector.load %arg9[%c0_140, %c0_141, %c0_142] : memref<2x8x32xf32, #tpu.memory_space<vmem>>, vector<1x8x32xf32>
    %289 = vector.shape_cast %288 : vector<1x8x32xf32> to vector<8x32xf32>
    %290 = vector.shape_cast %284 : vector<8x32xf32> to vector<1x8x32xf32>
    tpu.vector_store %arg9[%c0_140, %c0_141, %c0_142], %290 {strides = array<i32>} : memref<2x8x32xf32, #tpu.memory_space<vmem>>, vector<1x8x32xf32>,
    %c7_i32_143 = arith.constant 7 : i32
    %291 = arith.subi %c7_i32_143, %237 : i32
    %c8_i32_144 = arith.constant 8 : i32
    %292 = arith.muli %291, %c8_i32_144 : i32
    %293 = tpu.assume_multiple %292, 8 : i32
    %294 = arith.index_cast %293 : i32 to index
    %c0_145 = arith.constant 0 : index
    %295 = vector.load %arg7[%294, %c0_145] : memref<64x256xf32, #tpu.memory_space<vmem>>, vector<8x256xf32>
    %296 = vector.extract_strided_slice %295 {offsets = [0, 128], sizes = [8, 128], strides = [1, 1]} : vector<8x256xf32> to vector<8x128xf32>
    %c0_146 = arith.constant 0 : index
    %297 = arith.index_cast %291 : i32 to index
    %c0_147 = arith.constant 0 : index
    %c0_148 = arith.constant 0 : index
    %298 = vector.load %arg5[%c0_146, %297, %c0_147, %c0_148] : memref<1x8x8x1xf32, #tpu.memory_space<vmem>>, vector<1x1x8x1xf32>
    %299 = vector.shape_cast %298 : vector<1x1x8x1xf32> to vector<8x1xf32>
    %c1_149 = arith.constant 1 : index
    %c0_150 = arith.constant 0 : index
    %c0_151 = arith.constant 0 : index
    %300 = vector.load %arg8[%c1_149, %c0_150, %c0_151] : memref<2x8x32xf32, #tpu.memory_space<vmem>>, vector<1x8x32xf32>
    %301 = vector.shape_cast %300 : vector<1x8x32xf32> to vector<8x32xf32>
    %c1_152 = arith.constant 1 : index
    %c0_153 = arith.constant 0 : index
    %c0_154 = arith.constant 0 : index
    %302 = vector.load %arg9[%c1_152, %c0_153, %c0_154] : memref<2x8x32xf32, #tpu.memory_space<vmem>>, vector<1x8x32xf32>
    %303 = vector.shape_cast %302 : vector<1x8x32xf32> to vector<8x32xf32>
    %304 = arith.truncf %301 : vector<8x32xf32> to vector<8x32xbf16>
    %cst_155 = arith.constant dense<0.000000e+00> : vector<8x128xf32>
    %305 = tpu.matmul %304, %17, %cst_155 {dimension_numbers = #tpu.dot_dimension_numbers<[1], [0], [0], [1], [0, 0, 1, 1], [], []>} : vector<8x32xbf16>, vector<32x128xbf16>, vector<8x128xf32> -> vector<8x128xf32>
    %306 = arith.addf %296, %305 : vector<8x128xf32>
    %307 = arith.negf %306 : vector<8x128xf32>
    %308 = math.exp %307 : vector<8x128xf32>
    %cst_156 = arith.constant 1.000000e+00 : f32
    %309 = vector.broadcast %cst_156 : f32 to vector<8x128xf32>
    %310 = arith.addf %309, %308 : vector<8x128xf32>
    %311 = arith.divf %309, %310 : vector<8x128xf32>
    %312 = vector.extract_strided_slice %311 {offsets = [0, 0], sizes = [8, 32], strides = [1, 1]} : vector<8x128xf32> to vector<8x32xf32>
    %313 = vector.extract_strided_slice %311 {offsets = [0, 32], sizes = [8, 32], strides = [1, 1]} : vector<8x128xf32> to vector<8x32xf32>
    %314 = vector.extract_strided_slice %311 {offsets = [0, 64], sizes = [8, 32], strides = [1, 1]} : vector<8x128xf32> to vector<8x32xf32>
    %cst_157 = arith.constant 2.000000e+00 : f32
    %315 = vector.broadcast %cst_157 : f32 to vector<8x32xf32>
    %316 = arith.mulf %315, %314 : vector<8x32xf32>
    %cst_158 = arith.constant 1.000000e+00 : f32
    %317 = vector.broadcast %cst_158 : f32 to vector<8x32xf32>
    %318 = arith.subf %316, %317 : vector<8x32xf32>
    %319 = vector.extract_strided_slice %311 {offsets = [0, 96], sizes = [8, 32], strides = [1, 1]} : vector<8x128xf32> to vector<8x32xf32>
    %320 = arith.mulf %313, %303 : vector<8x32xf32>
    %321 = arith.mulf %312, %318 : vector<8x32xf32>
    %322 = arith.addf %320, %321 : vector<8x32xf32>
    %323 = math.tanh %322 : vector<8x32xf32>
    %324 = arith.mulf %319, %323 : vector<8x32xf32>
    %325 = vector.broadcast %299 : vector<8x1xf32> to vector<8x32xf32>
    %326 = arith.mulf %325, %324 : vector<8x32xf32>
    %cst_159 = arith.constant 1.000000e+00 : f32
    %327 = vector.broadcast %cst_159 : f32 to vector<8x1xf32>
    %328 = arith.subf %327, %299 : vector<8x1xf32>
    %329 = vector.broadcast %328 : vector<8x1xf32> to vector<8x32xf32>
    %330 = arith.mulf %329, %301 : vector<8x32xf32>
    %331 = arith.addf %326, %330 : vector<8x32xf32>
    %332 = vector.broadcast %299 : vector<8x1xf32> to vector<8x32xf32>
    %333 = arith.mulf %332, %322 : vector<8x32xf32>
    %cst_160 = arith.constant 1.000000e+00 : f32
    %334 = vector.broadcast %cst_160 : f32 to vector<8x1xf32>
    %335 = arith.subf %334, %299 : vector<8x1xf32>
    %336 = vector.broadcast %335 : vector<8x1xf32> to vector<8x32xf32>
    %337 = arith.mulf %336, %303 : vector<8x32xf32>
    %338 = arith.addf %333, %337 : vector<8x32xf32>
    %c1_161 = arith.constant 1 : index
    %c0_162 = arith.constant 0 : index
    %c0_163 = arith.constant 0 : index
    %339 = vector.load %arg8[%c1_161, %c0_162, %c0_163] : memref<2x8x32xf32, #tpu.memory_space<vmem>>, vector<1x8x32xf32>
    %340 = vector.shape_cast %339 : vector<1x8x32xf32> to vector<8x32xf32>
    %341 = vector.shape_cast %331 : vector<8x32xf32> to vector<1x8x32xf32>
    tpu.vector_store %arg8[%c1_161, %c0_162, %c0_163], %341 {strides = array<i32>} : memref<2x8x32xf32, #tpu.memory_space<vmem>>, vector<1x8x32xf32>,
    %c1_164 = arith.constant 1 : index
    %c0_165 = arith.constant 0 : index
    %c0_166 = arith.constant 0 : index
    %342 = vector.load %arg9[%c1_164, %c0_165, %c0_166] : memref<2x8x32xf32, #tpu.memory_space<vmem>>, vector<1x8x32xf32>
    %343 = vector.shape_cast %342 : vector<1x8x32xf32> to vector<8x32xf32>
    %344 = vector.shape_cast %338 : vector<8x32xf32> to vector<1x8x32xf32>
    tpu.vector_store %arg9[%c1_164, %c0_165, %c0_166], %344 {strides = array<i32>} : memref<2x8x32xf32, #tpu.memory_space<vmem>>, vector<1x8x32xf32>,
    %c3_i32 = arith.constant 3 : i32
    %c1_i32_167 = arith.constant 1 : i32
    %345 = arith.muli %c3_i32, %c1_i32_167 : i32
    %c0_i32_168 = arith.constant 0 : i32
    %346 = arith.addi %c0_i32_168, %345 : i32
    %c8_i32_169 = arith.constant 8 : i32
    %347 = arith.muli %346, %c8_i32_169 : i32
    %348 = tpu.assume_multiple %347, 8 : i32
    %349 = arith.index_cast %348 : i32 to index
    %c0_170 = arith.constant 0 : index
    %350 = vector.load %arg7[%349, %c0_170] : memref<64x256xf32, #tpu.memory_space<vmem>>, vector<8x256xf32>
    %351 = vector.extract_strided_slice %350 {offsets = [0, 0], sizes = [8, 128], strides = [1, 1]} : vector<8x256xf32> to vector<8x128xf32>
    %c0_171 = arith.constant 0 : index
    %352 = arith.index_cast %346 : i32 to index
    %c0_172 = arith.constant 0 : index
    %c0_173 = arith.constant 0 : index
    %353 = vector.load %arg5[%c0_171, %352, %c0_172, %c0_173] : memref<1x8x8x1xf32, #tpu.memory_space<vmem>>, vector<1x1x8x1xf32>
    %354 = vector.shape_cast %353 : vector<1x1x8x1xf32> to vector<8x1xf32>
    %c0_174 = arith.constant 0 : index
    %c0_175 = arith.constant 0 : index
    %c0_176 = arith.constant 0 : index
    %355 = vector.load %arg8[%c0_174, %c0_175, %c0_176] : memref<2x8x32xf32, #tpu.memory_space<vmem>>, vector<1x8x32xf32>
    %356 = vector.shape_cast %355 : vector<1x8x32xf32> to vector<8x32xf32>
    %c0_177 = arith.constant 0 : index
    %c0_178 = arith.constant 0 : index
    %c0_179 = arith.constant 0 : index
    %357 = vector.load %arg9[%c0_177, %c0_178, %c0_179] : memref<2x8x32xf32, #tpu.memory_space<vmem>>, vector<1x8x32xf32>
    %358 = vector.shape_cast %357 : vector<1x8x32xf32> to vector<8x32xf32>
    %359 = arith.truncf %356 : vector<8x32xf32> to vector<8x32xbf16>
    %cst_180 = arith.constant dense<0.000000e+00> : vector<8x128xf32>
    %360 = tpu.matmul %359, %15, %cst_180 {dimension_numbers = #tpu.dot_dimension_numbers<[1], [0], [0], [1], [0, 0, 1, 1], [], []>} : vector<8x32xbf16>, vector<32x128xbf16>, vector<8x128xf32> -> vector<8x128xf32>
    %361 = arith.addf %351, %360 : vector<8x128xf32>
    %362 = arith.negf %361 : vector<8x128xf32>
    %363 = math.exp %362 : vector<8x128xf32>
    %cst_181 = arith.constant 1.000000e+00 : f32
    %364 = vector.broadcast %cst_181 : f32 to vector<8x128xf32>
    %365 = arith.addf %364, %363 : vector<8x128xf32>
    %366 = arith.divf %364, %365 : vector<8x128xf32>
    %367 = vector.extract_strided_slice %366 {offsets = [0, 0], sizes = [8, 32], strides = [1, 1]} : vector<8x128xf32> to vector<8x32xf32>
    %368 = vector.extract_strided_slice %366 {offsets = [0, 32], sizes = [8, 32], strides = [1, 1]} : vector<8x128xf32> to vector<8x32xf32>
    %369 = vector.extract_strided_slice %366 {offsets = [0, 64], sizes = [8, 32], strides = [1, 1]} : vector<8x128xf32> to vector<8x32xf32>
    %cst_182 = arith.constant 2.000000e+00 : f32
    %370 = vector.broadcast %cst_182 : f32 to vector<8x32xf32>
    %371 = arith.mulf %370, %369 : vector<8x32xf32>
    %cst_183 = arith.constant 1.000000e+00 : f32
    %372 = vector.broadcast %cst_183 : f32 to vector<8x32xf32>
    %373 = arith.subf %371, %372 : vector<8x32xf32>
    %374 = vector.extract_strided_slice %366 {offsets = [0, 96], sizes = [8, 32], strides = [1, 1]} : vector<8x128xf32> to vector<8x32xf32>
    %375 = arith.mulf %368, %358 : vector<8x32xf32>
    %376 = arith.mulf %367, %373 : vector<8x32xf32>
    %377 = arith.addf %375, %376 : vector<8x32xf32>
    %378 = math.tanh %377 : vector<8x32xf32>
    %379 = arith.mulf %374, %378 : vector<8x32xf32>
    %380 = vector.broadcast %354 : vector<8x1xf32> to vector<8x32xf32>
    %381 = arith.mulf %380, %379 : vector<8x32xf32>
    %cst_184 = arith.constant 1.000000e+00 : f32
    %382 = vector.broadcast %cst_184 : f32 to vector<8x1xf32>
    %383 = arith.subf %382, %354 : vector<8x1xf32>
    %384 = vector.broadcast %383 : vector<8x1xf32> to vector<8x32xf32>
    %385 = arith.mulf %384, %356 : vector<8x32xf32>
    %386 = arith.addf %381, %385 : vector<8x32xf32>
    %387 = vector.broadcast %354 : vector<8x1xf32> to vector<8x32xf32>
    %388 = arith.mulf %387, %377 : vector<8x32xf32>
    %cst_185 = arith.constant 1.000000e+00 : f32
    %389 = vector.broadcast %cst_185 : f32 to vector<8x1xf32>
    %390 = arith.subf %389, %354 : vector<8x1xf32>
    %391 = vector.broadcast %390 : vector<8x1xf32> to vector<8x32xf32>
    %392 = arith.mulf %391, %358 : vector<8x32xf32>
    %393 = arith.addf %388, %392 : vector<8x32xf32>
    %c0_186 = arith.constant 0 : index
    %c0_187 = arith.constant 0 : index
    %c0_188 = arith.constant 0 : index
    %394 = vector.load %arg8[%c0_186, %c0_187, %c0_188] : memref<2x8x32xf32, #tpu.memory_space<vmem>>, vector<1x8x32xf32>
    %395 = vector.shape_cast %394 : vector<1x8x32xf32> to vector<8x32xf32>
    %396 = vector.shape_cast %386 : vector<8x32xf32> to vector<1x8x32xf32>
    tpu.vector_store %arg8[%c0_186, %c0_187, %c0_188], %396 {strides = array<i32>} : memref<2x8x32xf32, #tpu.memory_space<vmem>>, vector<1x8x32xf32>,
    %c0_189 = arith.constant 0 : index
    %c0_190 = arith.constant 0 : index
    %c0_191 = arith.constant 0 : index
    %397 = vector.load %arg9[%c0_189, %c0_190, %c0_191] : memref<2x8x32xf32, #tpu.memory_space<vmem>>, vector<1x8x32xf32>
    %398 = vector.shape_cast %397 : vector<1x8x32xf32> to vector<8x32xf32>
    %399 = vector.shape_cast %393 : vector<8x32xf32> to vector<1x8x32xf32>
    tpu.vector_store %arg9[%c0_189, %c0_190, %c0_191], %399 {strides = array<i32>} : memref<2x8x32xf32, #tpu.memory_space<vmem>>, vector<1x8x32xf32>,
    %c7_i32_192 = arith.constant 7 : i32
    %400 = arith.subi %c7_i32_192, %346 : i32
    %c8_i32_193 = arith.constant 8 : i32
    %401 = arith.muli %400, %c8_i32_193 : i32
    %402 = tpu.assume_multiple %401, 8 : i32
    %403 = arith.index_cast %402 : i32 to index
    %c0_194 = arith.constant 0 : index
    %404 = vector.load %arg7[%403, %c0_194] : memref<64x256xf32, #tpu.memory_space<vmem>>, vector<8x256xf32>
    %405 = vector.extract_strided_slice %404 {offsets = [0, 128], sizes = [8, 128], strides = [1, 1]} : vector<8x256xf32> to vector<8x128xf32>
    %c0_195 = arith.constant 0 : index
    %406 = arith.index_cast %400 : i32 to index
    %c0_196 = arith.constant 0 : index
    %c0_197 = arith.constant 0 : index
    %407 = vector.load %arg5[%c0_195, %406, %c0_196, %c0_197] : memref<1x8x8x1xf32, #tpu.memory_space<vmem>>, vector<1x1x8x1xf32>
    %408 = vector.shape_cast %407 : vector<1x1x8x1xf32> to vector<8x1xf32>
    %c1_198 = arith.constant 1 : index
    %c0_199 = arith.constant 0 : index
    %c0_200 = arith.constant 0 : index
    %409 = vector.load %arg8[%c1_198, %c0_199, %c0_200] : memref<2x8x32xf32, #tpu.memory_space<vmem>>, vector<1x8x32xf32>
    %410 = vector.shape_cast %409 : vector<1x8x32xf32> to vector<8x32xf32>
    %c1_201 = arith.constant 1 : index
    %c0_202 = arith.constant 0 : index
    %c0_203 = arith.constant 0 : index
    %411 = vector.load %arg9[%c1_201, %c0_202, %c0_203] : memref<2x8x32xf32, #tpu.memory_space<vmem>>, vector<1x8x32xf32>
    %412 = vector.shape_cast %411 : vector<1x8x32xf32> to vector<8x32xf32>
    %413 = arith.truncf %410 : vector<8x32xf32> to vector<8x32xbf16>
    %cst_204 = arith.constant dense<0.000000e+00> : vector<8x128xf32>
    %414 = tpu.matmul %413, %17, %cst_204 {dimension_numbers = #tpu.dot_dimension_numbers<[1], [0], [0], [1], [0, 0, 1, 1], [], []>} : vector<8x32xbf16>, vector<32x128xbf16>, vector<8x128xf32> -> vector<8x128xf32>
    %415 = arith.addf %405, %414 : vector<8x128xf32>
    %416 = arith.negf %415 : vector<8x128xf32>
    %417 = math.exp %416 : vector<8x128xf32>
    %cst_205 = arith.constant 1.000000e+00 : f32
    %418 = vector.broadcast %cst_205 : f32 to vector<8x128xf32>
    %419 = arith.addf %418, %417 : vector<8x128xf32>
    %420 = arith.divf %418, %419 : vector<8x128xf32>
    %421 = vector.extract_strided_slice %420 {offsets = [0, 0], sizes = [8, 32], strides = [1, 1]} : vector<8x128xf32> to vector<8x32xf32>
    %422 = vector.extract_strided_slice %420 {offsets = [0, 32], sizes = [8, 32], strides = [1, 1]} : vector<8x128xf32> to vector<8x32xf32>
    %423 = vector.extract_strided_slice %420 {offsets = [0, 64], sizes = [8, 32], strides = [1, 1]} : vector<8x128xf32> to vector<8x32xf32>
    %cst_206 = arith.constant 2.000000e+00 : f32
    %424 = vector.broadcast %cst_206 : f32 to vector<8x32xf32>
    %425 = arith.mulf %424, %423 : vector<8x32xf32>
    %cst_207 = arith.constant 1.000000e+00 : f32
    %426 = vector.broadcast %cst_207 : f32 to vector<8x32xf32>
    %427 = arith.subf %425, %426 : vector<8x32xf32>
    %428 = vector.extract_strided_slice %420 {offsets = [0, 96], sizes = [8, 32], strides = [1, 1]} : vector<8x128xf32> to vector<8x32xf32>
    %429 = arith.mulf %422, %412 : vector<8x32xf32>
    %430 = arith.mulf %421, %427 : vector<8x32xf32>
    %431 = arith.addf %429, %430 : vector<8x32xf32>
    %432 = math.tanh %431 : vector<8x32xf32>
    %433 = arith.mulf %428, %432 : vector<8x32xf32>
    %434 = vector.broadcast %408 : vector<8x1xf32> to vector<8x32xf32>
    %435 = arith.mulf %434, %433 : vector<8x32xf32>
    %cst_208 = arith.constant 1.000000e+00 : f32
    %436 = vector.broadcast %cst_208 : f32 to vector<8x1xf32>
    %437 = arith.subf %436, %408 : vector<8x1xf32>
    %438 = vector.broadcast %437 : vector<8x1xf32> to vector<8x32xf32>
    %439 = arith.mulf %438, %410 : vector<8x32xf32>
    %440 = arith.addf %435, %439 : vector<8x32xf32>
    %441 = vector.broadcast %408 : vector<8x1xf32> to vector<8x32xf32>
    %442 = arith.mulf %441, %431 : vector<8x32xf32>
    %cst_209 = arith.constant 1.000000e+00 : f32
    %443 = vector.broadcast %cst_209 : f32 to vector<8x1xf32>
    %444 = arith.subf %443, %408 : vector<8x1xf32>
    %445 = vector.broadcast %444 : vector<8x1xf32> to vector<8x32xf32>
    %446 = arith.mulf %445, %412 : vector<8x32xf32>
    %447 = arith.addf %442, %446 : vector<8x32xf32>
    %c1_210 = arith.constant 1 : index
    %c0_211 = arith.constant 0 : index
    %c0_212 = arith.constant 0 : index
    %448 = vector.load %arg8[%c1_210, %c0_211, %c0_212] : memref<2x8x32xf32, #tpu.memory_space<vmem>>, vector<1x8x32xf32>
    %449 = vector.shape_cast %448 : vector<1x8x32xf32> to vector<8x32xf32>
    %450 = vector.shape_cast %440 : vector<8x32xf32> to vector<1x8x32xf32>
    tpu.vector_store %arg8[%c1_210, %c0_211, %c0_212], %450 {strides = array<i32>} : memref<2x8x32xf32, #tpu.memory_space<vmem>>, vector<1x8x32xf32>,
    %c1_213 = arith.constant 1 : index
    %c0_214 = arith.constant 0 : index
    %c0_215 = arith.constant 0 : index
    %451 = vector.load %arg9[%c1_213, %c0_214, %c0_215] : memref<2x8x32xf32, #tpu.memory_space<vmem>>, vector<1x8x32xf32>
    %452 = vector.shape_cast %451 : vector<1x8x32xf32> to vector<8x32xf32>
    %453 = vector.shape_cast %447 : vector<8x32xf32> to vector<1x8x32xf32>
    tpu.vector_store %arg9[%c1_213, %c0_214, %c0_215], %453 {strides = array<i32>} : memref<2x8x32xf32, #tpu.memory_space<vmem>>, vector<1x8x32xf32>,
    %c4_i32 = arith.constant 4 : i32
    %c1_i32_216 = arith.constant 1 : i32
    %454 = arith.muli %c4_i32, %c1_i32_216 : i32
    %c0_i32_217 = arith.constant 0 : i32
    %455 = arith.addi %c0_i32_217, %454 : i32
    %c8_i32_218 = arith.constant 8 : i32
    %456 = arith.muli %455, %c8_i32_218 : i32
    %457 = tpu.assume_multiple %456, 8 : i32
    %458 = arith.index_cast %457 : i32 to index
    %c0_219 = arith.constant 0 : index
    %459 = vector.load %arg7[%458, %c0_219] : memref<64x256xf32, #tpu.memory_space<vmem>>, vector<8x256xf32>
    %460 = vector.extract_strided_slice %459 {offsets = [0, 0], sizes = [8, 128], strides = [1, 1]} : vector<8x256xf32> to vector<8x128xf32>
    %c0_220 = arith.constant 0 : index
    %461 = arith.index_cast %455 : i32 to index
    %c0_221 = arith.constant 0 : index
    %c0_222 = arith.constant 0 : index
    %462 = vector.load %arg5[%c0_220, %461, %c0_221, %c0_222] : memref<1x8x8x1xf32, #tpu.memory_space<vmem>>, vector<1x1x8x1xf32>
    %463 = vector.shape_cast %462 : vector<1x1x8x1xf32> to vector<8x1xf32>
    %c0_223 = arith.constant 0 : index
    %c0_224 = arith.constant 0 : index
    %c0_225 = arith.constant 0 : index
    %464 = vector.load %arg8[%c0_223, %c0_224, %c0_225] : memref<2x8x32xf32, #tpu.memory_space<vmem>>, vector<1x8x32xf32>
    %465 = vector.shape_cast %464 : vector<1x8x32xf32> to vector<8x32xf32>
    %c0_226 = arith.constant 0 : index
    %c0_227 = arith.constant 0 : index
    %c0_228 = arith.constant 0 : index
    %466 = vector.load %arg9[%c0_226, %c0_227, %c0_228] : memref<2x8x32xf32, #tpu.memory_space<vmem>>, vector<1x8x32xf32>
    %467 = vector.shape_cast %466 : vector<1x8x32xf32> to vector<8x32xf32>
    %468 = arith.truncf %465 : vector<8x32xf32> to vector<8x32xbf16>
    %cst_229 = arith.constant dense<0.000000e+00> : vector<8x128xf32>
    %469 = tpu.matmul %468, %15, %cst_229 {dimension_numbers = #tpu.dot_dimension_numbers<[1], [0], [0], [1], [0, 0, 1, 1], [], []>} : vector<8x32xbf16>, vector<32x128xbf16>, vector<8x128xf32> -> vector<8x128xf32>
    %470 = arith.addf %460, %469 : vector<8x128xf32>
    %471 = arith.negf %470 : vector<8x128xf32>
    %472 = math.exp %471 : vector<8x128xf32>
    %cst_230 = arith.constant 1.000000e+00 : f32
    %473 = vector.broadcast %cst_230 : f32 to vector<8x128xf32>
    %474 = arith.addf %473, %472 : vector<8x128xf32>
    %475 = arith.divf %473, %474 : vector<8x128xf32>
    %476 = vector.extract_strided_slice %475 {offsets = [0, 0], sizes = [8, 32], strides = [1, 1]} : vector<8x128xf32> to vector<8x32xf32>
    %477 = vector.extract_strided_slice %475 {offsets = [0, 32], sizes = [8, 32], strides = [1, 1]} : vector<8x128xf32> to vector<8x32xf32>
    %478 = vector.extract_strided_slice %475 {offsets = [0, 64], sizes = [8, 32], strides = [1, 1]} : vector<8x128xf32> to vector<8x32xf32>
    %cst_231 = arith.constant 2.000000e+00 : f32
    %479 = vector.broadcast %cst_231 : f32 to vector<8x32xf32>
    %480 = arith.mulf %479, %478 : vector<8x32xf32>
    %cst_232 = arith.constant 1.000000e+00 : f32
    %481 = vector.broadcast %cst_232 : f32 to vector<8x32xf32>
    %482 = arith.subf %480, %481 : vector<8x32xf32>
    %483 = vector.extract_strided_slice %475 {offsets = [0, 96], sizes = [8, 32], strides = [1, 1]} : vector<8x128xf32> to vector<8x32xf32>
    %484 = arith.mulf %477, %467 : vector<8x32xf32>
    %485 = arith.mulf %476, %482 : vector<8x32xf32>
    %486 = arith.addf %484, %485 : vector<8x32xf32>
    %487 = math.tanh %486 : vector<8x32xf32>
    %488 = arith.mulf %483, %487 : vector<8x32xf32>
    %489 = vector.broadcast %463 : vector<8x1xf32> to vector<8x32xf32>
    %490 = arith.mulf %489, %488 : vector<8x32xf32>
    %cst_233 = arith.constant 1.000000e+00 : f32
    %491 = vector.broadcast %cst_233 : f32 to vector<8x1xf32>
    %492 = arith.subf %491, %463 : vector<8x1xf32>
    %493 = vector.broadcast %492 : vector<8x1xf32> to vector<8x32xf32>
    %494 = arith.mulf %493, %465 : vector<8x32xf32>
    %495 = arith.addf %490, %494 : vector<8x32xf32>
    %496 = vector.broadcast %463 : vector<8x1xf32> to vector<8x32xf32>
    %497 = arith.mulf %496, %486 : vector<8x32xf32>
    %cst_234 = arith.constant 1.000000e+00 : f32
    %498 = vector.broadcast %cst_234 : f32 to vector<8x1xf32>
    %499 = arith.subf %498, %463 : vector<8x1xf32>
    %500 = vector.broadcast %499 : vector<8x1xf32> to vector<8x32xf32>
    %501 = arith.mulf %500, %467 : vector<8x32xf32>
    %502 = arith.addf %497, %501 : vector<8x32xf32>
    %c0_235 = arith.constant 0 : index
    %c0_236 = arith.constant 0 : index
    %c0_237 = arith.constant 0 : index
    %503 = vector.load %arg8[%c0_235, %c0_236, %c0_237] : memref<2x8x32xf32, #tpu.memory_space<vmem>>, vector<1x8x32xf32>
    %504 = vector.shape_cast %503 : vector<1x8x32xf32> to vector<8x32xf32>
    %505 = vector.shape_cast %495 : vector<8x32xf32> to vector<1x8x32xf32>
    tpu.vector_store %arg8[%c0_235, %c0_236, %c0_237], %505 {strides = array<i32>} : memref<2x8x32xf32, #tpu.memory_space<vmem>>, vector<1x8x32xf32>,
    %c0_238 = arith.constant 0 : index
    %c0_239 = arith.constant 0 : index
    %c0_240 = arith.constant 0 : index
    %506 = vector.load %arg9[%c0_238, %c0_239, %c0_240] : memref<2x8x32xf32, #tpu.memory_space<vmem>>, vector<1x8x32xf32>
    %507 = vector.shape_cast %506 : vector<1x8x32xf32> to vector<8x32xf32>
    %508 = vector.shape_cast %502 : vector<8x32xf32> to vector<1x8x32xf32>
    tpu.vector_store %arg9[%c0_238, %c0_239, %c0_240], %508 {strides = array<i32>} : memref<2x8x32xf32, #tpu.memory_space<vmem>>, vector<1x8x32xf32>,
    %c7_i32_241 = arith.constant 7 : i32
    %509 = arith.subi %c7_i32_241, %455 : i32
    %c8_i32_242 = arith.constant 8 : i32
    %510 = arith.muli %509, %c8_i32_242 : i32
    %511 = tpu.assume_multiple %510, 8 : i32
    %512 = arith.index_cast %511 : i32 to index
    %c0_243 = arith.constant 0 : index
    %513 = vector.load %arg7[%512, %c0_243] : memref<64x256xf32, #tpu.memory_space<vmem>>, vector<8x256xf32>
    %514 = vector.extract_strided_slice %513 {offsets = [0, 128], sizes = [8, 128], strides = [1, 1]} : vector<8x256xf32> to vector<8x128xf32>
    %c0_244 = arith.constant 0 : index
    %515 = arith.index_cast %509 : i32 to index
    %c0_245 = arith.constant 0 : index
    %c0_246 = arith.constant 0 : index
    %516 = vector.load %arg5[%c0_244, %515, %c0_245, %c0_246] : memref<1x8x8x1xf32, #tpu.memory_space<vmem>>, vector<1x1x8x1xf32>
    %517 = vector.shape_cast %516 : vector<1x1x8x1xf32> to vector<8x1xf32>
    %c1_247 = arith.constant 1 : index
    %c0_248 = arith.constant 0 : index
    %c0_249 = arith.constant 0 : index
    %518 = vector.load %arg8[%c1_247, %c0_248, %c0_249] : memref<2x8x32xf32, #tpu.memory_space<vmem>>, vector<1x8x32xf32>
    %519 = vector.shape_cast %518 : vector<1x8x32xf32> to vector<8x32xf32>
    %c1_250 = arith.constant 1 : index
    %c0_251 = arith.constant 0 : index
    %c0_252 = arith.constant 0 : index
    %520 = vector.load %arg9[%c1_250, %c0_251, %c0_252] : memref<2x8x32xf32, #tpu.memory_space<vmem>>, vector<1x8x32xf32>
    %521 = vector.shape_cast %520 : vector<1x8x32xf32> to vector<8x32xf32>
    %522 = arith.truncf %519 : vector<8x32xf32> to vector<8x32xbf16>
    %cst_253 = arith.constant dense<0.000000e+00> : vector<8x128xf32>
    %523 = tpu.matmul %522, %17, %cst_253 {dimension_numbers = #tpu.dot_dimension_numbers<[1], [0], [0], [1], [0, 0, 1, 1], [], []>} : vector<8x32xbf16>, vector<32x128xbf16>, vector<8x128xf32> -> vector<8x128xf32>
    %524 = arith.addf %514, %523 : vector<8x128xf32>
    %525 = arith.negf %524 : vector<8x128xf32>
    %526 = math.exp %525 : vector<8x128xf32>
    %cst_254 = arith.constant 1.000000e+00 : f32
    %527 = vector.broadcast %cst_254 : f32 to vector<8x128xf32>
    %528 = arith.addf %527, %526 : vector<8x128xf32>
    %529 = arith.divf %527, %528 : vector<8x128xf32>
    %530 = vector.extract_strided_slice %529 {offsets = [0, 0], sizes = [8, 32], strides = [1, 1]} : vector<8x128xf32> to vector<8x32xf32>
    %531 = vector.extract_strided_slice %529 {offsets = [0, 32], sizes = [8, 32], strides = [1, 1]} : vector<8x128xf32> to vector<8x32xf32>
    %532 = vector.extract_strided_slice %529 {offsets = [0, 64], sizes = [8, 32], strides = [1, 1]} : vector<8x128xf32> to vector<8x32xf32>
    %cst_255 = arith.constant 2.000000e+00 : f32
    %533 = vector.broadcast %cst_255 : f32 to vector<8x32xf32>
    %534 = arith.mulf %533, %532 : vector<8x32xf32>
    %cst_256 = arith.constant 1.000000e+00 : f32
    %535 = vector.broadcast %cst_256 : f32 to vector<8x32xf32>
    %536 = arith.subf %534, %535 : vector<8x32xf32>
    %537 = vector.extract_strided_slice %529 {offsets = [0, 96], sizes = [8, 32], strides = [1, 1]} : vector<8x128xf32> to vector<8x32xf32>
    %538 = arith.mulf %531, %521 : vector<8x32xf32>
    %539 = arith.mulf %530, %536 : vector<8x32xf32>
    %540 = arith.addf %538, %539 : vector<8x32xf32>
    %541 = math.tanh %540 : vector<8x32xf32>
    %542 = arith.mulf %537, %541 : vector<8x32xf32>
    %543 = vector.broadcast %517 : vector<8x1xf32> to vector<8x32xf32>
    %544 = arith.mulf %543, %542 : vector<8x32xf32>
    %cst_257 = arith.constant 1.000000e+00 : f32
    %545 = vector.broadcast %cst_257 : f32 to vector<8x1xf32>
    %546 = arith.subf %545, %517 : vector<8x1xf32>
    %547 = vector.broadcast %546 : vector<8x1xf32> to vector<8x32xf32>
    %548 = arith.mulf %547, %519 : vector<8x32xf32>
    %549 = arith.addf %544, %548 : vector<8x32xf32>
    %550 = vector.broadcast %517 : vector<8x1xf32> to vector<8x32xf32>
    %551 = arith.mulf %550, %540 : vector<8x32xf32>
    %cst_258 = arith.constant 1.000000e+00 : f32
    %552 = vector.broadcast %cst_258 : f32 to vector<8x1xf32>
    %553 = arith.subf %552, %517 : vector<8x1xf32>
    %554 = vector.broadcast %553 : vector<8x1xf32> to vector<8x32xf32>
    %555 = arith.mulf %554, %521 : vector<8x32xf32>
    %556 = arith.addf %551, %555 : vector<8x32xf32>
    %c1_259 = arith.constant 1 : index
    %c0_260 = arith.constant 0 : index
    %c0_261 = arith.constant 0 : index
    %557 = vector.load %arg8[%c1_259, %c0_260, %c0_261] : memref<2x8x32xf32, #tpu.memory_space<vmem>>, vector<1x8x32xf32>
    %558 = vector.shape_cast %557 : vector<1x8x32xf32> to vector<8x32xf32>
    %559 = vector.shape_cast %549 : vector<8x32xf32> to vector<1x8x32xf32>
    tpu.vector_store %arg8[%c1_259, %c0_260, %c0_261], %559 {strides = array<i32>} : memref<2x8x32xf32, #tpu.memory_space<vmem>>, vector<1x8x32xf32>,
    %c1_262 = arith.constant 1 : index
    %c0_263 = arith.constant 0 : index
    %c0_264 = arith.constant 0 : index
    %560 = vector.load %arg9[%c1_262, %c0_263, %c0_264] : memref<2x8x32xf32, #tpu.memory_space<vmem>>, vector<1x8x32xf32>
    %561 = vector.shape_cast %560 : vector<1x8x32xf32> to vector<8x32xf32>
    %562 = vector.shape_cast %556 : vector<8x32xf32> to vector<1x8x32xf32>
    tpu.vector_store %arg9[%c1_262, %c0_263, %c0_264], %562 {strides = array<i32>} : memref<2x8x32xf32, #tpu.memory_space<vmem>>, vector<1x8x32xf32>,
    %c5_i32 = arith.constant 5 : i32
    %c1_i32_265 = arith.constant 1 : i32
    %563 = arith.muli %c5_i32, %c1_i32_265 : i32
    %c0_i32_266 = arith.constant 0 : i32
    %564 = arith.addi %c0_i32_266, %563 : i32
    %c8_i32_267 = arith.constant 8 : i32
    %565 = arith.muli %564, %c8_i32_267 : i32
    %566 = tpu.assume_multiple %565, 8 : i32
    %567 = arith.index_cast %566 : i32 to index
    %c0_268 = arith.constant 0 : index
    %568 = vector.load %arg7[%567, %c0_268] : memref<64x256xf32, #tpu.memory_space<vmem>>, vector<8x256xf32>
    %569 = vector.extract_strided_slice %568 {offsets = [0, 0], sizes = [8, 128], strides = [1, 1]} : vector<8x256xf32> to vector<8x128xf32>
    %c0_269 = arith.constant 0 : index
    %570 = arith.index_cast %564 : i32 to index
    %c0_270 = arith.constant 0 : index
    %c0_271 = arith.constant 0 : index
    %571 = vector.load %arg5[%c0_269, %570, %c0_270, %c0_271] : memref<1x8x8x1xf32, #tpu.memory_space<vmem>>, vector<1x1x8x1xf32>
    %572 = vector.shape_cast %571 : vector<1x1x8x1xf32> to vector<8x1xf32>
    %c0_272 = arith.constant 0 : index
    %c0_273 = arith.constant 0 : index
    %c0_274 = arith.constant 0 : index
    %573 = vector.load %arg8[%c0_272, %c0_273, %c0_274] : memref<2x8x32xf32, #tpu.memory_space<vmem>>, vector<1x8x32xf32>
    %574 = vector.shape_cast %573 : vector<1x8x32xf32> to vector<8x32xf32>
    %c0_275 = arith.constant 0 : index
    %c0_276 = arith.constant 0 : index
    %c0_277 = arith.constant 0 : index
    %575 = vector.load %arg9[%c0_275, %c0_276, %c0_277] : memref<2x8x32xf32, #tpu.memory_space<vmem>>, vector<1x8x32xf32>
    %576 = vector.shape_cast %575 : vector<1x8x32xf32> to vector<8x32xf32>
    %577 = arith.truncf %574 : vector<8x32xf32> to vector<8x32xbf16>
    %cst_278 = arith.constant dense<0.000000e+00> : vector<8x128xf32>
    %578 = tpu.matmul %577, %15, %cst_278 {dimension_numbers = #tpu.dot_dimension_numbers<[1], [0], [0], [1], [0, 0, 1, 1], [], []>} : vector<8x32xbf16>, vector<32x128xbf16>, vector<8x128xf32> -> vector<8x128xf32>
    %579 = arith.addf %569, %578 : vector<8x128xf32>
    %580 = arith.negf %579 : vector<8x128xf32>
    %581 = math.exp %580 : vector<8x128xf32>
    %cst_279 = arith.constant 1.000000e+00 : f32
    %582 = vector.broadcast %cst_279 : f32 to vector<8x128xf32>
    %583 = arith.addf %582, %581 : vector<8x128xf32>
    %584 = arith.divf %582, %583 : vector<8x128xf32>
    %585 = vector.extract_strided_slice %584 {offsets = [0, 0], sizes = [8, 32], strides = [1, 1]} : vector<8x128xf32> to vector<8x32xf32>
    %586 = vector.extract_strided_slice %584 {offsets = [0, 32], sizes = [8, 32], strides = [1, 1]} : vector<8x128xf32> to vector<8x32xf32>
    %587 = vector.extract_strided_slice %584 {offsets = [0, 64], sizes = [8, 32], strides = [1, 1]} : vector<8x128xf32> to vector<8x32xf32>
    %cst_280 = arith.constant 2.000000e+00 : f32
    %588 = vector.broadcast %cst_280 : f32 to vector<8x32xf32>
    %589 = arith.mulf %588, %587 : vector<8x32xf32>
    %cst_281 = arith.constant 1.000000e+00 : f32
    %590 = vector.broadcast %cst_281 : f32 to vector<8x32xf32>
    %591 = arith.subf %589, %590 : vector<8x32xf32>
    %592 = vector.extract_strided_slice %584 {offsets = [0, 96], sizes = [8, 32], strides = [1, 1]} : vector<8x128xf32> to vector<8x32xf32>
    %593 = arith.mulf %586, %576 : vector<8x32xf32>
    %594 = arith.mulf %585, %591 : vector<8x32xf32>
    %595 = arith.addf %593, %594 : vector<8x32xf32>
    %596 = math.tanh %595 : vector<8x32xf32>
    %597 = arith.mulf %592, %596 : vector<8x32xf32>
    %598 = vector.broadcast %572 : vector<8x1xf32> to vector<8x32xf32>
    %599 = arith.mulf %598, %597 : vector<8x32xf32>
    %cst_282 = arith.constant 1.000000e+00 : f32
    %600 = vector.broadcast %cst_282 : f32 to vector<8x1xf32>
    %601 = arith.subf %600, %572 : vector<8x1xf32>
    %602 = vector.broadcast %601 : vector<8x1xf32> to vector<8x32xf32>
    %603 = arith.mulf %602, %574 : vector<8x32xf32>
    %604 = arith.addf %599, %603 : vector<8x32xf32>
    %605 = vector.broadcast %572 : vector<8x1xf32> to vector<8x32xf32>
    %606 = arith.mulf %605, %595 : vector<8x32xf32>
    %cst_283 = arith.constant 1.000000e+00 : f32
    %607 = vector.broadcast %cst_283 : f32 to vector<8x1xf32>
    %608 = arith.subf %607, %572 : vector<8x1xf32>
    %609 = vector.broadcast %608 : vector<8x1xf32> to vector<8x32xf32>
    %610 = arith.mulf %609, %576 : vector<8x32xf32>
    %611 = arith.addf %606, %610 : vector<8x32xf32>
    %c0_284 = arith.constant 0 : index
    %c0_285 = arith.constant 0 : index
    %c0_286 = arith.constant 0 : index
    %612 = vector.load %arg8[%c0_284, %c0_285, %c0_286] : memref<2x8x32xf32, #tpu.memory_space<vmem>>, vector<1x8x32xf32>
    %613 = vector.shape_cast %612 : vector<1x8x32xf32> to vector<8x32xf32>
    %614 = vector.shape_cast %604 : vector<8x32xf32> to vector<1x8x32xf32>
    tpu.vector_store %arg8[%c0_284, %c0_285, %c0_286], %614 {strides = array<i32>} : memref<2x8x32xf32, #tpu.memory_space<vmem>>, vector<1x8x32xf32>,
    %c0_287 = arith.constant 0 : index
    %c0_288 = arith.constant 0 : index
    %c0_289 = arith.constant 0 : index
    %615 = vector.load %arg9[%c0_287, %c0_288, %c0_289] : memref<2x8x32xf32, #tpu.memory_space<vmem>>, vector<1x8x32xf32>
    %616 = vector.shape_cast %615 : vector<1x8x32xf32> to vector<8x32xf32>
    %617 = vector.shape_cast %611 : vector<8x32xf32> to vector<1x8x32xf32>
    tpu.vector_store %arg9[%c0_287, %c0_288, %c0_289], %617 {strides = array<i32>} : memref<2x8x32xf32, #tpu.memory_space<vmem>>, vector<1x8x32xf32>,
    %c7_i32_290 = arith.constant 7 : i32
    %618 = arith.subi %c7_i32_290, %564 : i32
    %c8_i32_291 = arith.constant 8 : i32
    %619 = arith.muli %618, %c8_i32_291 : i32
    %620 = tpu.assume_multiple %619, 8 : i32
    %621 = arith.index_cast %620 : i32 to index
    %c0_292 = arith.constant 0 : index
    %622 = vector.load %arg7[%621, %c0_292] : memref<64x256xf32, #tpu.memory_space<vmem>>, vector<8x256xf32>
    %623 = vector.extract_strided_slice %622 {offsets = [0, 128], sizes = [8, 128], strides = [1, 1]} : vector<8x256xf32> to vector<8x128xf32>
    %c0_293 = arith.constant 0 : index
    %624 = arith.index_cast %618 : i32 to index
    %c0_294 = arith.constant 0 : index
    %c0_295 = arith.constant 0 : index
    %625 = vector.load %arg5[%c0_293, %624, %c0_294, %c0_295] : memref<1x8x8x1xf32, #tpu.memory_space<vmem>>, vector<1x1x8x1xf32>
    %626 = vector.shape_cast %625 : vector<1x1x8x1xf32> to vector<8x1xf32>
    %c1_296 = arith.constant 1 : index
    %c0_297 = arith.constant 0 : index
    %c0_298 = arith.constant 0 : index
    %627 = vector.load %arg8[%c1_296, %c0_297, %c0_298] : memref<2x8x32xf32, #tpu.memory_space<vmem>>, vector<1x8x32xf32>
    %628 = vector.shape_cast %627 : vector<1x8x32xf32> to vector<8x32xf32>
    %c1_299 = arith.constant 1 : index
    %c0_300 = arith.constant 0 : index
    %c0_301 = arith.constant 0 : index
    %629 = vector.load %arg9[%c1_299, %c0_300, %c0_301] : memref<2x8x32xf32, #tpu.memory_space<vmem>>, vector<1x8x32xf32>
    %630 = vector.shape_cast %629 : vector<1x8x32xf32> to vector<8x32xf32>
    %631 = arith.truncf %628 : vector<8x32xf32> to vector<8x32xbf16>
    %cst_302 = arith.constant dense<0.000000e+00> : vector<8x128xf32>
    %632 = tpu.matmul %631, %17, %cst_302 {dimension_numbers = #tpu.dot_dimension_numbers<[1], [0], [0], [1], [0, 0, 1, 1], [], []>} : vector<8x32xbf16>, vector<32x128xbf16>, vector<8x128xf32> -> vector<8x128xf32>
    %633 = arith.addf %623, %632 : vector<8x128xf32>
    %634 = arith.negf %633 : vector<8x128xf32>
    %635 = math.exp %634 : vector<8x128xf32>
    %cst_303 = arith.constant 1.000000e+00 : f32
    %636 = vector.broadcast %cst_303 : f32 to vector<8x128xf32>
    %637 = arith.addf %636, %635 : vector<8x128xf32>
    %638 = arith.divf %636, %637 : vector<8x128xf32>
    %639 = vector.extract_strided_slice %638 {offsets = [0, 0], sizes = [8, 32], strides = [1, 1]} : vector<8x128xf32> to vector<8x32xf32>
    %640 = vector.extract_strided_slice %638 {offsets = [0, 32], sizes = [8, 32], strides = [1, 1]} : vector<8x128xf32> to vector<8x32xf32>
    %641 = vector.extract_strided_slice %638 {offsets = [0, 64], sizes = [8, 32], strides = [1, 1]} : vector<8x128xf32> to vector<8x32xf32>
    %cst_304 = arith.constant 2.000000e+00 : f32
    %642 = vector.broadcast %cst_304 : f32 to vector<8x32xf32>
    %643 = arith.mulf %642, %641 : vector<8x32xf32>
    %cst_305 = arith.constant 1.000000e+00 : f32
    %644 = vector.broadcast %cst_305 : f32 to vector<8x32xf32>
    %645 = arith.subf %643, %644 : vector<8x32xf32>
    %646 = vector.extract_strided_slice %638 {offsets = [0, 96], sizes = [8, 32], strides = [1, 1]} : vector<8x128xf32> to vector<8x32xf32>
    %647 = arith.mulf %640, %630 : vector<8x32xf32>
    %648 = arith.mulf %639, %645 : vector<8x32xf32>
    %649 = arith.addf %647, %648 : vector<8x32xf32>
    %650 = math.tanh %649 : vector<8x32xf32>
    %651 = arith.mulf %646, %650 : vector<8x32xf32>
    %652 = vector.broadcast %626 : vector<8x1xf32> to vector<8x32xf32>
    %653 = arith.mulf %652, %651 : vector<8x32xf32>
    %cst_306 = arith.constant 1.000000e+00 : f32
    %654 = vector.broadcast %cst_306 : f32 to vector<8x1xf32>
    %655 = arith.subf %654, %626 : vector<8x1xf32>
    %656 = vector.broadcast %655 : vector<8x1xf32> to vector<8x32xf32>
    %657 = arith.mulf %656, %628 : vector<8x32xf32>
    %658 = arith.addf %653, %657 : vector<8x32xf32>
    %659 = vector.broadcast %626 : vector<8x1xf32> to vector<8x32xf32>
    %660 = arith.mulf %659, %649 : vector<8x32xf32>
    %cst_307 = arith.constant 1.000000e+00 : f32
    %661 = vector.broadcast %cst_307 : f32 to vector<8x1xf32>
    %662 = arith.subf %661, %626 : vector<8x1xf32>
    %663 = vector.broadcast %662 : vector<8x1xf32> to vector<8x32xf32>
    %664 = arith.mulf %663, %630 : vector<8x32xf32>
    %665 = arith.addf %660, %664 : vector<8x32xf32>
    %c1_308 = arith.constant 1 : index
    %c0_309 = arith.constant 0 : index
    %c0_310 = arith.constant 0 : index
    %666 = vector.load %arg8[%c1_308, %c0_309, %c0_310] : memref<2x8x32xf32, #tpu.memory_space<vmem>>, vector<1x8x32xf32>
    %667 = vector.shape_cast %666 : vector<1x8x32xf32> to vector<8x32xf32>
    %668 = vector.shape_cast %658 : vector<8x32xf32> to vector<1x8x32xf32>
    tpu.vector_store %arg8[%c1_308, %c0_309, %c0_310], %668 {strides = array<i32>} : memref<2x8x32xf32, #tpu.memory_space<vmem>>, vector<1x8x32xf32>,
    %c1_311 = arith.constant 1 : index
    %c0_312 = arith.constant 0 : index
    %c0_313 = arith.constant 0 : index
    %669 = vector.load %arg9[%c1_311, %c0_312, %c0_313] : memref<2x8x32xf32, #tpu.memory_space<vmem>>, vector<1x8x32xf32>
    %670 = vector.shape_cast %669 : vector<1x8x32xf32> to vector<8x32xf32>
    %671 = vector.shape_cast %665 : vector<8x32xf32> to vector<1x8x32xf32>
    tpu.vector_store %arg9[%c1_311, %c0_312, %c0_313], %671 {strides = array<i32>} : memref<2x8x32xf32, #tpu.memory_space<vmem>>, vector<1x8x32xf32>,
    %c6_i32 = arith.constant 6 : i32
    %c1_i32_314 = arith.constant 1 : i32
    %672 = arith.muli %c6_i32, %c1_i32_314 : i32
    %c0_i32_315 = arith.constant 0 : i32
    %673 = arith.addi %c0_i32_315, %672 : i32
    %c8_i32_316 = arith.constant 8 : i32
    %674 = arith.muli %673, %c8_i32_316 : i32
    %675 = tpu.assume_multiple %674, 8 : i32
    %676 = arith.index_cast %675 : i32 to index
    %c0_317 = arith.constant 0 : index
    %677 = vector.load %arg7[%676, %c0_317] : memref<64x256xf32, #tpu.memory_space<vmem>>, vector<8x256xf32>
    %678 = vector.extract_strided_slice %677 {offsets = [0, 0], sizes = [8, 128], strides = [1, 1]} : vector<8x256xf32> to vector<8x128xf32>
    %c0_318 = arith.constant 0 : index
    %679 = arith.index_cast %673 : i32 to index
    %c0_319 = arith.constant 0 : index
    %c0_320 = arith.constant 0 : index
    %680 = vector.load %arg5[%c0_318, %679, %c0_319, %c0_320] : memref<1x8x8x1xf32, #tpu.memory_space<vmem>>, vector<1x1x8x1xf32>
    %681 = vector.shape_cast %680 : vector<1x1x8x1xf32> to vector<8x1xf32>
    %c0_321 = arith.constant 0 : index
    %c0_322 = arith.constant 0 : index
    %c0_323 = arith.constant 0 : index
    %682 = vector.load %arg8[%c0_321, %c0_322, %c0_323] : memref<2x8x32xf32, #tpu.memory_space<vmem>>, vector<1x8x32xf32>
    %683 = vector.shape_cast %682 : vector<1x8x32xf32> to vector<8x32xf32>
    %c0_324 = arith.constant 0 : index
    %c0_325 = arith.constant 0 : index
    %c0_326 = arith.constant 0 : index
    %684 = vector.load %arg9[%c0_324, %c0_325, %c0_326] : memref<2x8x32xf32, #tpu.memory_space<vmem>>, vector<1x8x32xf32>
    %685 = vector.shape_cast %684 : vector<1x8x32xf32> to vector<8x32xf32>
    %686 = arith.truncf %683 : vector<8x32xf32> to vector<8x32xbf16>
    %cst_327 = arith.constant dense<0.000000e+00> : vector<8x128xf32>
    %687 = tpu.matmul %686, %15, %cst_327 {dimension_numbers = #tpu.dot_dimension_numbers<[1], [0], [0], [1], [0, 0, 1, 1], [], []>} : vector<8x32xbf16>, vector<32x128xbf16>, vector<8x128xf32> -> vector<8x128xf32>
    %688 = arith.addf %678, %687 : vector<8x128xf32>
    %689 = arith.negf %688 : vector<8x128xf32>
    %690 = math.exp %689 : vector<8x128xf32>
    %cst_328 = arith.constant 1.000000e+00 : f32
    %691 = vector.broadcast %cst_328 : f32 to vector<8x128xf32>
    %692 = arith.addf %691, %690 : vector<8x128xf32>
    %693 = arith.divf %691, %692 : vector<8x128xf32>
    %694 = vector.extract_strided_slice %693 {offsets = [0, 0], sizes = [8, 32], strides = [1, 1]} : vector<8x128xf32> to vector<8x32xf32>
    %695 = vector.extract_strided_slice %693 {offsets = [0, 32], sizes = [8, 32], strides = [1, 1]} : vector<8x128xf32> to vector<8x32xf32>
    %696 = vector.extract_strided_slice %693 {offsets = [0, 64], sizes = [8, 32], strides = [1, 1]} : vector<8x128xf32> to vector<8x32xf32>
    %cst_329 = arith.constant 2.000000e+00 : f32
    %697 = vector.broadcast %cst_329 : f32 to vector<8x32xf32>
    %698 = arith.mulf %697, %696 : vector<8x32xf32>
    %cst_330 = arith.constant 1.000000e+00 : f32
    %699 = vector.broadcast %cst_330 : f32 to vector<8x32xf32>
    %700 = arith.subf %698, %699 : vector<8x32xf32>
    %701 = vector.extract_strided_slice %693 {offsets = [0, 96], sizes = [8, 32], strides = [1, 1]} : vector<8x128xf32> to vector<8x32xf32>
    %702 = arith.mulf %695, %685 : vector<8x32xf32>
    %703 = arith.mulf %694, %700 : vector<8x32xf32>
    %704 = arith.addf %702, %703 : vector<8x32xf32>
    %705 = math.tanh %704 : vector<8x32xf32>
    %706 = arith.mulf %701, %705 : vector<8x32xf32>
    %707 = vector.broadcast %681 : vector<8x1xf32> to vector<8x32xf32>
    %708 = arith.mulf %707, %706 : vector<8x32xf32>
    %cst_331 = arith.constant 1.000000e+00 : f32
    %709 = vector.broadcast %cst_331 : f32 to vector<8x1xf32>
    %710 = arith.subf %709, %681 : vector<8x1xf32>
    %711 = vector.broadcast %710 : vector<8x1xf32> to vector<8x32xf32>
    %712 = arith.mulf %711, %683 : vector<8x32xf32>
    %713 = arith.addf %708, %712 : vector<8x32xf32>
    %714 = vector.broadcast %681 : vector<8x1xf32> to vector<8x32xf32>
    %715 = arith.mulf %714, %704 : vector<8x32xf32>
    %cst_332 = arith.constant 1.000000e+00 : f32
    %716 = vector.broadcast %cst_332 : f32 to vector<8x1xf32>
    %717 = arith.subf %716, %681 : vector<8x1xf32>
    %718 = vector.broadcast %717 : vector<8x1xf32> to vector<8x32xf32>
    %719 = arith.mulf %718, %685 : vector<8x32xf32>
    %720 = arith.addf %715, %719 : vector<8x32xf32>
    %c0_333 = arith.constant 0 : index
    %c0_334 = arith.constant 0 : index
    %c0_335 = arith.constant 0 : index
    %721 = vector.load %arg8[%c0_333, %c0_334, %c0_335] : memref<2x8x32xf32, #tpu.memory_space<vmem>>, vector<1x8x32xf32>
    %722 = vector.shape_cast %721 : vector<1x8x32xf32> to vector<8x32xf32>
    %723 = vector.shape_cast %713 : vector<8x32xf32> to vector<1x8x32xf32>
    tpu.vector_store %arg8[%c0_333, %c0_334, %c0_335], %723 {strides = array<i32>} : memref<2x8x32xf32, #tpu.memory_space<vmem>>, vector<1x8x32xf32>,
    %c0_336 = arith.constant 0 : index
    %c0_337 = arith.constant 0 : index
    %c0_338 = arith.constant 0 : index
    %724 = vector.load %arg9[%c0_336, %c0_337, %c0_338] : memref<2x8x32xf32, #tpu.memory_space<vmem>>, vector<1x8x32xf32>
    %725 = vector.shape_cast %724 : vector<1x8x32xf32> to vector<8x32xf32>
    %726 = vector.shape_cast %720 : vector<8x32xf32> to vector<1x8x32xf32>
    tpu.vector_store %arg9[%c0_336, %c0_337, %c0_338], %726 {strides = array<i32>} : memref<2x8x32xf32, #tpu.memory_space<vmem>>, vector<1x8x32xf32>,
    %c7_i32_339 = arith.constant 7 : i32
    %727 = arith.subi %c7_i32_339, %673 : i32
    %c8_i32_340 = arith.constant 8 : i32
    %728 = arith.muli %727, %c8_i32_340 : i32
    %729 = tpu.assume_multiple %728, 8 : i32
    %730 = arith.index_cast %729 : i32 to index
    %c0_341 = arith.constant 0 : index
    %731 = vector.load %arg7[%730, %c0_341] : memref<64x256xf32, #tpu.memory_space<vmem>>, vector<8x256xf32>
    %732 = vector.extract_strided_slice %731 {offsets = [0, 128], sizes = [8, 128], strides = [1, 1]} : vector<8x256xf32> to vector<8x128xf32>
    %c0_342 = arith.constant 0 : index
    %733 = arith.index_cast %727 : i32 to index
    %c0_343 = arith.constant 0 : index
    %c0_344 = arith.constant 0 : index
    %734 = vector.load %arg5[%c0_342, %733, %c0_343, %c0_344] : memref<1x8x8x1xf32, #tpu.memory_space<vmem>>, vector<1x1x8x1xf32>
    %735 = vector.shape_cast %734 : vector<1x1x8x1xf32> to vector<8x1xf32>
    %c1_345 = arith.constant 1 : index
    %c0_346 = arith.constant 0 : index
    %c0_347 = arith.constant 0 : index
    %736 = vector.load %arg8[%c1_345, %c0_346, %c0_347] : memref<2x8x32xf32, #tpu.memory_space<vmem>>, vector<1x8x32xf32>
    %737 = vector.shape_cast %736 : vector<1x8x32xf32> to vector<8x32xf32>
    %c1_348 = arith.constant 1 : index
    %c0_349 = arith.constant 0 : index
    %c0_350 = arith.constant 0 : index
    %738 = vector.load %arg9[%c1_348, %c0_349, %c0_350] : memref<2x8x32xf32, #tpu.memory_space<vmem>>, vector<1x8x32xf32>
    %739 = vector.shape_cast %738 : vector<1x8x32xf32> to vector<8x32xf32>
    %740 = arith.truncf %737 : vector<8x32xf32> to vector<8x32xbf16>
    %cst_351 = arith.constant dense<0.000000e+00> : vector<8x128xf32>
    %741 = tpu.matmul %740, %17, %cst_351 {dimension_numbers = #tpu.dot_dimension_numbers<[1], [0], [0], [1], [0, 0, 1, 1], [], []>} : vector<8x32xbf16>, vector<32x128xbf16>, vector<8x128xf32> -> vector<8x128xf32>
    %742 = arith.addf %732, %741 : vector<8x128xf32>
    %743 = arith.negf %742 : vector<8x128xf32>
    %744 = math.exp %743 : vector<8x128xf32>
    %cst_352 = arith.constant 1.000000e+00 : f32
    %745 = vector.broadcast %cst_352 : f32 to vector<8x128xf32>
    %746 = arith.addf %745, %744 : vector<8x128xf32>
    %747 = arith.divf %745, %746 : vector<8x128xf32>
    %748 = vector.extract_strided_slice %747 {offsets = [0, 0], sizes = [8, 32], strides = [1, 1]} : vector<8x128xf32> to vector<8x32xf32>
    %749 = vector.extract_strided_slice %747 {offsets = [0, 32], sizes = [8, 32], strides = [1, 1]} : vector<8x128xf32> to vector<8x32xf32>
    %750 = vector.extract_strided_slice %747 {offsets = [0, 64], sizes = [8, 32], strides = [1, 1]} : vector<8x128xf32> to vector<8x32xf32>
    %cst_353 = arith.constant 2.000000e+00 : f32
    %751 = vector.broadcast %cst_353 : f32 to vector<8x32xf32>
    %752 = arith.mulf %751, %750 : vector<8x32xf32>
    %cst_354 = arith.constant 1.000000e+00 : f32
    %753 = vector.broadcast %cst_354 : f32 to vector<8x32xf32>
    %754 = arith.subf %752, %753 : vector<8x32xf32>
    %755 = vector.extract_strided_slice %747 {offsets = [0, 96], sizes = [8, 32], strides = [1, 1]} : vector<8x128xf32> to vector<8x32xf32>
    %756 = arith.mulf %749, %739 : vector<8x32xf32>
    %757 = arith.mulf %748, %754 : vector<8x32xf32>
    %758 = arith.addf %756, %757 : vector<8x32xf32>
    %759 = math.tanh %758 : vector<8x32xf32>
    %760 = arith.mulf %755, %759 : vector<8x32xf32>
    %761 = vector.broadcast %735 : vector<8x1xf32> to vector<8x32xf32>
    %762 = arith.mulf %761, %760 : vector<8x32xf32>
    %cst_355 = arith.constant 1.000000e+00 : f32
    %763 = vector.broadcast %cst_355 : f32 to vector<8x1xf32>
    %764 = arith.subf %763, %735 : vector<8x1xf32>
    %765 = vector.broadcast %764 : vector<8x1xf32> to vector<8x32xf32>
    %766 = arith.mulf %765, %737 : vector<8x32xf32>
    %767 = arith.addf %762, %766 : vector<8x32xf32>
    %768 = vector.broadcast %735 : vector<8x1xf32> to vector<8x32xf32>
    %769 = arith.mulf %768, %758 : vector<8x32xf32>
    %cst_356 = arith.constant 1.000000e+00 : f32
    %770 = vector.broadcast %cst_356 : f32 to vector<8x1xf32>
    %771 = arith.subf %770, %735 : vector<8x1xf32>
    %772 = vector.broadcast %771 : vector<8x1xf32> to vector<8x32xf32>
    %773 = arith.mulf %772, %739 : vector<8x32xf32>
    %774 = arith.addf %769, %773 : vector<8x32xf32>
    %c1_357 = arith.constant 1 : index
    %c0_358 = arith.constant 0 : index
    %c0_359 = arith.constant 0 : index
    %775 = vector.load %arg8[%c1_357, %c0_358, %c0_359] : memref<2x8x32xf32, #tpu.memory_space<vmem>>, vector<1x8x32xf32>
    %776 = vector.shape_cast %775 : vector<1x8x32xf32> to vector<8x32xf32>
    %777 = vector.shape_cast %767 : vector<8x32xf32> to vector<1x8x32xf32>
    tpu.vector_store %arg8[%c1_357, %c0_358, %c0_359], %777 {strides = array<i32>} : memref<2x8x32xf32, #tpu.memory_space<vmem>>, vector<1x8x32xf32>,
    %c1_360 = arith.constant 1 : index
    %c0_361 = arith.constant 0 : index
    %c0_362 = arith.constant 0 : index
    %778 = vector.load %arg9[%c1_360, %c0_361, %c0_362] : memref<2x8x32xf32, #tpu.memory_space<vmem>>, vector<1x8x32xf32>
    %779 = vector.shape_cast %778 : vector<1x8x32xf32> to vector<8x32xf32>
    %780 = vector.shape_cast %774 : vector<8x32xf32> to vector<1x8x32xf32>
    tpu.vector_store %arg9[%c1_360, %c0_361, %c0_362], %780 {strides = array<i32>} : memref<2x8x32xf32, #tpu.memory_space<vmem>>, vector<1x8x32xf32>,
    %c7_i32_363 = arith.constant 7 : i32
    %c1_i32_364 = arith.constant 1 : i32
    %781 = arith.muli %c7_i32_363, %c1_i32_364 : i32
    %c0_i32_365 = arith.constant 0 : i32
    %782 = arith.addi %c0_i32_365, %781 : i32
    %c8_i32_366 = arith.constant 8 : i32
    %783 = arith.muli %782, %c8_i32_366 : i32
    %784 = tpu.assume_multiple %783, 8 : i32
    %785 = arith.index_cast %784 : i32 to index
    %c0_367 = arith.constant 0 : index
    %786 = vector.load %arg7[%785, %c0_367] : memref<64x256xf32, #tpu.memory_space<vmem>>, vector<8x256xf32>
    %787 = vector.extract_strided_slice %786 {offsets = [0, 0], sizes = [8, 128], strides = [1, 1]} : vector<8x256xf32> to vector<8x128xf32>
    %c0_368 = arith.constant 0 : index
    %788 = arith.index_cast %782 : i32 to index
    %c0_369 = arith.constant 0 : index
    %c0_370 = arith.constant 0 : index
    %789 = vector.load %arg5[%c0_368, %788, %c0_369, %c0_370] : memref<1x8x8x1xf32, #tpu.memory_space<vmem>>, vector<1x1x8x1xf32>
    %790 = vector.shape_cast %789 : vector<1x1x8x1xf32> to vector<8x1xf32>
    %c0_371 = arith.constant 0 : index
    %c0_372 = arith.constant 0 : index
    %c0_373 = arith.constant 0 : index
    %791 = vector.load %arg8[%c0_371, %c0_372, %c0_373] : memref<2x8x32xf32, #tpu.memory_space<vmem>>, vector<1x8x32xf32>
    %792 = vector.shape_cast %791 : vector<1x8x32xf32> to vector<8x32xf32>
    %c0_374 = arith.constant 0 : index
    %c0_375 = arith.constant 0 : index
    %c0_376 = arith.constant 0 : index
    %793 = vector.load %arg9[%c0_374, %c0_375, %c0_376] : memref<2x8x32xf32, #tpu.memory_space<vmem>>, vector<1x8x32xf32>
    %794 = vector.shape_cast %793 : vector<1x8x32xf32> to vector<8x32xf32>
    %795 = arith.truncf %792 : vector<8x32xf32> to vector<8x32xbf16>
    %cst_377 = arith.constant dense<0.000000e+00> : vector<8x128xf32>
    %796 = tpu.matmul %795, %15, %cst_377 {dimension_numbers = #tpu.dot_dimension_numbers<[1], [0], [0], [1], [0, 0, 1, 1], [], []>} : vector<8x32xbf16>, vector<32x128xbf16>, vector<8x128xf32> -> vector<8x128xf32>
    %797 = arith.addf %787, %796 : vector<8x128xf32>
    %798 = arith.negf %797 : vector<8x128xf32>
    %799 = math.exp %798 : vector<8x128xf32>
    %cst_378 = arith.constant 1.000000e+00 : f32
    %800 = vector.broadcast %cst_378 : f32 to vector<8x128xf32>
    %801 = arith.addf %800, %799 : vector<8x128xf32>
    %802 = arith.divf %800, %801 : vector<8x128xf32>
    %803 = vector.extract_strided_slice %802 {offsets = [0, 0], sizes = [8, 32], strides = [1, 1]} : vector<8x128xf32> to vector<8x32xf32>
    %804 = vector.extract_strided_slice %802 {offsets = [0, 32], sizes = [8, 32], strides = [1, 1]} : vector<8x128xf32> to vector<8x32xf32>
    %805 = vector.extract_strided_slice %802 {offsets = [0, 64], sizes = [8, 32], strides = [1, 1]} : vector<8x128xf32> to vector<8x32xf32>
    %cst_379 = arith.constant 2.000000e+00 : f32
    %806 = vector.broadcast %cst_379 : f32 to vector<8x32xf32>
    %807 = arith.mulf %806, %805 : vector<8x32xf32>
    %cst_380 = arith.constant 1.000000e+00 : f32
    %808 = vector.broadcast %cst_380 : f32 to vector<8x32xf32>
    %809 = arith.subf %807, %808 : vector<8x32xf32>
    %810 = vector.extract_strided_slice %802 {offsets = [0, 96], sizes = [8, 32], strides = [1, 1]} : vector<8x128xf32> to vector<8x32xf32>
    %811 = arith.mulf %804, %794 : vector<8x32xf32>
    %812 = arith.mulf %803, %809 : vector<8x32xf32>
    %813 = arith.addf %811, %812 : vector<8x32xf32>
    %814 = math.tanh %813 : vector<8x32xf32>
    %815 = arith.mulf %810, %814 : vector<8x32xf32>
    %816 = vector.broadcast %790 : vector<8x1xf32> to vector<8x32xf32>
    %817 = arith.mulf %816, %815 : vector<8x32xf32>
    %cst_381 = arith.constant 1.000000e+00 : f32
    %818 = vector.broadcast %cst_381 : f32 to vector<8x1xf32>
    %819 = arith.subf %818, %790 : vector<8x1xf32>
    %820 = vector.broadcast %819 : vector<8x1xf32> to vector<8x32xf32>
    %821 = arith.mulf %820, %792 : vector<8x32xf32>
    %822 = arith.addf %817, %821 : vector<8x32xf32>
    %823 = vector.broadcast %790 : vector<8x1xf32> to vector<8x32xf32>
    %824 = arith.mulf %823, %813 : vector<8x32xf32>
    %cst_382 = arith.constant 1.000000e+00 : f32
    %825 = vector.broadcast %cst_382 : f32 to vector<8x1xf32>
    %826 = arith.subf %825, %790 : vector<8x1xf32>
    %827 = vector.broadcast %826 : vector<8x1xf32> to vector<8x32xf32>
    %828 = arith.mulf %827, %794 : vector<8x32xf32>
    %829 = arith.addf %824, %828 : vector<8x32xf32>
    %c0_383 = arith.constant 0 : index
    %c0_384 = arith.constant 0 : index
    %c0_385 = arith.constant 0 : index
    %830 = vector.load %arg8[%c0_383, %c0_384, %c0_385] : memref<2x8x32xf32, #tpu.memory_space<vmem>>, vector<1x8x32xf32>
    %831 = vector.shape_cast %830 : vector<1x8x32xf32> to vector<8x32xf32>
    %832 = vector.shape_cast %822 : vector<8x32xf32> to vector<1x8x32xf32>
    tpu.vector_store %arg8[%c0_383, %c0_384, %c0_385], %832 {strides = array<i32>} : memref<2x8x32xf32, #tpu.memory_space<vmem>>, vector<1x8x32xf32>,
    %c0_386 = arith.constant 0 : index
    %c0_387 = arith.constant 0 : index
    %c0_388 = arith.constant 0 : index
    %833 = vector.load %arg9[%c0_386, %c0_387, %c0_388] : memref<2x8x32xf32, #tpu.memory_space<vmem>>, vector<1x8x32xf32>
    %834 = vector.shape_cast %833 : vector<1x8x32xf32> to vector<8x32xf32>
    %835 = vector.shape_cast %829 : vector<8x32xf32> to vector<1x8x32xf32>
    tpu.vector_store %arg9[%c0_386, %c0_387, %c0_388], %835 {strides = array<i32>} : memref<2x8x32xf32, #tpu.memory_space<vmem>>, vector<1x8x32xf32>,
    %c7_i32_389 = arith.constant 7 : i32
    %836 = arith.subi %c7_i32_389, %782 : i32
    %c8_i32_390 = arith.constant 8 : i32
    %837 = arith.muli %836, %c8_i32_390 : i32
    %838 = tpu.assume_multiple %837, 8 : i32
    %839 = arith.index_cast %838 : i32 to index
    %c0_391 = arith.constant 0 : index
    %840 = vector.load %arg7[%839, %c0_391] : memref<64x256xf32, #tpu.memory_space<vmem>>, vector<8x256xf32>
    %841 = vector.extract_strided_slice %840 {offsets = [0, 128], sizes = [8, 128], strides = [1, 1]} : vector<8x256xf32> to vector<8x128xf32>
    %c0_392 = arith.constant 0 : index
    %842 = arith.index_cast %836 : i32 to index
    %c0_393 = arith.constant 0 : index
    %c0_394 = arith.constant 0 : index
    %843 = vector.load %arg5[%c0_392, %842, %c0_393, %c0_394] : memref<1x8x8x1xf32, #tpu.memory_space<vmem>>, vector<1x1x8x1xf32>
    %844 = vector.shape_cast %843 : vector<1x1x8x1xf32> to vector<8x1xf32>
    %c1_395 = arith.constant 1 : index
    %c0_396 = arith.constant 0 : index
    %c0_397 = arith.constant 0 : index
    %845 = vector.load %arg8[%c1_395, %c0_396, %c0_397] : memref<2x8x32xf32, #tpu.memory_space<vmem>>, vector<1x8x32xf32>
    %846 = vector.shape_cast %845 : vector<1x8x32xf32> to vector<8x32xf32>
    %c1_398 = arith.constant 1 : index
    %c0_399 = arith.constant 0 : index
    %c0_400 = arith.constant 0 : index
    %847 = vector.load %arg9[%c1_398, %c0_399, %c0_400] : memref<2x8x32xf32, #tpu.memory_space<vmem>>, vector<1x8x32xf32>
    %848 = vector.shape_cast %847 : vector<1x8x32xf32> to vector<8x32xf32>
    %849 = arith.truncf %846 : vector<8x32xf32> to vector<8x32xbf16>
    %cst_401 = arith.constant dense<0.000000e+00> : vector<8x128xf32>
    %850 = tpu.matmul %849, %17, %cst_401 {dimension_numbers = #tpu.dot_dimension_numbers<[1], [0], [0], [1], [0, 0, 1, 1], [], []>} : vector<8x32xbf16>, vector<32x128xbf16>, vector<8x128xf32> -> vector<8x128xf32>
    %851 = arith.addf %841, %850 : vector<8x128xf32>
    %852 = arith.negf %851 : vector<8x128xf32>
    %853 = math.exp %852 : vector<8x128xf32>
    %cst_402 = arith.constant 1.000000e+00 : f32
    %854 = vector.broadcast %cst_402 : f32 to vector<8x128xf32>
    %855 = arith.addf %854, %853 : vector<8x128xf32>
    %856 = arith.divf %854, %855 : vector<8x128xf32>
    %857 = vector.extract_strided_slice %856 {offsets = [0, 0], sizes = [8, 32], strides = [1, 1]} : vector<8x128xf32> to vector<8x32xf32>
    %858 = vector.extract_strided_slice %856 {offsets = [0, 32], sizes = [8, 32], strides = [1, 1]} : vector<8x128xf32> to vector<8x32xf32>
    %859 = vector.extract_strided_slice %856 {offsets = [0, 64], sizes = [8, 32], strides = [1, 1]} : vector<8x128xf32> to vector<8x32xf32>
    %cst_403 = arith.constant 2.000000e+00 : f32
    %860 = vector.broadcast %cst_403 : f32 to vector<8x32xf32>
    %861 = arith.mulf %860, %859 : vector<8x32xf32>
    %cst_404 = arith.constant 1.000000e+00 : f32
    %862 = vector.broadcast %cst_404 : f32 to vector<8x32xf32>
    %863 = arith.subf %861, %862 : vector<8x32xf32>
    %864 = vector.extract_strided_slice %856 {offsets = [0, 96], sizes = [8, 32], strides = [1, 1]} : vector<8x128xf32> to vector<8x32xf32>
    %865 = arith.mulf %858, %848 : vector<8x32xf32>
    %866 = arith.mulf %857, %863 : vector<8x32xf32>
    %867 = arith.addf %865, %866 : vector<8x32xf32>
    %868 = math.tanh %867 : vector<8x32xf32>
    %869 = arith.mulf %864, %868 : vector<8x32xf32>
    %870 = vector.broadcast %844 : vector<8x1xf32> to vector<8x32xf32>
    %871 = arith.mulf %870, %869 : vector<8x32xf32>
    %cst_405 = arith.constant 1.000000e+00 : f32
    %872 = vector.broadcast %cst_405 : f32 to vector<8x1xf32>
    %873 = arith.subf %872, %844 : vector<8x1xf32>
    %874 = vector.broadcast %873 : vector<8x1xf32> to vector<8x32xf32>
    %875 = arith.mulf %874, %846 : vector<8x32xf32>
    %876 = arith.addf %871, %875 : vector<8x32xf32>
    %877 = vector.broadcast %844 : vector<8x1xf32> to vector<8x32xf32>
    %878 = arith.mulf %877, %867 : vector<8x32xf32>
    %cst_406 = arith.constant 1.000000e+00 : f32
    %879 = vector.broadcast %cst_406 : f32 to vector<8x1xf32>
    %880 = arith.subf %879, %844 : vector<8x1xf32>
    %881 = vector.broadcast %880 : vector<8x1xf32> to vector<8x32xf32>
    %882 = arith.mulf %881, %848 : vector<8x32xf32>
    %883 = arith.addf %878, %882 : vector<8x32xf32>
    %c1_407 = arith.constant 1 : index
    %c0_408 = arith.constant 0 : index
    %c0_409 = arith.constant 0 : index
    %884 = vector.load %arg8[%c1_407, %c0_408, %c0_409] : memref<2x8x32xf32, #tpu.memory_space<vmem>>, vector<1x8x32xf32>
    %885 = vector.shape_cast %884 : vector<1x8x32xf32> to vector<8x32xf32>
    %886 = vector.shape_cast %876 : vector<8x32xf32> to vector<1x8x32xf32>
    tpu.vector_store %arg8[%c1_407, %c0_408, %c0_409], %886 {strides = array<i32>} : memref<2x8x32xf32, #tpu.memory_space<vmem>>, vector<1x8x32xf32>,
    %c1_410 = arith.constant 1 : index
    %c0_411 = arith.constant 0 : index
    %c0_412 = arith.constant 0 : index
    %887 = vector.load %arg9[%c1_410, %c0_411, %c0_412] : memref<2x8x32xf32, #tpu.memory_space<vmem>>, vector<1x8x32xf32>
    %888 = vector.shape_cast %887 : vector<1x8x32xf32> to vector<8x32xf32>
    %889 = vector.shape_cast %883 : vector<8x32xf32> to vector<1x8x32xf32>
    tpu.vector_store %arg9[%c1_410, %c0_411, %c0_412], %889 {strides = array<i32>} : memref<2x8x32xf32, #tpu.memory_space<vmem>>, vector<1x8x32xf32>,
    %c8_i32_413 = arith.constant 8 : i32
    %c0_414 = arith.constant 0 : index
    %c0_415 = arith.constant 0 : index
    %c0_416 = arith.constant 0 : index
    %890 = vector.load %arg8[%c0_414, %c0_415, %c0_416] : memref<2x8x32xf32, #tpu.memory_space<vmem>>, vector<1x8x32xf32>
    %891 = vector.shape_cast %890 : vector<1x8x32xf32> to vector<8x32xf32>
    %c0_417 = arith.constant 0 : index
    %c0_418 = arith.constant 0 : index
    %c0_419 = arith.constant 0 : index
    %c0_420 = arith.constant 0 : index
    %892 = vector.load %arg6[%c0_417, %c0_418, %c0_419, %c0_420] : memref<1x2x8x32xf32, #tpu.memory_space<vmem>>, vector<1x1x8x32xf32>
    %893 = vector.shape_cast %892 : vector<1x1x8x32xf32> to vector<8x32xf32>
    %894 = vector.shape_cast %891 : vector<8x32xf32> to vector<1x1x8x32xf32>
    tpu.vector_store %arg6[%c0_417, %c0_418, %c0_419, %c0_420], %894 {strides = array<i32>} : memref<1x2x8x32xf32, #tpu.memory_space<vmem>>, vector<1x1x8x32xf32>,
    %c1_421 = arith.constant 1 : index
    %c0_422 = arith.constant 0 : index
    %c0_423 = arith.constant 0 : index
    %895 = vector.load %arg8[%c1_421, %c0_422, %c0_423] : memref<2x8x32xf32, #tpu.memory_space<vmem>>, vector<1x8x32xf32>
    %896 = vector.shape_cast %895 : vector<1x8x32xf32> to vector<8x32xf32>
    %c0_424 = arith.constant 0 : index
    %c1_425 = arith.constant 1 : index
    %c0_426 = arith.constant 0 : index
    %c0_427 = arith.constant 0 : index
    %897 = vector.load %arg6[%c0_424, %c1_425, %c0_426, %c0_427] : memref<1x2x8x32xf32, #tpu.memory_space<vmem>>, vector<1x1x8x32xf32>
    %898 = vector.shape_cast %897 : vector<1x1x8x32xf32> to vector<8x32xf32>
    %899 = vector.shape_cast %896 : vector<8x32xf32> to vector<1x1x8x32xf32>
    tpu.vector_store %arg6[%c0_424, %c1_425, %c0_426, %c0_427], %899 {strides = array<i32>} : memref<1x2x8x32xf32, #tpu.memory_space<vmem>>, vector<1x1x8x32xf32>,
    return
  }
  func.func @transform_0(%arg0: i32) -> (i32, i32, i32) {
    %c0_i32 = arith.constant 0 : i32
    %c0_i32_0 = arith.constant 0 : i32
    %c0_i32_1 = arith.constant 0 : i32
    return %arg0, %c0_i32, %c0_i32_0 : i32, i32, i32
  }
  func.func @transform_1(%arg0: i32) -> (i32, i32, i32) {
    %c0_i32 = arith.constant 0 : i32
    %c0_i32_0 = arith.constant 0 : i32
    %c0_i32_1 = arith.constant 0 : i32
    return %arg0, %c0_i32, %c0_i32_0 : i32, i32, i32
  }
  func.func @transform_2(%arg0: i32) -> (i32, i32, i32) {
    %c0_i32 = arith.constant 0 : i32
    %c0_i32_0 = arith.constant 0 : i32
    %c0_i32_1 = arith.constant 0 : i32
    return %arg0, %c0_i32, %c0_i32_0 : i32, i32, i32
  }
  func.func @transform_3(%arg0: i32) -> (i32, i32, i32) {
    %c0_i32 = arith.constant 0 : i32
    %c0_i32_0 = arith.constant 0 : i32
    %c0_i32_1 = arith.constant 0 : i32
    return %arg0, %c0_i32, %c0_i32_0 : i32, i32, i32
  }
  func.func @transform_4(%arg0: i32) -> (i32, i32, i32, i32) {
    %c0_i32 = arith.constant 0 : i32
    %c0_i32_0 = arith.constant 0 : i32
    %c0_i32_1 = arith.constant 0 : i32
    %c0_i32_2 = arith.constant 0 : i32
    return %arg0, %c0_i32, %c0_i32_0, %c0_i32_1 : i32, i32, i32, i32
  }
  func.func @transform_5(%arg0: i32) -> (i32, i32, i32, i32) {
    %c0_i32 = arith.constant 0 : i32
    %c0_i32_0 = arith.constant 0 : i32
    %c0_i32_1 = arith.constant 0 : i32
    %c0_i32_2 = arith.constant 0 : i32
    return %arg0, %c0_i32, %c0_i32_0, %c0_i32_1 : i32, i32, i32, i32
  }
}

module attributes {stable_mosaic.version = 11 : i64} {
  func.func @_dense_head_kernel(%arg0: i32, %arg1: memref<8x64xbf16, #tpu.memory_space<vmem>>, %arg2: memref<8x128xbf16, #tpu.memory_space<vmem>>, %arg3: memref<8x16xf32, #tpu.memory_space<vmem>>, %arg4: memref<64x64xbf16, #tpu.memory_space<vmem>>, %arg5: memref<128x64xbf16, #tpu.memory_space<vmem>>, %arg6: memref<1x64xf32, #tpu.memory_space<vmem>>, %arg7: memref<1x64xf32, #tpu.memory_space<vmem>>, %arg8: memref<1x64xf32, #tpu.memory_space<vmem>>, %arg9: memref<64x128xbf16, #tpu.memory_space<vmem>>, %arg10: memref<1x128xf32, #tpu.memory_space<vmem>>, %arg11: memref<128x64xbf16, #tpu.memory_space<vmem>>, %arg12: memref<1x64xf32, #tpu.memory_space<vmem>>, %arg13: memref<1x64xf32, #tpu.memory_space<vmem>>, %arg14: memref<1x64xf32, #tpu.memory_space<vmem>>, %arg15: memref<64x128xbf16, #tpu.memory_space<vmem>>, %arg16: memref<1x128xf32, #tpu.memory_space<vmem>>, %arg17: memref<16x32xbf16, #tpu.memory_space<vmem>>, %arg18: memref<128x32xbf16, #tpu.memory_space<vmem>>, %arg19: memref<1x32xf32, #tpu.memory_space<vmem>>, %arg20: memref<32x128xbf16, #tpu.memory_space<vmem>>, %arg21: memref<1x128xf32, #tpu.memory_space<vmem>>, %arg22: memref<16x32xbf16, #tpu.memory_space<vmem>>, %arg23: memref<128x32xbf16, #tpu.memory_space<vmem>>, %arg24: memref<1x32xf32, #tpu.memory_space<vmem>>, %arg25: memref<8x128xf32, #tpu.memory_space<vmem>>, %arg26: memref<8x128xf32, #tpu.memory_space<vmem>>, %arg27: memref<8x128xf32, #tpu.memory_space<vmem>>, %arg28: memref<8x32xf32, #tpu.memory_space<vmem>>) attributes {dimension_semantics = [#tpu.dimension_semantics<arbitrary>], iteration_bounds = array<i64: 1>, scalar_prefetch = 0 : i64, scratch_operands = 0 : i64, tpu.core_type = #tpu.core_type<tc>, window_params = [{pipeline_mode = #tpu.pipeline_mode<synchronous>, transform_indices = @transform_0, window_bounds = array<i64: 8, 64>}, {pipeline_mode = #tpu.pipeline_mode<synchronous>, transform_indices = @transform_1, window_bounds = array<i64: 8, 128>}, {pipeline_mode = #tpu.pipeline_mode<synchronous>, transform_indices = @transform_2, window_bounds = array<i64: 8, 16>}, {pipeline_mode = #tpu.pipeline_mode<synchronous>, transform_indices = @transform_3, window_bounds = array<i64: 64, 64>}, {pipeline_mode = #tpu.pipeline_mode<synchronous>, transform_indices = @transform_4, window_bounds = array<i64: 128, 64>}, {pipeline_mode = #tpu.pipeline_mode<synchronous>, transform_indices = @transform_5, window_bounds = array<i64: 1, 64>}, {pipeline_mode = #tpu.pipeline_mode<synchronous>, transform_indices = @transform_6, window_bounds = array<i64: 1, 64>}, {pipeline_mode = #tpu.pipeline_mode<synchronous>, transform_indices = @transform_7, window_bounds = array<i64: 1, 64>}, {pipeline_mode = #tpu.pipeline_mode<synchronous>, transform_indices = @transform_8, window_bounds = array<i64: 64, 128>}, {pipeline_mode = #tpu.pipeline_mode<synchronous>, transform_indices = @transform_9, window_bounds = array<i64: 1, 128>}, {pipeline_mode = #tpu.pipeline_mode<synchronous>, transform_indices = @transform_10, window_bounds = array<i64: 128, 64>}, {pipeline_mode = #tpu.pipeline_mode<synchronous>, transform_indices = @transform_11, window_bounds = array<i64: 1, 64>}, {pipeline_mode = #tpu.pipeline_mode<synchronous>, transform_indices = @transform_12, window_bounds = array<i64: 1, 64>}, {pipeline_mode = #tpu.pipeline_mode<synchronous>, transform_indices = @transform_13, window_bounds = array<i64: 1, 64>}, {pipeline_mode = #tpu.pipeline_mode<synchronous>, transform_indices = @transform_14, window_bounds = array<i64: 64, 128>}, {pipeline_mode = #tpu.pipeline_mode<synchronous>, transform_indices = @transform_15, window_bounds = array<i64: 1, 128>}, {pipeline_mode = #tpu.pipeline_mode<synchronous>, transform_indices = @transform_16, window_bounds = array<i64: 16, 32>}, {pipeline_mode = #tpu.pipeline_mode<synchronous>, transform_indices = @transform_17, window_bounds = array<i64: 128, 32>}, {pipeline_mode = #tpu.pipeline_mode<synchronous>, transform_indices = @transform_18, window_bounds = array<i64: 1, 32>}, {pipeline_mode = #tpu.pipeline_mode<synchronous>, transform_indices = @transform_19, window_bounds = array<i64: 32, 128>}, {pipeline_mode = #tpu.pipeline_mode<synchronous>, transform_indices = @transform_20, window_bounds = array<i64: 1, 128>}, {pipeline_mode = #tpu.pipeline_mode<synchronous>, transform_indices = @transform_21, window_bounds = array<i64: 16, 32>}, {pipeline_mode = #tpu.pipeline_mode<synchronous>, transform_indices = @transform_22, window_bounds = array<i64: 128, 32>}, {pipeline_mode = #tpu.pipeline_mode<synchronous>, transform_indices = @transform_23, window_bounds = array<i64: 1, 32>}, {pipeline_mode = #tpu.pipeline_mode<synchronous>, transform_indices = @transform_24, window_bounds = array<i64: 8, 128>}, {pipeline_mode = #tpu.pipeline_mode<synchronous>, transform_indices = @transform_25, window_bounds = array<i64: 8, 128>}, {pipeline_mode = #tpu.pipeline_mode<synchronous>, transform_indices = @transform_26, window_bounds = array<i64: 8, 128>}, {pipeline_mode = #tpu.pipeline_mode<synchronous>, transform_indices = @transform_27, window_bounds = array<i64: 8, 32>}]} {
    %c0 = arith.constant 0 : index
    %c0_0 = arith.constant 0 : index
    %0 = vector.load %arg1[%c0, %c0_0] : memref<8x64xbf16, #tpu.memory_space<vmem>>, vector<8x64xbf16>
    %c0_1 = arith.constant 0 : index
    %c0_2 = arith.constant 0 : index
    %1 = vector.load %arg2[%c0_1, %c0_2] : memref<8x128xbf16, #tpu.memory_space<vmem>>, vector<8x128xbf16>
    %c0_3 = arith.constant 0 : index
    %c0_4 = arith.constant 0 : index
    %2 = vector.load %arg4[%c0_3, %c0_4] : memref<64x64xbf16, #tpu.memory_space<vmem>>, vector<64x64xbf16>
    %cst = arith.constant dense<0.000000e+00> : vector<8x64xf32>
    %3 = tpu.matmul %0, %2, %cst {dimension_numbers = #tpu.dot_dimension_numbers<[1], [0], [0], [1], [0, 0, 1, 1], [], []>} : vector<8x64xbf16>, vector<64x64xbf16>, vector<8x64xf32> -> vector<8x64xf32>
    %c0_5 = arith.constant 0 : index
    %c0_6 = arith.constant 0 : index
    %4 = vector.load %arg5[%c0_5, %c0_6] : memref<128x64xbf16, #tpu.memory_space<vmem>>, vector<128x64xbf16>
    %cst_7 = arith.constant dense<0.000000e+00> : vector<8x64xf32>
    %5 = tpu.matmul %1, %4, %cst_7 {dimension_numbers = #tpu.dot_dimension_numbers<[1], [0], [0], [1], [0, 0, 1, 1], [], []>} : vector<8x128xbf16>, vector<128x64xbf16>, vector<8x64xf32> -> vector<8x64xf32>
    %6 = arith.addf %3, %5 : vector<8x64xf32>
    %c0_8 = arith.constant 0 : index
    %c0_9 = arith.constant 0 : index
    %7 = vector.load %arg6[%c0_8, %c0_9] : memref<1x64xf32, #tpu.memory_space<vmem>>, vector<1x64xf32>
    %8 = vector.broadcast %7 : vector<1x64xf32> to vector<8x64xf32>
    %9 = arith.addf %6, %8 : vector<8x64xf32>
    %c0_10 = arith.constant 0 : index
    %c0_11 = arith.constant 0 : index
    %10 = vector.load %arg7[%c0_10, %c0_11] : memref<1x64xf32, #tpu.memory_space<vmem>>, vector<1x64xf32>
    %c0_12 = arith.constant 0 : index
    %c0_13 = arith.constant 0 : index
    %11 = vector.load %arg8[%c0_12, %c0_13] : memref<1x64xf32, #tpu.memory_space<vmem>>, vector<1x64xf32>
    %12 = math.tanh %9 : vector<8x64xf32>
    %cst_14 = arith.constant dense<0.000000e+00> : vector<8xf32>
    %13 = vector.multi_reduction <add>, %12, %cst_14 [1] : vector<8x64xf32> to vector<8xf32>
    %14 = vector.shape_cast %13 : vector<8xf32> to vector<8x1xf32>
    %cst_15 = arith.constant 6.400000e+01 : f32
    %15 = vector.broadcast %cst_15 : f32 to vector<8x1xf32>
    %16 = arith.divf %14, %15 : vector<8x1xf32>
    %17 = vector.broadcast %16 : vector<8x1xf32> to vector<8x64xf32>
    %18 = arith.subf %12, %17 : vector<8x64xf32>
    %19 = arith.mulf %18, %18 : vector<8x64xf32>
    %cst_16 = arith.constant dense<0.000000e+00> : vector<8xf32>
    %20 = vector.multi_reduction <add>, %19, %cst_16 [1] : vector<8x64xf32> to vector<8xf32>
    %21 = vector.shape_cast %20 : vector<8xf32> to vector<8x1xf32>
    %cst_17 = arith.constant 6.400000e+01 : f32
    %22 = vector.broadcast %cst_17 : f32 to vector<8x1xf32>
    %23 = arith.divf %21, %22 : vector<8x1xf32>
    %24 = vector.broadcast %16 : vector<8x1xf32> to vector<8x64xf32>
    %25 = arith.subf %12, %24 : vector<8x64xf32>
    %cst_18 = arith.constant 9.99999974E-6 : f32
    %26 = vector.broadcast %cst_18 : f32 to vector<8x1xf32>
    %27 = arith.addf %23, %26 : vector<8x1xf32>
    %28 = math.rsqrt %27 : vector<8x1xf32>
    %29 = vector.broadcast %28 : vector<8x1xf32> to vector<8x64xf32>
    %30 = arith.mulf %25, %29 : vector<8x64xf32>
    %31 = vector.broadcast %10 : vector<1x64xf32> to vector<8x64xf32>
    %32 = arith.mulf %30, %31 : vector<8x64xf32>
    %33 = vector.broadcast %11 : vector<1x64xf32> to vector<8x64xf32>
    %34 = arith.addf %32, %33 : vector<8x64xf32>
    %35 = arith.truncf %34 : vector<8x64xf32> to vector<8x64xbf16>
    %c0_19 = arith.constant 0 : index
    %c0_20 = arith.constant 0 : index
    %36 = vector.load %arg9[%c0_19, %c0_20] : memref<64x128xbf16, #tpu.memory_space<vmem>>, vector<64x128xbf16>
    %cst_21 = arith.constant dense<0.000000e+00> : vector<8x128xf32>
    %37 = tpu.matmul %35, %36, %cst_21 {dimension_numbers = #tpu.dot_dimension_numbers<[1], [0], [0], [1], [0, 0, 1, 1], [], []>} : vector<8x64xbf16>, vector<64x128xbf16>, vector<8x128xf32> -> vector<8x128xf32>
    %c0_22 = arith.constant 0 : index
    %c0_23 = arith.constant 0 : index
    %38 = vector.load %arg10[%c0_22, %c0_23] : memref<1x128xf32, #tpu.memory_space<vmem>>, vector<1x128xf32>
    %39 = vector.broadcast %38 : vector<1x128xf32> to vector<8x128xf32>
    %40 = arith.addf %37, %39 : vector<8x128xf32>
    %c0_24 = arith.constant 0 : index
    %c0_25 = arith.constant 0 : index
    %41 = vector.load %arg25[%c0_24, %c0_25] : memref<8x128xf32, #tpu.memory_space<vmem>>, vector<8x128xf32>
    tpu.vector_store %arg25[%c0_24, %c0_25], %40 {strides = array<i32>} : memref<8x128xf32, #tpu.memory_space<vmem>>, vector<8x128xf32>,
    %c0_26 = arith.constant 0 : index
    %c0_27 = arith.constant 0 : index
    %42 = vector.load %arg11[%c0_26, %c0_27] : memref<128x64xbf16, #tpu.memory_space<vmem>>, vector<128x64xbf16>
    %cst_28 = arith.constant dense<0.000000e+00> : vector<8x64xf32>
    %43 = tpu.matmul %1, %42, %cst_28 {dimension_numbers = #tpu.dot_dimension_numbers<[1], [0], [0], [1], [0, 0, 1, 1], [], []>} : vector<8x128xbf16>, vector<128x64xbf16>, vector<8x64xf32> -> vector<8x64xf32>
    %c0_29 = arith.constant 0 : index
    %c0_30 = arith.constant 0 : index
    %44 = vector.load %arg12[%c0_29, %c0_30] : memref<1x64xf32, #tpu.memory_space<vmem>>, vector<1x64xf32>
    %45 = vector.broadcast %44 : vector<1x64xf32> to vector<8x64xf32>
    %46 = arith.addf %43, %45 : vector<8x64xf32>
    %c0_31 = arith.constant 0 : index
    %c0_32 = arith.constant 0 : index
    %47 = vector.load %arg13[%c0_31, %c0_32] : memref<1x64xf32, #tpu.memory_space<vmem>>, vector<1x64xf32>
    %c0_33 = arith.constant 0 : index
    %c0_34 = arith.constant 0 : index
    %48 = vector.load %arg14[%c0_33, %c0_34] : memref<1x64xf32, #tpu.memory_space<vmem>>, vector<1x64xf32>
    %49 = math.tanh %46 : vector<8x64xf32>
    %cst_35 = arith.constant dense<0.000000e+00> : vector<8xf32>
    %50 = vector.multi_reduction <add>, %49, %cst_35 [1] : vector<8x64xf32> to vector<8xf32>
    %51 = vector.shape_cast %50 : vector<8xf32> to vector<8x1xf32>
    %cst_36 = arith.constant 6.400000e+01 : f32
    %52 = vector.broadcast %cst_36 : f32 to vector<8x1xf32>
    %53 = arith.divf %51, %52 : vector<8x1xf32>
    %54 = vector.broadcast %53 : vector<8x1xf32> to vector<8x64xf32>
    %55 = arith.subf %49, %54 : vector<8x64xf32>
    %56 = arith.mulf %55, %55 : vector<8x64xf32>
    %cst_37 = arith.constant dense<0.000000e+00> : vector<8xf32>
    %57 = vector.multi_reduction <add>, %56, %cst_37 [1] : vector<8x64xf32> to vector<8xf32>
    %58 = vector.shape_cast %57 : vector<8xf32> to vector<8x1xf32>
    %cst_38 = arith.constant 6.400000e+01 : f32
    %59 = vector.broadcast %cst_38 : f32 to vector<8x1xf32>
    %60 = arith.divf %58, %59 : vector<8x1xf32>
    %61 = vector.broadcast %53 : vector<8x1xf32> to vector<8x64xf32>
    %62 = arith.subf %49, %61 : vector<8x64xf32>
    %cst_39 = arith.constant 9.99999974E-6 : f32
    %63 = vector.broadcast %cst_39 : f32 to vector<8x1xf32>
    %64 = arith.addf %60, %63 : vector<8x1xf32>
    %65 = math.rsqrt %64 : vector<8x1xf32>
    %66 = vector.broadcast %65 : vector<8x1xf32> to vector<8x64xf32>
    %67 = arith.mulf %62, %66 : vector<8x64xf32>
    %68 = vector.broadcast %47 : vector<1x64xf32> to vector<8x64xf32>
    %69 = arith.mulf %67, %68 : vector<8x64xf32>
    %70 = vector.broadcast %48 : vector<1x64xf32> to vector<8x64xf32>
    %71 = arith.addf %69, %70 : vector<8x64xf32>
    %72 = arith.truncf %71 : vector<8x64xf32> to vector<8x64xbf16>
    %c0_40 = arith.constant 0 : index
    %c0_41 = arith.constant 0 : index
    %73 = vector.load %arg15[%c0_40, %c0_41] : memref<64x128xbf16, #tpu.memory_space<vmem>>, vector<64x128xbf16>
    %cst_42 = arith.constant dense<0.000000e+00> : vector<8x128xf32>
    %74 = tpu.matmul %72, %73, %cst_42 {dimension_numbers = #tpu.dot_dimension_numbers<[1], [0], [0], [1], [0, 0, 1, 1], [], []>} : vector<8x64xbf16>, vector<64x128xbf16>, vector<8x128xf32> -> vector<8x128xf32>
    %c0_43 = arith.constant 0 : index
    %c0_44 = arith.constant 0 : index
    %75 = vector.load %arg16[%c0_43, %c0_44] : memref<1x128xf32, #tpu.memory_space<vmem>>, vector<1x128xf32>
    %76 = vector.broadcast %75 : vector<1x128xf32> to vector<8x128xf32>
    %77 = arith.addf %74, %76 : vector<8x128xf32>
    %c0_45 = arith.constant 0 : index
    %c0_46 = arith.constant 0 : index
    %78 = vector.load %arg26[%c0_45, %c0_46] : memref<8x128xf32, #tpu.memory_space<vmem>>, vector<8x128xf32>
    tpu.vector_store %arg26[%c0_45, %c0_46], %77 {strides = array<i32>} : memref<8x128xf32, #tpu.memory_space<vmem>>, vector<8x128xf32>,
    %79 = vector.extract_strided_slice %40 {offsets = [0, 0], sizes = [8, 16], strides = [1, 1]} : vector<8x128xf32> to vector<8x16xf32>
    %c0_47 = arith.constant 0 : index
    %c0_48 = arith.constant 0 : index
    %80 = vector.load %arg3[%c0_47, %c0_48] : memref<8x16xf32, #tpu.memory_space<vmem>>, vector<8x16xf32>
    %81 = vector.extract_strided_slice %40 {offsets = [0, 16], sizes = [8, 16], strides = [1, 1]} : vector<8x128xf32> to vector<8x16xf32>
    %cst_49 = arith.constant 5.000000e-01 : f32
    %82 = vector.broadcast %cst_49 : f32 to vector<8x16xf32>
    %83 = arith.mulf %82, %81 : vector<8x16xf32>
    %84 = math.exp %83 : vector<8x16xf32>
    %85 = arith.mulf %80, %84 : vector<8x16xf32>
    %86 = arith.addf %79, %85 : vector<8x16xf32>
    %87 = arith.truncf %86 : vector<8x16xf32> to vector<8x16xbf16>
    %c0_50 = arith.constant 0 : index
    %c0_51 = arith.constant 0 : index
    %88 = vector.load %arg17[%c0_50, %c0_51] : memref<16x32xbf16, #tpu.memory_space<vmem>>, vector<16x32xbf16>
    %cst_52 = arith.constant dense<0.000000e+00> : vector<8x32xf32>
    %89 = tpu.matmul %87, %88, %cst_52 {dimension_numbers = #tpu.dot_dimension_numbers<[1], [0], [0], [1], [0, 0, 1, 1], [], []>} : vector<8x16xbf16>, vector<16x32xbf16>, vector<8x32xf32> -> vector<8x32xf32>
    %c0_53 = arith.constant 0 : index
    %c0_54 = arith.constant 0 : index
    %90 = vector.load %arg18[%c0_53, %c0_54] : memref<128x32xbf16, #tpu.memory_space<vmem>>, vector<128x32xbf16>
    %cst_55 = arith.constant dense<0.000000e+00> : vector<8x32xf32>
    %91 = tpu.matmul %1, %90, %cst_55 {dimension_numbers = #tpu.dot_dimension_numbers<[1], [0], [0], [1], [0, 0, 1, 1], [], []>} : vector<8x128xbf16>, vector<128x32xbf16>, vector<8x32xf32> -> vector<8x32xf32>
    %92 = arith.addf %89, %91 : vector<8x32xf32>
    %c0_56 = arith.constant 0 : index
    %c0_57 = arith.constant 0 : index
    %93 = vector.load %arg19[%c0_56, %c0_57] : memref<1x32xf32, #tpu.memory_space<vmem>>, vector<1x32xf32>
    %94 = vector.broadcast %93 : vector<1x32xf32> to vector<8x32xf32>
    %95 = arith.addf %92, %94 : vector<8x32xf32>
    %96 = math.tanh %95 : vector<8x32xf32>
    %97 = arith.truncf %96 : vector<8x32xf32> to vector<8x32xbf16>
    %c0_58 = arith.constant 0 : index
    %c0_59 = arith.constant 0 : index
    %98 = vector.load %arg20[%c0_58, %c0_59] : memref<32x128xbf16, #tpu.memory_space<vmem>>, vector<32x128xbf16>
    %cst_60 = arith.constant dense<0.000000e+00> : vector<8x128xf32>
    %99 = tpu.matmul %97, %98, %cst_60 {dimension_numbers = #tpu.dot_dimension_numbers<[1], [0], [0], [1], [0, 0, 1, 1], [], []>} : vector<8x32xbf16>, vector<32x128xbf16>, vector<8x128xf32> -> vector<8x128xf32>
    %c0_61 = arith.constant 0 : index
    %c0_62 = arith.constant 0 : index
    %100 = vector.load %arg21[%c0_61, %c0_62] : memref<1x128xf32, #tpu.memory_space<vmem>>, vector<1x128xf32>
    %101 = vector.broadcast %100 : vector<1x128xf32> to vector<8x128xf32>
    %102 = arith.addf %99, %101 : vector<8x128xf32>
    %c0_63 = arith.constant 0 : index
    %c0_64 = arith.constant 0 : index
    %103 = vector.load %arg27[%c0_63, %c0_64] : memref<8x128xf32, #tpu.memory_space<vmem>>, vector<8x128xf32>
    tpu.vector_store %arg27[%c0_63, %c0_64], %102 {strides = array<i32>} : memref<8x128xf32, #tpu.memory_space<vmem>>, vector<8x128xf32>,
    %c0_65 = arith.constant 0 : index
    %c0_66 = arith.constant 0 : index
    %104 = vector.load %arg22[%c0_65, %c0_66] : memref<16x32xbf16, #tpu.memory_space<vmem>>, vector<16x32xbf16>
    %cst_67 = arith.constant dense<0.000000e+00> : vector<8x32xf32>
    %105 = tpu.matmul %87, %104, %cst_67 {dimension_numbers = #tpu.dot_dimension_numbers<[1], [0], [0], [1], [0, 0, 1, 1], [], []>} : vector<8x16xbf16>, vector<16x32xbf16>, vector<8x32xf32> -> vector<8x32xf32>
    %c0_68 = arith.constant 0 : index
    %c0_69 = arith.constant 0 : index
    %106 = vector.load %arg23[%c0_68, %c0_69] : memref<128x32xbf16, #tpu.memory_space<vmem>>, vector<128x32xbf16>
    %cst_70 = arith.constant dense<0.000000e+00> : vector<8x32xf32>
    %107 = tpu.matmul %1, %106, %cst_70 {dimension_numbers = #tpu.dot_dimension_numbers<[1], [0], [0], [1], [0, 0, 1, 1], [], []>} : vector<8x128xbf16>, vector<128x32xbf16>, vector<8x32xf32> -> vector<8x32xf32>
    %108 = arith.addf %105, %107 : vector<8x32xf32>
    %c0_71 = arith.constant 0 : index
    %c0_72 = arith.constant 0 : index
    %109 = vector.load %arg24[%c0_71, %c0_72] : memref<1x32xf32, #tpu.memory_space<vmem>>, vector<1x32xf32>
    %110 = vector.broadcast %109 : vector<1x32xf32> to vector<8x32xf32>
    %111 = arith.addf %108, %110 : vector<8x32xf32>
    %c0_73 = arith.constant 0 : index
    %c0_74 = arith.constant 0 : index
    %112 = vector.load %arg28[%c0_73, %c0_74] : memref<8x32xf32, #tpu.memory_space<vmem>>, vector<8x32xf32>
    tpu.vector_store %arg28[%c0_73, %c0_74], %111 {strides = array<i32>} : memref<8x32xf32, #tpu.memory_space<vmem>>, vector<8x32xf32>,
    return
  }
  func.func @transform_0(%arg0: i32) -> (i32, i32) {
    %c0_i32 = arith.constant 0 : i32
    %c0_i32_0 = arith.constant 0 : i32
    %c0_i32_1 = arith.constant 0 : i32
    return %c0_i32, %c0_i32_0 : i32, i32
  }
  func.func @transform_1(%arg0: i32) -> (i32, i32) {
    %c0_i32 = arith.constant 0 : i32
    %c0_i32_0 = arith.constant 0 : i32
    %c0_i32_1 = arith.constant 0 : i32
    return %c0_i32, %c0_i32_0 : i32, i32
  }
  func.func @transform_2(%arg0: i32) -> (i32, i32) {
    %c0_i32 = arith.constant 0 : i32
    %c0_i32_0 = arith.constant 0 : i32
    %c0_i32_1 = arith.constant 0 : i32
    return %c0_i32, %c0_i32_0 : i32, i32
  }
  func.func @transform_3(%arg0: i32) -> (i32, i32) {
    %c0_i32 = arith.constant 0 : i32
    %c0_i32_0 = arith.constant 0 : i32
    %c0_i32_1 = arith.constant 0 : i32
    return %c0_i32, %c0_i32_0 : i32, i32
  }
  func.func @transform_4(%arg0: i32) -> (i32, i32) {
    %c0_i32 = arith.constant 0 : i32
    %c0_i32_0 = arith.constant 0 : i32
    %c0_i32_1 = arith.constant 0 : i32
    return %c0_i32, %c0_i32_0 : i32, i32
  }
  func.func @transform_5(%arg0: i32) -> (i32, i32) {
    %c0_i32 = arith.constant 0 : i32
    %c0_i32_0 = arith.constant 0 : i32
    %c0_i32_1 = arith.constant 0 : i32
    return %c0_i32, %c0_i32_0 : i32, i32
  }
  func.func @transform_6(%arg0: i32) -> (i32, i32) {
    %c0_i32 = arith.constant 0 : i32
    %c0_i32_0 = arith.constant 0 : i32
    %c0_i32_1 = arith.constant 0 : i32
    return %c0_i32, %c0_i32_0 : i32, i32
  }
  func.func @transform_7(%arg0: i32) -> (i32, i32) {
    %c0_i32 = arith.constant 0 : i32
    %c0_i32_0 = arith.constant 0 : i32
    %c0_i32_1 = arith.constant 0 : i32
    return %c0_i32, %c0_i32_0 : i32, i32
  }
  func.func @transform_8(%arg0: i32) -> (i32, i32) {
    %c0_i32 = arith.constant 0 : i32
    %c0_i32_0 = arith.constant 0 : i32
    %c0_i32_1 = arith.constant 0 : i32
    return %c0_i32, %c0_i32_0 : i32, i32
  }
  func.func @transform_9(%arg0: i32) -> (i32, i32) {
    %c0_i32 = arith.constant 0 : i32
    %c0_i32_0 = arith.constant 0 : i32
    %c0_i32_1 = arith.constant 0 : i32
    return %c0_i32, %c0_i32_0 : i32, i32
  }
  func.func @transform_10(%arg0: i32) -> (i32, i32) {
    %c0_i32 = arith.constant 0 : i32
    %c0_i32_0 = arith.constant 0 : i32
    %c0_i32_1 = arith.constant 0 : i32
    return %c0_i32, %c0_i32_0 : i32, i32
  }
  func.func @transform_11(%arg0: i32) -> (i32, i32) {
    %c0_i32 = arith.constant 0 : i32
    %c0_i32_0 = arith.constant 0 : i32
    %c0_i32_1 = arith.constant 0 : i32
    return %c0_i32, %c0_i32_0 : i32, i32
  }
  func.func @transform_12(%arg0: i32) -> (i32, i32) {
    %c0_i32 = arith.constant 0 : i32
    %c0_i32_0 = arith.constant 0 : i32
    %c0_i32_1 = arith.constant 0 : i32
    return %c0_i32, %c0_i32_0 : i32, i32
  }
  func.func @transform_13(%arg0: i32) -> (i32, i32) {
    %c0_i32 = arith.constant 0 : i32
    %c0_i32_0 = arith.constant 0 : i32
    %c0_i32_1 = arith.constant 0 : i32
    return %c0_i32, %c0_i32_0 : i32, i32
  }
  func.func @transform_14(%arg0: i32) -> (i32, i32) {
    %c0_i32 = arith.constant 0 : i32
    %c0_i32_0 = arith.constant 0 : i32
    %c0_i32_1 = arith.constant 0 : i32
    return %c0_i32, %c0_i32_0 : i32, i32
  }
  func.func @transform_15(%arg0: i32) -> (i32, i32) {
    %c0_i32 = arith.constant 0 : i32
    %c0_i32_0 = arith.constant 0 : i32
    %c0_i32_1 = arith.constant 0 : i32
    return %c0_i32, %c0_i32_0 : i32, i32
  }
  func.func @transform_16(%arg0: i32) -> (i32, i32) {
    %c0_i32 = arith.constant 0 : i32
    %c0_i32_0 = arith.constant 0 : i32
    %c0_i32_1 = arith.constant 0 : i32
    return %c0_i32, %c0_i32_0 : i32, i32
  }
  func.func @transform_17(%arg0: i32) -> (i32, i32) {
    %c0_i32 = arith.constant 0 : i32
    %c0_i32_0 = arith.constant 0 : i32
    %c0_i32_1 = arith.constant 0 : i32
    return %c0_i32, %c0_i32_0 : i32, i32
  }
  func.func @transform_18(%arg0: i32) -> (i32, i32) {
    %c0_i32 = arith.constant 0 : i32
    %c0_i32_0 = arith.constant 0 : i32
    %c0_i32_1 = arith.constant 0 : i32
    return %c0_i32, %c0_i32_0 : i32, i32
  }
  func.func @transform_19(%arg0: i32) -> (i32, i32) {
    %c0_i32 = arith.constant 0 : i32
    %c0_i32_0 = arith.constant 0 : i32
    %c0_i32_1 = arith.constant 0 : i32
    return %c0_i32, %c0_i32_0 : i32, i32
  }
  func.func @transform_20(%arg0: i32) -> (i32, i32) {
    %c0_i32 = arith.constant 0 : i32
    %c0_i32_0 = arith.constant 0 : i32
    %c0_i32_1 = arith.constant 0 : i32
    return %c0_i32, %c0_i32_0 : i32, i32
  }
  func.func @transform_21(%arg0: i32) -> (i32, i32) {
    %c0_i32 = arith.constant 0 : i32
    %c0_i32_0 = arith.constant 0 : i32
    %c0_i32_1 = arith.constant 0 : i32
    return %c0_i32, %c0_i32_0 : i32, i32
  }
  func.func @transform_22(%arg0: i32) -> (i32, i32) {
    %c0_i32 = arith.constant 0 : i32
    %c0_i32_0 = arith.constant 0 : i32
    %c0_i32_1 = arith.constant 0 : i32
    return %c0_i32, %c0_i32_0 : i32, i32
  }
  func.func @transform_23(%arg0: i32) -> (i32, i32) {
    %c0_i32 = arith.constant 0 : i32
    %c0_i32_0 = arith.constant 0 : i32
    %c0_i32_1 = arith.constant 0 : i32
    return %c0_i32, %c0_i32_0 : i32, i32
  }
  func.func @transform_24(%arg0: i32) -> (i32, i32) {
    %c0_i32 = arith.constant 0 : i32
    %c0_i32_0 = arith.constant 0 : i32
    %c0_i32_1 = arith.constant 0 : i32
    return %c0_i32, %c0_i32_0 : i32, i32
  }
  func.func @transform_25(%arg0: i32) -> (i32, i32) {
    %c0_i32 = arith.constant 0 : i32
    %c0_i32_0 = arith.constant 0 : i32
    %c0_i32_1 = arith.constant 0 : i32
    return %c0_i32, %c0_i32_0 : i32, i32
  }
  func.func @transform_26(%arg0: i32) -> (i32, i32) {
    %c0_i32 = arith.constant 0 : i32
    %c0_i32_0 = arith.constant 0 : i32
    %c0_i32_1 = arith.constant 0 : i32
    return %c0_i32, %c0_i32_0 : i32, i32
  }
  func.func @transform_27(%arg0: i32) -> (i32, i32) {
    %c0_i32 = arith.constant 0 : i32
    %c0_i32_0 = arith.constant 0 : i32
    %c0_i32_1 = arith.constant 0 : i32
    return %c0_i32, %c0_i32_0 : i32, i32
  }
}

module attributes {stable_mosaic.version = 11 : i64} {
  func.func @_dec_kernel(%arg0: i32, %arg1: memref<72x32xbf16, #tpu.memory_space<vmem>>, %arg2: memref<32x128xbf16, #tpu.memory_space<vmem>>, %arg3: memref<1x128xf32, #tpu.memory_space<vmem>>, %arg4: memref<32x128xbf16, #tpu.memory_space<vmem>>, %arg5: memref<8x32xf32, #tpu.memory_space<vmem>>, %arg6: memref<9x8x1xf32, #tpu.memory_space<vmem>>, %arg7: memref<32x128xbf16, #tpu.memory_space<vmem>>, %arg8: memref<1x128xf32, #tpu.memory_space<vmem>>, %arg9: memref<72x128xf32, #tpu.memory_space<vmem>>, %arg10: memref<72x128xf32, #tpu.memory_space<vmem>>, %arg11: memref<72x32xf32, #tpu.memory_space<vmem>>, %arg12: memref<8x32xf32, #tpu.memory_space<vmem>>, %arg13: memref<8x32xf32, #tpu.memory_space<vmem>>) attributes {dimension_semantics = [#tpu.dimension_semantics<arbitrary>], iteration_bounds = array<i64: 1>, scalar_prefetch = 0 : i64, scratch_operands = 4 : i64, tpu.core_type = #tpu.core_type<tc>, window_params = [{pipeline_mode = #tpu.pipeline_mode<synchronous>, transform_indices = @transform_0, window_bounds = array<i64: 72, 32>}, {pipeline_mode = #tpu.pipeline_mode<synchronous>, transform_indices = @transform_1, window_bounds = array<i64: 32, 128>}, {pipeline_mode = #tpu.pipeline_mode<synchronous>, transform_indices = @transform_2, window_bounds = array<i64: 1, 128>}, {pipeline_mode = #tpu.pipeline_mode<synchronous>, transform_indices = @transform_3, window_bounds = array<i64: 32, 128>}, {pipeline_mode = #tpu.pipeline_mode<synchronous>, transform_indices = @transform_4, window_bounds = array<i64: 8, 32>}, {pipeline_mode = #tpu.pipeline_mode<synchronous>, transform_indices = @transform_5, window_bounds = array<i64: 9, 8, 1>}, {pipeline_mode = #tpu.pipeline_mode<synchronous>, transform_indices = @transform_6, window_bounds = array<i64: 32, 128>}, {pipeline_mode = #tpu.pipeline_mode<synchronous>, transform_indices = @transform_7, window_bounds = array<i64: 1, 128>}, {pipeline_mode = #tpu.pipeline_mode<synchronous>, transform_indices = @transform_8, window_bounds = array<i64: 72, 128>}]} {
    %c0 = arith.constant 0 : index
    %c0_0 = arith.constant 0 : index
    %0 = vector.load %arg1[%c0, %c0_0] : memref<72x32xbf16, #tpu.memory_space<vmem>>, vector<72x32xbf16>
    %c0_1 = arith.constant 0 : index
    %c0_2 = arith.constant 0 : index
    %1 = vector.load %arg2[%c0_1, %c0_2] : memref<32x128xbf16, #tpu.memory_space<vmem>>, vector<32x128xbf16>
    %cst = arith.constant dense<0.000000e+00> : vector<72x128xf32>
    %2 = tpu.matmul %0, %1, %cst {dimension_numbers = #tpu.dot_dimension_numbers<[1], [0], [0], [1], [0, 0, 1, 1], [], []>} : vector<72x32xbf16>, vector<32x128xbf16>, vector<72x128xf32> -> vector<72x128xf32>
    %c0_3 = arith.constant 0 : index
    %c0_4 = arith.constant 0 : index
    %3 = vector.load %arg3[%c0_3, %c0_4] : memref<1x128xf32, #tpu.memory_space<vmem>>, vector<1x128xf32>
    %4 = vector.broadcast %3 : vector<1x128xf32> to vector<72x128xf32>
    %5 = arith.addf %2, %4 : vector<72x128xf32>
    %c0_5 = arith.constant 0 : index
    %c0_6 = arith.constant 0 : index
    %6 = vector.load %arg10[%c0_5, %c0_6] : memref<72x128xf32, #tpu.memory_space<vmem>>, vector<72x128xf32>
    tpu.vector_store %arg10[%c0_5, %c0_6], %5 {strides = array<i32>} : memref<72x128xf32, #tpu.memory_space<vmem>>, vector<72x128xf32>,
    %c0_7 = arith.constant 0 : index
    %c0_8 = arith.constant 0 : index
    %7 = vector.load %arg5[%c0_7, %c0_8] : memref<8x32xf32, #tpu.memory_space<vmem>>, vector<8x32xf32>
    %c0_9 = arith.constant 0 : index
    %c0_10 = arith.constant 0 : index
    %8 = vector.load %arg12[%c0_9, %c0_10] : memref<8x32xf32, #tpu.memory_space<vmem>>, vector<8x32xf32>
    tpu.vector_store %arg12[%c0_9, %c0_10], %7 {strides = array<i32>} : memref<8x32xf32, #tpu.memory_space<vmem>>, vector<8x32xf32>,
    %c0_11 = arith.constant 0 : index
    %c0_12 = arith.constant 0 : index
    %9 = vector.load %arg5[%c0_11, %c0_12] : memref<8x32xf32, #tpu.memory_space<vmem>>, vector<8x32xf32>
    %c0_13 = arith.constant 0 : index
    %c0_14 = arith.constant 0 : index
    %10 = vector.load %arg13[%c0_13, %c0_14] : memref<8x32xf32, #tpu.memory_space<vmem>>, vector<8x32xf32>
    tpu.vector_store %arg13[%c0_13, %c0_14], %9 {strides = array<i32>} : memref<8x32xf32, #tpu.memory_space<vmem>>, vector<8x32xf32>,
    %c0_15 = arith.constant 0 : index
    %c0_16 = arith.constant 0 : index
    %11 = vector.load %arg4[%c0_15, %c0_16] : memref<32x128xbf16, #tpu.memory_space<vmem>>, vector<32x128xbf16>
    %c0_i32 = arith.constant 0 : i32
    %c1_i32 = arith.constant 1 : i32
    %12 = arith.muli %c0_i32, %c1_i32 : i32
    %c0_i32_17 = arith.constant 0 : i32
    %13 = arith.addi %c0_i32_17, %12 : i32
    %c8_i32 = arith.constant 8 : i32
    %14 = arith.muli %13, %c8_i32 : i32
    %15 = tpu.assume_multiple %14, 8 : i32
    %16 = arith.index_cast %15 : i32 to index
    %c0_18 = arith.constant 0 : index
    %17 = vector.load %arg10[%16, %c0_18] : memref<72x128xf32, #tpu.memory_space<vmem>>, vector<8x128xf32>
    %c0_19 = arith.constant 0 : index
    %c0_20 = arith.constant 0 : index
    %18 = vector.load %arg12[%c0_19, %c0_20] : memref<8x32xf32, #tpu.memory_space<vmem>>, vector<8x32xf32>
    %19 = arith.truncf %18 : vector<8x32xf32> to vector<8x32xbf16>
    %cst_21 = arith.constant dense<0.000000e+00> : vector<8x128xf32>
    %20 = tpu.matmul %19, %11, %cst_21 {dimension_numbers = #tpu.dot_dimension_numbers<[1], [0], [0], [1], [0, 0, 1, 1], [], []>} : vector<8x32xbf16>, vector<32x128xbf16>, vector<8x128xf32> -> vector<8x128xf32>
    %21 = arith.addf %17, %20 : vector<8x128xf32>
    %22 = arith.negf %21 : vector<8x128xf32>
    %23 = math.exp %22 : vector<8x128xf32>
    %cst_22 = arith.constant 1.000000e+00 : f32
    %24 = vector.broadcast %cst_22 : f32 to vector<8x128xf32>
    %25 = arith.addf %24, %23 : vector<8x128xf32>
    %26 = arith.divf %24, %25 : vector<8x128xf32>
    %27 = vector.extract_strided_slice %26 {offsets = [0, 0], sizes = [8, 32], strides = [1, 1]} : vector<8x128xf32> to vector<8x32xf32>
    %28 = vector.extract_strided_slice %26 {offsets = [0, 32], sizes = [8, 32], strides = [1, 1]} : vector<8x128xf32> to vector<8x32xf32>
    %29 = vector.extract_strided_slice %26 {offsets = [0, 64], sizes = [8, 32], strides = [1, 1]} : vector<8x128xf32> to vector<8x32xf32>
    %cst_23 = arith.constant 2.000000e+00 : f32
    %30 = vector.broadcast %cst_23 : f32 to vector<8x32xf32>
    %31 = arith.mulf %30, %29 : vector<8x32xf32>
    %cst_24 = arith.constant 1.000000e+00 : f32
    %32 = vector.broadcast %cst_24 : f32 to vector<8x32xf32>
    %33 = arith.subf %31, %32 : vector<8x32xf32>
    %34 = vector.extract_strided_slice %26 {offsets = [0, 96], sizes = [8, 32], strides = [1, 1]} : vector<8x128xf32> to vector<8x32xf32>
    %c0_25 = arith.constant 0 : index
    %c0_26 = arith.constant 0 : index
    %35 = vector.load %arg13[%c0_25, %c0_26] : memref<8x32xf32, #tpu.memory_space<vmem>>, vector<8x32xf32>
    %36 = arith.mulf %28, %35 : vector<8x32xf32>
    %37 = arith.mulf %27, %33 : vector<8x32xf32>
    %38 = arith.addf %36, %37 : vector<8x32xf32>
    %39 = math.tanh %38 : vector<8x32xf32>
    %40 = arith.mulf %34, %39 : vector<8x32xf32>
    %41 = arith.index_cast %13 : i32 to index
    %c0_27 = arith.constant 0 : index
    %c0_28 = arith.constant 0 : index
    %42 = vector.load %arg6[%41, %c0_27, %c0_28] : memref<9x8x1xf32, #tpu.memory_space<vmem>>, vector<1x8x1xf32>
    %43 = vector.shape_cast %42 : vector<1x8x1xf32> to vector<8x1xf32>
    %44 = vector.broadcast %43 : vector<8x1xf32> to vector<8x32xf32>
    %45 = arith.mulf %44, %40 : vector<8x32xf32>
    %46 = arith.index_cast %15 : i32 to index
    %c0_29 = arith.constant 0 : index
    %47 = vector.load %arg11[%46, %c0_29] : memref<72x32xf32, #tpu.memory_space<vmem>>, vector<8x32xf32>
    tpu.vector_store %arg11[%46, %c0_29], %45 {strides = array<i32>} : memref<72x32xf32, #tpu.memory_space<vmem>>, vector<8x32xf32>,
    %48 = vector.broadcast %43 : vector<8x1xf32> to vector<8x32xf32>
    %49 = arith.mulf %48, %40 : vector<8x32xf32>
    %cst_30 = arith.constant 1.000000e+00 : f32
    %50 = vector.broadcast %cst_30 : f32 to vector<8x1xf32>
    %51 = arith.subf %50, %43 : vector<8x1xf32>
    %c0_31 = arith.constant 0 : index
    %c0_32 = arith.constant 0 : index
    %52 = vector.load %arg12[%c0_31, %c0_32] : memref<8x32xf32, #tpu.memory_space<vmem>>, vector<8x32xf32>
    %53 = vector.broadcast %51 : vector<8x1xf32> to vector<8x32xf32>
    %54 = arith.mulf %53, %52 : vector<8x32xf32>
    %55 = arith.addf %49, %54 : vector<8x32xf32>
    %c0_33 = arith.constant 0 : index
    %c0_34 = arith.constant 0 : index
    %56 = vector.load %arg12[%c0_33, %c0_34] : memref<8x32xf32, #tpu.memory_space<vmem>>, vector<8x32xf32>
    tpu.vector_store %arg12[%c0_33, %c0_34], %55 {strides = array<i32>} : memref<8x32xf32, #tpu.memory_space<vmem>>, vector<8x32xf32>,
    %57 = vector.broadcast %43 : vector<8x1xf32> to vector<8x32xf32>
    %58 = arith.mulf %57, %38 : vector<8x32xf32>
    %cst_35 = arith.constant 1.000000e+00 : f32
    %59 = vector.broadcast %cst_35 : f32 to vector<8x1xf32>
    %60 = arith.subf %59, %43 : vector<8x1xf32>
    %c0_36 = arith.constant 0 : index
    %c0_37 = arith.constant 0 : index
    %61 = vector.load %arg13[%c0_36, %c0_37] : memref<8x32xf32, #tpu.memory_space<vmem>>, vector<8x32xf32>
    %62 = vector.broadcast %60 : vector<8x1xf32> to vector<8x32xf32>
    %63 = arith.mulf %62, %61 : vector<8x32xf32>
    %64 = arith.addf %58, %63 : vector<8x32xf32>
    %c0_38 = arith.constant 0 : index
    %c0_39 = arith.constant 0 : index
    %65 = vector.load %arg13[%c0_38, %c0_39] : memref<8x32xf32, #tpu.memory_space<vmem>>, vector<8x32xf32>
    tpu.vector_store %arg13[%c0_38, %c0_39], %64 {strides = array<i32>} : memref<8x32xf32, #tpu.memory_space<vmem>>, vector<8x32xf32>,
    %c1_i32_40 = arith.constant 1 : i32
    %c1_i32_41 = arith.constant 1 : i32
    %66 = arith.muli %c1_i32_40, %c1_i32_41 : i32
    %c0_i32_42 = arith.constant 0 : i32
    %67 = arith.addi %c0_i32_42, %66 : i32
    %c8_i32_43 = arith.constant 8 : i32
    %68 = arith.muli %67, %c8_i32_43 : i32
    %69 = tpu.assume_multiple %68, 8 : i32
    %70 = arith.index_cast %69 : i32 to index
    %c0_44 = arith.constant 0 : index
    %71 = vector.load %arg10[%70, %c0_44] : memref<72x128xf32, #tpu.memory_space<vmem>>, vector<8x128xf32>
    %c0_45 = arith.constant 0 : index
    %c0_46 = arith.constant 0 : index
    %72 = vector.load %arg12[%c0_45, %c0_46] : memref<8x32xf32, #tpu.memory_space<vmem>>, vector<8x32xf32>
    %73 = arith.truncf %72 : vector<8x32xf32> to vector<8x32xbf16>
    %cst_47 = arith.constant dense<0.000000e+00> : vector<8x128xf32>
    %74 = tpu.matmul %73, %11, %cst_47 {dimension_numbers = #tpu.dot_dimension_numbers<[1], [0], [0], [1], [0, 0, 1, 1], [], []>} : vector<8x32xbf16>, vector<32x128xbf16>, vector<8x128xf32> -> vector<8x128xf32>
    %75 = arith.addf %71, %74 : vector<8x128xf32>
    %76 = arith.negf %75 : vector<8x128xf32>
    %77 = math.exp %76 : vector<8x128xf32>
    %cst_48 = arith.constant 1.000000e+00 : f32
    %78 = vector.broadcast %cst_48 : f32 to vector<8x128xf32>
    %79 = arith.addf %78, %77 : vector<8x128xf32>
    %80 = arith.divf %78, %79 : vector<8x128xf32>
    %81 = vector.extract_strided_slice %80 {offsets = [0, 0], sizes = [8, 32], strides = [1, 1]} : vector<8x128xf32> to vector<8x32xf32>
    %82 = vector.extract_strided_slice %80 {offsets = [0, 32], sizes = [8, 32], strides = [1, 1]} : vector<8x128xf32> to vector<8x32xf32>
    %83 = vector.extract_strided_slice %80 {offsets = [0, 64], sizes = [8, 32], strides = [1, 1]} : vector<8x128xf32> to vector<8x32xf32>
    %cst_49 = arith.constant 2.000000e+00 : f32
    %84 = vector.broadcast %cst_49 : f32 to vector<8x32xf32>
    %85 = arith.mulf %84, %83 : vector<8x32xf32>
    %cst_50 = arith.constant 1.000000e+00 : f32
    %86 = vector.broadcast %cst_50 : f32 to vector<8x32xf32>
    %87 = arith.subf %85, %86 : vector<8x32xf32>
    %88 = vector.extract_strided_slice %80 {offsets = [0, 96], sizes = [8, 32], strides = [1, 1]} : vector<8x128xf32> to vector<8x32xf32>
    %c0_51 = arith.constant 0 : index
    %c0_52 = arith.constant 0 : index
    %89 = vector.load %arg13[%c0_51, %c0_52] : memref<8x32xf32, #tpu.memory_space<vmem>>, vector<8x32xf32>
    %90 = arith.mulf %82, %89 : vector<8x32xf32>
    %91 = arith.mulf %81, %87 : vector<8x32xf32>
    %92 = arith.addf %90, %91 : vector<8x32xf32>
    %93 = math.tanh %92 : vector<8x32xf32>
    %94 = arith.mulf %88, %93 : vector<8x32xf32>
    %95 = arith.index_cast %67 : i32 to index
    %c0_53 = arith.constant 0 : index
    %c0_54 = arith.constant 0 : index
    %96 = vector.load %arg6[%95, %c0_53, %c0_54] : memref<9x8x1xf32, #tpu.memory_space<vmem>>, vector<1x8x1xf32>
    %97 = vector.shape_cast %96 : vector<1x8x1xf32> to vector<8x1xf32>
    %98 = vector.broadcast %97 : vector<8x1xf32> to vector<8x32xf32>
    %99 = arith.mulf %98, %94 : vector<8x32xf32>
    %100 = arith.index_cast %69 : i32 to index
    %c0_55 = arith.constant 0 : index
    %101 = vector.load %arg11[%100, %c0_55] : memref<72x32xf32, #tpu.memory_space<vmem>>, vector<8x32xf32>
    tpu.vector_store %arg11[%100, %c0_55], %99 {strides = array<i32>} : memref<72x32xf32, #tpu.memory_space<vmem>>, vector<8x32xf32>,
    %102 = vector.broadcast %97 : vector<8x1xf32> to vector<8x32xf32>
    %103 = arith.mulf %102, %94 : vector<8x32xf32>
    %cst_56 = arith.constant 1.000000e+00 : f32
    %104 = vector.broadcast %cst_56 : f32 to vector<8x1xf32>
    %105 = arith.subf %104, %97 : vector<8x1xf32>
    %c0_57 = arith.constant 0 : index
    %c0_58 = arith.constant 0 : index
    %106 = vector.load %arg12[%c0_57, %c0_58] : memref<8x32xf32, #tpu.memory_space<vmem>>, vector<8x32xf32>
    %107 = vector.broadcast %105 : vector<8x1xf32> to vector<8x32xf32>
    %108 = arith.mulf %107, %106 : vector<8x32xf32>
    %109 = arith.addf %103, %108 : vector<8x32xf32>
    %c0_59 = arith.constant 0 : index
    %c0_60 = arith.constant 0 : index
    %110 = vector.load %arg12[%c0_59, %c0_60] : memref<8x32xf32, #tpu.memory_space<vmem>>, vector<8x32xf32>
    tpu.vector_store %arg12[%c0_59, %c0_60], %109 {strides = array<i32>} : memref<8x32xf32, #tpu.memory_space<vmem>>, vector<8x32xf32>,
    %111 = vector.broadcast %97 : vector<8x1xf32> to vector<8x32xf32>
    %112 = arith.mulf %111, %92 : vector<8x32xf32>
    %cst_61 = arith.constant 1.000000e+00 : f32
    %113 = vector.broadcast %cst_61 : f32 to vector<8x1xf32>
    %114 = arith.subf %113, %97 : vector<8x1xf32>
    %c0_62 = arith.constant 0 : index
    %c0_63 = arith.constant 0 : index
    %115 = vector.load %arg13[%c0_62, %c0_63] : memref<8x32xf32, #tpu.memory_space<vmem>>, vector<8x32xf32>
    %116 = vector.broadcast %114 : vector<8x1xf32> to vector<8x32xf32>
    %117 = arith.mulf %116, %115 : vector<8x32xf32>
    %118 = arith.addf %112, %117 : vector<8x32xf32>
    %c0_64 = arith.constant 0 : index
    %c0_65 = arith.constant 0 : index
    %119 = vector.load %arg13[%c0_64, %c0_65] : memref<8x32xf32, #tpu.memory_space<vmem>>, vector<8x32xf32>
    tpu.vector_store %arg13[%c0_64, %c0_65], %118 {strides = array<i32>} : memref<8x32xf32, #tpu.memory_space<vmem>>, vector<8x32xf32>,
    %c2_i32 = arith.constant 2 : i32
    %c1_i32_66 = arith.constant 1 : i32
    %120 = arith.muli %c2_i32, %c1_i32_66 : i32
    %c0_i32_67 = arith.constant 0 : i32
    %121 = arith.addi %c0_i32_67, %120 : i32
    %c8_i32_68 = arith.constant 8 : i32
    %122 = arith.muli %121, %c8_i32_68 : i32
    %123 = tpu.assume_multiple %122, 8 : i32
    %124 = arith.index_cast %123 : i32 to index
    %c0_69 = arith.constant 0 : index
    %125 = vector.load %arg10[%124, %c0_69] : memref<72x128xf32, #tpu.memory_space<vmem>>, vector<8x128xf32>
    %c0_70 = arith.constant 0 : index
    %c0_71 = arith.constant 0 : index
    %126 = vector.load %arg12[%c0_70, %c0_71] : memref<8x32xf32, #tpu.memory_space<vmem>>, vector<8x32xf32>
    %127 = arith.truncf %126 : vector<8x32xf32> to vector<8x32xbf16>
    %cst_72 = arith.constant dense<0.000000e+00> : vector<8x128xf32>
    %128 = tpu.matmul %127, %11, %cst_72 {dimension_numbers = #tpu.dot_dimension_numbers<[1], [0], [0], [1], [0, 0, 1, 1], [], []>} : vector<8x32xbf16>, vector<32x128xbf16>, vector<8x128xf32> -> vector<8x128xf32>
    %129 = arith.addf %125, %128 : vector<8x128xf32>
    %130 = arith.negf %129 : vector<8x128xf32>
    %131 = math.exp %130 : vector<8x128xf32>
    %cst_73 = arith.constant 1.000000e+00 : f32
    %132 = vector.broadcast %cst_73 : f32 to vector<8x128xf32>
    %133 = arith.addf %132, %131 : vector<8x128xf32>
    %134 = arith.divf %132, %133 : vector<8x128xf32>
    %135 = vector.extract_strided_slice %134 {offsets = [0, 0], sizes = [8, 32], strides = [1, 1]} : vector<8x128xf32> to vector<8x32xf32>
    %136 = vector.extract_strided_slice %134 {offsets = [0, 32], sizes = [8, 32], strides = [1, 1]} : vector<8x128xf32> to vector<8x32xf32>
    %137 = vector.extract_strided_slice %134 {offsets = [0, 64], sizes = [8, 32], strides = [1, 1]} : vector<8x128xf32> to vector<8x32xf32>
    %cst_74 = arith.constant 2.000000e+00 : f32
    %138 = vector.broadcast %cst_74 : f32 to vector<8x32xf32>
    %139 = arith.mulf %138, %137 : vector<8x32xf32>
    %cst_75 = arith.constant 1.000000e+00 : f32
    %140 = vector.broadcast %cst_75 : f32 to vector<8x32xf32>
    %141 = arith.subf %139, %140 : vector<8x32xf32>
    %142 = vector.extract_strided_slice %134 {offsets = [0, 96], sizes = [8, 32], strides = [1, 1]} : vector<8x128xf32> to vector<8x32xf32>
    %c0_76 = arith.constant 0 : index
    %c0_77 = arith.constant 0 : index
    %143 = vector.load %arg13[%c0_76, %c0_77] : memref<8x32xf32, #tpu.memory_space<vmem>>, vector<8x32xf32>
    %144 = arith.mulf %136, %143 : vector<8x32xf32>
    %145 = arith.mulf %135, %141 : vector<8x32xf32>
    %146 = arith.addf %144, %145 : vector<8x32xf32>
    %147 = math.tanh %146 : vector<8x32xf32>
    %148 = arith.mulf %142, %147 : vector<8x32xf32>
    %149 = arith.index_cast %121 : i32 to index
    %c0_78 = arith.constant 0 : index
    %c0_79 = arith.constant 0 : index
    %150 = vector.load %arg6[%149, %c0_78, %c0_79] : memref<9x8x1xf32, #tpu.memory_space<vmem>>, vector<1x8x1xf32>
    %151 = vector.shape_cast %150 : vector<1x8x1xf32> to vector<8x1xf32>
    %152 = vector.broadcast %151 : vector<8x1xf32> to vector<8x32xf32>
    %153 = arith.mulf %152, %148 : vector<8x32xf32>
    %154 = arith.index_cast %123 : i32 to index
    %c0_80 = arith.constant 0 : index
    %155 = vector.load %arg11[%154, %c0_80] : memref<72x32xf32, #tpu.memory_space<vmem>>, vector<8x32xf32>
    tpu.vector_store %arg11[%154, %c0_80], %153 {strides = array<i32>} : memref<72x32xf32, #tpu.memory_space<vmem>>, vector<8x32xf32>,
    %156 = vector.broadcast %151 : vector<8x1xf32> to vector<8x32xf32>
    %157 = arith.mulf %156, %148 : vector<8x32xf32>
    %cst_81 = arith.constant 1.000000e+00 : f32
    %158 = vector.broadcast %cst_81 : f32 to vector<8x1xf32>
    %159 = arith.subf %158, %151 : vector<8x1xf32>
    %c0_82 = arith.constant 0 : index
    %c0_83 = arith.constant 0 : index
    %160 = vector.load %arg12[%c0_82, %c0_83] : memref<8x32xf32, #tpu.memory_space<vmem>>, vector<8x32xf32>
    %161 = vector.broadcast %159 : vector<8x1xf32> to vector<8x32xf32>
    %162 = arith.mulf %161, %160 : vector<8x32xf32>
    %163 = arith.addf %157, %162 : vector<8x32xf32>
    %c0_84 = arith.constant 0 : index
    %c0_85 = arith.constant 0 : index
    %164 = vector.load %arg12[%c0_84, %c0_85] : memref<8x32xf32, #tpu.memory_space<vmem>>, vector<8x32xf32>
    tpu.vector_store %arg12[%c0_84, %c0_85], %163 {strides = array<i32>} : memref<8x32xf32, #tpu.memory_space<vmem>>, vector<8x32xf32>,
    %165 = vector.broadcast %151 : vector<8x1xf32> to vector<8x32xf32>
    %166 = arith.mulf %165, %146 : vector<8x32xf32>
    %cst_86 = arith.constant 1.000000e+00 : f32
    %167 = vector.broadcast %cst_86 : f32 to vector<8x1xf32>
    %168 = arith.subf %167, %151 : vector<8x1xf32>
    %c0_87 = arith.constant 0 : index
    %c0_88 = arith.constant 0 : index
    %169 = vector.load %arg13[%c0_87, %c0_88] : memref<8x32xf32, #tpu.memory_space<vmem>>, vector<8x32xf32>
    %170 = vector.broadcast %168 : vector<8x1xf32> to vector<8x32xf32>
    %171 = arith.mulf %170, %169 : vector<8x32xf32>
    %172 = arith.addf %166, %171 : vector<8x32xf32>
    %c0_89 = arith.constant 0 : index
    %c0_90 = arith.constant 0 : index
    %173 = vector.load %arg13[%c0_89, %c0_90] : memref<8x32xf32, #tpu.memory_space<vmem>>, vector<8x32xf32>
    tpu.vector_store %arg13[%c0_89, %c0_90], %172 {strides = array<i32>} : memref<8x32xf32, #tpu.memory_space<vmem>>, vector<8x32xf32>,
    %c3_i32 = arith.constant 3 : i32
    %c1_i32_91 = arith.constant 1 : i32
    %174 = arith.muli %c3_i32, %c1_i32_91 : i32
    %c0_i32_92 = arith.constant 0 : i32
    %175 = arith.addi %c0_i32_92, %174 : i32
    %c8_i32_93 = arith.constant 8 : i32
    %176 = arith.muli %175, %c8_i32_93 : i32
    %177 = tpu.assume_multiple %176, 8 : i32
    %178 = arith.index_cast %177 : i32 to index
    %c0_94 = arith.constant 0 : index
    %179 = vector.load %arg10[%178, %c0_94] : memref<72x128xf32, #tpu.memory_space<vmem>>, vector<8x128xf32>
    %c0_95 = arith.constant 0 : index
    %c0_96 = arith.constant 0 : index
    %180 = vector.load %arg12[%c0_95, %c0_96] : memref<8x32xf32, #tpu.memory_space<vmem>>, vector<8x32xf32>
    %181 = arith.truncf %180 : vector<8x32xf32> to vector<8x32xbf16>
    %cst_97 = arith.constant dense<0.000000e+00> : vector<8x128xf32>
    %182 = tpu.matmul %181, %11, %cst_97 {dimension_numbers = #tpu.dot_dimension_numbers<[1], [0], [0], [1], [0, 0, 1, 1], [], []>} : vector<8x32xbf16>, vector<32x128xbf16>, vector<8x128xf32> -> vector<8x128xf32>
    %183 = arith.addf %179, %182 : vector<8x128xf32>
    %184 = arith.negf %183 : vector<8x128xf32>
    %185 = math.exp %184 : vector<8x128xf32>
    %cst_98 = arith.constant 1.000000e+00 : f32
    %186 = vector.broadcast %cst_98 : f32 to vector<8x128xf32>
    %187 = arith.addf %186, %185 : vector<8x128xf32>
    %188 = arith.divf %186, %187 : vector<8x128xf32>
    %189 = vector.extract_strided_slice %188 {offsets = [0, 0], sizes = [8, 32], strides = [1, 1]} : vector<8x128xf32> to vector<8x32xf32>
    %190 = vector.extract_strided_slice %188 {offsets = [0, 32], sizes = [8, 32], strides = [1, 1]} : vector<8x128xf32> to vector<8x32xf32>
    %191 = vector.extract_strided_slice %188 {offsets = [0, 64], sizes = [8, 32], strides = [1, 1]} : vector<8x128xf32> to vector<8x32xf32>
    %cst_99 = arith.constant 2.000000e+00 : f32
    %192 = vector.broadcast %cst_99 : f32 to vector<8x32xf32>
    %193 = arith.mulf %192, %191 : vector<8x32xf32>
    %cst_100 = arith.constant 1.000000e+00 : f32
    %194 = vector.broadcast %cst_100 : f32 to vector<8x32xf32>
    %195 = arith.subf %193, %194 : vector<8x32xf32>
    %196 = vector.extract_strided_slice %188 {offsets = [0, 96], sizes = [8, 32], strides = [1, 1]} : vector<8x128xf32> to vector<8x32xf32>
    %c0_101 = arith.constant 0 : index
    %c0_102 = arith.constant 0 : index
    %197 = vector.load %arg13[%c0_101, %c0_102] : memref<8x32xf32, #tpu.memory_space<vmem>>, vector<8x32xf32>
    %198 = arith.mulf %190, %197 : vector<8x32xf32>
    %199 = arith.mulf %189, %195 : vector<8x32xf32>
    %200 = arith.addf %198, %199 : vector<8x32xf32>
    %201 = math.tanh %200 : vector<8x32xf32>
    %202 = arith.mulf %196, %201 : vector<8x32xf32>
    %203 = arith.index_cast %175 : i32 to index
    %c0_103 = arith.constant 0 : index
    %c0_104 = arith.constant 0 : index
    %204 = vector.load %arg6[%203, %c0_103, %c0_104] : memref<9x8x1xf32, #tpu.memory_space<vmem>>, vector<1x8x1xf32>
    %205 = vector.shape_cast %204 : vector<1x8x1xf32> to vector<8x1xf32>
    %206 = vector.broadcast %205 : vector<8x1xf32> to vector<8x32xf32>
    %207 = arith.mulf %206, %202 : vector<8x32xf32>
    %208 = arith.index_cast %177 : i32 to index
    %c0_105 = arith.constant 0 : index
    %209 = vector.load %arg11[%208, %c0_105] : memref<72x32xf32, #tpu.memory_space<vmem>>, vector<8x32xf32>
    tpu.vector_store %arg11[%208, %c0_105], %207 {strides = array<i32>} : memref<72x32xf32, #tpu.memory_space<vmem>>, vector<8x32xf32>,
    %210 = vector.broadcast %205 : vector<8x1xf32> to vector<8x32xf32>
    %211 = arith.mulf %210, %202 : vector<8x32xf32>
    %cst_106 = arith.constant 1.000000e+00 : f32
    %212 = vector.broadcast %cst_106 : f32 to vector<8x1xf32>
    %213 = arith.subf %212, %205 : vector<8x1xf32>
    %c0_107 = arith.constant 0 : index
    %c0_108 = arith.constant 0 : index
    %214 = vector.load %arg12[%c0_107, %c0_108] : memref<8x32xf32, #tpu.memory_space<vmem>>, vector<8x32xf32>
    %215 = vector.broadcast %213 : vector<8x1xf32> to vector<8x32xf32>
    %216 = arith.mulf %215, %214 : vector<8x32xf32>
    %217 = arith.addf %211, %216 : vector<8x32xf32>
    %c0_109 = arith.constant 0 : index
    %c0_110 = arith.constant 0 : index
    %218 = vector.load %arg12[%c0_109, %c0_110] : memref<8x32xf32, #tpu.memory_space<vmem>>, vector<8x32xf32>
    tpu.vector_store %arg12[%c0_109, %c0_110], %217 {strides = array<i32>} : memref<8x32xf32, #tpu.memory_space<vmem>>, vector<8x32xf32>,
    %219 = vector.broadcast %205 : vector<8x1xf32> to vector<8x32xf32>
    %220 = arith.mulf %219, %200 : vector<8x32xf32>
    %cst_111 = arith.constant 1.000000e+00 : f32
    %221 = vector.broadcast %cst_111 : f32 to vector<8x1xf32>
    %222 = arith.subf %221, %205 : vector<8x1xf32>
    %c0_112 = arith.constant 0 : index
    %c0_113 = arith.constant 0 : index
    %223 = vector.load %arg13[%c0_112, %c0_113] : memref<8x32xf32, #tpu.memory_space<vmem>>, vector<8x32xf32>
    %224 = vector.broadcast %222 : vector<8x1xf32> to vector<8x32xf32>
    %225 = arith.mulf %224, %223 : vector<8x32xf32>
    %226 = arith.addf %220, %225 : vector<8x32xf32>
    %c0_114 = arith.constant 0 : index
    %c0_115 = arith.constant 0 : index
    %227 = vector.load %arg13[%c0_114, %c0_115] : memref<8x32xf32, #tpu.memory_space<vmem>>, vector<8x32xf32>
    tpu.vector_store %arg13[%c0_114, %c0_115], %226 {strides = array<i32>} : memref<8x32xf32, #tpu.memory_space<vmem>>, vector<8x32xf32>,
    %c4_i32 = arith.constant 4 : i32
    %c1_i32_116 = arith.constant 1 : i32
    %228 = arith.muli %c4_i32, %c1_i32_116 : i32
    %c0_i32_117 = arith.constant 0 : i32
    %229 = arith.addi %c0_i32_117, %228 : i32
    %c8_i32_118 = arith.constant 8 : i32
    %230 = arith.muli %229, %c8_i32_118 : i32
    %231 = tpu.assume_multiple %230, 8 : i32
    %232 = arith.index_cast %231 : i32 to index
    %c0_119 = arith.constant 0 : index
    %233 = vector.load %arg10[%232, %c0_119] : memref<72x128xf32, #tpu.memory_space<vmem>>, vector<8x128xf32>
    %c0_120 = arith.constant 0 : index
    %c0_121 = arith.constant 0 : index
    %234 = vector.load %arg12[%c0_120, %c0_121] : memref<8x32xf32, #tpu.memory_space<vmem>>, vector<8x32xf32>
    %235 = arith.truncf %234 : vector<8x32xf32> to vector<8x32xbf16>
    %cst_122 = arith.constant dense<0.000000e+00> : vector<8x128xf32>
    %236 = tpu.matmul %235, %11, %cst_122 {dimension_numbers = #tpu.dot_dimension_numbers<[1], [0], [0], [1], [0, 0, 1, 1], [], []>} : vector<8x32xbf16>, vector<32x128xbf16>, vector<8x128xf32> -> vector<8x128xf32>
    %237 = arith.addf %233, %236 : vector<8x128xf32>
    %238 = arith.negf %237 : vector<8x128xf32>
    %239 = math.exp %238 : vector<8x128xf32>
    %cst_123 = arith.constant 1.000000e+00 : f32
    %240 = vector.broadcast %cst_123 : f32 to vector<8x128xf32>
    %241 = arith.addf %240, %239 : vector<8x128xf32>
    %242 = arith.divf %240, %241 : vector<8x128xf32>
    %243 = vector.extract_strided_slice %242 {offsets = [0, 0], sizes = [8, 32], strides = [1, 1]} : vector<8x128xf32> to vector<8x32xf32>
    %244 = vector.extract_strided_slice %242 {offsets = [0, 32], sizes = [8, 32], strides = [1, 1]} : vector<8x128xf32> to vector<8x32xf32>
    %245 = vector.extract_strided_slice %242 {offsets = [0, 64], sizes = [8, 32], strides = [1, 1]} : vector<8x128xf32> to vector<8x32xf32>
    %cst_124 = arith.constant 2.000000e+00 : f32
    %246 = vector.broadcast %cst_124 : f32 to vector<8x32xf32>
    %247 = arith.mulf %246, %245 : vector<8x32xf32>
    %cst_125 = arith.constant 1.000000e+00 : f32
    %248 = vector.broadcast %cst_125 : f32 to vector<8x32xf32>
    %249 = arith.subf %247, %248 : vector<8x32xf32>
    %250 = vector.extract_strided_slice %242 {offsets = [0, 96], sizes = [8, 32], strides = [1, 1]} : vector<8x128xf32> to vector<8x32xf32>
    %c0_126 = arith.constant 0 : index
    %c0_127 = arith.constant 0 : index
    %251 = vector.load %arg13[%c0_126, %c0_127] : memref<8x32xf32, #tpu.memory_space<vmem>>, vector<8x32xf32>
    %252 = arith.mulf %244, %251 : vector<8x32xf32>
    %253 = arith.mulf %243, %249 : vector<8x32xf32>
    %254 = arith.addf %252, %253 : vector<8x32xf32>
    %255 = math.tanh %254 : vector<8x32xf32>
    %256 = arith.mulf %250, %255 : vector<8x32xf32>
    %257 = arith.index_cast %229 : i32 to index
    %c0_128 = arith.constant 0 : index
    %c0_129 = arith.constant 0 : index
    %258 = vector.load %arg6[%257, %c0_128, %c0_129] : memref<9x8x1xf32, #tpu.memory_space<vmem>>, vector<1x8x1xf32>
    %259 = vector.shape_cast %258 : vector<1x8x1xf32> to vector<8x1xf32>
    %260 = vector.broadcast %259 : vector<8x1xf32> to vector<8x32xf32>
    %261 = arith.mulf %260, %256 : vector<8x32xf32>
    %262 = arith.index_cast %231 : i32 to index
    %c0_130 = arith.constant 0 : index
    %263 = vector.load %arg11[%262, %c0_130] : memref<72x32xf32, #tpu.memory_space<vmem>>, vector<8x32xf32>
    tpu.vector_store %arg11[%262, %c0_130], %261 {strides = array<i32>} : memref<72x32xf32, #tpu.memory_space<vmem>>, vector<8x32xf32>,
    %264 = vector.broadcast %259 : vector<8x1xf32> to vector<8x32xf32>
    %265 = arith.mulf %264, %256 : vector<8x32xf32>
    %cst_131 = arith.constant 1.000000e+00 : f32
    %266 = vector.broadcast %cst_131 : f32 to vector<8x1xf32>
    %267 = arith.subf %266, %259 : vector<8x1xf32>
    %c0_132 = arith.constant 0 : index
    %c0_133 = arith.constant 0 : index
    %268 = vector.load %arg12[%c0_132, %c0_133] : memref<8x32xf32, #tpu.memory_space<vmem>>, vector<8x32xf32>
    %269 = vector.broadcast %267 : vector<8x1xf32> to vector<8x32xf32>
    %270 = arith.mulf %269, %268 : vector<8x32xf32>
    %271 = arith.addf %265, %270 : vector<8x32xf32>
    %c0_134 = arith.constant 0 : index
    %c0_135 = arith.constant 0 : index
    %272 = vector.load %arg12[%c0_134, %c0_135] : memref<8x32xf32, #tpu.memory_space<vmem>>, vector<8x32xf32>
    tpu.vector_store %arg12[%c0_134, %c0_135], %271 {strides = array<i32>} : memref<8x32xf32, #tpu.memory_space<vmem>>, vector<8x32xf32>,
    %273 = vector.broadcast %259 : vector<8x1xf32> to vector<8x32xf32>
    %274 = arith.mulf %273, %254 : vector<8x32xf32>
    %cst_136 = arith.constant 1.000000e+00 : f32
    %275 = vector.broadcast %cst_136 : f32 to vector<8x1xf32>
    %276 = arith.subf %275, %259 : vector<8x1xf32>
    %c0_137 = arith.constant 0 : index
    %c0_138 = arith.constant 0 : index
    %277 = vector.load %arg13[%c0_137, %c0_138] : memref<8x32xf32, #tpu.memory_space<vmem>>, vector<8x32xf32>
    %278 = vector.broadcast %276 : vector<8x1xf32> to vector<8x32xf32>
    %279 = arith.mulf %278, %277 : vector<8x32xf32>
    %280 = arith.addf %274, %279 : vector<8x32xf32>
    %c0_139 = arith.constant 0 : index
    %c0_140 = arith.constant 0 : index
    %281 = vector.load %arg13[%c0_139, %c0_140] : memref<8x32xf32, #tpu.memory_space<vmem>>, vector<8x32xf32>
    tpu.vector_store %arg13[%c0_139, %c0_140], %280 {strides = array<i32>} : memref<8x32xf32, #tpu.memory_space<vmem>>, vector<8x32xf32>,
    %c5_i32 = arith.constant 5 : i32
    %c1_i32_141 = arith.constant 1 : i32
    %282 = arith.muli %c5_i32, %c1_i32_141 : i32
    %c0_i32_142 = arith.constant 0 : i32
    %283 = arith.addi %c0_i32_142, %282 : i32
    %c8_i32_143 = arith.constant 8 : i32
    %284 = arith.muli %283, %c8_i32_143 : i32
    %285 = tpu.assume_multiple %284, 8 : i32
    %286 = arith.index_cast %285 : i32 to index
    %c0_144 = arith.constant 0 : index
    %287 = vector.load %arg10[%286, %c0_144] : memref<72x128xf32, #tpu.memory_space<vmem>>, vector<8x128xf32>
    %c0_145 = arith.constant 0 : index
    %c0_146 = arith.constant 0 : index
    %288 = vector.load %arg12[%c0_145, %c0_146] : memref<8x32xf32, #tpu.memory_space<vmem>>, vector<8x32xf32>
    %289 = arith.truncf %288 : vector<8x32xf32> to vector<8x32xbf16>
    %cst_147 = arith.constant dense<0.000000e+00> : vector<8x128xf32>
    %290 = tpu.matmul %289, %11, %cst_147 {dimension_numbers = #tpu.dot_dimension_numbers<[1], [0], [0], [1], [0, 0, 1, 1], [], []>} : vector<8x32xbf16>, vector<32x128xbf16>, vector<8x128xf32> -> vector<8x128xf32>
    %291 = arith.addf %287, %290 : vector<8x128xf32>
    %292 = arith.negf %291 : vector<8x128xf32>
    %293 = math.exp %292 : vector<8x128xf32>
    %cst_148 = arith.constant 1.000000e+00 : f32
    %294 = vector.broadcast %cst_148 : f32 to vector<8x128xf32>
    %295 = arith.addf %294, %293 : vector<8x128xf32>
    %296 = arith.divf %294, %295 : vector<8x128xf32>
    %297 = vector.extract_strided_slice %296 {offsets = [0, 0], sizes = [8, 32], strides = [1, 1]} : vector<8x128xf32> to vector<8x32xf32>
    %298 = vector.extract_strided_slice %296 {offsets = [0, 32], sizes = [8, 32], strides = [1, 1]} : vector<8x128xf32> to vector<8x32xf32>
    %299 = vector.extract_strided_slice %296 {offsets = [0, 64], sizes = [8, 32], strides = [1, 1]} : vector<8x128xf32> to vector<8x32xf32>
    %cst_149 = arith.constant 2.000000e+00 : f32
    %300 = vector.broadcast %cst_149 : f32 to vector<8x32xf32>
    %301 = arith.mulf %300, %299 : vector<8x32xf32>
    %cst_150 = arith.constant 1.000000e+00 : f32
    %302 = vector.broadcast %cst_150 : f32 to vector<8x32xf32>
    %303 = arith.subf %301, %302 : vector<8x32xf32>
    %304 = vector.extract_strided_slice %296 {offsets = [0, 96], sizes = [8, 32], strides = [1, 1]} : vector<8x128xf32> to vector<8x32xf32>
    %c0_151 = arith.constant 0 : index
    %c0_152 = arith.constant 0 : index
    %305 = vector.load %arg13[%c0_151, %c0_152] : memref<8x32xf32, #tpu.memory_space<vmem>>, vector<8x32xf32>
    %306 = arith.mulf %298, %305 : vector<8x32xf32>
    %307 = arith.mulf %297, %303 : vector<8x32xf32>
    %308 = arith.addf %306, %307 : vector<8x32xf32>
    %309 = math.tanh %308 : vector<8x32xf32>
    %310 = arith.mulf %304, %309 : vector<8x32xf32>
    %311 = arith.index_cast %283 : i32 to index
    %c0_153 = arith.constant 0 : index
    %c0_154 = arith.constant 0 : index
    %312 = vector.load %arg6[%311, %c0_153, %c0_154] : memref<9x8x1xf32, #tpu.memory_space<vmem>>, vector<1x8x1xf32>
    %313 = vector.shape_cast %312 : vector<1x8x1xf32> to vector<8x1xf32>
    %314 = vector.broadcast %313 : vector<8x1xf32> to vector<8x32xf32>
    %315 = arith.mulf %314, %310 : vector<8x32xf32>
    %316 = arith.index_cast %285 : i32 to index
    %c0_155 = arith.constant 0 : index
    %317 = vector.load %arg11[%316, %c0_155] : memref<72x32xf32, #tpu.memory_space<vmem>>, vector<8x32xf32>
    tpu.vector_store %arg11[%316, %c0_155], %315 {strides = array<i32>} : memref<72x32xf32, #tpu.memory_space<vmem>>, vector<8x32xf32>,
    %318 = vector.broadcast %313 : vector<8x1xf32> to vector<8x32xf32>
    %319 = arith.mulf %318, %310 : vector<8x32xf32>
    %cst_156 = arith.constant 1.000000e+00 : f32
    %320 = vector.broadcast %cst_156 : f32 to vector<8x1xf32>
    %321 = arith.subf %320, %313 : vector<8x1xf32>
    %c0_157 = arith.constant 0 : index
    %c0_158 = arith.constant 0 : index
    %322 = vector.load %arg12[%c0_157, %c0_158] : memref<8x32xf32, #tpu.memory_space<vmem>>, vector<8x32xf32>
    %323 = vector.broadcast %321 : vector<8x1xf32> to vector<8x32xf32>
    %324 = arith.mulf %323, %322 : vector<8x32xf32>
    %325 = arith.addf %319, %324 : vector<8x32xf32>
    %c0_159 = arith.constant 0 : index
    %c0_160 = arith.constant 0 : index
    %326 = vector.load %arg12[%c0_159, %c0_160] : memref<8x32xf32, #tpu.memory_space<vmem>>, vector<8x32xf32>
    tpu.vector_store %arg12[%c0_159, %c0_160], %325 {strides = array<i32>} : memref<8x32xf32, #tpu.memory_space<vmem>>, vector<8x32xf32>,
    %327 = vector.broadcast %313 : vector<8x1xf32> to vector<8x32xf32>
    %328 = arith.mulf %327, %308 : vector<8x32xf32>
    %cst_161 = arith.constant 1.000000e+00 : f32
    %329 = vector.broadcast %cst_161 : f32 to vector<8x1xf32>
    %330 = arith.subf %329, %313 : vector<8x1xf32>
    %c0_162 = arith.constant 0 : index
    %c0_163 = arith.constant 0 : index
    %331 = vector.load %arg13[%c0_162, %c0_163] : memref<8x32xf32, #tpu.memory_space<vmem>>, vector<8x32xf32>
    %332 = vector.broadcast %330 : vector<8x1xf32> to vector<8x32xf32>
    %333 = arith.mulf %332, %331 : vector<8x32xf32>
    %334 = arith.addf %328, %333 : vector<8x32xf32>
    %c0_164 = arith.constant 0 : index
    %c0_165 = arith.constant 0 : index
    %335 = vector.load %arg13[%c0_164, %c0_165] : memref<8x32xf32, #tpu.memory_space<vmem>>, vector<8x32xf32>
    tpu.vector_store %arg13[%c0_164, %c0_165], %334 {strides = array<i32>} : memref<8x32xf32, #tpu.memory_space<vmem>>, vector<8x32xf32>,
    %c6_i32 = arith.constant 6 : i32
    %c1_i32_166 = arith.constant 1 : i32
    %336 = arith.muli %c6_i32, %c1_i32_166 : i32
    %c0_i32_167 = arith.constant 0 : i32
    %337 = arith.addi %c0_i32_167, %336 : i32
    %c8_i32_168 = arith.constant 8 : i32
    %338 = arith.muli %337, %c8_i32_168 : i32
    %339 = tpu.assume_multiple %338, 8 : i32
    %340 = arith.index_cast %339 : i32 to index
    %c0_169 = arith.constant 0 : index
    %341 = vector.load %arg10[%340, %c0_169] : memref<72x128xf32, #tpu.memory_space<vmem>>, vector<8x128xf32>
    %c0_170 = arith.constant 0 : index
    %c0_171 = arith.constant 0 : index
    %342 = vector.load %arg12[%c0_170, %c0_171] : memref<8x32xf32, #tpu.memory_space<vmem>>, vector<8x32xf32>
    %343 = arith.truncf %342 : vector<8x32xf32> to vector<8x32xbf16>
    %cst_172 = arith.constant dense<0.000000e+00> : vector<8x128xf32>
    %344 = tpu.matmul %343, %11, %cst_172 {dimension_numbers = #tpu.dot_dimension_numbers<[1], [0], [0], [1], [0, 0, 1, 1], [], []>} : vector<8x32xbf16>, vector<32x128xbf16>, vector<8x128xf32> -> vector<8x128xf32>
    %345 = arith.addf %341, %344 : vector<8x128xf32>
    %346 = arith.negf %345 : vector<8x128xf32>
    %347 = math.exp %346 : vector<8x128xf32>
    %cst_173 = arith.constant 1.000000e+00 : f32
    %348 = vector.broadcast %cst_173 : f32 to vector<8x128xf32>
    %349 = arith.addf %348, %347 : vector<8x128xf32>
    %350 = arith.divf %348, %349 : vector<8x128xf32>
    %351 = vector.extract_strided_slice %350 {offsets = [0, 0], sizes = [8, 32], strides = [1, 1]} : vector<8x128xf32> to vector<8x32xf32>
    %352 = vector.extract_strided_slice %350 {offsets = [0, 32], sizes = [8, 32], strides = [1, 1]} : vector<8x128xf32> to vector<8x32xf32>
    %353 = vector.extract_strided_slice %350 {offsets = [0, 64], sizes = [8, 32], strides = [1, 1]} : vector<8x128xf32> to vector<8x32xf32>
    %cst_174 = arith.constant 2.000000e+00 : f32
    %354 = vector.broadcast %cst_174 : f32 to vector<8x32xf32>
    %355 = arith.mulf %354, %353 : vector<8x32xf32>
    %cst_175 = arith.constant 1.000000e+00 : f32
    %356 = vector.broadcast %cst_175 : f32 to vector<8x32xf32>
    %357 = arith.subf %355, %356 : vector<8x32xf32>
    %358 = vector.extract_strided_slice %350 {offsets = [0, 96], sizes = [8, 32], strides = [1, 1]} : vector<8x128xf32> to vector<8x32xf32>
    %c0_176 = arith.constant 0 : index
    %c0_177 = arith.constant 0 : index
    %359 = vector.load %arg13[%c0_176, %c0_177] : memref<8x32xf32, #tpu.memory_space<vmem>>, vector<8x32xf32>
    %360 = arith.mulf %352, %359 : vector<8x32xf32>
    %361 = arith.mulf %351, %357 : vector<8x32xf32>
    %362 = arith.addf %360, %361 : vector<8x32xf32>
    %363 = math.tanh %362 : vector<8x32xf32>
    %364 = arith.mulf %358, %363 : vector<8x32xf32>
    %365 = arith.index_cast %337 : i32 to index
    %c0_178 = arith.constant 0 : index
    %c0_179 = arith.constant 0 : index
    %366 = vector.load %arg6[%365, %c0_178, %c0_179] : memref<9x8x1xf32, #tpu.memory_space<vmem>>, vector<1x8x1xf32>
    %367 = vector.shape_cast %366 : vector<1x8x1xf32> to vector<8x1xf32>
    %368 = vector.broadcast %367 : vector<8x1xf32> to vector<8x32xf32>
    %369 = arith.mulf %368, %364 : vector<8x32xf32>
    %370 = arith.index_cast %339 : i32 to index
    %c0_180 = arith.constant 0 : index
    %371 = vector.load %arg11[%370, %c0_180] : memref<72x32xf32, #tpu.memory_space<vmem>>, vector<8x32xf32>
    tpu.vector_store %arg11[%370, %c0_180], %369 {strides = array<i32>} : memref<72x32xf32, #tpu.memory_space<vmem>>, vector<8x32xf32>,
    %372 = vector.broadcast %367 : vector<8x1xf32> to vector<8x32xf32>
    %373 = arith.mulf %372, %364 : vector<8x32xf32>
    %cst_181 = arith.constant 1.000000e+00 : f32
    %374 = vector.broadcast %cst_181 : f32 to vector<8x1xf32>
    %375 = arith.subf %374, %367 : vector<8x1xf32>
    %c0_182 = arith.constant 0 : index
    %c0_183 = arith.constant 0 : index
    %376 = vector.load %arg12[%c0_182, %c0_183] : memref<8x32xf32, #tpu.memory_space<vmem>>, vector<8x32xf32>
    %377 = vector.broadcast %375 : vector<8x1xf32> to vector<8x32xf32>
    %378 = arith.mulf %377, %376 : vector<8x32xf32>
    %379 = arith.addf %373, %378 : vector<8x32xf32>
    %c0_184 = arith.constant 0 : index
    %c0_185 = arith.constant 0 : index
    %380 = vector.load %arg12[%c0_184, %c0_185] : memref<8x32xf32, #tpu.memory_space<vmem>>, vector<8x32xf32>
    tpu.vector_store %arg12[%c0_184, %c0_185], %379 {strides = array<i32>} : memref<8x32xf32, #tpu.memory_space<vmem>>, vector<8x32xf32>,
    %381 = vector.broadcast %367 : vector<8x1xf32> to vector<8x32xf32>
    %382 = arith.mulf %381, %362 : vector<8x32xf32>
    %cst_186 = arith.constant 1.000000e+00 : f32
    %383 = vector.broadcast %cst_186 : f32 to vector<8x1xf32>
    %384 = arith.subf %383, %367 : vector<8x1xf32>
    %c0_187 = arith.constant 0 : index
    %c0_188 = arith.constant 0 : index
    %385 = vector.load %arg13[%c0_187, %c0_188] : memref<8x32xf32, #tpu.memory_space<vmem>>, vector<8x32xf32>
    %386 = vector.broadcast %384 : vector<8x1xf32> to vector<8x32xf32>
    %387 = arith.mulf %386, %385 : vector<8x32xf32>
    %388 = arith.addf %382, %387 : vector<8x32xf32>
    %c0_189 = arith.constant 0 : index
    %c0_190 = arith.constant 0 : index
    %389 = vector.load %arg13[%c0_189, %c0_190] : memref<8x32xf32, #tpu.memory_space<vmem>>, vector<8x32xf32>
    tpu.vector_store %arg13[%c0_189, %c0_190], %388 {strides = array<i32>} : memref<8x32xf32, #tpu.memory_space<vmem>>, vector<8x32xf32>,
    %c7_i32 = arith.constant 7 : i32
    %c1_i32_191 = arith.constant 1 : i32
    %390 = arith.muli %c7_i32, %c1_i32_191 : i32
    %c0_i32_192 = arith.constant 0 : i32
    %391 = arith.addi %c0_i32_192, %390 : i32
    %c8_i32_193 = arith.constant 8 : i32
    %392 = arith.muli %391, %c8_i32_193 : i32
    %393 = tpu.assume_multiple %392, 8 : i32
    %394 = arith.index_cast %393 : i32 to index
    %c0_194 = arith.constant 0 : index
    %395 = vector.load %arg10[%394, %c0_194] : memref<72x128xf32, #tpu.memory_space<vmem>>, vector<8x128xf32>
    %c0_195 = arith.constant 0 : index
    %c0_196 = arith.constant 0 : index
    %396 = vector.load %arg12[%c0_195, %c0_196] : memref<8x32xf32, #tpu.memory_space<vmem>>, vector<8x32xf32>
    %397 = arith.truncf %396 : vector<8x32xf32> to vector<8x32xbf16>
    %cst_197 = arith.constant dense<0.000000e+00> : vector<8x128xf32>
    %398 = tpu.matmul %397, %11, %cst_197 {dimension_numbers = #tpu.dot_dimension_numbers<[1], [0], [0], [1], [0, 0, 1, 1], [], []>} : vector<8x32xbf16>, vector<32x128xbf16>, vector<8x128xf32> -> vector<8x128xf32>
    %399 = arith.addf %395, %398 : vector<8x128xf32>
    %400 = arith.negf %399 : vector<8x128xf32>
    %401 = math.exp %400 : vector<8x128xf32>
    %cst_198 = arith.constant 1.000000e+00 : f32
    %402 = vector.broadcast %cst_198 : f32 to vector<8x128xf32>
    %403 = arith.addf %402, %401 : vector<8x128xf32>
    %404 = arith.divf %402, %403 : vector<8x128xf32>
    %405 = vector.extract_strided_slice %404 {offsets = [0, 0], sizes = [8, 32], strides = [1, 1]} : vector<8x128xf32> to vector<8x32xf32>
    %406 = vector.extract_strided_slice %404 {offsets = [0, 32], sizes = [8, 32], strides = [1, 1]} : vector<8x128xf32> to vector<8x32xf32>
    %407 = vector.extract_strided_slice %404 {offsets = [0, 64], sizes = [8, 32], strides = [1, 1]} : vector<8x128xf32> to vector<8x32xf32>
    %cst_199 = arith.constant 2.000000e+00 : f32
    %408 = vector.broadcast %cst_199 : f32 to vector<8x32xf32>
    %409 = arith.mulf %408, %407 : vector<8x32xf32>
    %cst_200 = arith.constant 1.000000e+00 : f32
    %410 = vector.broadcast %cst_200 : f32 to vector<8x32xf32>
    %411 = arith.subf %409, %410 : vector<8x32xf32>
    %412 = vector.extract_strided_slice %404 {offsets = [0, 96], sizes = [8, 32], strides = [1, 1]} : vector<8x128xf32> to vector<8x32xf32>
    %c0_201 = arith.constant 0 : index
    %c0_202 = arith.constant 0 : index
    %413 = vector.load %arg13[%c0_201, %c0_202] : memref<8x32xf32, #tpu.memory_space<vmem>>, vector<8x32xf32>
    %414 = arith.mulf %406, %413 : vector<8x32xf32>
    %415 = arith.mulf %405, %411 : vector<8x32xf32>
    %416 = arith.addf %414, %415 : vector<8x32xf32>
    %417 = math.tanh %416 : vector<8x32xf32>
    %418 = arith.mulf %412, %417 : vector<8x32xf32>
    %419 = arith.index_cast %391 : i32 to index
    %c0_203 = arith.constant 0 : index
    %c0_204 = arith.constant 0 : index
    %420 = vector.load %arg6[%419, %c0_203, %c0_204] : memref<9x8x1xf32, #tpu.memory_space<vmem>>, vector<1x8x1xf32>
    %421 = vector.shape_cast %420 : vector<1x8x1xf32> to vector<8x1xf32>
    %422 = vector.broadcast %421 : vector<8x1xf32> to vector<8x32xf32>
    %423 = arith.mulf %422, %418 : vector<8x32xf32>
    %424 = arith.index_cast %393 : i32 to index
    %c0_205 = arith.constant 0 : index
    %425 = vector.load %arg11[%424, %c0_205] : memref<72x32xf32, #tpu.memory_space<vmem>>, vector<8x32xf32>
    tpu.vector_store %arg11[%424, %c0_205], %423 {strides = array<i32>} : memref<72x32xf32, #tpu.memory_space<vmem>>, vector<8x32xf32>,
    %426 = vector.broadcast %421 : vector<8x1xf32> to vector<8x32xf32>
    %427 = arith.mulf %426, %418 : vector<8x32xf32>
    %cst_206 = arith.constant 1.000000e+00 : f32
    %428 = vector.broadcast %cst_206 : f32 to vector<8x1xf32>
    %429 = arith.subf %428, %421 : vector<8x1xf32>
    %c0_207 = arith.constant 0 : index
    %c0_208 = arith.constant 0 : index
    %430 = vector.load %arg12[%c0_207, %c0_208] : memref<8x32xf32, #tpu.memory_space<vmem>>, vector<8x32xf32>
    %431 = vector.broadcast %429 : vector<8x1xf32> to vector<8x32xf32>
    %432 = arith.mulf %431, %430 : vector<8x32xf32>
    %433 = arith.addf %427, %432 : vector<8x32xf32>
    %c0_209 = arith.constant 0 : index
    %c0_210 = arith.constant 0 : index
    %434 = vector.load %arg12[%c0_209, %c0_210] : memref<8x32xf32, #tpu.memory_space<vmem>>, vector<8x32xf32>
    tpu.vector_store %arg12[%c0_209, %c0_210], %433 {strides = array<i32>} : memref<8x32xf32, #tpu.memory_space<vmem>>, vector<8x32xf32>,
    %435 = vector.broadcast %421 : vector<8x1xf32> to vector<8x32xf32>
    %436 = arith.mulf %435, %416 : vector<8x32xf32>
    %cst_211 = arith.constant 1.000000e+00 : f32
    %437 = vector.broadcast %cst_211 : f32 to vector<8x1xf32>
    %438 = arith.subf %437, %421 : vector<8x1xf32>
    %c0_212 = arith.constant 0 : index
    %c0_213 = arith.constant 0 : index
    %439 = vector.load %arg13[%c0_212, %c0_213] : memref<8x32xf32, #tpu.memory_space<vmem>>, vector<8x32xf32>
    %440 = vector.broadcast %438 : vector<8x1xf32> to vector<8x32xf32>
    %441 = arith.mulf %440, %439 : vector<8x32xf32>
    %442 = arith.addf %436, %441 : vector<8x32xf32>
    %c0_214 = arith.constant 0 : index
    %c0_215 = arith.constant 0 : index
    %443 = vector.load %arg13[%c0_214, %c0_215] : memref<8x32xf32, #tpu.memory_space<vmem>>, vector<8x32xf32>
    tpu.vector_store %arg13[%c0_214, %c0_215], %442 {strides = array<i32>} : memref<8x32xf32, #tpu.memory_space<vmem>>, vector<8x32xf32>,
    %c8_i32_216 = arith.constant 8 : i32
    %c1_i32_217 = arith.constant 1 : i32
    %444 = arith.muli %c8_i32_216, %c1_i32_217 : i32
    %c0_i32_218 = arith.constant 0 : i32
    %445 = arith.addi %c0_i32_218, %444 : i32
    %c8_i32_219 = arith.constant 8 : i32
    %446 = arith.muli %445, %c8_i32_219 : i32
    %447 = tpu.assume_multiple %446, 8 : i32
    %448 = arith.index_cast %447 : i32 to index
    %c0_220 = arith.constant 0 : index
    %449 = vector.load %arg10[%448, %c0_220] : memref<72x128xf32, #tpu.memory_space<vmem>>, vector<8x128xf32>
    %c0_221 = arith.constant 0 : index
    %c0_222 = arith.constant 0 : index
    %450 = vector.load %arg12[%c0_221, %c0_222] : memref<8x32xf32, #tpu.memory_space<vmem>>, vector<8x32xf32>
    %451 = arith.truncf %450 : vector<8x32xf32> to vector<8x32xbf16>
    %cst_223 = arith.constant dense<0.000000e+00> : vector<8x128xf32>
    %452 = tpu.matmul %451, %11, %cst_223 {dimension_numbers = #tpu.dot_dimension_numbers<[1], [0], [0], [1], [0, 0, 1, 1], [], []>} : vector<8x32xbf16>, vector<32x128xbf16>, vector<8x128xf32> -> vector<8x128xf32>
    %453 = arith.addf %449, %452 : vector<8x128xf32>
    %454 = arith.negf %453 : vector<8x128xf32>
    %455 = math.exp %454 : vector<8x128xf32>
    %cst_224 = arith.constant 1.000000e+00 : f32
    %456 = vector.broadcast %cst_224 : f32 to vector<8x128xf32>
    %457 = arith.addf %456, %455 : vector<8x128xf32>
    %458 = arith.divf %456, %457 : vector<8x128xf32>
    %459 = vector.extract_strided_slice %458 {offsets = [0, 0], sizes = [8, 32], strides = [1, 1]} : vector<8x128xf32> to vector<8x32xf32>
    %460 = vector.extract_strided_slice %458 {offsets = [0, 32], sizes = [8, 32], strides = [1, 1]} : vector<8x128xf32> to vector<8x32xf32>
    %461 = vector.extract_strided_slice %458 {offsets = [0, 64], sizes = [8, 32], strides = [1, 1]} : vector<8x128xf32> to vector<8x32xf32>
    %cst_225 = arith.constant 2.000000e+00 : f32
    %462 = vector.broadcast %cst_225 : f32 to vector<8x32xf32>
    %463 = arith.mulf %462, %461 : vector<8x32xf32>
    %cst_226 = arith.constant 1.000000e+00 : f32
    %464 = vector.broadcast %cst_226 : f32 to vector<8x32xf32>
    %465 = arith.subf %463, %464 : vector<8x32xf32>
    %466 = vector.extract_strided_slice %458 {offsets = [0, 96], sizes = [8, 32], strides = [1, 1]} : vector<8x128xf32> to vector<8x32xf32>
    %c0_227 = arith.constant 0 : index
    %c0_228 = arith.constant 0 : index
    %467 = vector.load %arg13[%c0_227, %c0_228] : memref<8x32xf32, #tpu.memory_space<vmem>>, vector<8x32xf32>
    %468 = arith.mulf %460, %467 : vector<8x32xf32>
    %469 = arith.mulf %459, %465 : vector<8x32xf32>
    %470 = arith.addf %468, %469 : vector<8x32xf32>
    %471 = math.tanh %470 : vector<8x32xf32>
    %472 = arith.mulf %466, %471 : vector<8x32xf32>
    %473 = arith.index_cast %445 : i32 to index
    %c0_229 = arith.constant 0 : index
    %c0_230 = arith.constant 0 : index
    %474 = vector.load %arg6[%473, %c0_229, %c0_230] : memref<9x8x1xf32, #tpu.memory_space<vmem>>, vector<1x8x1xf32>
    %475 = vector.shape_cast %474 : vector<1x8x1xf32> to vector<8x1xf32>
    %476 = vector.broadcast %475 : vector<8x1xf32> to vector<8x32xf32>
    %477 = arith.mulf %476, %472 : vector<8x32xf32>
    %478 = arith.index_cast %447 : i32 to index
    %c0_231 = arith.constant 0 : index
    %479 = vector.load %arg11[%478, %c0_231] : memref<72x32xf32, #tpu.memory_space<vmem>>, vector<8x32xf32>
    tpu.vector_store %arg11[%478, %c0_231], %477 {strides = array<i32>} : memref<72x32xf32, #tpu.memory_space<vmem>>, vector<8x32xf32>,
    %480 = vector.broadcast %475 : vector<8x1xf32> to vector<8x32xf32>
    %481 = arith.mulf %480, %472 : vector<8x32xf32>
    %cst_232 = arith.constant 1.000000e+00 : f32
    %482 = vector.broadcast %cst_232 : f32 to vector<8x1xf32>
    %483 = arith.subf %482, %475 : vector<8x1xf32>
    %c0_233 = arith.constant 0 : index
    %c0_234 = arith.constant 0 : index
    %484 = vector.load %arg12[%c0_233, %c0_234] : memref<8x32xf32, #tpu.memory_space<vmem>>, vector<8x32xf32>
    %485 = vector.broadcast %483 : vector<8x1xf32> to vector<8x32xf32>
    %486 = arith.mulf %485, %484 : vector<8x32xf32>
    %487 = arith.addf %481, %486 : vector<8x32xf32>
    %c0_235 = arith.constant 0 : index
    %c0_236 = arith.constant 0 : index
    %488 = vector.load %arg12[%c0_235, %c0_236] : memref<8x32xf32, #tpu.memory_space<vmem>>, vector<8x32xf32>
    tpu.vector_store %arg12[%c0_235, %c0_236], %487 {strides = array<i32>} : memref<8x32xf32, #tpu.memory_space<vmem>>, vector<8x32xf32>,
    %489 = vector.broadcast %475 : vector<8x1xf32> to vector<8x32xf32>
    %490 = arith.mulf %489, %470 : vector<8x32xf32>
    %cst_237 = arith.constant 1.000000e+00 : f32
    %491 = vector.broadcast %cst_237 : f32 to vector<8x1xf32>
    %492 = arith.subf %491, %475 : vector<8x1xf32>
    %c0_238 = arith.constant 0 : index
    %c0_239 = arith.constant 0 : index
    %493 = vector.load %arg13[%c0_238, %c0_239] : memref<8x32xf32, #tpu.memory_space<vmem>>, vector<8x32xf32>
    %494 = vector.broadcast %492 : vector<8x1xf32> to vector<8x32xf32>
    %495 = arith.mulf %494, %493 : vector<8x32xf32>
    %496 = arith.addf %490, %495 : vector<8x32xf32>
    %c0_240 = arith.constant 0 : index
    %c0_241 = arith.constant 0 : index
    %497 = vector.load %arg13[%c0_240, %c0_241] : memref<8x32xf32, #tpu.memory_space<vmem>>, vector<8x32xf32>
    tpu.vector_store %arg13[%c0_240, %c0_241], %496 {strides = array<i32>} : memref<8x32xf32, #tpu.memory_space<vmem>>, vector<8x32xf32>,
    %c9_i32 = arith.constant 9 : i32
    %c0_242 = arith.constant 0 : index
    %c0_243 = arith.constant 0 : index
    %498 = vector.load %arg11[%c0_242, %c0_243] : memref<72x32xf32, #tpu.memory_space<vmem>>, vector<72x32xf32>
    %499 = arith.truncf %498 : vector<72x32xf32> to vector<72x32xbf16>
    %c0_244 = arith.constant 0 : index
    %c0_245 = arith.constant 0 : index
    %500 = vector.load %arg7[%c0_244, %c0_245] : memref<32x128xbf16, #tpu.memory_space<vmem>>, vector<32x128xbf16>
    %cst_246 = arith.constant dense<0.000000e+00> : vector<72x128xf32>
    %501 = tpu.matmul %499, %500, %cst_246 {dimension_numbers = #tpu.dot_dimension_numbers<[1], [0], [0], [1], [0, 0, 1, 1], [], []>} : vector<72x32xbf16>, vector<32x128xbf16>, vector<72x128xf32> -> vector<72x128xf32>
    %c0_247 = arith.constant 0 : index
    %c0_248 = arith.constant 0 : index
    %502 = vector.load %arg8[%c0_247, %c0_248] : memref<1x128xf32, #tpu.memory_space<vmem>>, vector<1x128xf32>
    %503 = vector.broadcast %502 : vector<1x128xf32> to vector<72x128xf32>
    %504 = arith.addf %501, %503 : vector<72x128xf32>
    %cst_249 = arith.constant dense<0xFF800000> : vector<72xf32>
    %505 = vector.multi_reduction <maximumf>, %504, %cst_249 [1] : vector<72x128xf32> to vector<72xf32>
    %506 = vector.shape_cast %505 : vector<72xf32> to vector<72x1xf32>
    %507 = vector.broadcast %506 : vector<72x1xf32> to vector<72x128xf32>
    %508 = arith.subf %504, %507 : vector<72x128xf32>
    %509 = math.exp %508 : vector<72x128xf32>
    %cst_250 = arith.constant dense<0.000000e+00> : vector<72xf32>
    %510 = vector.multi_reduction <add>, %509, %cst_250 [1] : vector<72x128xf32> to vector<72xf32>
    %511 = vector.shape_cast %510 : vector<72xf32> to vector<72x1xf32>
    %512 = math.log %511 : vector<72x1xf32>
    %513 = arith.addf %512, %506 : vector<72x1xf32>
    %514 = vector.broadcast %513 : vector<72x1xf32> to vector<72x128xf32>
    %515 = arith.subf %504, %514 : vector<72x128xf32>
    %c0_251 = arith.constant 0 : index
    %c0_252 = arith.constant 0 : index
    %516 = vector.load %arg9[%c0_251, %c0_252] : memref<72x128xf32, #tpu.memory_space<vmem>>, vector<72x128xf32>
    tpu.vector_store %arg9[%c0_251, %c0_252], %515 {strides = array<i32>} : memref<72x128xf32, #tpu.memory_space<vmem>>, vector<72x128xf32>,
    return
  }
  func.func @transform_0(%arg0: i32) -> (i32, i32) {
    %c0_i32 = arith.constant 0 : i32
    %c0_i32_0 = arith.constant 0 : i32
    %c0_i32_1 = arith.constant 0 : i32
    return %c0_i32, %c0_i32_0 : i32, i32
  }
  func.func @transform_1(%arg0: i32) -> (i32, i32) {
    %c0_i32 = arith.constant 0 : i32
    %c0_i32_0 = arith.constant 0 : i32
    %c0_i32_1 = arith.constant 0 : i32
    return %c0_i32, %c0_i32_0 : i32, i32
  }
  func.func @transform_2(%arg0: i32) -> (i32, i32) {
    %c0_i32 = arith.constant 0 : i32
    %c0_i32_0 = arith.constant 0 : i32
    %c0_i32_1 = arith.constant 0 : i32
    return %c0_i32, %c0_i32_0 : i32, i32
  }
  func.func @transform_3(%arg0: i32) -> (i32, i32) {
    %c0_i32 = arith.constant 0 : i32
    %c0_i32_0 = arith.constant 0 : i32
    %c0_i32_1 = arith.constant 0 : i32
    return %c0_i32, %c0_i32_0 : i32, i32
  }
  func.func @transform_4(%arg0: i32) -> (i32, i32) {
    %c0_i32 = arith.constant 0 : i32
    %c0_i32_0 = arith.constant 0 : i32
    %c0_i32_1 = arith.constant 0 : i32
    return %c0_i32, %c0_i32_0 : i32, i32
  }
  func.func @transform_5(%arg0: i32) -> (i32, i32, i32) {
    %c0_i32 = arith.constant 0 : i32
    %c0_i32_0 = arith.constant 0 : i32
    %c0_i32_1 = arith.constant 0 : i32
    %c0_i32_2 = arith.constant 0 : i32
    return %c0_i32, %c0_i32_0, %c0_i32_1 : i32, i32, i32
  }
  func.func @transform_6(%arg0: i32) -> (i32, i32) {
    %c0_i32 = arith.constant 0 : i32
    %c0_i32_0 = arith.constant 0 : i32
    %c0_i32_1 = arith.constant 0 : i32
    return %c0_i32, %c0_i32_0 : i32, i32
  }
  func.func @transform_7(%arg0: i32) -> (i32, i32) {
    %c0_i32 = arith.constant 0 : i32
    %c0_i32_0 = arith.constant 0 : i32
    %c0_i32_1 = arith.constant 0 : i32
    return %c0_i32, %c0_i32_0 : i32, i32
  }
  func.func @transform_8(%arg0: i32) -> (i32, i32) {
    %c0_i32 = arith.constant 0 : i32
    %c0_i32_0 = arith.constant 0 : i32
    %c0_i32_1 = arith.constant 0 : i32
    return %c0_i32, %c0_i32_0 : i32, i32
  }
}

</mosaic_0001>

<bundles_post_ra>
// kernel: cvae_forward.4
= control target key start
LH: loop header
LB: loop body
LE: loop exit
PB: predicated region body
PF: predicated region fallthrough
CT: control target
= control target key end

     0   :  { %vm193_vm0 = vcmask 523264   ;;  %v1028_v23 = vmov 64.0   ;;  %vm573_vm5 = vcmask 130048   ;;  %vm617_vm6 = vcmask 261120   ;;  %s1394_s4 = inlined_call_operand.vmem [shape: bf16[128,64], index: 4, kind: input, shape index: {}]   ;;  %s1395_s3 = inlined_call_operand.vmem [shape: bf16[64,64], index: 3, kind: input, shape index: {}]   ;;  %s1396_s0 = inlined_call_operand.vmem [shape: bf16[8,64], index: 0, kind: input, shape index: {}]   ;;  %s1397_s5 = inlined_call_operand.vmem [shape: f32[1,64], index: 5, kind: input, shape index: {}]   ;;  %s1398_s1 = inlined_call_operand.vmem [shape: bf16[8,128], index: 1, kind: input, shape index: {}]   ;;  %s1399_s6 = inlined_call_operand.vmem [shape: f32[1,64], index: 6, kind: input, shape index: {}]   ;;  %s1400_s7 = inlined_call_operand.vmem [shape: f32[1,64], index: 7, kind: input, shape index: {}]   ;;  %s1401_s9 = inlined_call_operand.vmem [shape: f32[1,128], index: 9, kind: input, shape index: {}]   ;;  %s1402_s8 = inlined_call_operand.vmem [shape: bf16[64,128], index: 8, kind: input, shape index: {}]   ;;  %s1403_s10 = inlined_call_operand.vmem [shape: bf16[128,64], index: 10, kind: input, shape index: {}]   ;;  %s1404_s11 = inlined_call_operand.vmem [shape: f32[1,64], index: 11, kind: input, shape index: {}]   ;;  %s1405_s24 = inlined_call_operand.vmem [shape: f32[8,128], index: 24, kind: output, shape index: {0}]   ;;  %s1406_s17 = inlined_call_operand.vmem [shape: bf16[128,32], index: 17, kind: input, shape index: {}]   ;;  %s1407_s22 = inlined_call_operand.vmem [shape: bf16[128,32], index: 22, kind: input, shape index: {}]   ;;  %s1408_s18 = inlined_call_operand.vmem [shape: f32[1,32], index: 18, kind: input, shape index: {}]   ;;  %s1409_s16 = inlined_call_operand.vmem [shape: bf16[16,32], index: 16, kind: input, shape index: {}]   ;;  %s1410_s21 = inlined_call_operand.vmem [shape: bf16[16,32], index: 21, kind: input, shape index: {}]   ;;  %s1411_s2 = inlined_call_operand.vmem [shape: f32[8,16], index: 2, kind: input, shape index: {}]   ;;  %s1412_s23 = inlined_call_operand.vmem [shape: f32[1,32], index: 23, kind: input, shape index: {}]   ;;  %s1413_s12 = inlined_call_operand.vmem [shape: f32[1,64], index: 12, kind: input, shape index: {}]   ;;  %s1414_s13 = inlined_call_operand.vmem [shape: f32[1,64], index: 13, kind: input, shape index: {}]   ;;  %s1415_s15 = inlined_call_operand.vmem [shape: f32[1,128], index: 15, kind: input, shape index: {}]   ;;  %s1416_s14 = inlined_call_operand.vmem [shape: bf16[64,128], index: 14, kind: input, shape index: {}]   ;;  %s1417_s27 = inlined_call_operand.vmem [shape: f32[8,32], index: 27, kind: output, shape index: {3}]   ;;  %s1418_s19 = inlined_call_operand.vmem [shape: bf16[32,128], index: 19, kind: input, shape index: {}]   ;;  %s1419_s20 = inlined_call_operand.vmem [shape: f32[1,128], index: 20, kind: input, shape index: {}]   ;;  %s1420_s25 = inlined_call_operand.vmem [shape: f32[8,128], index: 25, kind: output, shape index: {1}]   ;;  %s1421_s26 = inlined_call_operand.vmem [shape: f32[8,128], index: 26, kind: output, shape index: {2}]  }
   0x1   :  { %1426 = sst [smem:[#allocation2_spill]] %s1394_s4 }
   0x2   :  { %1427 = sst [smem:[#allocation3_spill]] %s1395_s3 }
   0x3   :  { %1428 = sst [smem:[#allocation4_spill]] %s1396_s0 }
   0x4   :  { %1429 = sst [smem:[#allocation5_spill]] %s1397_s5 }
   0x5   :  { %1430 = sst [smem:[#allocation6_spill]] %s1398_s1 }
   0x6   :  { %1431 = sst [smem:[#allocation7_spill]] %s1399_s6 }
   0x7   :  { %1432 = sst [smem:[#allocation8_spill]] %s1400_s7 }
   0x8   :  { %1433 = sst [smem:[#allocation9_spill]] %s1401_s9 }
   0x9   :  { %1434 = sst [smem:[#allocation10_spill]] %s1402_s8 }
   0xa   :  { %1435 = sst [smem:[#allocation11_spill]] %s1403_s10 }
   0xb   :  { %1436 = sst [smem:[#allocation12_spill]] %s1404_s11 }
   0xc   :  { %1437 = sst [smem:[#allocation13_spill]] %s1405_s24 }
   0xd   :  { %1438 = sst [smem:[#allocation14_spill]] %s1415_s15 }
   0xe   :  { %s1439_s8 = sld [smem:[#allocation2_spill]] }
   0xf   :  { %s1440_s15 = sld [smem:[#allocation3_spill]] }
  0x10   :  { %s1441_s3 = sld [smem:[#allocation4_spill]] }
  0x11   :  { %s1442_s9 = sld [smem:[#allocation6_spill]] }
  0x12   :  { %s1443_s10 = sld [smem:[#allocation5_spill]] }
  0x13   :  { %s1444_s28 = sld [smem:[#allocation10_spill]] }
  0x14   :  { %v964_v0 = vld [vmem:[%s1439_s8 + $0x38] sm:$0xff]  ;;  %v963_v2 = vld [vmem:[%s1439_s8 + $0x30] sm:$0xff]  ;;  %v962_v4 = vld [vmem:[%s1439_s8 + $0x28] sm:$0xff]  ;;  %s1445_s5 = sld [smem:[#allocation11_spill]] }
  0x15   :  { %v956_v1 = vld [vmem:[%s1440_s15 + $0x18] sm:$0xff]  ;;  %156 = vmatpush.bf16.msra.mxu0 %v964_v0  ;;  %v955_v3 = vld [vmem:[%s1440_s15 + $0x10] sm:$0xff]  ;;  %v954_v5 = vld [vmem:[%s1440_s15 + $0x8] sm:$0xff]  ;;  %s1446_s7 = sld [smem:[#allocation7_spill]] }
  0x16   :  { %201 = vmatpush.bf16.msra.mxu1 %v956_v1  ;;  %v961_v6 = vld [vmem:[%s1439_s8 + $0x20] sm:$0xff]  ;;  %v960_v8 = vld [vmem:[%s1439_s8 + $0x18] sm:$0xff]  ;;  %v959_v10 = vld [vmem:[%s1439_s8 + $0x10] sm:$0xff]  ;;  %s1447_s30 = sld [smem:[#allocation8_spill]] }
  0x17   :  { %v953_v7 = vld [vmem:[%s1440_s15] sm:$0xff]  ;;  %v958_v11 = vld [vmem:[%s1439_s8 + $0x8] sm:$0xff]  ;;  %s1449_s15 = sld [smem:[#allocation13_spill]] }
  0x18   :  { %v82_v9 = vld [vmem:[%s1441_s3] sm:$0xf]  ;;  %s1448_s3 = sld [smem:[#allocation9_spill]] }
  0x19   :  { %157 = vmatpush.bf16.msra.mxu0 %v963_v2  ;;  %v957_v12 = vld [vmem:[%s1439_s8] sm:$0xff]  ;;  %v968_v35 = vld [vmem:[%s1444_s28 + $0x18] sm:$0xff]  ;;  %v967_v36 = vld [vmem:[%s1444_s28 + $0x10] sm:$0xff]  ;;  %s1450_s24 = sld [smem:[#allocation12_spill]] }
  0x1a   :  { %202 = vmatpush.bf16.msra.mxu1 %v955_v3  ;;  %v1213_v13 = vld [vmem:[%s1442_s9] sm:$0xf]  ;;  %299 = vmatpush.bf16.msra.mxu2 %v968_v35  ;;  %v966_v37 = vld [vmem:[%s1444_s28 + $0x8] sm:$0xff]  ;;  %v976_v39 = vld [vmem:[%s1445_s5 + $0x38] sm:$0xff] }
  0x1b   :  { %v1003_v16 = vld [vmem:[%s1443_s10] ss:$0 sm:$0xff]  ;;  %377 = vmatpush.bf16.msra.mxu3 %v976_v39  ;;  %v975_v42 = vld [vmem:[%s1445_s5 + $0x30] sm:$0xff]  ;;  %v974_v44 = vld [vmem:[%s1445_s5 + $0x28] sm:$0xff] }
  0x1c   :  { %v965_v38 = vld [vmem:[%s1444_s28] sm:$0xff]  ;;  %v972_v48 = vld [vmem:[%s1445_s5 + $0x18] sm:$0xff]  ;;  %v971_v51 = vld [vmem:[%s1445_s5 + $0x10] sm:$0xff] }
  0x1d   :  { %158 = vmatpush.bf16.msra.mxu0 %v962_v4  ;;  %v973_v45 = vld [vmem:[%s1445_s5 + $0x20] sm:$0xff]  ;;  %v970_v55 = vld [vmem:[%s1445_s5 + $0x8] sm:$0xff] }
  0x1e   :  { %203 = vmatpush.bf16.msra.mxu1 %v954_v5  ;;  %300 = vmatpush.bf16.msra.mxu2 %v967_v36  ;;  %v1004_v54 = vld [vmem:[%s1446_s7] ss:$0 sm:$0xff] }
  0x1f   :  { %378 = vmatpush.bf16.msra.mxu3 %v975_v42  ;;  %v1005_v58 = vld [vmem:[%s1447_s30] ss:$0 sm:$0xff] }
  0x20   :  { %v969_v60 = vld [vmem:[%s1445_s5] sm:$0xff]  ;;  %s1029_s5 = smov 112  }
  0x21   :  { %159 = vmatpush.bf16.msra.mxu0 %v961_v6  ;;  %v1006_v63 = vld [vmem:[%s1448_s3] ss:$0 sm:$0xff] }
  0x22   :  { %204 = vmatpush.bf16.msra.mxu1 %v953_v7  ;;  %301 = vmatpush.bf16.msra.mxu2 %v966_v37 }
  0x23   :  { %379 = vmatpush.bf16.msra.mxu3 %v974_v44 }
  0x25   :  { %160 = vmatpush.bf16.msra.mxu0 %v960_v8  ;;  %803 = vmatmul.msk.bf16.vlgmr.msra.gmra.mxu1 %vm193_vm0, %v82_v9  ;;  %v989_v8 = vld [vmem:[%s1406_s17 + $0x38] sm:$0xff] }
  0x26   :  { %302 = vmatpush.bf16.msra.mxu2 %v965_v38  ;;  %v1000_v9 = vld [vmem:[%s1407_s22 + $0x38] sm:$0xff] }
  0x27   :  { %380 = vmatpush.bf16.msra.mxu3 %v973_v45 }
  0x29   :  { %161 = vmatpush.bf16.msra.mxu0 %v959_v10  ;;  %v988_v10 = vld [vmem:[%s1406_s17 + $0x30] sm:$0xff] }
  0x2a   :  { %554 = vmatpush.bf16.msrb.mxu2 %v989_v8 }
  0x2b   :  { %381 = vmatpush.bf16.msra.mxu3 %v972_v48 }
  0x2d   :  { %162 = vmatpush.bf16.msra.mxu0 %v958_v11  ;;  %v999_v11 = vld [vmem:[%s1407_s22 + $0x30] sm:$0xff] }
  0x2e   :  { %555 = vmatpush.bf16.msrb.mxu2 %v988_v10 }
  0x2f   :  { %382 = vmatpush.bf16.msra.mxu3 %v971_v51 }
  0x31   :  { %163 = vmatpush.bf16.msra.mxu0 %v957_v12  ;;  %v987_v12 = vld [vmem:[%s1406_s17 + $0x28] sm:$0xff] }
  0x32   :  { %556 = vmatpush.bf16.msrb.mxu2 %v987_v12 }
  0x33   :  { %383 = vmatpush.bf16.msra.mxu3 %v970_v55  ;;  %v977_v55 = vld [vmem:[%s1416_s14] sm:$0xff] }
  0x34   :  { %164 = vmatmul.bf16.vlgmr.msra.gmra.mxu0 %v1213_v13 }
  0x37   :  { %384 = vmatpush.bf16.msra.mxu3 %v969_v60 }
  0x3a   :  { %385 = vmatmul.bf16.vlgmr.msra.gmra.mxu3 %v1213_v13 }
  0x3b   :  { %701 = vmatpush.bf16.msrb.mxu3 %v1000_v9  ;;  %v1008_v9 = vld [vmem:[%s1408_s18] ss:$0 sm:$0xff] }
  0x3f   :  { %702 = vmatpush.bf16.msrb.mxu3 %v999_v11 }
  0xa2   :  { %v206_v14 = vpop.f32.mrf.mxu1 }
  0xaa   :  { %v208_v15 = vpop.f32.mrf.mxu1 }
  0xab   :  { %v986_v15 = vld [vmem:[%s1406_s17 + $0x20] sm:$0xff] }
  0xac   :  { %557 = vmatpush.bf16.msrb.mxu2 %v986_v15 }
  0xb1   :  { %v165_v17 = vpop.f32.mrf.mxu0 }
  0xb2   :  { %v207_v18 = vadd.f32 %v206_v14, %v165_v17  ;;  %v998_v14 = vld [vmem:[%s1407_s22 + $0x28] sm:$0xff]  ;;  %v1007_v17 = vld [vmem:[%s1450_s24] ss:$0 sm:$0xff] }
  0xb3   :  { %703 = vmatpush.bf16.msrb.mxu3 %v998_v14 }
  0xb4   :  { %v214_v19 = vadd.f32 %v1003_v16, %v207_v18  ;;  %v997_v16 = vld [vmem:[%s1407_s22 + $0x20] sm:$0xff]  ;;  %v985_v18 = vld [vmem:[%s1406_s17 + $0x18] sm:$0xff] }
  0xb5   :  { %558 = vmatpush.bf16.msrb.mxu2 %v985_v18 }
  0xb6   :  { %1014 = vtanh.f32 %v214_v19 }
  0xb7   :  { %1016 = vrcp.f32 %v1028_v23  ;;  %704 = vmatpush.bf16.msrb.mxu3 %v997_v16  ;;  %v982_v23 = vld [vmem:[%s1406_s17] sm:$0xff] }
  0xb9   :  { %v167_v20 = vpop.f32.mrf.mxu0 }
  0xba   :  { %v984_v20 = vld [vmem:[%s1406_s17 + $0x10] sm:$0xff] }
  0xbb   :  { %559 = vmatpush.bf16.msrb.mxu2 %v984_v20 }
  0xbc   :  { %v1015_v21 = vpop.eup %1014 }
  0xbd   :  { %v218_v22 = vsel %vm193_vm0, %v1015_v21, 0.0  ;;  %v1017_v24 = vpop.eup %1016  ;;  %v386_v2 = vpop.f32.mrf.mxu3 }
  0xbe   :  { %219 = vadd.xlane.f32.xlu0 %v218_v22  ;;  %v222_v25 = vmul.f32 64.0, %v1017_v24  ;;  %vm226_vm1 = vweird.f32 %v1017_v24  ;;  %v387_v19 = vadd.f32 %v1007_v17, %v386_v2 }
  0xc0   :  { %v223_v26 = vsub.f32 1.0, %v222_v25  ;;  %v996_v25 = vld [vmem:[%s1407_s22 + $0x18] sm:$0xff] }
  0xc1   :  { %705 = vmatpush.bf16.msrb.mxu3 %v996_v25 }
  0xc2   :  { %v224_v27 = vmul.f32 %v1017_v24, %v223_v26  ;;  %v981_v26 = vld [vmem:[%s1409_s16] sm:$0xff]  ;;  %s1451_s16 = sld [smem:[#allocation14_spill]] }
  0xc3   :  { %584 = vmatpush.bf16.msrb.mxu0 %v981_v26 }
  0xc4   :  { %v225_v28 = vadd.f32 %v1017_v24, %v224_v27  ;;  %v995_v27 = vld [vmem:[%s1407_s22 + $0x10] sm:$0xff] }
  0xc5   :  { %v388_v6 = vpop.f32.mrf.mxu3  ;;  %706 = vmatpush.bf16.msrb.mxu3 %v995_v27 }
  0xc6   :  { %v1220_v29 = vsel %vm226_vm1, %v1017_v24, %v225_v28  ;;  %v994_v28 = vld [vmem:[%s1407_s22 + $0x8] sm:$0xff] }
  0xc8   :  { %v1012_v15 = vld [vmem:[%s1451_s16] ss:$0 sm:$0xff] }
  0xc9   :  { %707 = vmatpush.bf16.msrb.mxu3 %v994_v28 }
 0x131   :  { %v220_v30 = vpop.xlane.xlu0 %219 }
 0x132   :  { %v228_v31 = vmul.f32 %v1220_v29, %v220_v30  ;;  %v992_v30 = vld [vmem:[%s1410_s21] sm:$0xff] }
 0x133   :  { %727 = vmatpush.bf16.msra.mxu0 %v992_v30 }
 0x134   :  { %v229_v32 = vsub.f32 %v1015_v21, %v228_v31  ;;  %v983_v21 = vld [vmem:[%s1406_s17 + $0x8] sm:$0xff]  ;;  %v993_v31 = vld [vmem:[%s1407_s22] sm:$0xff] }
 0x135   :  { %560 = vmatpush.bf16.msrb.mxu2 %v983_v21  ;;  %708 = vmatpush.bf16.msrb.mxu3 %v993_v31 }
 0x136   :  { %v230_v33 = vmul.f32 %v229_v32, %v229_v32 }
 0x138   :  { %v231_v34 = vsel %vm193_vm0, %v230_v33, 0.0  ;;  %709 = vmatmul.bf16.vlgmr.msrb.gmra.mxu3 %v1213_v13 }
 0x139   :  { %232 = vadd.xlane.f32.xlu0 %v231_v34  ;;  %561 = vmatpush.bf16.msrb.mxu2 %v982_v23 }
 0x1ac   :  { %v233_v40 = vpop.xlane.xlu0 %232 }
 0x1ad   :  { %v234_v41 = vmul.f32 %v233_v40, %v1220_v29 }
 0x1af   :  { %v235_v43 = vadd.f32 1e-05, %v234_v41 }
 0x1b1   :  { %1018 = vrsqrt.f32 %v235_v43  ;;  %vm242_vm3 = vweird.f32 %v235_v43 }
 0x1b7   :  { %v1019_v46 = vpop.eup %1018 }
 0x1b8   :  { %v237_v47 = vmul.f32 %v1019_v46, %v235_v43  ;;  %vm243_vm2 = vweird.f32 %v1019_v46 }
 0x1b9   :  { %vm244_vm4 = vmor %vm242_vm3, %vm243_vm2 }
 0x1ba   :  { %v238_v49 = vmul.f32 %v1019_v46, %v237_v47  ;;  %v1009_v47 = vld [vmem:[%s1412_s23] ss:$0 sm:$0xff] }
 0x1bb   :  { %v710_v43 = vpop.f32.mrf.mxu3 }
 0x1bc   :  { %v239_v50 = vmul.f32 0.5, %v238_v49  ;;  %v980_v49 = vld [vmem:[%s1416_s14 + $0x18] sm:$0xff] }
 0x1bd   :  { %467 = vmatpush.bf16.msrb.mxu1 %v980_v49 }
 0x1be   :  { %v240_v52 = vsub.f32 1.5, %v239_v50 }
 0x1c0   :  { %v241_v53 = vmul.f32 %v1019_v46, %v240_v52  ;;  %v979_v52 = vld [vmem:[%s1416_s14 + $0x10] sm:$0xff] }
 0x1c1   :  { %468 = vmatpush.bf16.msrb.mxu1 %v979_v52 }
 0x1c2   :  { %v245_v56 = vsel %vm244_vm4, %v1019_v46, %v241_v53 }
 0x1c3   :  { %v246_v57 = vmul.f32 %v245_v56, %v229_v32  ;;  %v477_v32 = vld [vmem:[%s1411_s2] sm:$0xff]  ;;  %v712_v44 = vpop.f32.mrf.mxu3  ;;  %v991_v56 = vld [vmem:[%s1418_s19 + $0x8] sm:$0xff] }
 0x1c5   :  { %v250_v59 = vmul.f32 %v1004_v54, %v246_v57  ;;  %v978_v54 = vld [vmem:[%s1416_s14 + $0x8] sm:$0xff] }
 0x1c6   :  { %469 = vmatpush.bf16.msrb.mxu1 %v978_v54 }
 0x1c7   :  { %v254_v61 = vadd.f32 %v1005_v58, %v250_v59  ;;  %v990_v59 = vld [vmem:[%s1418_s19] sm:$0xff] }
 0x1c9   :  { %v255_v62 = vpack.c.bf16 %v254_v61, %v254_v61 }
 0x1ca   :  { %470 = vmatpush.bf16.msrb.mxu1 %v977_v55 }
 0x1cb   :  { %820 = vmatmul.msk.bf16.vlgmr.msra.gmra.mxu2 %vm193_vm0, %v255_v62 }
 0x1ce   :  { %627 = vmatpush.bf16.msra.mxu1 %v991_v56 }
 0x1d2   :  { %628 = vmatpush.bf16.msra.mxu1 %v990_v59 }
 0x1db   :  { %562 = vmatmul.bf16.vlgmr.msrb.gmra.mxu2 %v1213_v13 }
 0x24e   :  { %v304_v0 = vpop.f32.mrf.mxu2 }
 0x24f   :  { %v1272_v1 = vadd.f32 %v1006_v63, %v304_v0 }
 0x251   :  { %308 = vst [vmem:[%s1449_s15] sm:$0xff] %v1272_v1  ;;  %v478_v3 = vmul.f32 0.5, %v1272_v1 }
 0x253   :  { %v479_v4 = vmul.f32 1.442695, %v478_v3 }
 0x255   :  { %1020 = vpow2.f32 %v479_v4 }
 0x256   :  { %v306_v5 = vpop.f32.mrf.mxu2  ;;  %1022 = vtanh.f32 %v387_v19  ;;  %v1013_v19 = vld [vmem:[%s1419_s20] ss:$0 sm:$0xff] }
 0x257   :  { %v1011_v5 = vld [vmem:[%s1414_s13] ss:$0 sm:$0xff] }
 0x25b   :  { %v1021_v7 = vpop.eup %1020 }
 0x25c   :  { %482 = vrot.lane.b32.xlu1 %v1021_v7, %s1029_s5  ;;  %v1023_v22 = vpop.eup %1022 }
 0x25d   :  { %v393_v24 = vsel %vm193_vm0, %v1023_v22, 0.0 }
 0x25e   :  { %v563_v13 = vpop.f32.mrf.mxu2 }
 0x266   :  { %v565_v42 = vpop.f32.mrf.mxu2 }
 0x286   :  { %394 = vadd.xlane.f32.xlu1 %v393_v24 }
 0x2ce   :  { %v483_v33 = vpop.permute.xlu1 %482 }
 0x2cf   :  { %v485_v34 = vmul.f32 %v483_v33, %v477_v32 }
 0x2d1   :  { %v486_v35 = vadd.f32 %v485_v34, %v1272_v1 }
 0x2d3   :  { %v487_v36 = vpack.c.bf16 %v486_v35, %v486_v35 }
 0x2d5   :  { %906 = vmatmul.msk.bf16.vlgmr.msrb.gmra.mxu0 %vm573_vm5, %v487_v36 }
 0x2e5   :  { %952 = vmatmul.msk.bf16.vlgmr.msra.gmra.mxu0 %vm573_vm5, %v487_v36 }
 0x2f9   :  { %v395_v37 = vpop.xlane.xlu1 %394 }
 0x2fa   :  { %v396_v38 = vmul.f32 %v395_v37, %v1220_v29 }
 0x2fc   :  { %v397_v39 = vsub.f32 %v1023_v22, %v396_v38 }
 0x2fe   :  { %v398_v40 = vmul.f32 %v397_v39, %v397_v39 }
 0x300   :  { %v399_v41 = vsel %vm193_vm0, %v398_v40, 0.0 }
 0x301   :  { %400 = vadd.xlane.f32.xlu2 %v399_v41 }
 0x352   :  { %v586_v45 = vpop.f32.mrf.mxu0 }
 0x353   :  { %v587_v8 = vadd.f32 %v586_v45, %v563_v13 }
 0x355   :  { %v594_v11 = vadd.f32 %v1008_v9, %v587_v8 }
 0x35a   :  { %v588_v46 = vpop.f32.mrf.mxu0 }
 0x362   :  { %v729_v48 = vpop.f32.mrf.mxu0 }
 0x363   :  { %v730_v50 = vadd.f32 %v729_v48, %v710_v43 }
 0x365   :  { %v737_v51 = vadd.f32 %v1009_v47, %v730_v50 }
 0x367   :  { %738 = vst.msk [vmem:[%s1417_s27] sm:$0xff] %vm617_vm6, %v737_v51 }
 0x36a   :  { %v731_v53 = vpop.f32.mrf.mxu0 }
 0x374   :  { %v401_v57 = vpop.xlane.xlu2 %400 }
 0x375   :  { %v402_v58 = vmul.f32 %v401_v57, %v1220_v29  ;;  %v1010_v29 = vld [vmem:[%s1413_s12] ss:$0 sm:$0xff] }
 0x377   :  { %v403_v60 = vadd.f32 1e-05, %v402_v58 }
 0x379   :  { %1024 = vrsqrt.f32 %v403_v60  ;;  %vm410_vm8 = vweird.f32 %v403_v60 }
 0x37a   :  { %1026 = vtanh.f32 %v594_v11 }
 0x37f   :  { %v1025_v61 = vpop.eup %1024 }
 0x380   :  { %v405_v62 = vmul.f32 %v1025_v61, %v403_v60  ;;  %vm411_vm7 = vweird.f32 %v1025_v61  ;;  %v1027_v12 = vpop.eup %1026 }
 0x381   :  { %vm412_vm9 = vmor %vm410_vm8, %vm411_vm7  ;;  %v596_v14 = vpack.c.bf16 %v1027_v12, %v1027_v12 }
 0x382   :  { %v406_v63 = vmul.f32 %v1025_v61, %v405_v62 }
 0x384   :  { %v407_v0 = vmul.f32 0.5, %v406_v63 }
 0x386   :  { %v408_v1 = vsub.f32 1.5, %v407_v0 }
 0x388   :  { %v409_v2 = vmul.f32 %v1025_v61, %v408_v1 }
 0x38a   :  { %v413_v3 = vsel %vm412_vm9, %v1025_v61, %v409_v2 }
 0x38b   :  { %v414_v4 = vmul.f32 %v413_v3, %v397_v39 }
 0x38d   :  { %v418_v6 = vmul.f32 %v1010_v29, %v414_v4 }
 0x38f   :  { %v422_v7 = vadd.f32 %v1011_v5, %v418_v6 }
 0x391   :  { %v423_v10 = vpack.c.bf16 %v422_v7, %v422_v7 }
 0x393   :  { %869 = vmatmul.msk.bf16.vlgmr.msrb.gmra.mxu1 %vm193_vm0, %v423_v10 }
 0x3a3   :  { %915 = vmatmul.msk.bf16.vlgmr.msra.gmra.mxu1 %vm617_vm6, %v596_v14 }
 0x410   :  { %v472_v16 = vpop.f32.mrf.mxu1 }
 0x411   :  { %v473_v17 = vadd.f32 %v1012_v15, %v472_v16 }
 0x413   :  { %476 = vst [vmem:[%s1420_s25] sm:$0xff] %v473_v17 }
 0x418   :  { %v474_v18 = vpop.f32.mrf.mxu1 }
 0x420   :  { %v630_v20 = vpop.f32.mrf.mxu1 }
 0x421   :  { %v631_v21 = vadd.f32 %v1013_v19, %v630_v20 }
 0x423   :  { %634 = vst [vmem:[%s1421_s26] sm:$0xff] %v631_v21 }
 0x428   :  { %v632_v22 = vpop.f32.mrf.mxu1 }

// kernel: cvae_forward.3
= control target key start
LH: loop header
LB: loop body
LE: loop exit
PB: predicated region body
PF: predicated region fallthrough
CT: control target
= control target key end

     0   :  { %s2525_s18 = smov 0   ;;  %s3056_s0 = inlined_call_operand.vmem [shape: bf16[3,64,32], index: 0, kind: input, shape index: {}]   ;;  %s3057_s1 = inlined_call_operand.vmem [shape: bf16[3,32,256], index: 1, kind: input, shape index: {}]   ;;  %s3058_s2 = inlined_call_operand.vmem [shape: f32[3,1,256], index: 2, kind: input, shape index: {}]   ;;  %s3059_s3 = inlined_call_operand.vmem [shape: bf16[3,32,256], index: 3, kind: input, shape index: {}]   ;;  %s3060_s4 = inlined_call_operand.vmem [shape: f32[3,8,8,1], index: 4, kind: input, shape index: {}]   ;;  %s3061_s5 = inlined_call_operand.vmem [shape: f32[3,2,8,32], index: 5, kind: output, shape index: {}]  }
   0x1 LB: > { %s2216_s19 = sadd.s32 4294967295, %s2488_s18   ;;  %p2220_p0 = scmp.ge.s32.totalorder %s2488_s18, 1  ;;  %s2488_s18 = sphi %s2525_s18, %s15_s18  }
   0x2   : > { %p226_p1 = scmp.lt.s32.totalorder %s2488_s18, 4 }
   0x4   : > { %p227_p2 = pnand %p2220_p0, %p226_p1 }
   0x5   : > { %p273_p3 = scmp.lt.s32.totalorder (!%p227_p2), %s2216_s19, 2  ;;  %s2491_s30 = smov (!%p227_p2), 32  }
   0x6   : > { %230 = sbr.rel (%p227_p2) target bundleno = 5162 (0x142a), region = 40  ;;  %s2492_s10 = smov (!%p227_p2), 64  }
   0x7   : > { %s2494_s15 = smov (!%p227_p2), 96  }
   0xb   : > { %vm361_vm0 = vcmask 261120   ;;  %v2490_v0 = vmov 0.0   ;;  %s3063_s19 = smov (!%p273_p3, %s2216_s19), 2 }
   0xc   : > { %448 = vst.msk [vmem:[#allocation3] sm:$0xff] %vm361_vm0, %v2490_v0  ;;  %s2353_s20 = sshll.u32 %s3063_s19, 5  ;;  %s2225_s6 = sshll.u32 %s3063_s19, 1 }
   0xd   : > { %449 = vst.msk [vmem:[#allocation3 + $0x8] sm:$0xff] %vm361_vm0, %v2490_v0  ;;  %s282_s23 = scalar_lea.vmem %s3057_s1, %s2353_s20  ;;  %s2546_s26 = scalar_lea.vmem %s3059_s3, %s2353_s20 }
   0xe   : > { %450 = vst.msk [vmem:[#allocation4] sm:$0xff] %vm361_vm0, %v2490_v0  ;;  %v2364_v1 = vld [vmem:[%s282_s23 + $0x14] sm:$0xf]  ;;  %v2260_v2 = vld [vmem:[%s282_s23 + $0x18] sm:$0xf0]  ;;  %s2557_s29 = scalar_lea.vmem %s3056_s0, %s2353_s20  ;;  %s286_s9 = scalar_lea.vmem %s3058_s2, %s2225_s6 }
   0xf   : > { %451 = vst.msk [vmem:[#allocation4 + $0x8] sm:$0xff] %vm361_vm0, %v2490_v0  ;;  %v2263_v3 = vor.u32 %v2364_v1, %v2260_v2  ;;  %v2278_v4 = vld [vmem:[%s2546_s26 + $0x10] sm:$0xf]  ;;  %v2367_v5 = vld [vmem:[%s2546_s26 + $0x14] sm:$0xf0]  ;;  %v2358_v20 = vld [vmem:[%s2557_s29] sm:$0xff] }
  0x10   : > { %v2258_v6 = vld [vmem:[%s282_s23 + $0x10] sm:$0xf]  ;;  %v2550_v7 = vor.u32 %v2367_v5, %v2278_v4  ;;  %v2365_v8 = vld [vmem:[%s282_s23 + $0x14] sm:$0xf0]  ;;  %v2362_v9 = vld [vmem:[%s282_s23 + $0x4] sm:$0xf] }
  0x11   : > { %v2252_v10 = vld [vmem:[%s282_s23 + $0x8] sm:$0xf0]  ;;  %409 = vmatpush.bf16.msra.mxu1 %v2263_v3  ;;  %v2259_v11 = vor.u32 %v2365_v8, %v2258_v6  ;;  %v2274_v13 = vld [vmem:[%s2546_s26] sm:$0xf]  ;;  %v2366_v14 = vld [vmem:[%s2546_s26 + $0x4] sm:$0xf0] }
  0x12   : > { %v2255_v12 = vor.u32 %v2362_v9, %v2252_v10  ;;  %489 = vmatpush.bf16.msra.mxu2 %v2550_v7  ;;  %v2560_v15 = vor.u32 %v2366_v14, %v2274_v13  ;;  %v2250_v17 = vld [vmem:[%s282_s23] sm:$0xf]  ;;  %v2363_v18 = vld [vmem:[%s282_s23 + $0x4] sm:$0xf0]  ;;  %v2290_v22 = vld [vmem:[%s2546_s26 + $0x14] sm:$0xf] }
  0x13   : > { %v2562_v16 = vld [vmem:[#allocation3] sm:$0xff]  ;;  %380 = vmatpush.bf16.msra.mxu0 %v2259_v11  ;;  %v2251_v19 = vor.u32 %v2363_v18, %v2250_v17  ;;  %v2369_v23 = vld [vmem:[%s2546_s26 + $0x18] sm:$0xf0]  ;;  %v2368_v26 = vld [vmem:[%s2546_s26 + $0x8] sm:$0xf0]  ;;  %s2356_s11 = sshll.u32 %s3063_s19, 6 }
  0x14   : > { %v467_v21 = vpack.c.bf16 %v2562_v16, %v2562_v16  ;;  %v2286_v24 = vld [vmem:[%s2546_s26 + $0x4] sm:$0xf]  ;;  %v2575_v25 = vor.u32 %v2369_v23, %v2290_v22  ;;  %v2582_v28 = vld [vmem:[#allocation3 + $0x8] sm:$0xff]  ;;  %v2360_v33 = vld [vmem:[%s2557_s29 + $0x10] sm:$0xff]  ;;  %s2648_s14 = scalar_lea.vmem %s3060_s4, %s2356_s11  ;;  %v2493_v18 = vmov 0   ;;  %s2357_s16 = sshll.u32 %s3063_s19, 4 }
  0x15   : > { %410 = vmatpush.bf16.msra.mxu1 %v2255_v12  ;;  %v2580_v27 = vor.u32 %v2368_v26, %v2286_v24  ;;  %v584_v29 = vpack.c.bf16 %v2582_v28, %v2582_v28  ;;  %v2359_v30 = vld [vmem:[%s2557_s29 + $0x8] sm:$0xff]  ;;  %v2603_v31 = vld [vmem:[#allocation4] sm:$0xff]  ;;  %v2361_v34 = vld [vmem:[%s2557_s29 + $0x18] sm:$0xff]  ;;  %2384 = vset.pattern.permute.xlu1 %v2493_v18  ;;  %s301_s21 = scalar_lea.vmem %s3061_s5, %s2357_s16 }
  0x16   : > { %490 = vmatpush.bf16.msra.mxu2 %v2560_v15  ;;  %606 = vmatpush.bf16.msra.mxu3 %v2575_v25  ;;  %v2609_v32 = vld [vmem:[#allocation4 + $0x8] sm:$0xff]  ;;  %v315_v35 = vld [vmem:[%s286_s9] sm:$0x3] }
  0x17   : > { %381 = vmatpush.bf16.msra.mxu0 %v2251_v19  ;;  %519 = vrot.lane.b32.xlu1 %v2603_v31, %s2491_s30  ;;  %v318_v36 = vperm.slane %v315_v35, 1  ;;  %v2623_v38 = vperm.slane %v315_v35, 0  ;;  %v2283_v17 = vld [vmem:[%s2648_s14 + $0x38] sm:$0xff] }
  0x18   : > { %2268 = vmatmul.msk.bf16.vlgmr.msra.gmra.mxu1 %vm361_vm0, %v2358_v20  ;;  %v662_v19 = vsub.f32 1.0, %v2283_v17  ;;  %2383 = vset.pattern.permute.xlu0 %v2493_v18 }
  0x19   : > { %2280 = vmatmul.msk.bf16.vlgmr.msra.gmra.mxu2 %vm361_vm0, %v467_v21  ;;  %1422 = vmatpush.bf16.msrb.mxu1 %v2575_v25 }
  0x1a   : > { %709 = vmatpush.bf16.msrb.mxu2 %v2550_v7  ;;  %2264 = vmatmul.msk.bf16.vlgmr.msra.gmra.mxu0 %vm361_vm0, %v2358_v20 }
  0x1b   : > { %1323 = vmatpush.bf16.msrb.mxu0 %v2550_v7  ;;  %607 = vmatpush.bf16.msra.mxu3 %v2580_v27 }
  0x1c   : > { %2385 = vset.pattern.permute.xlu2 %v2493_v18 }
  0x1d   : > { %1423 = vmatpush.bf16.msrb.mxu1 %v2580_v27 }
  0x1e   : > { %710 = vmatpush.bf16.msrb.mxu2 %v2560_v15  ;;  %2292 = vmatmul.msk.bf16.vlgmr.msra.gmra.mxu3 %vm361_vm0, %v584_v29 }
  0x1f   : > { %1324 = vmatpush.bf16.msrb.mxu0 %v2560_v15  ;;  %812 = vmatpush.bf16.msrb.mxu3 %v2575_v25 }
  0x20   : > { %636 = vrot.lane.b32.xlu1 %v2609_v32, %s2491_s30 }
  0x21   : > { %1818 = vmatpush.bf16.msra.mxu1 %v2575_v25 }
  0x22   : > { %915 = vmatpush.bf16.msra.mxu2 %v2550_v7 }
  0x23   : > { %1719 = vmatpush.bf16.msra.mxu0 %v2550_v7  ;;  %813 = vmatpush.bf16.msrb.mxu3 %v2580_v27 }
  0x25   : > { %1819 = vmatpush.bf16.msra.mxu1 %v2580_v27 }
  0x26   : > { %916 = vmatpush.bf16.msra.mxu2 %v2560_v15 }
  0x27   : > { %1720 = vmatpush.bf16.msra.mxu0 %v2560_v15  ;;  %1018 = vmatpush.bf16.msra.mxu3 %v2575_v25 }
  0x28   : > { %2269 = vmatmul.msk.bf16.gmra.mxu1 %vm361_vm0, %v2359_v30  ;;  %665 = vperm.xlu1 %2384, %v662_v19  }
  0x2a   : > { %2265 = vmatmul.msk.bf16.gmra.mxu0 %vm361_vm0, %v2359_v30 }
  0x2b   : > { %1019 = vmatpush.bf16.msra.mxu3 %v2580_v27 }
  0x38   : > { %2270 = vmatmul.msk.bf16.gmra.mxu1 %vm361_vm0, %v2360_v33 }
  0x3a   : > { %2266 = vmatmul.msk.bf16.gmra.mxu0 %vm361_vm0, %v2360_v33 }
  0x48   : > { %2271 = vmatmul.msk.bf16.gmra.mxu1 %vm361_vm0, %v2361_v34 }
  0x4a   : > { %2267 = vmatmul.msk.bf16.gmra.mxu0 %vm361_vm0, %v2361_v34 }
  0x95   : > { %v412_v37 = vpop.f32.mrf.mxu1 }
  0x96   : > { %v2625_v39 = vadd.f32 %v412_v37, %v318_v36 }
  0x97   : > { %v383_v40 = vpop.f32.mrf.mxu0 }
  0x98   : > { %v384_v41 = vadd.f32 %v383_v40, %v2623_v38 }
  0x9c   : > { %v492_v42 = vpop.f32.mrf.mxu2 }
  0x9d   : > { %v496_v43 = vadd.f32 %v492_v42, %v384_v41  ;;  %v414_v44 = vpop.f32.mrf.mxu1  ;;  %v464_v41 = vld [vmem:[%s2648_s14] sm:$0xff] }
  0x9e   : > { %v2628_v45 = vadd.f32 %v414_v44, %v318_v36  ;;  %v545_v42 = vsub.f32 1.0, %v464_v41 }
  0x9f   : > { %v2281_v46 = vmul.f32 -1.442695, %v496_v43 }
  0xa1   : > { %2386 = vpow2.f32 %v2281_v46  ;;  %v609_v50 = vpop.f32.mrf.mxu3 }
  0xa4   : > { %v494_v47 = vpop.f32.mrf.mxu2 }
  0xa5   : > { %v417_v48 = vpop.f32.mrf.mxu1 }
  0xa6   : > { %v2630_v49 = vadd.f32 %v417_v48, %v318_v36  ;;  %v520_v48 = vpop.permute.xlu1 %519 }
  0xa7   : > { %v2387_v51 = vpop.eup %2386 }
  0xa8   : > { %v500_v52 = vadd.f32 1.0, %v2387_v51 }
  0xa9   : > { %v611_v55 = vpop.f32.mrf.mxu3 }
  0xaa   : > { %2388 = vrcp.f32 %v500_v52  ;;  %v512_v58 = vand.u32 2147483648, %v500_v52  ;;  %vm506_vm1 = vweird.f32 %v500_v52  ;;  %v510_v60 = vand.u32 2147483647, %v500_v52 }
  0xac   : > { %v513_v0 = vor.u32 1.1754944e-38, %v512_v58  ;;  %vm511_vm4 = vcmp.eq.f32.partialorder %v510_v60, 8.507059e+37 }
  0xad   : > { %v419_v53 = vpop.f32.mrf.mxu1 }
  0xae   : > { %v2632_v54 = vadd.f32 %v419_v53, %v318_v36  ;;  %v637_v53 = vpop.permute.xlu1 %636 }
  0xb0   : > { %v2389_v56 = vpop.eup %2388 }
  0xb1   : > { %v502_v57 = vmul.f32 %v2389_v56, %v500_v52  ;;  %vm507_vm2 = vweird.f32 %v2389_v56 }
  0xb2   : > { %vm508_vm3 = vmor %vm506_vm1, %vm507_vm2 }
  0xb3   : > { %v503_v59 = vsub.f32 1.0, %v502_v57 }
  0xb5   : > { %v422_v61 = vpop.f32.mrf.mxu1  ;;  %v504_v62 = vmul.f32 %v2389_v56, %v503_v59 }
  0xb6   : > { %v2634_v63 = vadd.f32 %v422_v61, %v318_v36 }
  0xb7   : > { %v505_v1 = vadd.f32 %v2389_v56, %v504_v62 }
  0xb9   : > { %v509_v2 = vsel %vm508_vm3, %v2389_v56, %v505_v1  ;;  %v666_v56 = vpop.permute.xlu1 %665 }
  0xba   : > { %v2636_v3 = vsel %vm511_vm4, %v513_v0, %v509_v2  ;;  %v668_v57 = vmul.f32 %v666_v56, %v2582_v28 }
  0xbb   : > { %v516_v4 = vmul.f32 2.0, %v2636_v3 }
  0xbd   : > { %v424_v5 = vpop.f32.mrf.mxu1  ;;  %v2282_v6 = vadd.f32 -1.0, %v516_v4 }
  0xbe   : > { %v2639_v8 = vadd.f32 %v424_v5, %v318_v36 }
  0xbf   : > { %524 = vrot.lane.b32.xlu0 %v2282_v6, %s2492_s10 }
  0xc5   : > { %v427_v9 = vpop.f32.mrf.mxu1 }
  0xc6   : > { %v2642_v10 = vadd.f32 %v427_v9, %v318_v36 }
  0xcd   : > { %v429_v11 = vpop.f32.mrf.mxu1 }
  0xce   : > { %v430_v12 = vadd.f32 %v429_v11, %v318_v36 }
  0xd0   : > { %v613_v13 = vadd.f32 %v609_v50, %v430_v12  ;;  %v522_v50 = vmul.f32 %v520_v48, %v2636_v3 }
  0xd2   : > { %v2293_v14 = vmul.f32 -1.442695, %v613_v13 }
  0xd4   : > { %2390 = vpow2.f32 %v2293_v14 }
  0xda   : > { %v2391_v20 = vpop.eup %2390 }
  0xdb   : > { %v617_v21 = vadd.f32 1.0, %v2391_v20  ;;  %v675_v20 = vmul.f32 %v666_v56, %v2609_v32 }
  0xdd   : > { %2392 = vrcp.f32 %v617_v21  ;;  %v629_v26 = vand.u32 2147483648, %v617_v21  ;;  %v627_v30 = vand.u32 2147483647, %v617_v21  ;;  %vm623_vm6 = vweird.f32 %v617_v21 }
  0xdf   : > { %v630_v34 = vor.u32 1.1754944e-38, %v629_v26  ;;  %vm628_vm8 = vcmp.eq.f32.partialorder %v627_v30, 8.507059e+37 }
  0xe3   : > { %v2393_v22 = vpop.eup %2392 }
  0xe4   : > { %v619_v23 = vmul.f32 %v2393_v22, %v617_v21  ;;  %vm624_vm5 = vweird.f32 %v2393_v22 }
  0xe5   : > { %vm625_vm7 = vmor %vm623_vm6, %vm624_vm5 }
  0xe6   : > { %v620_v24 = vsub.f32 1.0, %v619_v23 }
  0xe8   : > { %v621_v29 = vmul.f32 %v2393_v22, %v620_v24 }
  0xea   : > { %v622_v33 = vadd.f32 %v2393_v22, %v621_v29 }
  0xec   : > { %v626_v35 = vsel %vm625_vm7, %v2393_v22, %v622_v33 }
  0xed   : > { %v631_v36 = vsel %vm628_vm8, %v630_v34, %v626_v35 }
  0xee   : > { %v633_v37 = vmul.f32 2.0, %v631_v36  ;;  %v639_v60 = vmul.f32 %v637_v53, %v631_v36 }
  0xf0   : > { %v2294_v40 = vadd.f32 -1.0, %v633_v37 }
  0xf2   : > { %641 = vrot.lane.b32.xlu0 %v2294_v40, %s2492_s10 }
  0xfa   : > { %548 = vperm.xlu0 %2383, %v545_v42  }
 0x102   : > { %658 = vperm.xlu0 %2383, %v2283_v17  }
 0x131   : > { %v525_v43 = vpop.permute.xlu0 %524 }
 0x132   : > { %v527_v44 = vmul.f32 %v525_v43, %v2636_v3 }
 0x134   : > { %529 = vrot.lane.b32.xlu2 %v527_v44, %s2491_s30 }
 0x164   : > { %v642_v46 = vpop.permute.xlu0 %641 }
 0x165   : > { %v644_v47 = vmul.f32 %v642_v46, %v631_v36 }
 0x167   : > { %646 = vrot.lane.b32.xlu2 %v644_v47, %s2491_s30 }
 0x16c   : > { %v549_v58 = vpop.permute.xlu0 %548 }
 0x16d   : > { %v558_v59 = vmul.f32 %v549_v58, %v2603_v31  ;;  %v551_v1 = vmul.f32 %v549_v58, %v2562_v16 }
 0x16f   : > { %541 = vperm.xlu2 %2385, %v464_v41  }
 0x174   : > { %v659_v9 = vpop.permute.xlu0 %658 }
 0x18e   : > { %v530_v51 = vpop.permute.xlu2 %529 }
 0x18f   : > { %v532_v52 = vadd.f32 %v530_v51, %v522_v50 }
 0x191   : > { %2394 = vtanh.f32 %v532_v52 }
 0x197   : > { %v2395_v55 = vpop.eup %2394 }
 0x198   : > { %535 = vrot.lane.b32.xlu2 %v2395_v55, %s2492_s10 }
 0x1a0   : > { %670 = vrot.lane.b32.xlu2 %v668_v57, %s2494_s15 }
 0x1a8   : > { %560 = vrot.lane.b32.xlu2 %v558_v59, %s2491_s30 }
 0x1c1   : > { %v647_v61 = vpop.permute.xlu2 %646 }
 0x1c2   : > { %v649_v62 = vadd.f32 %v647_v61, %v639_v60 }
 0x1c4   : > { %2396 = vtanh.f32 %v649_v62  ;;  %v674_v26 = vmul.f32 %v659_v9, %v649_v62 }
 0x1c9   : > { %v542_v28 = vpop.permute.xlu2 %541 }
 0x1ca   : > { %v2397_v0 = vpop.eup %2396  ;;  %v557_v19 = vmul.f32 %v542_v28, %v532_v52 }
 0x1cb   : > { %652 = vrot.lane.b32.xlu1 %v2397_v0, %s2492_s10 }
 0x1d3   : > { %553 = vrot.lane.b32.xlu1 %v551_v1, %s2494_s15 }
 0x1f2   : > { %v536_v2 = vpop.permute.xlu2 %535 }
 0x1f3   : > { %v538_v31 = vmul.f32 %v536_v2, %v2636_v3 }
 0x1f5   : > { %v544_v13 = vmul.f32 %v542_v28, %v538_v31 }
 0x1fa   : > { %v671_v4 = vpop.permute.xlu2 %670 }
 0x202   : > { %v561_v18 = vpop.permute.xlu2 %560 }
 0x203   : > { %v563_v16 = vadd.f32 %v561_v18, %v557_v19 }
 0x23d   : > { %v653_v5 = vpop.permute.xlu1 %652 }
 0x23e   : > { %v655_v6 = vmul.f32 %v653_v5, %v631_v36  ;;  %v385_v36 = vpop.f32.mrf.mxu0 }
 0x23f   : > { %v386_v41 = vadd.f32 %v385_v36, %v2623_v38 }
 0x240   : > { %v661_v11 = vmul.f32 %v659_v9, %v655_v6 }
 0x242   : > { %v673_v12 = vadd.f32 %v671_v4, %v661_v11 }
 0x244   : > { %682 = vrot.lane.b32.xlu1 %v673_v12, %s2491_s30 }
 0x245   : > { %v554_v14 = vpop.permute.xlu1 %553 }
 0x246   : > { %v556_v17 = vadd.f32 %v554_v14, %v544_v13 }
 0x248   : > { %565 = vrot.lane.b32.xlu0 %v556_v17, %s2491_s30 }
 0x24c   : > { %570 = vrot.lane.b32.xlu1 %v563_v16, %s2494_s15  ;;  %v2295_v16 = vld [vmem:[%s2648_s14 + $0x8] sm:$0xff] }
 0x250   : > { %677 = vrot.lane.b32.xlu0 %v675_v20, %s2491_s30  ;;  %v765_v20 = vsub.f32 1.0, %v2295_v16 }
 0x2b6   : > { %v683_v21 = vpop.permute.xlu1 %682 }
 0x2b7   : > { %685 = vst.msk [vmem:[#allocation3 + $0x8] sm:$0xff] %vm361_vm0, %v683_v21 }
 0x2ba   : > { %v566_v3 = vpop.permute.xlu0 %565 }
 0x2bb   : > { %568 = vst.msk [vmem:[#allocation3] sm:$0xff] %vm361_vm0, %v566_v3 }
 0x2be   : > { %v571_v22 = vpop.permute.xlu1 %570  ;;  %v2673_v23 = vld [vmem:[#allocation3 + $0x8] sm:$0xff] }
 0x2bf   : > { %573 = vst.msk [vmem:[#allocation4] sm:$0xff] %vm361_vm0, %v571_v22  ;;  %v802_v24 = vpack.c.bf16 %v2673_v23, %v2673_v23 }
 0x2c1   : > { %2300 = vmatmul.msk.bf16.vlgmr.msrb.gmra.mxu3 %vm361_vm0, %v802_v24 }
 0x2c2   : > { %v678_v32 = vpop.permute.xlu0 %677  ;;  %v2679_v29 = vld [vmem:[#allocation3] sm:$0xff]  ;;  %1224 = vmatpush.bf16.msrb.mxu3 %v2575_v25 }
 0x2c3   : > { %v680_v30 = vadd.f32 %v678_v32, %v674_v26  ;;  %v699_v33 = vpack.c.bf16 %v2679_v29, %v2679_v29  ;;  %v2299_v26 = vld [vmem:[%s2648_s14 + $0x30] sm:$0xff] }
 0x2c4   : > { %v868_v32 = vsub.f32 1.0, %v2299_v26 }
 0x2c5   : > { %2296 = vmatmul.msk.bf16.vlgmr.msrb.gmra.mxu2 %vm361_vm0, %v699_v33  ;;  %687 = vrot.lane.b32.xlu2 %v680_v30, %s2494_s15 }
 0x2c6   : > { %1225 = vmatpush.bf16.msrb.mxu3 %v2580_v27  ;;  %1121 = vmatpush.bf16.msrb.mxu2 %v2550_v7  ;;  %v2689_v34 = vld [vmem:[#allocation4] sm:$0xff] }
 0x2ca   : > { %1122 = vmatpush.bf16.msrb.mxu2 %v2560_v15 }
 0x2cd   : > { %739 = vrot.lane.b32.xlu2 %v2689_v34, %s2491_s30 }
 0x31f   : > { %v688_v35 = vpop.permute.xlu2 %687 }
 0x320   : > { %690 = vst.msk [vmem:[#allocation4 + $0x8] sm:$0xff] %vm361_vm0, %v688_v35 }
 0x327   : > { %v801_v19 = vld [vmem:[#allocation4 + $0x8] sm:$0xff]  ;;  %v740_v30 = vpop.permute.xlu2 %739 }
 0x344   : > { %v815_v37 = vpop.f32.mrf.mxu3 }
 0x345   : > { %v819_v40 = vadd.f32 %v815_v37, %v2642_v10 }
 0x347   : > { %v2301_v42 = vmul.f32 -1.442695, %v819_v40 }
 0x348   : > { %v712_v43 = vpop.f32.mrf.mxu2 }
 0x349   : > { %2398 = vpow2.f32 %v2301_v42  ;;  %v716_v44 = vadd.f32 %v712_v43, %v386_v41 }
 0x34b   : > { %v2297_v46 = vmul.f32 -1.442695, %v716_v44 }
 0x34c   : > { %v817_v47 = vpop.f32.mrf.mxu3 }
 0x34d   : > { %2400 = vpow2.f32 %v2297_v46 }
 0x34f   : > { %v2399_v48 = vpop.eup %2398 }
 0x350   : > { %v823_v50 = vadd.f32 1.0, %v2399_v48  ;;  %v714_v51 = vpop.f32.mrf.mxu2 }
 0x352   : > { %2402 = vrcp.f32 %v823_v50  ;;  %v833_v58 = vand.u32 2147483647, %v823_v50  ;;  %v835_v59 = vand.u32 2147483648, %v823_v50  ;;  %vm829_vm10 = vweird.f32 %v823_v50 }
 0x353   : > { %v2401_v52 = vpop.eup %2400 }
 0x354   : > { %v720_v53 = vadd.f32 1.0, %v2401_v52  ;;  %vm834_vm12 = vcmp.eq.f32.partialorder %v833_v58, 8.507059e+37  ;;  %v836_v1 = vor.u32 1.1754944e-38, %v835_v59 }
 0x356   : > { %2404 = vrcp.f32 %v720_v53  ;;  %v732_v28 = vand.u32 2147483648, %v720_v53  ;;  %v730_v5 = vand.u32 2147483647, %v720_v53  ;;  %vm726_vm14 = vweird.f32 %v720_v53 }
 0x358   : > { %v2403_v55 = vpop.eup %2402  ;;  %v733_v11 = vor.u32 1.1754944e-38, %v732_v28  ;;  %vm731_vm1 = vcmp.eq.f32.partialorder %v730_v5, 8.507059e+37 }
 0x359   : > { %v825_v56 = vmul.f32 %v2403_v55, %v823_v50  ;;  %vm830_vm9 = vweird.f32 %v2403_v55 }
 0x35a   : > { %vm831_vm11 = vmor %vm829_vm10, %vm830_vm9 }
 0x35b   : > { %v826_v57 = vsub.f32 1.0, %v825_v56 }
 0x35c   : > { %v2405_v10 = vpop.eup %2404 }
 0x35d   : > { %v722_v60 = vmul.f32 %v2405_v10, %v720_v53  ;;  %v827_v61 = vmul.f32 %v2403_v55, %v826_v57  ;;  %vm727_vm13 = vweird.f32 %v2405_v10 }
 0x35e   : > { %vm728_vm15 = vmor %vm726_vm14, %vm727_vm13 }
 0x35f   : > { %v723_v62 = vsub.f32 1.0, %v722_v60  ;;  %v828_v0 = vadd.f32 %v2403_v55, %v827_v61 }
 0x361   : > { %v832_v2 = vsel %vm831_vm11, %v2403_v55, %v828_v0  ;;  %v724_v4 = vmul.f32 %v2405_v10, %v723_v62 }
 0x362   : > { %v2696_v6 = vsel %vm834_vm12, %v836_v1, %v832_v2 }
 0x363   : > { %v839_v9 = vmul.f32 2.0, %v2696_v6  ;;  %v725_v31 = vadd.f32 %v2405_v10, %v724_v4 }
 0x365   : > { %v2302_v12 = vadd.f32 -1.0, %v839_v9  ;;  %v729_v13 = vsel %vm728_vm15, %v2405_v10, %v725_v31 }
 0x366   : > { %v734_v14 = vsel %vm731_vm1, %v733_v11, %v729_v13 }
 0x367   : > { %847 = vrot.lane.b32.xlu1 %v2302_v12, %s2492_s10  ;;  %v736_v17 = vmul.f32 2.0, %v734_v14  ;;  %v742_v43 = vmul.f32 %v740_v30, %v734_v14 }
 0x369   : > { %v2298_v18 = vadd.f32 -1.0, %v736_v17 }
 0x36b   : > { %744 = vrot.lane.b32.xlu0 %v2298_v18, %s2492_s10  ;;  %v388_v18 = vpop.f32.mrf.mxu0 }
 0x373   : > { %842 = vrot.lane.b32.xlu0 %v801_v19, %s2491_s30 }
 0x37b   : > { %768 = vperm.xlu0 %2383, %v765_v20  }
 0x3d9   : > { %v848_v21 = vpop.permute.xlu1 %847 }
 0x3da   : > { %v850_v3 = vmul.f32 %v848_v21, %v2696_v6 }
 0x3dc   : > { %852 = vrot.lane.b32.xlu2 %v850_v3, %s2491_s30 }
 0x3dd   : > { %v745_v22 = vpop.permute.xlu0 %744 }
 0x3de   : > { %v747_v24 = vmul.f32 %v745_v22, %v734_v14 }
 0x3e0   : > { %749 = vrot.lane.b32.xlu1 %v747_v24, %s2491_s30 }
 0x3e5   : > { %v843_v33 = vpop.permute.xlu0 %842 }
 0x3e6   : > { %v845_v35 = vmul.f32 %v843_v33, %v2696_v6 }
 0x3e8   : > { %871 = vperm.xlu1 %2384, %v868_v32  }
 0x3ed   : > { %v769_v41 = vpop.permute.xlu0 %768 }
 0x3ee   : > { %v771_v42 = vmul.f32 %v769_v41, %v2679_v29  ;;  %v778_v51 = vmul.f32 %v769_v41, %v2689_v34 }
 0x3f0   : > { %761 = vperm.xlu1 %2384, %v2295_v16  }
 0x436   : > { %v853_v36 = vpop.permute.xlu2 %852 }
 0x437   : > { %v855_v37 = vadd.f32 %v853_v36, %v845_v35 }
 0x439   : > { %2406 = vtanh.f32 %v855_v37 }
 0x43f   : > { %v2407_v40 = vpop.eup %2406 }
 0x440   : > { %858 = vrot.lane.b32.xlu0 %v2407_v40, %s2492_s10 }
 0x448   : > { %773 = vrot.lane.b32.xlu0 %v771_v42, %s2494_s15 }
 0x452   : > { %v750_v44 = vpop.permute.xlu1 %749 }
 0x453   : > { %v752_v46 = vadd.f32 %v750_v44, %v742_v43 }
 0x455   : > { %2408 = vtanh.f32 %v752_v46 }
 0x45a   : > { %v872_v47 = vpop.permute.xlu1 %871 }
 0x45b   : > { %v2409_v48 = vpop.eup %2408  ;;  %v874_v50 = vmul.f32 %v872_v47, %v2673_v23  ;;  %v881_v58 = vmul.f32 %v872_v47, %v801_v19  ;;  %v389_v19 = vadd.f32 %v388_v18, %v2623_v38  ;;  %v2754_v47 = vld [vmem:[%s2648_s14 + $0x10] sm:$0xff] }
 0x45c   : > { %755 = vrot.lane.b32.xlu2 %v2409_v48, %s2492_s10 }
 0x45d   : > { %876 = vrot.lane.b32.xlu1 %v874_v50, %s2494_s15 }
 0x462   : > { %v762_v55 = vpop.permute.xlu1 %761 }
 0x463   : > { %v777_v62 = vmul.f32 %v762_v55, %v752_v46 }
 0x464   : > { %864 = vperm.xlu2 %2385, %v2299_v26  }
 0x465   : > { %780 = vrot.lane.b32.xlu1 %v778_v51, %s2491_s30  ;;  %v971_v51 = vsub.f32 1.0, %v2754_v47 }
 0x4b2   : > { %v859_v29 = vpop.permute.xlu0 %858 }
 0x4b3   : > { %v861_v59 = vmul.f32 %v859_v29, %v2696_v6 }
 0x4b6   : > { %v756_v52 = vpop.permute.xlu2 %755 }
 0x4b7   : > { %v758_v53 = vmul.f32 %v756_v52, %v734_v14 }
 0x4b9   : > { %v764_v56 = vmul.f32 %v762_v55, %v758_v53 }
 0x4ba   : > { %v774_v57 = vpop.permute.xlu0 %773 }
 0x4bb   : > { %v776_v10 = vadd.f32 %v774_v57, %v764_v56 }
 0x4bd   : > { %785 = vrot.lane.b32.xlu2 %v776_v10, %s2491_s30 }
 0x4be   : > { %v865_v23 = vpop.permute.xlu2 %864 }
 0x4bf   : > { %v867_v60 = vmul.f32 %v865_v23, %v861_v59  ;;  %v880_v2 = vmul.f32 %v865_v23, %v855_v37 }
 0x4c5   : > { %883 = vrot.lane.b32.xlu2 %v881_v58, %s2491_s30 }
 0x4cf   : > { %v877_v34 = vpop.permute.xlu1 %876 }
 0x4d0   : > { %v879_v61 = vadd.f32 %v877_v34, %v867_v60 }
 0x4d2   : > { %888 = vrot.lane.b32.xlu0 %v879_v61, %s2491_s30 }
 0x4d7   : > { %v781_v0 = vpop.permute.xlu1 %780 }
 0x4d8   : > { %v783_v1 = vadd.f32 %v781_v0, %v777_v62 }
 0x4da   : > { %790 = vrot.lane.b32.xlu0 %v783_v1, %s2494_s15 }
 0x517   : > { %v786_v28 = vpop.permute.xlu2 %785 }
 0x518   : > { %788 = vst.msk [vmem:[#allocation3] sm:$0xff] %vm361_vm0, %v786_v28 }
 0x51f   : > { %v884_v4 = vpop.permute.xlu2 %883  ;;  %v2722_v5 = vld [vmem:[#allocation3] sm:$0xff] }
 0x520   : > { %v886_v9 = vadd.f32 %v884_v4, %v880_v2  ;;  %v905_v6 = vpack.c.bf16 %v2722_v5, %v2722_v5  ;;  %v2764_v2 = vld [vmem:[%s2648_s14 + $0x28] sm:$0xff] }
 0x521   : > { %v1074_v4 = vsub.f32 1.0, %v2764_v2 }
 0x522   : > { %2304 = vmatmul.msk.bf16.vlgmr.msra.gmra.mxu2 %vm361_vm0, %v905_v6  ;;  %893 = vrot.lane.b32.xlu1 %v886_v9, %s2494_s15 }
 0x523   : > { %1521 = vmatpush.bf16.msra.mxu2 %v2550_v7 }
 0x527   : > { %1522 = vmatpush.bf16.msra.mxu2 %v2560_v15 }
 0x544   : > { %v889_v31 = vpop.permute.xlu0 %888 }
 0x545   : > { %891 = vst.msk [vmem:[#allocation3 + $0x8] sm:$0xff] %vm361_vm0, %v889_v31 }
 0x54c   : > { %v791_v11 = vpop.permute.xlu0 %790  ;;  %v2731_v12 = vld [vmem:[#allocation3 + $0x8] sm:$0xff] }
 0x54d   : > { %793 = vst.msk [vmem:[#allocation4] sm:$0xff] %vm361_vm0, %v791_v11  ;;  %v1008_v13 = vpack.c.bf16 %v2731_v12, %v2731_v12 }
 0x54f   : > { %2308 = vmatmul.msk.bf16.vlgmr.msra.gmra.mxu3 %vm361_vm0, %v1008_v13 }
 0x550   : > { %1620 = vmatpush.bf16.msra.mxu3 %v2575_v25 }
 0x554   : > { %v2738_v14 = vld [vmem:[#allocation4] sm:$0xff]  ;;  %1621 = vmatpush.bf16.msra.mxu3 %v2580_v27 }
 0x555   : > { %945 = vrot.lane.b32.xlu1 %v2738_v14, %s2491_s30 }
 0x594   : > { %v894_v17 = vpop.permute.xlu1 %893 }
 0x595   : > { %896 = vst.msk [vmem:[#allocation4 + $0x8] sm:$0xff] %vm361_vm0, %v894_v17 }
 0x59c   : > { %v2749_v46 = vld [vmem:[#allocation4 + $0x8] sm:$0xff] }
 0x5a5   : > { %v918_v16 = vpop.f32.mrf.mxu2 }
 0x5a6   : > { %v922_v20 = vadd.f32 %v918_v16, %v389_v19 }
 0x5a8   : > { %v2305_v21 = vmul.f32 -1.442695, %v922_v20 }
 0x5aa   : > { %2410 = vpow2.f32 %v2305_v21 }
 0x5ad   : > { %v920_v3 = vpop.f32.mrf.mxu2 }
 0x5b0   : > { %v2411_v22 = vpop.eup %2410 }
 0x5b1   : > { %v926_v24 = vadd.f32 1.0, %v2411_v22 }
 0x5b3   : > { %2412 = vrcp.f32 %v926_v24  ;;  %v938_v33 = vand.u32 2147483648, %v926_v24  ;;  %v936_v36 = vand.u32 2147483647, %v926_v24  ;;  %vm932_vm3 = vweird.f32 %v926_v24 }
 0x5b5   : > { %v939_v40 = vor.u32 1.1754944e-38, %v938_v33  ;;  %vm937_vm5 = vcmp.eq.f32.partialorder %v936_v36, 8.507059e+37 }
 0x5b9   : > { %v2413_v26 = vpop.eup %2412 }
 0x5ba   : > { %v928_v32 = vmul.f32 %v2413_v26, %v926_v24  ;;  %vm933_vm2 = vweird.f32 %v2413_v26 }
 0x5bb   : > { %vm934_vm4 = vmor %vm932_vm3, %vm933_vm2 }
 0x5bc   : > { %v929_v30 = vsub.f32 1.0, %v928_v32 }
 0x5be   : > { %v930_v35 = vmul.f32 %v2413_v26, %v929_v30 }
 0x5c0   : > { %v931_v37 = vadd.f32 %v2413_v26, %v930_v35 }
 0x5c2   : > { %v935_v41 = vsel %vm934_vm4, %v2413_v26, %v931_v37 }
 0x5c3   : > { %v2745_v42 = vsel %vm937_vm5, %v939_v40, %v935_v41 }
 0x5c4   : > { %v942_v43 = vmul.f32 2.0, %v2745_v42 }
 0x5c6   : > { %v2306_v44 = vadd.f32 -1.0, %v942_v43 }
 0x5c7   : > { %v946_v31 = vpop.permute.xlu1 %945 }
 0x5c8   : > { %950 = vrot.lane.b32.xlu2 %v2306_v44, %s2492_s10  ;;  %v948_v11 = vmul.f32 %v946_v31, %v2745_v42 }
 0x5d0   : > { %1048 = vrot.lane.b32.xlu2 %v2749_v46, %s2491_s30 }
 0x5d2   : > { %v1021_v48 = vpop.f32.mrf.mxu3 }
 0x5d3   : > { %v1025_v50 = vadd.f32 %v1021_v48, %v2639_v8 }
 0x5d5   : > { %v2309_v29 = vmul.f32 -1.442695, %v1025_v50 }
 0x5d7   : > { %2414 = vpow2.f32 %v2309_v29 }
 0x5d8   : > { %974 = vperm.xlu2 %2385, %v971_v51  }
 0x5da   : > { %v1023_v52 = vpop.f32.mrf.mxu3 }
 0x5dd   : > { %v2415_v53 = vpop.eup %2414 }
 0x5de   : > { %v1029_v55 = vadd.f32 1.0, %v2415_v53 }
 0x5e0   : > { %2416 = vrcp.f32 %v1029_v55  ;;  %v1041_v58 = vand.u32 2147483648, %v1029_v55  ;;  %v1039_v59 = vand.u32 2147483647, %v1029_v55  ;;  %vm1035_vm7 = vweird.f32 %v1029_v55 }
 0x5e2   : > { %v1042_v60 = vor.u32 1.1754944e-38, %v1041_v58  ;;  %vm1040_vm9 = vcmp.eq.f32.partialorder %v1039_v59, 8.507059e+37 }
 0x5e6   : > { %v2417_v56 = vpop.eup %2416 }
 0x5e7   : > { %v1031_v57 = vmul.f32 %v2417_v56, %v1029_v55  ;;  %vm1036_vm6 = vweird.f32 %v2417_v56 }
 0x5e8   : > { %vm1037_vm8 = vmor %vm1035_vm7, %vm1036_vm6 }
 0x5e9   : > { %v1032_v10 = vsub.f32 1.0, %v1031_v57 }
 0x5eb   : > { %v1033_v23 = vmul.f32 %v2417_v56, %v1032_v10 }
 0x5ed   : > { %v1034_v8 = vadd.f32 %v2417_v56, %v1033_v23 }
 0x5ef   : > { %v1038_v34 = vsel %vm1037_vm8, %v2417_v56, %v1034_v8 }
 0x5f0   : > { %v1043_v61 = vsel %vm1040_vm9, %v1042_v60, %v1038_v34 }
 0x5f1   : > { %v1045_v62 = vmul.f32 2.0, %v1043_v61 }
 0x5f3   : > { %v2310_v0 = vadd.f32 -1.0, %v1045_v62 }
 0x5f5   : > { %1053 = vrot.lane.b32.xlu0 %v2310_v0, %s2492_s10 }
 0x622   : > { %v951_v1 = vpop.permute.xlu2 %950 }
 0x623   : > { %v953_v28 = vmul.f32 %v951_v1, %v2745_v42 }
 0x625   : > { %955 = vrot.lane.b32.xlu0 %v953_v28, %s2491_s30 }
 0x62a   : > { %v1049_v18 = vpop.permute.xlu2 %1048 }
 0x62b   : > { %v1051_v22 = vmul.f32 %v1049_v18, %v1043_v61 }
 0x62d   : > { %1077 = vperm.xlu0 %2383, %v1074_v4  }
 0x632   : > { %v975_v21 = vpop.permute.xlu2 %974 }
 0x633   : > { %v984_v3 = vmul.f32 %v975_v21, %v2738_v14 }
 0x635   : > { %967 = vperm.xlu0 %2383, %v2754_v47  }
 0x667   : > { %v1054_v9 = vpop.permute.xlu0 %1053 }
 0x668   : > { %v1056_v6 = vmul.f32 %v1054_v9, %v1043_v61  ;;  %v390_v9 = vpop.f32.mrf.mxu0 }
 0x66a   : > { %1058 = vrot.lane.b32.xlu1 %v1056_v6, %s2491_s30 }
 0x697   : > { %v956_v13 = vpop.permute.xlu0 %955 }
 0x698   : > { %v958_v17 = vadd.f32 %v956_v13, %v948_v11  ;;  %v391_v13 = vadd.f32 %v390_v9, %v2623_v38 }
 0x69a   : > { %2418 = vtanh.f32 %v958_v17 }
 0x69f   : > { %v1078_v19 = vpop.permute.xlu0 %1077 }
 0x6a0   : > { %v2419_v16 = vpop.eup %2418  ;;  %v1080_v20 = vmul.f32 %v1078_v19, %v2731_v12  ;;  %v977_v12 = vmul.f32 %v975_v21, %v2722_v5  ;;  %v1087_v53 = vmul.f32 %v1078_v19, %v2749_v46 }
 0x6a1   : > { %961 = vrot.lane.b32.xlu1 %v2419_v16, %s2492_s10 }
 0x6a2   : > { %1082 = vrot.lane.b32.xlu0 %v1080_v20, %s2494_s15 }
 0x6a7   : > { %v968_v30 = vpop.permute.xlu0 %967 }
 0x6a8   : > { %v983_v52 = vmul.f32 %v968_v30, %v958_v17 }
 0x6a9   : > { %1070 = vperm.xlu1 %2384, %v2764_v2  }
 0x6aa   : > { %986 = vrot.lane.b32.xlu0 %v984_v3, %s2491_s30 }
 0x6dc   : > { %v1059_v24 = vpop.permute.xlu1 %1058 }
 0x6dd   : > { %v1061_v26 = vadd.f32 %v1059_v24, %v1051_v22 }
 0x6df   : > { %2420 = vtanh.f32 %v1061_v26 }
 0x6e5   : > { %v2421_v32 = vpop.eup %2420 }
 0x6e6   : > { %1064 = vrot.lane.b32.xlu2 %v2421_v32, %s2492_s10 }
 0x6ee   : > { %979 = vrot.lane.b32.xlu2 %v977_v12, %s2494_s15 }
 0x713   : > { %v962_v33 = vpop.permute.xlu1 %961 }
 0x714   : > { %v1083_v35 = vpop.permute.xlu0 %1082  ;;  %v964_v40 = vmul.f32 %v962_v33, %v2745_v42 }
 0x716   : > { %v970_v44 = vmul.f32 %v968_v30, %v964_v40 }
 0x71b   : > { %v1071_v37 = vpop.permute.xlu1 %1070 }
 0x71c   : > { %v987_v29 = vpop.permute.xlu0 %986  ;;  %v1086_v10 = vmul.f32 %v1071_v37, %v1061_v26 }
 0x71d   : > { %v989_v5 = vadd.f32 %v987_v29, %v983_v52  ;;  %v2819_v29 = vld [vmem:[%s2648_s14 + $0x18] sm:$0xff] }
 0x71e   : > { %v1177_v52 = vsub.f32 1.0, %v2819_v29 }
 0x740   : > { %v1065_v36 = vpop.permute.xlu2 %1064 }
 0x741   : > { %v1067_v14 = vmul.f32 %v1065_v36, %v1043_v61 }
 0x743   : > { %v1073_v41 = vmul.f32 %v1071_v37, %v1067_v14 }
 0x745   : > { %v1085_v43 = vadd.f32 %v1083_v35, %v1073_v41 }
 0x747   : > { %1094 = vrot.lane.b32.xlu2 %v1085_v43, %s2491_s30 }
 0x748   : > { %v980_v48 = vpop.permute.xlu2 %979 }
 0x749   : > { %v982_v50 = vadd.f32 %v980_v48, %v970_v44 }
 0x74b   : > { %991 = vrot.lane.b32.xlu1 %v982_v50, %s2491_s30 }
 0x74f   : > { %996 = vrot.lane.b32.xlu2 %v989_v5, %s2494_s15 }
 0x753   : > { %1089 = vrot.lane.b32.xlu1 %v1087_v53, %s2491_s30 }
 0x7a1   : > { %v1095_v55 = vpop.permute.xlu2 %1094 }
 0x7a2   : > { %1097 = vst.msk [vmem:[#allocation3 + $0x8] sm:$0xff] %vm361_vm0, %v1095_v55 }
 0x7a9   : > { %v997_v42 = vpop.permute.xlu2 %996  ;;  %v2788_v56 = vld [vmem:[#allocation3 + $0x8] sm:$0xff] }
 0x7aa   : > { %999 = vst.msk [vmem:[#allocation4] sm:$0xff] %vm361_vm0, %v997_v42  ;;  %v1214_v57 = vpack.c.bf16 %v2788_v56, %v2788_v56 }
 0x7ac   : > { %2316 = vmatmul.msk.bf16.vlgmr.msrb.gmra.mxu3 %vm361_vm0, %v1214_v57  ;;  %v2828_v57 = vld [vmem:[%s2648_s14 + $0x20] sm:$0xff] }
 0x7ad   : > { %2016 = vmatpush.bf16.msrb.mxu3 %v2575_v25 }
 0x7b1   : > { %2017 = vmatpush.bf16.msrb.mxu3 %v2580_v27  ;;  %v2805_v25 = vld [vmem:[#allocation4] sm:$0xff] }
 0x7bd   : > { %v992_v46 = vpop.permute.xlu1 %991 }
 0x7be   : > { %994 = vst.msk [vmem:[#allocation3] sm:$0xff] %vm361_vm0, %v992_v46  ;;  %v1280_v46 = vsub.f32 1.0, %v2828_v57 }
 0x7c5   : > { %v1090_v58 = vpop.permute.xlu1 %1089  ;;  %v2797_v23 = vld [vmem:[#allocation3] sm:$0xff] }
 0x7c6   : > { %v1092_v59 = vadd.f32 %v1090_v58, %v1086_v10  ;;  %v1111_v8 = vpack.c.bf16 %v2797_v23, %v2797_v23 }
 0x7c8   : > { %2312 = vmatmul.msk.bf16.vlgmr.msrb.gmra.mxu2 %vm361_vm0, %v1111_v8  ;;  %1099 = vrot.lane.b32.xlu0 %v1092_v59, %s2494_s15 }
 0x7c9   : > { %1917 = vmatpush.bf16.msrb.mxu2 %v2550_v7 }
 0x7cd   : > { %1918 = vmatpush.bf16.msrb.mxu2 %v2560_v15 }
 0x7d0   : > { %1151 = vrot.lane.b32.xlu0 %v2805_v25, %s2491_s30 }
 0x82f   : > { %v1227_v27 = vpop.f32.mrf.mxu3 }
 0x830   : > { %v1231_v60 = vadd.f32 %v1227_v27, %v2634_v63 }
 0x832   : > { %v2317_v34 = vmul.f32 -1.442695, %v1231_v60 }
 0x834   : > { %2422 = vpow2.f32 %v2317_v34 }
 0x837   : > { %v1229_v61 = vpop.f32.mrf.mxu3 }
 0x83a   : > { %v2423_v62 = vpop.eup %2422  ;;  %v1100_v0 = vpop.permute.xlu0 %1099 }
 0x83b   : > { %v1235_v1 = vadd.f32 1.0, %v2423_v62  ;;  %1102 = vst.msk [vmem:[#allocation4 + $0x8] sm:$0xff] %vm361_vm0, %v1100_v0 }
 0x83d   : > { %2424 = vrcp.f32 %v1235_v1  ;;  %v1247_v6 = vand.u32 2147483648, %v1235_v1  ;;  %v1245_v11 = vand.u32 2147483647, %v1235_v1  ;;  %vm1241_vm11 = vweird.f32 %v1235_v1 }
 0x83f   : > { %v1248_v18 = vor.u32 1.1754944e-38, %v1247_v6  ;;  %vm1246_vm13 = vcmp.eq.f32.partialorder %v1245_v11, 8.507059e+37 }
 0x842   : > { %v1213_v50 = vld [vmem:[#allocation4 + $0x8] sm:$0xff]  ;;  %v1152_v10 = vpop.permute.xlu0 %1151 }
 0x843   : > { %v2425_v7 = vpop.eup %2424 }
 0x844   : > { %v1237_v28 = vmul.f32 %v2425_v7, %v1235_v1  ;;  %vm1242_vm10 = vweird.f32 %v2425_v7 }
 0x845   : > { %vm1243_vm12 = vmor %vm1241_vm11, %vm1242_vm10 }
 0x846   : > { %v1238_v15 = vsub.f32 1.0, %v1237_v28 }
 0x848   : > { %v1239_v31 = vmul.f32 %v2425_v7, %v1238_v15 }
 0x84a   : > { %v1240_v63 = vadd.f32 %v2425_v7, %v1239_v31 }
 0x84b   : > { %v1124_v17 = vpop.f32.mrf.mxu2 }
 0x84c   : > { %v1128_v19 = vadd.f32 %v1124_v17, %v391_v13  ;;  %v1244_v16 = vsel %vm1243_vm12, %v2425_v7, %v1240_v63 }
 0x84d   : > { %v2812_v20 = vsel %vm1246_vm13, %v1248_v18, %v1244_v16 }
 0x84e   : > { %v2313_v21 = vmul.f32 -1.442695, %v1128_v19  ;;  %v1251_v3 = vmul.f32 2.0, %v2812_v20 }
 0x850   : > { %2426 = vpow2.f32 %v2313_v21  ;;  %v2318_v22 = vadd.f32 -1.0, %v1251_v3 }
 0x852   : > { %1259 = vrot.lane.b32.xlu2 %v2318_v22, %s2492_s10 }
 0x853   : > { %v1126_v24 = vpop.f32.mrf.mxu2 }
 0x856   : > { %v2427_v26 = vpop.eup %2426 }
 0x857   : > { %v1132_v32 = vadd.f32 1.0, %v2427_v26 }
 0x859   : > { %2428 = vrcp.f32 %v1132_v32  ;;  %v1144_v35 = vand.u32 2147483648, %v1132_v32  ;;  %v1142_v14 = vand.u32 2147483647, %v1132_v32  ;;  %vm1138_vm15 = vweird.f32 %v1132_v32 }
 0x85b   : > { %v1145_v40 = vor.u32 1.1754944e-38, %v1144_v35  ;;  %vm1143_vm2 = vcmp.eq.f32.partialorder %v1142_v14, 8.507059e+37 }
 0x85f   : > { %v2429_v12 = vpop.eup %2428 }
 0x860   : > { %v1134_v30 = vmul.f32 %v2429_v12, %v1132_v32  ;;  %vm1139_vm14 = vweird.f32 %v2429_v12 }
 0x861   : > { %vm1140_vm1 = vmor %vm1138_vm15, %vm1139_vm14 }
 0x862   : > { %v1135_v33 = vsub.f32 1.0, %v1134_v30 }
 0x864   : > { %v1136_v36 = vmul.f32 %v2429_v12, %v1135_v33 }
 0x866   : > { %v1137_v37 = vadd.f32 %v2429_v12, %v1136_v36 }
 0x868   : > { %v1141_v41 = vsel %vm1140_vm1, %v2429_v12, %v1137_v37 }
 0x869   : > { %v1146_v43 = vsel %vm1143_vm2, %v1145_v40, %v1141_v41  ;;  %v393_v41 = vpop.f32.mrf.mxu0 }
 0x86a   : > { %v1148_v44 = vmul.f32 2.0, %v1146_v43  ;;  %v1154_v62 = vmul.f32 %v1152_v10, %v1146_v43 }
 0x86c   : > { %v2314_v48 = vadd.f32 -1.0, %v1148_v44 }
 0x86e   : > { %1156 = vrot.lane.b32.xlu1 %v2314_v48, %s2492_s10 }
 0x871   : > { %v2868_v44 = vpop.f32.mrf.mxu0 }
 0x876   : > { %1254 = vrot.lane.b32.xlu1 %v1213_v50, %s2491_s30 }
 0x879   : > { %v2870_v48 = vpop.f32.mrf.mxu0 }
 0x87e   : > { %1180 = vperm.xlu1 %2384, %v1177_v52  }
 0x8ac   : > { %v1260_v5 = vpop.permute.xlu2 %1259 }
 0x8ad   : > { %v1262_v53 = vmul.f32 %v1260_v5, %v2812_v20  ;;  %v394_v5 = vadd.f32 %v393_v41, %v2623_v38 }
 0x8af   : > { %1264 = vrot.lane.b32.xlu0 %v1262_v53, %s2491_s30 }
 0x8e0   : > { %v1157_v55 = vpop.permute.xlu1 %1156 }
 0x8e1   : > { %v1159_v42 = vmul.f32 %v1157_v55, %v1146_v43 }
 0x8e3   : > { %1161 = vrot.lane.b32.xlu2 %v1159_v42, %s2491_s30 }
 0x8e8   : > { %v1255_v58 = vpop.permute.xlu1 %1254 }
 0x8e9   : > { %v1257_v59 = vmul.f32 %v1255_v58, %v2812_v20 }
 0x8eb   : > { %1283 = vperm.xlu2 %2385, %v1280_v46  }
 0x8f0   : > { %v1181_v34 = vpop.permute.xlu1 %1180 }
 0x8f1   : > { %v1183_v61 = vmul.f32 %v1181_v34, %v2797_v23  ;;  %v1190_v9 = vmul.f32 %v1181_v34, %v2805_v25 }
 0x8f3   : > { %1173 = vperm.xlu2 %2385, %v2819_v29  }
 0x921   : > { %v1265_v8 = vpop.permute.xlu0 %1264 }
 0x922   : > { %v1267_v27 = vadd.f32 %v1265_v8, %v1257_v59 }
 0x924   : > { %2430 = vtanh.f32 %v1267_v27 }
 0x92a   : > { %v2431_v60 = vpop.eup %2430 }
 0x92b   : > { %1270 = vrot.lane.b32.xlu1 %v2431_v60, %s2492_s10 }
 0x933   : > { %1185 = vrot.lane.b32.xlu1 %v1183_v61, %s2494_s15 }
 0x93d   : > { %v1162_v0 = vpop.permute.xlu2 %1161 }
 0x93e   : > { %v1164_v1 = vadd.f32 %v1162_v0, %v1154_v62 }
 0x940   : > { %2432 = vtanh.f32 %v1164_v1 }
 0x945   : > { %v1284_v7 = vpop.permute.xlu2 %1283 }
 0x946   : > { %v2433_v28 = vpop.eup %2432  ;;  %v1286_v15 = vmul.f32 %v1284_v7, %v2788_v56  ;;  %v1293_v25 = vmul.f32 %v1284_v7, %v1213_v50  ;;  %v2872_v50 = vpop.f32.mrf.mxu0 }
 0x947   : > { %1167 = vrot.lane.b32.xlu0 %v2433_v28, %s2492_s10 }
 0x948   : > { %1288 = vrot.lane.b32.xlu2 %v1286_v15, %s2494_s15 }
 0x94d   : > { %v1174_v6 = vpop.permute.xlu2 %1173 }
 0x94e   : > { %v1189_v22 = vmul.f32 %v1174_v6, %v1164_v1 }
 0x94f   : > { %1276 = vperm.xlu0 %2383, %v2828_v57  }
 0x950   : > { %1192 = vrot.lane.b32.xlu2 %v1190_v9, %s2491_s30 }
 0x99d   : > { %v1271_v23 = vpop.permute.xlu1 %1270 }
 0x99e   : > { %v1273_v56 = vmul.f32 %v1271_v23, %v2812_v20 }
 0x9a2   : > { %v1289_v18 = vpop.permute.xlu2 %1288 }
 0x9a5   : > { %v1186_v63 = vpop.permute.xlu1 %1185 }
 0x9aa   : > { %v1193_v3 = vpop.permute.xlu2 %1192 }
 0x9ab   : > { %v1195_v24 = vadd.f32 %v1193_v3, %v1189_v22 }
 0x9b9   : > { %v1168_v31 = vpop.permute.xlu0 %1167 }
 0x9ba   : > { %v1170_v11 = vmul.f32 %v1168_v31, %v1146_v43 }
 0x9bc   : > { %v1176_v13 = vmul.f32 %v1174_v6, %v1170_v11 }
 0x9be   : > { %v1188_v17 = vadd.f32 %v1186_v63, %v1176_v13 }
 0x9c0   : > { %1197 = vrot.lane.b32.xlu0 %v1188_v17, %s2491_s30 }
 0x9c1   : > { %v1277_v19 = vpop.permute.xlu0 %1276 }
 0x9c2   : > { %v1279_v16 = vmul.f32 %v1277_v19, %v1273_v56  ;;  %v1292_v20 = vmul.f32 %v1277_v19, %v1267_v27 }
 0x9c4   : > { %v1291_v21 = vadd.f32 %v1289_v18, %v1279_v16 }
 0x9c6   : > { %1300 = vrot.lane.b32.xlu1 %v1291_v21, %s2491_s30 }
 0x9c8   : > { %1295 = vrot.lane.b32.xlu0 %v1293_v25, %s2491_s30 }
 0x9ce   : > { %1202 = vrot.lane.b32.xlu1 %v1195_v24, %s2494_s15 }
 0xa32   : > { %v1198_v26 = vpop.permute.xlu0 %1197 }
 0xa33   : > { %1200 = vst.msk [vmem:[#allocation3] sm:$0xff] %vm361_vm0, %v1198_v26 }
 0xa38   : > { %v1301_v32 = vpop.permute.xlu1 %1300 }
 0xa39   : > { %1303 = vst.msk [vmem:[#allocation3 + $0x8] sm:$0xff] %vm361_vm0, %v1301_v32 }
 0xa3a   : > { %v1296_v12 = vpop.permute.xlu0 %1295  ;;  %v2851_v30 = vld [vmem:[#allocation3] sm:$0xff] }
 0xa3b   : > { %v1298_v33 = vadd.f32 %v1296_v12, %v1292_v20  ;;  %v1313_v35 = vpack.c.bf16 %v2851_v30, %v2851_v30 }
 0xa3d   : > { %2320 = vmatmul.msk.bf16.vlgmr.msrb.gmra.mxu0 %vm361_vm0, %v1313_v35  ;;  %1305 = vrot.lane.b32.xlu2 %v1298_v33, %s2494_s15 }
 0xa40   : > { %v1203_v36 = vpop.permute.xlu1 %1202  ;;  %v2857_v14 = vld [vmem:[#allocation3 + $0x8] sm:$0xff] }
 0xa41   : > { %1205 = vst.msk [vmem:[#allocation4] sm:$0xff] %vm361_vm0, %v1203_v36  ;;  %v1412_v37 = vpack.c.bf16 %v2857_v14, %v2857_v14 }
 0xa43   : > { %2324 = vmatmul.msk.bf16.vlgmr.msrb.gmra.mxu1 %vm361_vm0, %v1412_v37 }
 0xa48   : > { %v2863_v40 = vld [vmem:[#allocation4] sm:$0xff] }
 0xa49   : > { %1353 = vrot.lane.b32.xlu2 %v2863_v40, %s2491_s30 }
 0xa97   : > { %v1306_v43 = vpop.permute.xlu2 %1305 }
 0xa98   : > { %1308 = vst.msk [vmem:[#allocation4 + $0x8] sm:$0xff] %vm361_vm0, %v1306_v43 }
 0xa9f   : > { %v1411_v32 = vld [vmem:[#allocation4 + $0x8] sm:$0xff] }
 0xaa3   : > { %v1354_v36 = vpop.permute.xlu2 %1353 }
 0xaba   : > { %v1326_v53 = vpop.f32.mrf.mxu0 }
 0xabb   : > { %v1330_v55 = vadd.f32 %v1326_v53, %v394_v5 }
 0xabd   : > { %v2321_v42 = vmul.f32 -1.442695, %v1330_v55 }
 0xabf   : > { %2434 = vpow2.f32 %v2321_v42 }
 0xac0   : > { %v1425_v10 = vpop.f32.mrf.mxu1 }
 0xac1   : > { %v1429_v58 = vadd.f32 %v1425_v10, %v2632_v54 }
 0xac2   : > { %v1328_v59 = vpop.f32.mrf.mxu0 }
 0xac3   : > { %v2325_v8 = vmul.f32 -1.442695, %v1429_v58 }
 0xac5   : > { %v2435_v27 = vpop.eup %2434  ;;  %2436 = vpow2.f32 %v2325_v8 }
 0xac6   : > { %v1334_v60 = vadd.f32 1.0, %v2435_v27 }
 0xac8   : > { %2438 = vrcp.f32 %v1334_v60  ;;  %v1427_v34 = vpop.f32.mrf.mxu1  ;;  %v1346_v28 = vand.u32 2147483648, %v1334_v60  ;;  %v1344_v9 = vand.u32 2147483647, %v1334_v60  ;;  %vm1340_vm4 = vweird.f32 %v1334_v60 }
 0xaca   : > { %v1347_v31 = vor.u32 1.1754944e-38, %v1346_v28  ;;  %vm1345_vm6 = vcmp.eq.f32.partialorder %v1344_v9, 8.507059e+37 }
 0xacb   : > { %v2437_v61 = vpop.eup %2436 }
 0xacc   : > { %v1433_v62 = vadd.f32 1.0, %v2437_v61 }
 0xace   : > { %v2439_v0 = vpop.eup %2438  ;;  %2440 = vrcp.f32 %v1433_v62  ;;  %v1445_v17 = vand.u32 2147483648, %v1433_v62  ;;  %v1443_v19 = vand.u32 2147483647, %v1433_v62  ;;  %vm1439_vm8 = vweird.f32 %v1433_v62 }
 0xacf   : > { %v1336_v1 = vmul.f32 %v2439_v0, %v1334_v60  ;;  %vm1341_vm3 = vweird.f32 %v2439_v0 }
 0xad0   : > { %vm1342_vm5 = vmor %vm1340_vm4, %vm1341_vm3  ;;  %v1446_v25 = vor.u32 1.1754944e-38, %v1445_v17  ;;  %vm1444_vm10 = vcmp.eq.f32.partialorder %v1443_v19, 8.507059e+37 }
 0xad1   : > { %v1337_v7 = vsub.f32 1.0, %v1336_v1 }
 0xad3   : > { %v1338_v15 = vmul.f32 %v2439_v0, %v1337_v7 }
 0xad4   : > { %v2441_v23 = vpop.eup %2440 }
 0xad5   : > { %v1435_v6 = vmul.f32 %v2441_v23, %v1433_v62  ;;  %v1339_v54 = vadd.f32 %v2439_v0, %v1338_v15  ;;  %vm1440_vm7 = vweird.f32 %v2441_v23 }
 0xad6   : > { %vm1441_vm9 = vmor %vm1439_vm8, %vm1440_vm7 }
 0xad7   : > { %v1436_v11 = vsub.f32 1.0, %v1435_v6  ;;  %v1343_v13 = vsel %vm1342_vm5, %v2439_v0, %v1339_v54 }
 0xad8   : > { %v1348_v63 = vsel %vm1345_vm6, %v1347_v31, %v1343_v13 }
 0xad9   : > { %v1350_v18 = vmul.f32 2.0, %v1348_v63  ;;  %v1437_v56 = vmul.f32 %v2441_v23, %v1436_v11  ;;  %v1356_v42 = vmul.f32 %v1354_v36, %v1348_v63 }
 0xadb   : > { %v2322_v16 = vadd.f32 -1.0, %v1350_v18  ;;  %v1438_v21 = vadd.f32 %v2441_v23, %v1437_v56 }
 0xadd   : > { %1358 = vrot.lane.b32.xlu0 %v2322_v16, %s2492_s10  ;;  %v1442_v3 = vsel %vm1441_vm9, %v2441_v23, %v1438_v21 }
 0xade   : > { %v1447_v22 = vsel %vm1444_vm10, %v1446_v25, %v1442_v3  ;;  %v396_v25 = vadd.f32 %v2868_v44, %v2623_v38 }
 0xadf   : > { %v1449_v24 = vmul.f32 2.0, %v1447_v22 }
 0xae1   : > { %v2326_v26 = vadd.f32 -1.0, %v1449_v24 }
 0xae3   : > { %1457 = vrot.lane.b32.xlu1 %v2326_v26, %s2492_s10 }
 0xae5   : > { %1452 = vrot.lane.b32.xlu0 %v1411_v32, %s2491_s30 }
 0xaed   : > { %1382 = vperm.xlu0 %2383, %v1280_v46  }
 0xb4f   : > { %v1359_v20 = vpop.permute.xlu0 %1358 }
 0xb50   : > { %v1361_v12 = vmul.f32 %v1359_v20, %v1348_v63 }
 0xb52   : > { %1363 = vrot.lane.b32.xlu1 %v1361_v12, %s2491_s30 }
 0xb55   : > { %v1458_v33 = vpop.permute.xlu1 %1457 }
 0xb56   : > { %v1460_v35 = vmul.f32 %v1458_v33, %v1447_v22 }
 0xb57   : > { %v1453_v37 = vpop.permute.xlu0 %1452 }
 0xb58   : > { %1462 = vrot.lane.b32.xlu2 %v1460_v35, %s2491_s30  ;;  %v1455_v41 = vmul.f32 %v1453_v37, %v1447_v22 }
 0xb5a   : > { %1481 = vperm.xlu1 %2384, %v1177_v52  }
 0xb5f   : > { %v1383_v53 = vpop.permute.xlu0 %1382 }
 0xb60   : > { %v1385_v55 = vmul.f32 %v1383_v53, %v2851_v30  ;;  %v1392_v8 = vmul.f32 %v1383_v53, %v2863_v40 }
 0xb62   : > { %1375 = vperm.xlu1 %2384, %v2828_v57  }
 0xbb2   : > { %v1463_v43 = vpop.permute.xlu2 %1462 }
 0xbb3   : > { %v1465_v5 = vadd.f32 %v1463_v43, %v1455_v41 }
 0xbb5   : > { %2442 = vtanh.f32 %v1465_v5 }
 0xbbb   : > { %v2443_v46 = vpop.eup %2442 }
 0xbbc   : > { %1468 = vrot.lane.b32.xlu0 %v2443_v46, %s2492_s10 }
 0xbc4   : > { %v1364_v10 = vpop.permute.xlu1 %1363  ;;  %1387 = vrot.lane.b32.xlu0 %v1385_v55, %s2494_s15 }
 0xbc5   : > { %v1366_v58 = vadd.f32 %v1364_v10, %v1356_v42 }
 0xbc7   : > { %2444 = vtanh.f32 %v1366_v58 }
 0xbcc   : > { %v1482_v52 = vpop.permute.xlu1 %1481 }
 0xbcd   : > { %v2445_v57 = vpop.eup %2444  ;;  %v1484_v59 = vmul.f32 %v1482_v52, %v2857_v14  ;;  %v1491_v7 = vmul.f32 %v1482_v52, %v1411_v32 }
 0xbce   : > { %1369 = vrot.lane.b32.xlu2 %v2445_v57, %s2492_s10 }
 0xbcf   : > { %1486 = vrot.lane.b32.xlu1 %v1484_v59, %s2494_s15 }
 0xbd4   : > { %v1376_v34 = vpop.permute.xlu1 %1375 }
 0xbd6   : > { %1474 = vperm.xlu2 %2385, %v2819_v29   ;;  %v1391_v29 = vmul.f32 %v1376_v34, %v1366_v58 }
 0xbd7   : > { %1394 = vrot.lane.b32.xlu1 %v1392_v8, %s2491_s30 }
 0xc28   : > { %v1370_v30 = vpop.permute.xlu2 %1369 }
 0xc29   : > { %v1372_v60 = vmul.f32 %v1370_v30, %v1348_v63 }
 0xc2b   : > { %v1378_v61 = vmul.f32 %v1376_v34, %v1372_v60 }
 0xc2e   : > { %v1469_v27 = vpop.permute.xlu0 %1468 }
 0xc2f   : > { %v1471_v14 = vmul.f32 %v1469_v27, %v1447_v22 }
 0xc30   : > { %v1475_v1 = vpop.permute.xlu2 %1474 }
 0xc31   : > { %v1477_v28 = vmul.f32 %v1475_v1, %v1471_v14  ;;  %v1490_v54 = vmul.f32 %v1475_v1, %v1465_v5 }
 0xc36   : > { %v1388_v62 = vpop.permute.xlu0 %1387 }
 0xc37   : > { %v1390_v0 = vadd.f32 %v1388_v62, %v1378_v61 }
 0xc39   : > { %1399 = vrot.lane.b32.xlu2 %v1390_v0, %s2491_s30 }
 0xc41   : > { %v1487_v15 = vpop.permute.xlu1 %1486  ;;  %1493 = vrot.lane.b32.xlu2 %v1491_v7, %s2491_s30 }
 0xc42   : > { %v1489_v40 = vadd.f32 %v1487_v15, %v1477_v28 }
 0xc44   : > { %1498 = vrot.lane.b32.xlu0 %v1489_v40, %s2491_s30 }
 0xc49   : > { %v1395_v9 = vpop.permute.xlu1 %1394 }
 0xc4a   : > { %v1397_v23 = vadd.f32 %v1395_v9, %v1391_v29 }
 0xc4c   : > { %1404 = vrot.lane.b32.xlu0 %v1397_v23, %s2494_s15 }
 0xc93   : > { %v1400_v6 = vpop.permute.xlu2 %1399 }
 0xc94   : > { %1402 = vst.msk [vmem:[#allocation3] sm:$0xff] %vm361_vm0, %v1400_v6 }
 0xc9b   : > { %v1494_v31 = vpop.permute.xlu2 %1493  ;;  %v2900_v11 = vld [vmem:[#allocation3] sm:$0xff] }
 0xc9c   : > { %v1496_v13 = vadd.f32 %v1494_v31, %v1490_v54  ;;  %v1511_v63 = vpack.c.bf16 %v2900_v11, %v2900_v11 }
 0xc9e   : > { %2328 = vmatmul.msk.bf16.vlgmr.msra.gmra.mxu2 %vm361_vm0, %v1511_v63  ;;  %1503 = vrot.lane.b32.xlu1 %v1496_v13, %s2494_s15 }
 0xcb6   : > { %v1499_v17 = vpop.permute.xlu0 %1498 }
 0xcb7   : > { %1501 = vst.msk [vmem:[#allocation3 + $0x8] sm:$0xff] %vm361_vm0, %v1499_v17 }
 0xcbe   : > { %v1405_v18 = vpop.permute.xlu0 %1404  ;;  %v2907_v56 = vld [vmem:[#allocation3 + $0x8] sm:$0xff] }
 0xcbf   : > { %1407 = vst.msk [vmem:[#allocation4] sm:$0xff] %vm361_vm0, %v1405_v18  ;;  %v1610_v19 = vpack.c.bf16 %v2907_v56, %v2907_v56 }
 0xcc1   : > { %2332 = vmatmul.msk.bf16.vlgmr.msra.gmra.mxu3 %vm361_vm0, %v1610_v19 }
 0xcc6   : > { %v2913_v16 = vld [vmem:[#allocation4] sm:$0xff] }
 0xcc7   : > { %1551 = vrot.lane.b32.xlu1 %v2913_v16, %s2491_s30 }
 0xd10   : > { %v1504_v21 = vpop.permute.xlu1 %1503 }
 0xd11   : > { %1506 = vst.msk [vmem:[#allocation4 + $0x8] sm:$0xff] %vm361_vm0, %v1504_v21 }
 0xd18   : > { %v2925_v52 = vld [vmem:[#allocation4 + $0x8] sm:$0xff] }
 0xd21   : > { %v1524_v3 = vpop.f32.mrf.mxu2 }
 0xd22   : > { %v1528_v22 = vadd.f32 %v1524_v3, %v396_v25 }
 0xd24   : > { %v2329_v24 = vmul.f32 -1.442695, %v1528_v22 }
 0xd26   : > { %2446 = vpow2.f32 %v2329_v24 }
 0xd29   : > { %v1526_v26 = vpop.f32.mrf.mxu2 }
 0xd2c   : > { %v2447_v32 = vpop.eup %2446 }
 0xd2d   : > { %v1532_v20 = vadd.f32 1.0, %v2447_v32 }
 0xd2f   : > { %2448 = vrcp.f32 %v1532_v20  ;;  %v1544_v36 = vand.u32 2147483648, %v1532_v20  ;;  %v1542_v41 = vand.u32 2147483647, %v1532_v20  ;;  %vm1538_vm12 = vweird.f32 %v1532_v20 }
 0xd31   : > { %v1545_v5 = vor.u32 1.1754944e-38, %v1544_v36  ;;  %vm1543_vm14 = vcmp.eq.f32.partialorder %v1542_v41, 8.507059e+37 }
 0xd35   : > { %v2449_v12 = vpop.eup %2448 }
 0xd36   : > { %v1534_v33 = vmul.f32 %v2449_v12, %v1532_v20  ;;  %vm1539_vm11 = vweird.f32 %v2449_v12 }
 0xd37   : > { %vm1540_vm13 = vmor %vm1538_vm12, %vm1539_vm11 }
 0xd38   : > { %v1535_v35 = vsub.f32 1.0, %v1534_v33 }
 0xd39   : > { %v1552_v9 = vpop.permute.xlu1 %1551 }
 0xd3a   : > { %v1536_v37 = vmul.f32 %v2449_v12, %v1535_v35 }
 0xd3c   : > { %v1537_v43 = vadd.f32 %v2449_v12, %v1536_v37 }
 0xd3e   : > { %v1541_v44 = vsel %vm1540_vm13, %v2449_v12, %v1537_v43 }
 0xd3f   : > { %v2920_v46 = vsel %vm1543_vm14, %v1545_v5, %v1541_v44 }
 0xd40   : > { %v1548_v53 = vmul.f32 2.0, %v2920_v46  ;;  %v1554_v23 = vmul.f32 %v1552_v9, %v2920_v46 }
 0xd42   : > { %v2330_v55 = vadd.f32 -1.0, %v1548_v53 }
 0xd44   : > { %1556 = vrot.lane.b32.xlu2 %v2330_v55, %s2492_s10  ;;  %v1623_v42 = vpop.f32.mrf.mxu3 }
 0xd45   : > { %v1627_v10 = vadd.f32 %v1623_v42, %v2630_v49 }
 0xd47   : > { %v2333_v58 = vmul.f32 -1.442695, %v1627_v10 }
 0xd49   : > { %2450 = vpow2.f32 %v2333_v58 }
 0xd4c   : > { %1650 = vrot.lane.b32.xlu2 %v2925_v52, %s2491_s30  ;;  %v1625_v57 = vpop.f32.mrf.mxu3 }
 0xd4f   : > { %v2451_v59 = vpop.eup %2450 }
 0xd50   : > { %v1631_v8 = vadd.f32 1.0, %v2451_v59 }
 0xd52   : > { %2452 = vrcp.f32 %v1631_v8  ;;  %v1643_v34 = vand.u32 2147483648, %v1631_v8  ;;  %v1641_v49 = vand.u32 2147483647, %v1631_v8  ;;  %vm1637_vm1 = vweird.f32 %v1631_v8 }
 0xd54   : > { %1580 = vperm.xlu2 %2385, %v1074_v4   ;;  %v1644_v0 = vor.u32 1.1754944e-38, %v1643_v34  ;;  %vm1642_vm3 = vcmp.eq.f32.partialorder %v1641_v49, 8.507059e+37 }
 0xd58   : > { %v2453_v30 = vpop.eup %2452 }
 0xd59   : > { %v1633_v27 = vmul.f32 %v2453_v30, %v1631_v8  ;;  %vm1638_vm15 = vweird.f32 %v2453_v30 }
 0xd5a   : > { %vm1639_vm2 = vmor %vm1637_vm1, %vm1638_vm15 }
 0xd5b   : > { %v1634_v60 = vsub.f32 1.0, %v1633_v27 }
 0xd5d   : > { %v1635_v61 = vmul.f32 %v2453_v30, %v1634_v60 }
 0xd5f   : > { %v1636_v62 = vadd.f32 %v2453_v30, %v1635_v61 }
 0xd61   : > { %v1640_v14 = vsel %vm1639_vm2, %v2453_v30, %v1636_v62 }
 0xd62   : > { %v1645_v1 = vsel %vm1642_vm3, %v1644_v0, %v1640_v14 }
 0xd63   : > { %v1647_v7 = vmul.f32 2.0, %v1645_v1 }
 0xd65   : > { %v2334_v28 = vadd.f32 -1.0, %v1647_v7 }
 0xd67   : > { %1655 = vrot.lane.b32.xlu0 %v2334_v28, %s2492_s10 }
 0xd9e   : > { %v1557_v15 = vpop.permute.xlu2 %1556 }
 0xd9f   : > { %v1559_v4 = vmul.f32 %v1557_v15, %v2920_v46  ;;  %v399_v15 = vadd.f32 %v2870_v48, %v2623_v38 }
 0xda1   : > { %1561 = vrot.lane.b32.xlu0 %v1559_v4, %s2491_s30 }
 0xda6   : > { %v1651_v31 = vpop.permute.xlu2 %1650 }
 0xda7   : > { %v1653_v18 = vmul.f32 %v1651_v31, %v1645_v1 }
 0xda9   : > { %1679 = vperm.xlu0 %2383, %v971_v51  }
 0xdae   : > { %v1581_v51 = vpop.permute.xlu2 %1580 }
 0xdb1   : > { %1573 = vperm.xlu0 %2383, %v2764_v2   ;;  %v1590_v2 = vmul.f32 %v1581_v51, %v2913_v16 }
 0xdd9   : > { %v1656_v40 = vpop.permute.xlu0 %1655 }
 0xdda   : > { %v1658_v29 = vmul.f32 %v1656_v40, %v1645_v1 }
 0xddc   : > { %1660 = vrot.lane.b32.xlu1 %v1658_v29, %s2491_s30 }
 0xe13   : > { %v1562_v6 = vpop.permute.xlu0 %1561 }
 0xe14   : > { %v1564_v54 = vadd.f32 %v1562_v6, %v1554_v23 }
 0xe16   : > { %2454 = vtanh.f32 %v1564_v54 }
 0xe1b   : > { %v1680_v13 = vpop.permute.xlu0 %1679 }
 0xe1c   : > { %v2455_v63 = vpop.eup %2454  ;;  %v1682_v17 = vmul.f32 %v1680_v13, %v2907_v56  ;;  %v1583_v56 = vmul.f32 %v1581_v51, %v2900_v11  ;;  %v1689_v43 = vmul.f32 %v1680_v13, %v2925_v52 }
 0xe1d   : > { %1567 = vrot.lane.b32.xlu1 %v2455_v63, %s2492_s10 }
 0xe1e   : > { %1684 = vrot.lane.b32.xlu0 %v1682_v17, %s2494_s15 }
 0xe23   : > { %v1574_v3 = vpop.permute.xlu0 %1573 }
 0xe24   : > { %v1589_v41 = vmul.f32 %v1574_v3, %v1564_v54 }
 0xe25   : > { %1672 = vperm.xlu1 %2384, %v2754_v47  }
 0xe26   : > { %1592 = vrot.lane.b32.xlu0 %v1590_v2, %s2491_s30 }
 0xe4e   : > { %v1661_v19 = vpop.permute.xlu1 %1660 }
 0xe4f   : > { %v1663_v21 = vadd.f32 %v1661_v19, %v1653_v18 }
 0xe51   : > { %2456 = vtanh.f32 %v1663_v21 }
 0xe57   : > { %v2457_v25 = vpop.eup %2456 }
 0xe58   : > { %1666 = vrot.lane.b32.xlu2 %v2457_v25, %s2492_s10 }
 0xe60   : > { %1585 = vrot.lane.b32.xlu2 %v1583_v56, %s2494_s15 }
 0xe8f   : > { %v1568_v22 = vpop.permute.xlu1 %1567 }
 0xe90   : > { %v1685_v24 = vpop.permute.xlu0 %1684  ;;  %v1570_v47 = vmul.f32 %v1568_v22, %v2920_v46 }
 0xe92   : > { %v1576_v33 = vmul.f32 %v1574_v3, %v1570_v47 }
 0xe97   : > { %v1673_v32 = vpop.permute.xlu1 %1672 }
 0xe98   : > { %v1593_v37 = vpop.permute.xlu0 %1592  ;;  %v1688_v42 = vmul.f32 %v1673_v32, %v1663_v21 }
 0xe99   : > { %v1595_v11 = vadd.f32 %v1593_v37, %v1589_v41 }
 0xeb2   : > { %v1667_v26 = vpop.permute.xlu2 %1666 }
 0xeb3   : > { %v1669_v16 = vmul.f32 %v1667_v26, %v1645_v1 }
 0xeb5   : > { %v1675_v20 = vmul.f32 %v1673_v32, %v1669_v16  ;;  %v2335_v32 = vld [vmem:[%s2648_s14 + $0x30] sm:$0xff] }
 0xeb6   : > { %v1775_v47 = vsub.f32 1.0, %v2335_v32 }
 0xeb7   : > { %v1687_v12 = vadd.f32 %v1685_v24, %v1675_v20 }
 0xeb9   : > { %1696 = vrot.lane.b32.xlu2 %v1687_v12, %s2491_s30 }
 0xeba   : > { %v1586_v35 = vpop.permute.xlu2 %1585 }
 0xebb   : > { %v1588_v36 = vadd.f32 %v1586_v35, %v1576_v33 }
 0xebd   : > { %1597 = vrot.lane.b32.xlu1 %v1588_v36, %s2491_s30  ;;  %v2339_v36 = vld [vmem:[%s2648_s14 + $0x8] sm:$0xff] }
 0xebe   : > { %v1874_v37 = vsub.f32 1.0, %v2339_v36 }
 0xec1   : > { %1602 = vrot.lane.b32.xlu2 %v1595_v11, %s2494_s15 }
 0xec5   : > { %1691 = vrot.lane.b32.xlu1 %v1689_v43, %s2491_s30 }
 0xf13   : > { %v1697_v5 = vpop.permute.xlu2 %1696 }
 0xf14   : > { %1699 = vst.msk [vmem:[#allocation3 + $0x8] sm:$0xff] %vm361_vm0, %v1697_v5 }
 0xf1b   : > { %v1603_v44 = vpop.permute.xlu2 %1602  ;;  %v2955_v46 = vld [vmem:[#allocation3 + $0x8] sm:$0xff] }
 0xf1c   : > { %1605 = vst.msk [vmem:[#allocation4] sm:$0xff] %vm361_vm0, %v1603_v44  ;;  %v1808_v53 = vpack.c.bf16 %v2955_v46, %v2955_v46 }
 0xf1e   : > { %2340 = vmatmul.msk.bf16.vlgmr.msra.gmra.mxu1 %vm361_vm0, %v1808_v53 }
 0xf23   : > { %v2968_v59 = vld [vmem:[#allocation4] sm:$0xff] }
 0xf2f   : > { %v1598_v55 = vpop.permute.xlu1 %1597 }
 0xf30   : > { %1600 = vst.msk [vmem:[#allocation3] sm:$0xff] %vm361_vm0, %v1598_v55 }
 0xf37   : > { %v1692_v10 = vpop.permute.xlu1 %1691  ;;  %v2962_v58 = vld [vmem:[#allocation3] sm:$0xff] }
 0xf38   : > { %v1694_v52 = vadd.f32 %v1692_v10, %v1688_v42  ;;  %v1709_v57 = vpack.c.bf16 %v2962_v58, %v2962_v58 }
 0xf3a   : > { %2336 = vmatmul.msk.bf16.vlgmr.msra.gmra.mxu0 %vm361_vm0, %v1709_v57  ;;  %1701 = vrot.lane.b32.xlu0 %v1694_v52, %s2494_s15 }
 0xf42   : > { %1749 = vrot.lane.b32.xlu0 %v2968_v59, %s2491_s30 }
 0xf9b   : > { %v1821_v8 = vpop.f32.mrf.mxu1 }
 0xf9c   : > { %v1825_v30 = vadd.f32 %v1821_v8, %v2628_v45 }
 0xf9e   : > { %v2341_v27 = vmul.f32 -1.442695, %v1825_v30 }
 0xfa0   : > { %2458 = vpow2.f32 %v2341_v27 }
 0xfa3   : > { %v1823_v60 = vpop.f32.mrf.mxu1 }
 0xfa6   : > { %v2459_v34 = vpop.eup %2458 }
 0xfa7   : > { %v1829_v61 = vadd.f32 1.0, %v2459_v34 }
 0xfa9   : > { %2460 = vrcp.f32 %v1829_v61  ;;  %v1841_v1 = vand.u32 2147483648, %v1829_v61  ;;  %v1839_v28 = vand.u32 2147483647, %v1829_v61  ;;  %vm1835_vm5 = vweird.f32 %v1829_v61 }
 0xfab   : > { %v1842_v40 = vor.u32 1.1754944e-38, %v1841_v1  ;;  %vm1840_vm7 = vcmp.eq.f32.partialorder %v1839_v28, 8.507059e+37 }
 0xfac   : > { %v1702_v49 = vpop.permute.xlu0 %1701 }
 0xfad   : > { %1704 = vst.msk [vmem:[#allocation4 + $0x8] sm:$0xff] %vm361_vm0, %v1702_v49 }
 0xfaf   : > { %v2461_v62 = vpop.eup %2460 }
 0xfb0   : > { %v1831_v0 = vmul.f32 %v2461_v62, %v1829_v61  ;;  %vm1836_vm4 = vweird.f32 %v2461_v62 }
 0xfb1   : > { %vm1837_vm6 = vmor %vm1835_vm5, %vm1836_vm4 }
 0xfb2   : > { %v1832_v14 = vsub.f32 1.0, %v1831_v0 }
 0xfb4   : > { %v1833_v7 = vmul.f32 %v2461_v62, %v1832_v14  ;;  %v1807_v16 = vld [vmem:[#allocation4 + $0x8] sm:$0xff]  ;;  %v1750_v41 = vpop.permute.xlu0 %1749 }
 0xfb6   : > { %v1834_v45 = vadd.f32 %v2461_v62, %v1833_v7 }
 0xfb7   : > { %v1722_v4 = vpop.f32.mrf.mxu0 }
 0xfb8   : > { %v1726_v29 = vadd.f32 %v1722_v4, %v399_v15  ;;  %v1838_v9 = vsel %vm1837_vm6, %v2461_v62, %v1834_v45 }
 0xfb9   : > { %v2976_v23 = vsel %vm1840_vm7, %v1842_v40, %v1838_v9 }
 0xfba   : > { %v2337_v6 = vmul.f32 -1.442695, %v1726_v29  ;;  %v1845_v54 = vmul.f32 2.0, %v2976_v23 }
 0xfbc   : > { %2462 = vpow2.f32 %v2337_v6  ;;  %v2342_v31 = vadd.f32 -1.0, %v1845_v54 }
 0xfbe   : > { %1853 = vrot.lane.b32.xlu2 %v2342_v31, %s2492_s10 }
 0xfbf   : > { %v1724_v13 = vpop.f32.mrf.mxu0 }
 0xfc2   : > { %v2463_v63 = vpop.eup %2462 }
 0xfc3   : > { %v1730_v48 = vadd.f32 1.0, %v2463_v63 }
 0xfc5   : > { %2464 = vrcp.f32 %v1730_v48  ;;  %v1742_v18 = vand.u32 2147483648, %v1730_v48  ;;  %v1740_v21 = vand.u32 2147483647, %v1730_v48  ;;  %vm1736_vm9 = vweird.f32 %v1730_v48 }
 0xfc7   : > { %v1743_v56 = vor.u32 1.1754944e-38, %v1742_v18  ;;  %vm1741_vm11 = vcmp.eq.f32.partialorder %v1740_v21, 8.507059e+37  ;;  %v401_v18 = vadd.f32 %v2872_v50, %v2623_v38 }
 0xfcb   : > { %v2465_v17 = vpop.eup %2464 }
 0xfcc   : > { %v1732_v51 = vmul.f32 %v2465_v17, %v1730_v48  ;;  %vm1737_vm8 = vweird.f32 %v2465_v17 }
 0xfcd   : > { %vm1738_vm10 = vmor %vm1736_vm9, %vm1737_vm8 }
 0xfce   : > { %v1733_v2 = vsub.f32 1.0, %v1732_v51 }
 0xfd0   : > { %v1734_v19 = vmul.f32 %v2465_v17, %v1733_v2 }
 0xfd2   : > { %v1735_v25 = vadd.f32 %v2465_v17, %v1734_v19 }
 0xfd4   : > { %v1739_v3 = vsel %vm1738_vm10, %v2465_v17, %v1735_v25 }
 0xfd5   : > { %v1744_v22 = vsel %vm1741_vm11, %v1743_v56, %v1739_v3 }
 0xfd6   : > { %v1746_v24 = vmul.f32 2.0, %v1744_v22  ;;  %v1752_v10 = vmul.f32 %v1750_v41, %v1744_v22 }
 0xfd8   : > { %v2338_v26 = vadd.f32 -1.0, %v1746_v24 }
 0xfda   : > { %1754 = vrot.lane.b32.xlu1 %v2338_v26, %s2492_s10 }
 0xfe2   : > { %1848 = vrot.lane.b32.xlu1 %v1807_v16, %s2491_s30 }
 0xfea   : > { %1778 = vperm.xlu1 %2384, %v1775_v47  }
0x1018   : > { %v1854_v20 = vpop.permute.xlu2 %1853 }
0x1019   : > { %v1856_v12 = vmul.f32 %v1854_v20, %v2976_v23 }
0x101b   : > { %1858 = vrot.lane.b32.xlu0 %v1856_v12, %s2491_s30 }
0x104c   : > { %v1755_v33 = vpop.permute.xlu1 %1754 }
0x104d   : > { %v1757_v35 = vmul.f32 %v1755_v33, %v1744_v22 }
0x104f   : > { %1759 = vrot.lane.b32.xlu2 %v1757_v35, %s2491_s30 }
0x1054   : > { %v1849_v11 = vpop.permute.xlu1 %1848 }
0x1055   : > { %v1851_v43 = vmul.f32 %v1849_v11, %v2976_v23 }
0x1057   : > { %1877 = vperm.xlu2 %2385, %v1874_v37  }
0x105c   : > { %v1779_v55 = vpop.permute.xlu1 %1778 }
0x105d   : > { %v1781_v42 = vmul.f32 %v1779_v55, %v2962_v58  ;;  %v1788_v60 = vmul.f32 %v1779_v55, %v2968_v59 }
0x105f   : > { %1771 = vperm.xlu2 %2385, %v2335_v32  }
0x108d   : > { %v1859_v5 = vpop.permute.xlu0 %1858 }
0x108e   : > { %v1861_v44 = vadd.f32 %v1859_v5, %v1851_v43 }
0x1090   : > { %2466 = vtanh.f32 %v1861_v44 }
0x1096   : > { %v2467_v53 = vpop.eup %2466 }
0x1097   : > { %1864 = vrot.lane.b32.xlu1 %v2467_v53, %s2492_s10 }
0x109f   : > { %1783 = vrot.lane.b32.xlu1 %v1781_v42, %s2494_s15 }
0x10a9   : > { %v1760_v52 = vpop.permute.xlu2 %1759 }
0x10aa   : > { %v1762_v57 = vadd.f32 %v1760_v52, %v1752_v10 }
0x10ac   : > { %2468 = vtanh.f32 %v1762_v57 }
0x10b1   : > { %v1878_v8 = vpop.permute.xlu2 %1877 }
0x10b2   : > { %v2469_v30 = vpop.eup %2468  ;;  %v1880_v27 = vmul.f32 %v1878_v8, %v2955_v46  ;;  %v1887_v45 = vmul.f32 %v1878_v8, %v1807_v16 }
0x10b3   : > { %1765 = vrot.lane.b32.xlu0 %v2469_v30, %s2492_s10 }
0x10b4   : > { %1882 = vrot.lane.b32.xlu2 %v1880_v27, %s2494_s15 }
0x10b9   : > { %v1772_v34 = vpop.permute.xlu2 %1771 }
0x10ba   : > { %v1787_v4 = vmul.f32 %v1772_v34, %v1762_v57 }
0x10bb   : > { %1870 = vperm.xlu0 %2383, %v2339_v36  }
0x10bc   : > { %1790 = vrot.lane.b32.xlu2 %v1788_v60, %s2491_s30 }
0x1109   : > { %v1865_v58 = vpop.permute.xlu1 %1864 }
0x110a   : > { %v1867_v7 = vmul.f32 %v1865_v58, %v2976_v23 }
0x110e   : > { %v1883_v1 = vpop.permute.xlu2 %1882 }
0x1111   : > { %v1784_v0 = vpop.permute.xlu1 %1783 }
0x1116   : > { %v1791_v59 = vpop.permute.xlu2 %1790 }
0x1117   : > { %v1793_v40 = vadd.f32 %v1791_v59, %v1787_v4 }
0x1125   : > { %v1766_v61 = vpop.permute.xlu0 %1765 }
0x1126   : > { %v1768_v49 = vmul.f32 %v1766_v61, %v1744_v22  ;;  %v2343_v61 = vld [vmem:[%s2648_s14 + $0x38] sm:$0xff] }
0x1128   : > { %v1774_v62 = vmul.f32 %v1772_v34, %v1768_v49  ;;  %v1973_v49 = vsub.f32 1.0, %v2343_v61 }
0x112a   : > { %v1786_v14 = vadd.f32 %v1784_v0, %v1774_v62 }
0x112c   : > { %1795 = vrot.lane.b32.xlu0 %v1786_v14, %s2491_s30  ;;  %v2003_v14 = vld [vmem:[%s2648_s14] sm:$0xff] }
0x112d   : > { %v1871_v46 = vpop.permute.xlu0 %1870 }
0x112e   : > { %v1873_v28 = vmul.f32 %v1871_v46, %v1867_v7  ;;  %v1886_v23 = vmul.f32 %v1871_v46, %v1861_v44  ;;  %v2072_v46 = vsub.f32 1.0, %v2003_v14 }
0x1130   : > { %v1885_v15 = vadd.f32 %v1883_v1, %v1873_v28 }
0x1132   : > { %1894 = vrot.lane.b32.xlu1 %v1885_v15, %s2491_s30 }
0x1134   : > { %1889 = vrot.lane.b32.xlu0 %v1887_v45, %s2491_s30 }
0x113a   : > { %1800 = vrot.lane.b32.xlu1 %v1793_v40, %s2494_s15 }
0x119e   : > { %v1796_v29 = vpop.permute.xlu0 %1795 }
0x119f   : > { %1798 = vst.msk [vmem:[#allocation3] sm:$0xff] %vm361_vm0, %v1796_v29 }
0x11a4   : > { %v1895_v9 = vpop.permute.xlu1 %1894 }
0x11a5   : > { %1897 = vst.msk [vmem:[#allocation3 + $0x8] sm:$0xff] %vm361_vm0, %v1895_v9 }
0x11a6   : > { %v1890_v6 = vpop.permute.xlu0 %1889  ;;  %v3003_v54 = vld [vmem:[#allocation3] sm:$0xff] }
0x11a7   : > { %v1892_v31 = vadd.f32 %v1890_v6, %v1886_v23  ;;  %v1907_v13 = vpack.c.bf16 %v3003_v54, %v3003_v54 }
0x11a9   : > { %2344 = vmatmul.msk.bf16.vlgmr.msrb.gmra.mxu2 %vm361_vm0, %v1907_v13  ;;  %1899 = vrot.lane.b32.xlu2 %v1892_v31, %s2494_s15 }
0x11ac   : > { %v1801_v63 = vpop.permute.xlu1 %1800  ;;  %v3009_v48 = vld [vmem:[#allocation3 + $0x8] sm:$0xff] }
0x11ad   : > { %1803 = vst.msk [vmem:[#allocation4] sm:$0xff] %vm361_vm0, %v1801_v63  ;;  %v2006_v17 = vpack.c.bf16 %v3009_v48, %v3009_v48 }
0x11af   : > { %2347 = vmatmul.msk.bf16.vlgmr.msrb.gmra.mxu3 %vm361_vm0, %v2006_v17 }
0x11b4   : > { %v3015_v51 = vld [vmem:[#allocation4] sm:$0xff] }
0x11b5   : > { %1947 = vrot.lane.b32.xlu2 %v3015_v51, %s2491_s30 }
0x1203   : > { %v1900_v2 = vpop.permute.xlu2 %1899 }
0x1204   : > { %1902 = vst.msk [vmem:[#allocation4 + $0x8] sm:$0xff] %vm361_vm0, %v1900_v2 }
0x120b   : > { %v2005_v34 = vld [vmem:[#allocation4 + $0x8] sm:$0xff] }
0x120f   : > { %v1948_v28 = vpop.permute.xlu2 %1947 }
0x122c   : > { %v1920_v19 = vpop.f32.mrf.mxu2 }
0x122d   : > { %v1924_v21 = vadd.f32 %v1920_v19, %v401_v18 }
0x122f   : > { %v2345_v25 = vmul.f32 -1.442695, %v1924_v21 }
0x1231   : > { %2470 = vpow2.f32 %v2345_v25 }
0x1232   : > { %v2019_v56 = vpop.f32.mrf.mxu3 }
0x1233   : > { %v2023_v3 = vadd.f32 %v2019_v56, %v2625_v39 }
0x1234   : > { %v1922_v22 = vpop.f32.mrf.mxu2 }
0x1235   : > { %v2348_v24 = vmul.f32 -1.442695, %v2023_v3 }
0x1237   : > { %v2471_v26 = vpop.eup %2470  ;;  %2472 = vpow2.f32 %v2348_v24 }
0x1238   : > { %v1928_v16 = vadd.f32 1.0, %v2471_v26 }
0x123a   : > { %2474 = vrcp.f32 %v1928_v16  ;;  %v2021_v32 = vpop.f32.mrf.mxu3  ;;  %v1940_v50 = vand.u32 2147483648, %v1928_v16  ;;  %v1938_v36 = vand.u32 2147483647, %v1928_v16  ;;  %vm1934_vm13 = vweird.f32 %v1928_v16 }
0x123c   : > { %v1941_v11 = vor.u32 1.1754944e-38, %v1940_v50  ;;  %vm1939_vm15 = vcmp.eq.f32.partialorder %v1938_v36, 8.507059e+37 }
0x123d   : > { %v2473_v47 = vpop.eup %2472 }
0x123e   : > { %v2027_v20 = vadd.f32 1.0, %v2473_v47 }
0x1240   : > { %v2475_v12 = vpop.eup %2474  ;;  %2476 = vrcp.f32 %v2027_v20  ;;  %v2039_v53 = vand.u32 2147483648, %v2027_v20  ;;  %v2037_v10 = vand.u32 2147483647, %v2027_v20  ;;  %vm2033_vm2 = vweird.f32 %v2027_v20 }
0x1241   : > { %v1930_v33 = vmul.f32 %v2475_v12, %v1928_v16  ;;  %vm1935_vm12 = vweird.f32 %v2475_v12 }
0x1242   : > { %vm1936_vm14 = vmor %vm1934_vm13, %vm1935_vm12  ;;  %v2040_v8 = vor.u32 1.1754944e-38, %v2039_v53  ;;  %vm2038_vm4 = vcmp.eq.f32.partialorder %v2037_v10, 8.507059e+37 }
0x1243   : > { %v1931_v38 = vsub.f32 1.0, %v1930_v33 }
0x1245   : > { %v1932_v35 = vmul.f32 %v2475_v12, %v1931_v38 }
0x1246   : > { %v2477_v37 = vpop.eup %2476 }
0x1247   : > { %v2029_v41 = vmul.f32 %v2477_v37, %v2027_v20  ;;  %v1933_v39 = vadd.f32 %v2475_v12, %v1932_v35  ;;  %vm2034_vm1 = vweird.f32 %v2477_v37 }
0x1248   : > { %vm2035_vm3 = vmor %vm2033_vm2, %vm2034_vm1 }
0x1249   : > { %v2030_v43 = vsub.f32 1.0, %v2029_v41  ;;  %v1937_v5 = vsel %vm1936_vm14, %v2475_v12, %v1933_v39 }
0x124a   : > { %v1942_v44 = vsel %vm1939_vm15, %v1941_v11, %v1937_v5 }
0x124b   : > { %v1944_v55 = vmul.f32 2.0, %v1942_v44  ;;  %v2031_v42 = vmul.f32 %v2477_v37, %v2030_v43  ;;  %v1950_v23 = vmul.f32 %v1948_v28, %v1942_v44 }
0x124d   : > { %v2346_v52 = vadd.f32 -1.0, %v1944_v55  ;;  %v2032_v57 = vadd.f32 %v2477_v37, %v2031_v42 }
0x124f   : > { %1952 = vrot.lane.b32.xlu0 %v2346_v52, %s2492_s10  ;;  %v2036_v30 = vsel %vm2035_vm3, %v2477_v37, %v2032_v57 }
0x1250   : > { %v2041_v27 = vsel %vm2038_vm4, %v2040_v8, %v2036_v30 }
0x1251   : > { %v2043_v60 = vmul.f32 2.0, %v2041_v27 }
0x1253   : > { %v2349_v58 = vadd.f32 -1.0, %v2043_v60 }
0x1255   : > { %2051 = vrot.lane.b32.xlu1 %v2349_v58, %s2492_s10 }
0x1257   : > { %2046 = vrot.lane.b32.xlu0 %v2005_v34, %s2491_s30 }
0x125f   : > { %1976 = vperm.xlu0 %2383, %v1973_v49  }
0x12c1   : > { %v1953_v62 = vpop.permute.xlu0 %1952 }
0x12c2   : > { %v1955_v0 = vmul.f32 %v1953_v62, %v1942_v44 }
0x12c4   : > { %1957 = vrot.lane.b32.xlu1 %v1955_v0, %s2491_s30 }
0x12c7   : > { %v2052_v1 = vpop.permute.xlu1 %2051 }
0x12c8   : > { %v2054_v7 = vmul.f32 %v2052_v1, %v2041_v27 }
0x12c9   : > { %v2047_v15 = vpop.permute.xlu0 %2046 }
0x12ca   : > { %2056 = vrot.lane.b32.xlu2 %v2054_v7, %s2491_s30  ;;  %v2049_v45 = vmul.f32 %v2047_v15, %v2041_v27 }
0x12cc   : > { %2075 = vperm.xlu1 %2384, %v2072_v46  }
0x12d1   : > { %v1977_v29 = vpop.permute.xlu0 %1976 }
0x12d2   : > { %v1979_v9 = vmul.f32 %v1977_v29, %v3003_v54  ;;  %v1986_v54 = vmul.f32 %v1977_v29, %v3015_v51 }
0x12d4   : > { %1969 = vperm.xlu1 %2384, %v2343_v61  }
0x1324   : > { %v2057_v59 = vpop.permute.xlu2 %2056 }
0x1325   : > { %v2059_v4 = vadd.f32 %v2057_v59, %v2049_v45 }
0x1327   : > { %2478 = vtanh.f32 %v2059_v4 }
0x132d   : > { %v2479_v40 = vpop.eup %2478 }
0x132e   : > { %2062 = vrot.lane.b32.xlu0 %v2479_v40, %s2492_s10 }
0x1336   : > { %v1958_v6 = vpop.permute.xlu1 %1957  ;;  %1981 = vrot.lane.b32.xlu0 %v1979_v9, %s2494_s15 }
0x1337   : > { %v1960_v31 = vadd.f32 %v1958_v6, %v1950_v23 }
0x1339   : > { %2480 = vtanh.f32 %v1960_v31 }
0x133e   : > { %v2076_v13 = vpop.permute.xlu1 %2075 }
0x133f   : > { %v2481_v63 = vpop.eup %2480  ;;  %v2078_v17 = vmul.f32 %v2076_v13, %v3009_v48  ;;  %v2085_v2 = vmul.f32 %v2076_v13, %v2005_v34 }
0x1340   : > { %1963 = vrot.lane.b32.xlu2 %v2481_v63, %s2492_s10 }
0x1341   : > { %2080 = vrot.lane.b32.xlu1 %v2078_v17, %s2494_s15  ;;  %2087 = vrot.lane.b32.xlu0 %v2085_v2, %s2491_s30 }
0x1346   : > { %v1970_v56 = vpop.permute.xlu1 %1969 }
0x1347   : > { %v1985_v48 = vmul.f32 %v1970_v56, %v1960_v31 }
0x1348   : > { %2068 = vperm.xlu2 %2385, %v2003_v14  }
0x1350   : > { %1988 = vrot.lane.b32.xlu2 %v1986_v54, %s2491_s30 }
0x139a   : > { %v1964_v18 = vpop.permute.xlu2 %1963 }
0x139b   : > { %v1966_v25 = vmul.f32 %v1964_v18, %v1942_v44 }
0x139d   : > { %v1972_v3 = vmul.f32 %v1970_v56, %v1966_v25 }
0x13a0   : > { %v2063_v19 = vpop.permute.xlu0 %2062 }
0x13a1   : > { %v2065_v32 = vmul.f32 %v2063_v19, %v2041_v27 }
0x13a2   : > { %v2069_v21 = vpop.permute.xlu2 %2068 }
0x13a3   : > { %v2071_v51 = vmul.f32 %v2069_v21, %v2065_v32  ;;  %v2084_v47 = vmul.f32 %v2069_v21, %v2059_v4 }
0x13a8   : > { %v1982_v22 = vpop.permute.xlu0 %1981 }
0x13a9   : > { %v1984_v24 = vadd.f32 %v1982_v22, %v1972_v3 }
0x13aa   : > { %v1989_v26 = vpop.permute.xlu2 %1988 }
0x13ab   : > { %v1991_v16 = vadd.f32 %v1989_v26, %v1985_v48  ;;  %1993 = vrot.lane.b32.xlu1 %v1984_v24, %s2491_s30 }
0x13ad   : > { %1998 = vrot.lane.b32.xlu0 %v1991_v16, %s2494_s15 }
0x13b3   : > { %v2081_v20 = vpop.permute.xlu1 %2080  ;;  %v2088_v12 = vpop.permute.xlu0 %2087 }
0x13b4   : > { %v2083_v33 = vadd.f32 %v2081_v20, %v2071_v51  ;;  %v2090_v38 = vadd.f32 %v2088_v12, %v2084_v47 }
0x13b6   : > { %2092 = vrot.lane.b32.xlu2 %v2083_v33, %s2491_s30  ;;  %2097 = vrot.lane.b32.xlu1 %v2090_v38, %s2494_s15 }
0x1410   : > { %v2093_v50 = vpop.permute.xlu2 %2092 }
0x1411   : > { %2095 = vst.msk [vmem:[#allocation3 + $0x8] sm:$0xff] %vm361_vm0, %v2093_v50 }
0x1418   : > { %v2103_v35 = vld [vmem:[#allocation3 + $0x8] sm:$0xff] }
0x1419   : > { %2350 = vst.msk [vmem:[%s301_s21 + $0x8] sm:$0xff] %vm361_vm0, %v2103_v35 }
0x141d   : > { %v1994_v36 = vpop.permute.xlu1 %1993 }
0x141e   : > { %1996 = vst.msk [vmem:[#allocation3] sm:$0xff] %vm361_vm0, %v1994_v36 }
0x141f   : > { %v1999_v37 = vpop.permute.xlu0 %1998 }
0x1420   : > { %2001 = vst.msk [vmem:[#allocation4] sm:$0xff] %vm361_vm0, %v1999_v37 }
0x1425   : > { %v2101_v41 = vld [vmem:[#allocation3] sm:$0xff] }
0x1426   : > { %2102 = vst.msk [vmem:[%s301_s21] sm:$0xff] %vm361_vm0, %v2101_v41 }
0x1428   : > { %v2098_v39 = vpop.permute.xlu1 %2097 }
0x1429   : > { %2100 = vst.msk [vmem:[#allocation4 + $0x8] sm:$0xff] %vm361_vm0, %v2098_v39 }
0x142a PF: > { %s15_s18 = sadd.s32 1, %s2488_s18  }
0x142b   : > { %p12_p4 = scmp.ge.s32.totalorder %s15_s18, 5  }
0x142d   :  { %14 = sbr.rel (!%p12_p4) target bundleno = 1 (0x1), region = 100 }

// kernel: cvae_forward.5
= control target key start
LH: loop header
LB: loop body
LE: loop exit
PB: predicated region body
PF: predicated region fallthrough
CT: control target
= control target key end

     0   :  { %vm82_vm0 = vcmask 261120   ;;  %s1529_s16 = smov 64   ;;  %s1530_s17 = smov 32   ;;  %v1531_v30 = vmov 0   ;;  %s1971_s1 = inlined_call_operand.vmem [shape: bf16[32,128], index: 1, kind: input, shape index: {}]   ;;  %s1972_s3 = inlined_call_operand.vmem [shape: bf16[32,128], index: 3, kind: input, shape index: {}]   ;;  %s1973_s4 = inlined_call_operand.vmem [shape: f32[8,32], index: 4, kind: input, shape index: {}]   ;;  %s1974_s2 = inlined_call_operand.vmem [shape: f32[1,128], index: 2, kind: input, shape index: {}]   ;;  %s1975_s0 = inlined_call_operand.vmem [shape: bf16[72,32], index: 0, kind: input, shape index: {}]   ;;  %s1976_s5 = inlined_call_operand.vmem [shape: f32[9,8,1], index: 5, kind: input, shape index: {}]   ;;  %s1977_s6 = inlined_call_operand.vmem [shape: bf16[32,128], index: 6, kind: input, shape index: {}]   ;;  %s1978_s7 = inlined_call_operand.vmem [shape: f32[1,128], index: 7, kind: input, shape index: {}]   ;;  %s1979_s8 = inlined_call_operand.vmem [shape: f32[72,128], index: 8, kind: output, shape index: {}]  }
   0x1   :  { %v1422_v0 = vld [vmem:[%s1971_s1 + $0x8] sm:$0xff]  ;;  %v140_v2 = vld [vmem:[%s1973_s4] sm:$0xff]  ;;  %1433 = vset.pattern.permute.xlu1 %v1531_v30  ;;  %1434 = vset.pattern.permute.xlu2 %v1531_v30  ;;  %s1532_s20 = smov 96  }
   0x2   :  { %v1584_v1 = vld [vmem:[%s1972_s3 + $0x8] sm:$0xff]  ;;  %104 = vmatpush.bf16.msra.mxu0 %v1422_v0  ;;  %v1421_v3 = vld [vmem:[%s1971_s1] sm:$0xff]  ;;  %141 = vst.msk [vmem:[#allocation4] sm:$0xff] %vm82_vm0, %v140_v2  ;;  %1435 = vset.pattern.permute.xlu0 %v1531_v30 }
   0x3   :  { %172 = vmatpush.bf16.msra.mxu1 %v1584_v1  ;;  %v1596_v4 = vld [vmem:[%s1972_s3] sm:$0xff]  ;;  %143 = vst.msk [vmem:[#allocation5] sm:$0xff] %vm82_vm0, %v140_v2  ;;  %279 = vmatpush.bf16.msra.mxu3 %v1584_v1 }
   0x4   :  { %606 = vmatpush.bf16.msra.mxu2 %v1584_v1  ;;  %v1417_v5 = vld [vmem:[%s1975_s0] sm:$0xff] }
   0x5   :  { %v1621_v8 = vld [vmem:[%s1974_s2] ss:$0 sm:$0xff] }
   0x6   :  { %105 = vmatpush.bf16.msra.mxu0 %v1421_v3  ;;  %v223_v33 = vld [vmem:[%s1976_s5] sm:$0xff] }
   0x7   :  { %173 = vmatpush.bf16.msra.mxu1 %v1596_v4  ;;  %280 = vmatpush.bf16.msra.mxu3 %v1596_v4  ;;  %v235_v34 = vsub.f32 1.0, %v223_v33 }
   0x8   :  { %607 = vmatpush.bf16.msra.mxu2 %v1596_v4 }
   0x9   :  { %1356 = vmatmul.msk.bf16.vlgmr.msra.gmra.mxu0 %vm82_vm0, %v1417_v5  ;;  %v149_v6 = vld [vmem:[#allocation4] sm:$0xff] }
   0xa   :  { %v150_v7 = vpack.c.bf16 %v149_v6, %v149_v6  ;;  %v201_v29 = vld [vmem:[#allocation5] sm:$0xff] }
   0xb   :  { %497 = vmatpush.bf16.msrb.mxu1 %v1584_v1  ;;  %388 = vmatpush.bf16.msrb.mxu3 %v1584_v1 }
   0xc   :  { %933 = vmatpush.bf16.msrb.mxu2 %v1584_v1  ;;  %1369 = vmatmul.msk.bf16.vlgmr.msra.gmra.mxu1 %vm82_vm0, %v150_v7 }
   0xf   :  { %498 = vmatpush.bf16.msrb.mxu1 %v1596_v4  ;;  %389 = vmatpush.bf16.msrb.mxu3 %v1596_v4 }
  0x10   :  { %934 = vmatpush.bf16.msrb.mxu2 %v1596_v4 }
  0x13   :  { %824 = vmatpush.bf16.msra.mxu1 %v1584_v1 }
  0x17   :  { %825 = vmatpush.bf16.msra.mxu1 %v1596_v4 }
  0x86   :  { %v107_v9 = vpop.f32.mrf.mxu0 }
  0x87   :  { %v108_v10 = vadd.f32 %v1621_v8, %v107_v9 }
  0x89   :  { %v175_v11 = vpop.f32.mrf.mxu1 }
  0x8a   :  { %v179_v12 = vadd.f32 %v175_v11, %v108_v10 }
  0x8c   :  { %v1370_v13 = vmul.f32 -1.442695, %v179_v12 }
  0x8e   :  { %1438 = vpow2.f32 %v1370_v13  ;;  %v109_v57 = vpop.f32.mrf.mxu0 }
  0x8f   :  { %v110_v58 = vadd.f32 %v1621_v8, %v109_v57 }
  0x91   :  { %v177_v14 = vpop.f32.mrf.mxu1 }
  0x94   :  { %v1439_v15 = vpop.eup %1438 }
  0x95   :  { %v183_v16 = vadd.f32 1.0, %v1439_v15 }
  0x97   :  { %1440 = vrcp.f32 %v183_v16  ;;  %v195_v20 = vand.u32 2147483648, %v183_v16  ;;  %v193_v22 = vand.u32 2147483647, %v183_v16  ;;  %vm189_vm2 = vweird.f32 %v183_v16 }
  0x99   :  { %v196_v24 = vor.u32 1.1754944e-38, %v195_v20  ;;  %vm194_vm4 = vcmp.eq.f32.partialorder %v193_v22, 8.507059e+37 }
  0x9d   :  { %v1441_v17 = vpop.eup %1440 }
  0x9e   :  { %v185_v18 = vmul.f32 %v1441_v17, %v183_v16  ;;  %vm190_vm1 = vweird.f32 %v1441_v17  ;;  %v1375_v16 = vld [vmem:[%s1976_s5 + $0x8] sm:$0xff] }
  0x9f   :  { %vm191_vm3 = vmor %vm189_vm2, %vm190_vm1 }
  0xa0   :  { %v186_v19 = vsub.f32 1.0, %v185_v18 }
  0xa2   :  { %v187_v21 = vmul.f32 %v1441_v17, %v186_v19 }
  0xa4   :  { %v188_v23 = vadd.f32 %v1441_v17, %v187_v21 }
  0xa6   :  { %v192_v25 = vsel %vm191_vm3, %v1441_v17, %v188_v23  ;;  %v344_v17 = vsub.f32 1.0, %v1375_v16 }
  0xa7   :  { %v197_v26 = vsel %vm194_vm4, %v196_v24, %v192_v25 }
  0xa8   :  { %v199_v27 = vmul.f32 2.0, %v197_v26 }
  0xaa   :  { %v1371_v28 = vadd.f32 -1.0, %v199_v27 }
  0xac   :  { %208 = vrot.lane.b32.xlu0 %v1371_v28, %s1529_s16 }
  0xb4   :  { %203 = vrot.lane.b32.xlu0 %v201_v29, %s1530_s17 }
 0x11e   :  { %v209_v31 = vpop.permute.xlu0 %208 }
 0x11f   :  { %v211_v32 = vmul.f32 %v209_v31, %v197_v26 }
 0x121   :  { %213 = vrot.lane.b32.xlu1 %v211_v32, %s1530_s17 }
 0x126   :  { %v204_v35 = vpop.permute.xlu0 %203 }
 0x127   :  { %v206_v36 = vmul.f32 %v204_v35, %v197_v26 }
 0x129   :  { %239 = vperm.xlu1 %1433, %v235_v34  }
 0x193   :  { %v214_v37 = vpop.permute.xlu1 %213 }
 0x194   :  { %v216_v38 = vadd.f32 %v214_v37, %v206_v36  ;;  %v1418_v37 = vld [vmem:[%s1975_s0 + $0x8] sm:$0xff] }
 0x195   :  { %1357 = vmatmul.msk.bf16.gmra.mxu0 %vm82_vm0, %v1418_v37 }
 0x196   :  { %1442 = vtanh.f32 %v216_v38 }
 0x19b   :  { %v240_v39 = vpop.permute.xlu1 %239 }
 0x19c   :  { %v1443_v40 = vpop.eup %1442  ;;  %v242_v41 = vmul.f32 %v240_v39, %v149_v6  ;;  %v255_v42 = vmul.f32 %v240_v39, %v201_v29 }
 0x19d   :  { %219 = vrot.lane.b32.xlu2 %v1443_v40, %s1529_s16 }
 0x19e   :  { %244 = vrot.lane.b32.xlu0 %v242_v41, %s1532_s20 }
 0x1a5   :  { %226 = vperm.xlu2 %1434, %v223_v33  }
 0x1ad   :  { %257 = vrot.lane.b32.xlu2 %v255_v42, %s1530_s17 }
 0x1f7   :  { %v220_v43 = vpop.permute.xlu2 %219 }
 0x1f8   :  { %v222_v48 = vmul.f32 %v220_v43, %v197_v26 }
 0x1ff   :  { %v227_v44 = vpop.permute.xlu2 %226 }
 0x200   :  { %v253_v45 = vmul.f32 %v227_v44, %v216_v38  ;;  %v1634_v49 = vmul.f32 %v227_v44, %v222_v48 }
 0x207   :  { %v258_v46 = vpop.permute.xlu2 %257 }
 0x208   :  { %v260_v47 = vadd.f32 %v258_v46, %v253_v45 }
 0x20a   :  { %262 = vrot.lane.b32.xlu0 %v260_v47, %s1532_s20 }
 0x210   :  { %v245_v50 = vpop.permute.xlu0 %244 }
 0x211   :  { %v247_v51 = vadd.f32 %v245_v50, %v1634_v49 }
 0x212   :  { %v112_v43 = vpop.f32.mrf.mxu0 }
 0x213   :  { %249 = vrot.lane.b32.xlu1 %v247_v51, %s1530_s17  ;;  %v113_v44 = vadd.f32 %v1621_v8, %v112_v43 }
 0x27c   :  { %v263_v52 = vpop.permute.xlu0 %262 }
 0x27d   :  { %265 = vst.msk [vmem:[#allocation5] sm:$0xff] %vm82_vm0, %v263_v52 }
 0x284   :  { %v308_v53 = vld [vmem:[#allocation5] sm:$0xff] }
 0x285   :  { %v250_v54 = vpop.permute.xlu1 %249  ;;  %310 = vrot.lane.b32.xlu2 %v308_v53, %s1530_s17 }
 0x286   :  { %252 = vst.msk [vmem:[#allocation4] sm:$0xff] %vm82_vm0, %v250_v54 }
 0x28d   :  { %v268_v55 = vld [vmem:[#allocation4] sm:$0xff] }
 0x28e   :  { %v269_v56 = vpack.c.bf16 %v268_v55, %v268_v55 }
 0x290   :  { %1372 = vmatmul.msk.bf16.vlgmr.msra.gmra.mxu3 %vm82_vm0, %v269_v56 }
 0x291   :  { %715 = vmatpush.bf16.msra.mxu3 %v1584_v1 }
 0x295   :  { %716 = vmatpush.bf16.msra.mxu3 %v1596_v4 }
 0x2df   :  { %v311_v23 = vpop.permute.xlu2 %310 }
 0x313   :  { %v282_v59 = vpop.f32.mrf.mxu3 }
 0x314   :  { %v286_v60 = vadd.f32 %v282_v59, %v110_v58 }
 0x316   :  { %v1373_v61 = vmul.f32 -1.442695, %v286_v60 }
 0x318   :  { %1444 = vpow2.f32 %v1373_v61 }
 0x31b   :  { %v284_v62 = vpop.f32.mrf.mxu3 }
 0x31c   :  { %v1379_v62 = vld [vmem:[%s1976_s5 + $0x10] sm:$0xff] }
 0x31e   :  { %v1445_v63 = vpop.eup %1444 }
 0x31f   :  { %v290_v0 = vadd.f32 1.0, %v1445_v63  ;;  %v453_v63 = vsub.f32 1.0, %v1379_v62 }
 0x321   :  { %1446 = vrcp.f32 %v290_v0  ;;  %v302_v6 = vand.u32 2147483648, %v290_v0  ;;  %v300_v9 = vand.u32 2147483647, %v290_v0  ;;  %vm296_vm6 = vweird.f32 %v290_v0 }
 0x323   :  { %v303_v11 = vor.u32 1.1754944e-38, %v302_v6  ;;  %vm301_vm8 = vcmp.eq.f32.partialorder %v300_v9, 8.507059e+37 }
 0x327   :  { %v1447_v2 = vpop.eup %1446 }
 0x328   :  { %v292_v3 = vmul.f32 %v1447_v2, %v290_v0  ;;  %vm297_vm5 = vweird.f32 %v1447_v2 }
 0x329   :  { %vm298_vm7 = vmor %vm296_vm6, %vm297_vm5 }
 0x32a   :  { %v293_v5 = vsub.f32 1.0, %v292_v3 }
 0x32c   :  { %v294_v7 = vmul.f32 %v1447_v2, %v293_v5 }
 0x32e   :  { %v295_v10 = vadd.f32 %v1447_v2, %v294_v7 }
 0x330   :  { %v299_v12 = vsel %vm298_vm7, %v1447_v2, %v295_v10 }
 0x331   :  { %v304_v13 = vsel %vm301_vm8, %v303_v11, %v299_v12 }
 0x332   :  { %v306_v14 = vmul.f32 2.0, %v304_v13  ;;  %v313_v24 = vmul.f32 %v311_v23, %v304_v13 }
 0x334   :  { %v1374_v15 = vadd.f32 -1.0, %v306_v14 }
 0x336   :  { %315 = vrot.lane.b32.xlu1 %v1374_v15, %s1529_s16 }
 0x33e   :  { %348 = vperm.xlu1 %1433, %v344_v17  }
 0x3a8   :  { %v316_v18 = vpop.permute.xlu1 %315 }
 0x3a9   :  { %v318_v19 = vmul.f32 %v316_v18, %v304_v13 }
 0x3ab   :  { %320 = vrot.lane.b32.xlu0 %v318_v19, %s1530_s17 }
 0x3b0   :  { %v349_v20 = vpop.permute.xlu1 %348 }
 0x3b1   :  { %v351_v21 = vmul.f32 %v349_v20, %v268_v55  ;;  %v364_v22 = vmul.f32 %v349_v20, %v308_v53 }
 0x3b3   :  { %334 = vperm.xlu0 %1435, %v1375_v16   ;;  %353 = vrot.lane.b32.xlu1 %v351_v21, %s1532_s20 }
 0x3bb   :  { %366 = vrot.lane.b32.xlu1 %v364_v22, %s1530_s17 }
 0x41d   :  { %v321_v25 = vpop.permute.xlu0 %320 }
 0x41e   :  { %v323_v26 = vadd.f32 %v321_v25, %v313_v24 }
 0x420   :  { %1448 = vtanh.f32 %v323_v26 }
 0x425   :  { %v354_v28 = vpop.permute.xlu1 %353  ;;  %v335_v31 = vpop.permute.xlu0 %334 }
 0x426   :  { %v1449_v27 = vpop.eup %1448  ;;  %v362_v35 = vmul.f32 %v335_v31, %v323_v26 }
 0x427   :  { %326 = vrot.lane.b32.xlu2 %v1449_v27, %s1529_s16  ;;  %v114_v27 = vpop.f32.mrf.mxu0 }
 0x42d   :  { %v367_v34 = vpop.permute.xlu1 %366 }
 0x42e   :  { %v369_v36 = vadd.f32 %v367_v34, %v362_v35 }
 0x481   :  { %v327_v29 = vpop.permute.xlu2 %326 }
 0x482   :  { %v329_v30 = vmul.f32 %v327_v29, %v304_v13 }
 0x484   :  { %v1653_v32 = vmul.f32 %v335_v31, %v329_v30 }
 0x486   :  { %v356_v33 = vadd.f32 %v354_v28, %v1653_v32  ;;  %v115_v28 = vadd.f32 %v1621_v8, %v114_v27 }
 0x488   :  { %358 = vrot.lane.b32.xlu2 %v356_v33, %s1530_s17 }
 0x490   :  { %371 = vrot.lane.b32.xlu2 %v369_v36, %s1532_s20 }
 0x4e2   :  { %v359_v38 = vpop.permute.xlu2 %358 }
 0x4e3   :  { %361 = vst.msk [vmem:[#allocation4] sm:$0xff] %vm82_vm0, %v359_v38 }
 0x4ea   :  { %v372_v39 = vpop.permute.xlu2 %371  ;;  %v377_v40 = vld [vmem:[#allocation4] sm:$0xff] }
 0x4eb   :  { %374 = vst.msk [vmem:[#allocation5] sm:$0xff] %vm82_vm0, %v372_v39  ;;  %v378_v41 = vpack.c.bf16 %v377_v40, %v377_v40 }
 0x4ed   :  { %1376 = vmatmul.msk.bf16.vlgmr.msrb.gmra.mxu3 %vm82_vm0, %v378_v41 }
 0x4ee   :  { %1042 = vmatpush.bf16.msrb.mxu3 %v1584_v1 }
 0x4f2   :  { %v417_v42 = vld [vmem:[#allocation5] sm:$0xff]  ;;  %1043 = vmatpush.bf16.msrb.mxu3 %v1596_v4 }
 0x4f3   :  { %419 = vrot.lane.b32.xlu1 %v417_v42, %s1530_s17 }
 0x565   :  { %v420_v7 = vpop.permute.xlu1 %419 }
 0x570   :  { %v391_v45 = vpop.f32.mrf.mxu3 }
 0x571   :  { %v395_v46 = vadd.f32 %v391_v45, %v113_v44 }
 0x573   :  { %v1377_v47 = vmul.f32 -1.442695, %v395_v46 }
 0x575   :  { %1450 = vpow2.f32 %v1377_v47 }
 0x578   :  { %v393_v48 = vpop.f32.mrf.mxu3 }
 0x579   :  { %v1383_v48 = vld [vmem:[%s1976_s5 + $0x18] sm:$0xff] }
 0x57b   :  { %v1451_v50 = vpop.eup %1450 }
 0x57c   :  { %v399_v51 = vadd.f32 1.0, %v1451_v50  ;;  %v562_v50 = vsub.f32 1.0, %v1383_v48 }
 0x57e   :  { %1452 = vrcp.f32 %v399_v51  ;;  %v411_v1 = vand.u32 2147483648, %v399_v51  ;;  %v409_v4 = vand.u32 2147483647, %v399_v51  ;;  %vm405_vm10 = vweird.f32 %v399_v51 }
 0x580   :  { %v412_v57 = vor.u32 1.1754944e-38, %v411_v1  ;;  %vm410_vm12 = vcmp.eq.f32.partialorder %v409_v4, 8.507059e+37 }
 0x584   :  { %v1453_v52 = vpop.eup %1452 }
 0x585   :  { %v401_v53 = vmul.f32 %v1453_v52, %v399_v51  ;;  %vm406_vm9 = vweird.f32 %v1453_v52 }
 0x586   :  { %vm407_vm11 = vmor %vm405_vm10, %vm406_vm9 }
 0x587   :  { %v402_v54 = vsub.f32 1.0, %v401_v53 }
 0x589   :  { %v403_v55 = vmul.f32 %v1453_v52, %v402_v54 }
 0x58b   :  { %v404_v56 = vadd.f32 %v1453_v52, %v403_v55 }
 0x58d   :  { %v408_v58 = vsel %vm407_vm11, %v1453_v52, %v404_v56 }
 0x58e   :  { %v413_v59 = vsel %vm410_vm12, %v412_v57, %v408_v58 }
 0x58f   :  { %v415_v60 = vmul.f32 2.0, %v413_v59  ;;  %v422_v9 = vmul.f32 %v420_v7, %v413_v59 }
 0x591   :  { %v1378_v61 = vadd.f32 -1.0, %v415_v60 }
 0x593   :  { %424 = vrot.lane.b32.xlu0 %v1378_v61, %s1529_s16 }
 0x59b   :  { %457 = vperm.xlu0 %1435, %v453_v63  }
 0x605   :  { %v425_v0 = vpop.permute.xlu0 %424 }
 0x606   :  { %v427_v2 = vmul.f32 %v425_v0, %v413_v59 }
 0x608   :  { %429 = vrot.lane.b32.xlu2 %v427_v2, %s1530_s17 }
 0x60d   :  { %v458_v3 = vpop.permute.xlu0 %457 }
 0x60e   :  { %v460_v5 = vmul.f32 %v458_v3, %v377_v40  ;;  %v473_v6 = vmul.f32 %v458_v3, %v417_v42 }
 0x610   :  { %443 = vperm.xlu2 %1434, %v1379_v62   ;;  %462 = vrot.lane.b32.xlu0 %v460_v5, %s1532_s20 }
 0x618   :  { %475 = vrot.lane.b32.xlu2 %v473_v6, %s1530_s17 }
 0x662   :  { %v430_v10 = vpop.permute.xlu2 %429 }
 0x663   :  { %v432_v11 = vadd.f32 %v430_v10, %v422_v9  ;;  %v1419_v9 = vld [vmem:[%s1975_s0 + $0x10] sm:$0xff] }
 0x664   :  { %1358 = vmatmul.msk.bf16.gmra.mxu0 %vm82_vm0, %v1419_v9 }
 0x665   :  { %1454 = vtanh.f32 %v432_v11 }
 0x66a   :  { %v444_v12 = vpop.permute.xlu2 %443 }
 0x66b   :  { %v1455_v13 = vpop.eup %1454  ;;  %v471_v14 = vmul.f32 %v444_v12, %v432_v11 }
 0x66c   :  { %435 = vrot.lane.b32.xlu1 %v1455_v13, %s1529_s16 }
 0x672   :  { %v476_v15 = vpop.permute.xlu2 %475 }
 0x673   :  { %v478_v16 = vadd.f32 %v476_v15, %v471_v14 }
 0x675   :  { %480 = vrot.lane.b32.xlu0 %v478_v16, %s1532_s20 }
 0x682   :  { %v463_v18 = vpop.permute.xlu0 %462 }
 0x6de   :  { %v436_v17 = vpop.permute.xlu1 %435 }
 0x6df   :  { %v438_v19 = vmul.f32 %v436_v17, %v413_v59 }
 0x6e1   :  { %v1678_v20 = vmul.f32 %v444_v12, %v438_v19  ;;  %v117_v13 = vpop.f32.mrf.mxu0 }
 0x6e2   :  { %v118_v14 = vadd.f32 %v1621_v8, %v117_v13 }
 0x6e3   :  { %v465_v21 = vadd.f32 %v463_v18, %v1678_v20 }
 0x6e5   :  { %467 = vrot.lane.b32.xlu1 %v465_v21, %s1530_s17 }
 0x6e7   :  { %v481_v22 = vpop.permute.xlu0 %480 }
 0x6e8   :  { %483 = vst.msk [vmem:[#allocation5] sm:$0xff] %vm82_vm0, %v481_v22 }
 0x6ef   :  { %v526_v23 = vld [vmem:[#allocation5] sm:$0xff] }
 0x6f0   :  { %528 = vrot.lane.b32.xlu2 %v526_v23, %s1530_s17 }
 0x74a   :  { %v529_v55 = vpop.permute.xlu2 %528 }
 0x757   :  { %v468_v24 = vpop.permute.xlu1 %467 }
 0x758   :  { %470 = vst.msk [vmem:[#allocation4] sm:$0xff] %vm82_vm0, %v468_v24 }
 0x75f   :  { %v486_v25 = vld [vmem:[#allocation4] sm:$0xff] }
 0x760   :  { %v487_v26 = vpack.c.bf16 %v486_v25, %v486_v25 }
 0x762   :  { %1380 = vmatmul.msk.bf16.vlgmr.msrb.gmra.mxu1 %vm82_vm0, %v487_v26 }
 0x7df   :  { %v500_v29 = vpop.f32.mrf.mxu1 }
 0x7e0   :  { %v504_v30 = vadd.f32 %v500_v29, %v115_v28 }
 0x7e2   :  { %v1381_v31 = vmul.f32 -1.442695, %v504_v30 }
 0x7e4   :  { %1456 = vpow2.f32 %v1381_v31 }
 0x7e7   :  { %v502_v33 = vpop.f32.mrf.mxu1 }
 0x7ea   :  { %v1457_v34 = vpop.eup %1456 }
 0x7eb   :  { %v508_v35 = vadd.f32 1.0, %v1457_v34 }
 0x7ed   :  { %1458 = vrcp.f32 %v508_v35  ;;  %v520_v39 = vand.u32 2147483648, %v508_v35  ;;  %v518_v41 = vand.u32 2147483647, %v508_v35  ;;  %vm514_vm14 = vweird.f32 %v508_v35 }
 0x7ef   :  { %v521_v43 = vor.u32 1.1754944e-38, %v520_v39  ;;  %vm519_vm1 = vcmp.eq.f32.partialorder %v518_v41, 8.507059e+37 }
 0x7f3   :  { %v1459_v36 = vpop.eup %1458 }
 0x7f4   :  { %v510_v37 = vmul.f32 %v1459_v36, %v508_v35  ;;  %vm515_vm13 = vweird.f32 %v1459_v36  ;;  %v1387_v35 = vld [vmem:[%s1976_s5 + $0x20] sm:$0xff] }
 0x7f5   :  { %vm516_vm15 = vmor %vm514_vm14, %vm515_vm13 }
 0x7f6   :  { %v511_v38 = vsub.f32 1.0, %v510_v37 }
 0x7f8   :  { %v512_v40 = vmul.f32 %v1459_v36, %v511_v38 }
 0x7fa   :  { %v513_v42 = vadd.f32 %v1459_v36, %v512_v40 }
 0x7fc   :  { %v517_v44 = vsel %vm516_vm15, %v1459_v36, %v513_v42  ;;  %v671_v36 = vsub.f32 1.0, %v1387_v35 }
 0x7fd   :  { %v522_v45 = vsel %vm519_vm1, %v521_v43, %v517_v44 }
 0x7fe   :  { %v524_v46 = vmul.f32 2.0, %v522_v45  ;;  %v531_v4 = vmul.f32 %v529_v55, %v522_v45 }
 0x800   :  { %v1382_v47 = vadd.f32 -1.0, %v524_v46 }
 0x802   :  { %533 = vrot.lane.b32.xlu1 %v1382_v47, %s1529_s16 }
 0x80a   :  { %566 = vperm.xlu1 %1433, %v562_v50  }
 0x874   :  { %v534_v51 = vpop.permute.xlu1 %533 }
 0x875   :  { %v536_v52 = vmul.f32 %v534_v51, %v522_v45 }
 0x877   :  { %538 = vrot.lane.b32.xlu0 %v536_v52, %s1530_s17 }
 0x87c   :  { %v567_v53 = vpop.permute.xlu1 %566 }
 0x87d   :  { %v569_v54 = vmul.f32 %v567_v53, %v486_v25  ;;  %v582_v1 = vmul.f32 %v567_v53, %v526_v23 }
 0x87f   :  { %571 = vrot.lane.b32.xlu1 %v569_v54, %s1532_s20  ;;  %552 = vperm.xlu0 %1435, %v1383_v48  }
 0x887   :  { %584 = vrot.lane.b32.xlu0 %v582_v1, %s1530_s17 }
 0x8e9   :  { %v539_v56 = vpop.permute.xlu0 %538 }
 0x8ea   :  { %v541_v57 = vadd.f32 %v539_v56, %v531_v4 }
 0x8ec   :  { %1460 = vtanh.f32 %v541_v57 }
 0x8f1   :  { %v553_v58 = vpop.permute.xlu0 %552  ;;  %v572_v3 = vpop.permute.xlu1 %571 }
 0x8f2   :  { %v1461_v59 = vpop.eup %1460  ;;  %v580_v60 = vmul.f32 %v553_v58, %v541_v57 }
 0x8f3   :  { %544 = vrot.lane.b32.xlu2 %v1461_v59, %s1529_s16 }
 0x8f9   :  { %v585_v61 = vpop.permute.xlu0 %584 }
 0x8fa   :  { %v587_v62 = vadd.f32 %v585_v61, %v580_v60  ;;  %v119_v60 = vpop.f32.mrf.mxu0 }
 0x8fb   :  { %v120_v61 = vadd.f32 %v1621_v8, %v119_v60 }
 0x8fc   :  { %589 = vrot.lane.b32.xlu1 %v587_v62, %s1532_s20 }
 0x94d   :  { %v545_v63 = vpop.permute.xlu2 %544 }
 0x94e   :  { %v547_v0 = vmul.f32 %v545_v63, %v522_v45 }
 0x950   :  { %v1696_v2 = vmul.f32 %v553_v58, %v547_v0 }
 0x952   :  { %v574_v5 = vadd.f32 %v572_v3, %v1696_v2 }
 0x954   :  { %576 = vrot.lane.b32.xlu2 %v574_v5, %s1530_s17 }
 0x96e   :  { %v590_v6 = vpop.permute.xlu1 %589 }
 0x96f   :  { %592 = vst.msk [vmem:[#allocation5] sm:$0xff] %vm82_vm0, %v590_v6 }
 0x976   :  { %v635_v7 = vld [vmem:[#allocation5] sm:$0xff] }
 0x977   :  { %637 = vrot.lane.b32.xlu0 %v635_v7, %s1530_s17 }
 0x9ae   :  { %v577_v10 = vpop.permute.xlu2 %576 }
 0x9af   :  { %579 = vst.msk [vmem:[#allocation4] sm:$0xff] %vm82_vm0, %v577_v10 }
 0x9b6   :  { %v595_v11 = vld [vmem:[#allocation4] sm:$0xff] }
 0x9b7   :  { %v596_v12 = vpack.c.bf16 %v595_v11, %v595_v11 }
 0x9b9   :  { %1384 = vmatmul.msk.bf16.vlgmr.msra.gmra.mxu2 %vm82_vm0, %v596_v12 }
 0x9e9   :  { %v638_v42 = vpop.permute.xlu0 %637 }
 0xa3c   :  { %v609_v15 = vpop.f32.mrf.mxu2 }
 0xa3d   :  { %v613_v16 = vadd.f32 %v609_v15, %v118_v14 }
 0xa3f   :  { %v1385_v17 = vmul.f32 -1.442695, %v613_v16 }
 0xa41   :  { %1462 = vpow2.f32 %v1385_v17 }
 0xa44   :  { %v611_v18 = vpop.f32.mrf.mxu2 }
 0xa47   :  { %v1463_v19 = vpop.eup %1462 }
 0xa48   :  { %v617_v21 = vadd.f32 1.0, %v1463_v19 }
 0xa4a   :  { %1464 = vrcp.f32 %v617_v21  ;;  %v629_v25 = vand.u32 2147483648, %v617_v21  ;;  %v627_v27 = vand.u32 2147483647, %v617_v21  ;;  %vm623_vm3 = vweird.f32 %v617_v21 }
 0xa4c   :  { %v630_v29 = vor.u32 1.1754944e-38, %v629_v25  ;;  %vm628_vm5 = vcmp.eq.f32.partialorder %v627_v27, 8.507059e+37 }
 0xa50   :  { %v1465_v22 = vpop.eup %1464 }
 0xa51   :  { %v619_v23 = vmul.f32 %v1465_v22, %v617_v21  ;;  %vm624_vm2 = vweird.f32 %v1465_v22  ;;  %v1391_v21 = vld [vmem:[%s1976_s5 + $0x28] sm:$0xff] }
 0xa52   :  { %vm625_vm4 = vmor %vm623_vm3, %vm624_vm2 }
 0xa53   :  { %v620_v24 = vsub.f32 1.0, %v619_v23 }
 0xa55   :  { %v621_v26 = vmul.f32 %v1465_v22, %v620_v24 }
 0xa57   :  { %v622_v28 = vadd.f32 %v1465_v22, %v621_v26 }
 0xa59   :  { %v626_v30 = vsel %vm625_vm4, %v1465_v22, %v622_v28  ;;  %v780_v22 = vsub.f32 1.0, %v1391_v21 }
 0xa5a   :  { %v631_v31 = vsel %vm628_vm5, %v630_v29, %v626_v30 }
 0xa5b   :  { %v633_v33 = vmul.f32 2.0, %v631_v31  ;;  %v640_v43 = vmul.f32 %v638_v42, %v631_v31 }
 0xa5d   :  { %v1386_v34 = vadd.f32 -1.0, %v633_v33 }
 0xa5f   :  { %642 = vrot.lane.b32.xlu2 %v1386_v34, %s1529_s16 }
 0xa67   :  { %675 = vperm.xlu2 %1434, %v671_v36  }
 0xab9   :  { %v643_v37 = vpop.permute.xlu2 %642 }
 0xaba   :  { %v645_v38 = vmul.f32 %v643_v37, %v631_v31 }
 0xabc   :  { %647 = vrot.lane.b32.xlu1 %v645_v38, %s1530_s17 }
 0xac1   :  { %v676_v39 = vpop.permute.xlu2 %675 }
 0xac2   :  { %v678_v40 = vmul.f32 %v676_v39, %v595_v11  ;;  %v691_v41 = vmul.f32 %v676_v39, %v635_v7 }
 0xac4   :  { %680 = vrot.lane.b32.xlu2 %v678_v40, %s1532_s20  ;;  %661 = vperm.xlu1 %1433, %v1387_v35  }
 0xacc   :  { %693 = vrot.lane.b32.xlu1 %v691_v41, %s1530_s17 }
 0xb1e   :  { %v681_v52 = vpop.permute.xlu2 %680 }
 0xb2e   :  { %v648_v44 = vpop.permute.xlu1 %647 }
 0xb2f   :  { %v650_v45 = vadd.f32 %v648_v44, %v640_v43 }
 0xb31   :  { %1466 = vtanh.f32 %v650_v45 }
 0xb36   :  { %v662_v46 = vpop.permute.xlu1 %661 }
 0xb37   :  { %v1467_v47 = vpop.eup %1466  ;;  %v689_v48 = vmul.f32 %v662_v46, %v650_v45  ;;  %v1420_v45 = vld [vmem:[%s1975_s0 + $0x18] sm:$0xff] }
 0xb38   :  { %653 = vrot.lane.b32.xlu0 %v1467_v47, %s1529_s16  ;;  %1359 = vmatmul.msk.bf16.gmra.mxu0 %vm82_vm0, %v1420_v45 }
 0xb3e   :  { %v694_v50 = vpop.permute.xlu1 %693 }
 0xb3f   :  { %v696_v51 = vadd.f32 %v694_v50, %v689_v48 }
 0xb41   :  { %698 = vrot.lane.b32.xlu2 %v696_v51, %s1532_s20 }
 0xb9b   :  { %v699_v53 = vpop.permute.xlu2 %698 }
 0xb9c   :  { %701 = vst.msk [vmem:[#allocation5] sm:$0xff] %vm82_vm0, %v699_v53 }
 0xba3   :  { %v744_v54 = vld [vmem:[#allocation5] sm:$0xff] }
 0xba4   :  { %746 = vrot.lane.b32.xlu1 %v744_v54, %s1530_s17 }
 0xbaa   :  { %v654_v1 = vpop.permute.xlu0 %653 }
 0xbab   :  { %v656_v55 = vmul.f32 %v654_v1, %v631_v31 }
 0xbad   :  { %v1720_v4 = vmul.f32 %v662_v46, %v656_v55 }
 0xbaf   :  { %v683_v56 = vadd.f32 %v681_v52, %v1720_v4 }
 0xbb1   :  { %685 = vrot.lane.b32.xlu0 %v683_v56, %s1530_s17 }
 0xbb5   :  { %v122_v50 = vpop.f32.mrf.mxu0 }
 0xbb6   :  { %v123_v51 = vadd.f32 %v1621_v8, %v122_v50 }
 0xc16   :  { %v747_v28 = vpop.permute.xlu1 %746 }
 0xc23   :  { %v686_v57 = vpop.permute.xlu0 %685 }
 0xc24   :  { %688 = vst.msk [vmem:[#allocation4] sm:$0xff] %vm82_vm0, %v686_v57 }
 0xc2b   :  { %v704_v58 = vld [vmem:[#allocation4] sm:$0xff] }
 0xc2c   :  { %v705_v59 = vpack.c.bf16 %v704_v58, %v704_v58 }
 0xc2e   :  { %1388 = vmatmul.msk.bf16.vlgmr.msra.gmra.mxu3 %vm82_vm0, %v705_v59 }
 0xcb1   :  { %v718_v62 = vpop.f32.mrf.mxu3 }
 0xcb2   :  { %v722_v63 = vadd.f32 %v718_v62, %v120_v61 }
 0xcb4   :  { %v1389_v0 = vmul.f32 -1.442695, %v722_v63 }
 0xcb6   :  { %1468 = vpow2.f32 %v1389_v0 }
 0xcb9   :  { %v720_v3 = vpop.f32.mrf.mxu3 }
 0xcbc   :  { %v1469_v5 = vpop.eup %1468 }
 0xcbd   :  { %v726_v6 = vadd.f32 1.0, %v1469_v5 }
 0xcbf   :  { %1470 = vrcp.f32 %v726_v6  ;;  %v738_v11 = vand.u32 2147483648, %v726_v6  ;;  %v736_v13 = vand.u32 2147483647, %v726_v6  ;;  %vm732_vm7 = vweird.f32 %v726_v6 }
 0xcc1   :  { %v739_v15 = vor.u32 1.1754944e-38, %v738_v11  ;;  %vm737_vm9 = vcmp.eq.f32.partialorder %v736_v13, 8.507059e+37 }
 0xcc5   :  { %v1471_v7 = vpop.eup %1470 }
 0xcc6   :  { %v728_v9 = vmul.f32 %v1471_v7, %v726_v6  ;;  %vm733_vm6 = vweird.f32 %v1471_v7 }
 0xcc7   :  { %vm734_vm8 = vmor %vm732_vm7, %vm733_vm6 }
 0xcc8   :  { %v729_v10 = vsub.f32 1.0, %v728_v9  ;;  %v1395_v9 = vld [vmem:[%s1976_s5 + $0x30] sm:$0xff] }
 0xcca   :  { %v730_v12 = vmul.f32 %v1471_v7, %v729_v10  ;;  %v889_v10 = vsub.f32 1.0, %v1395_v9 }
 0xccc   :  { %v731_v14 = vadd.f32 %v1471_v7, %v730_v12 }
 0xcce   :  { %v735_v16 = vsel %vm734_vm8, %v1471_v7, %v731_v14 }
 0xccf   :  { %v740_v17 = vsel %vm737_vm9, %v739_v15, %v735_v16 }
 0xcd0   :  { %v742_v18 = vmul.f32 2.0, %v740_v17  ;;  %v749_v29 = vmul.f32 %v747_v28, %v740_v17 }
 0xcd2   :  { %v1390_v19 = vadd.f32 -1.0, %v742_v18 }
 0xcd4   :  { %751 = vrot.lane.b32.xlu0 %v1390_v19, %s1529_s16 }
 0xcdc   :  { %784 = vperm.xlu0 %1435, %v780_v22  }
 0xd46   :  { %v752_v23 = vpop.permute.xlu0 %751 }
 0xd47   :  { %v754_v24 = vmul.f32 %v752_v23, %v740_v17 }
 0xd49   :  { %756 = vrot.lane.b32.xlu2 %v754_v24, %s1530_s17 }
 0xd4e   :  { %v785_v25 = vpop.permute.xlu0 %784 }
 0xd4f   :  { %v787_v26 = vmul.f32 %v785_v25, %v704_v58  ;;  %v800_v27 = vmul.f32 %v785_v25, %v744_v54 }
 0xd51   :  { %789 = vrot.lane.b32.xlu0 %v787_v26, %s1532_s20  ;;  %770 = vperm.xlu2 %1434, %v1391_v21  }
 0xd59   :  { %802 = vrot.lane.b32.xlu2 %v800_v27, %s1530_s17 }
 0xda3   :  { %v757_v30 = vpop.permute.xlu2 %756 }
 0xda4   :  { %v759_v31 = vadd.f32 %v757_v30, %v749_v29 }
 0xda6   :  { %1472 = vtanh.f32 %v759_v31 }
 0xdab   :  { %v771_v33 = vpop.permute.xlu2 %770 }
 0xdac   :  { %v1473_v34 = vpop.eup %1472  ;;  %v798_v35 = vmul.f32 %v771_v33, %v759_v31 }
 0xdad   :  { %762 = vrot.lane.b32.xlu1 %v1473_v34, %s1529_s16 }
 0xdb3   :  { %v803_v36 = vpop.permute.xlu2 %802 }
 0xdb4   :  { %v805_v37 = vadd.f32 %v803_v36, %v798_v35 }
 0xdb6   :  { %807 = vrot.lane.b32.xlu0 %v805_v37, %s1532_s20  ;;  %v124_v37 = vpop.f32.mrf.mxu0 }
 0xdc3   :  { %v790_v39 = vpop.permute.xlu0 %789 }
 0xe1f   :  { %v763_v38 = vpop.permute.xlu1 %762 }
 0xe20   :  { %v765_v40 = vmul.f32 %v763_v38, %v740_v17  ;;  %v125_v38 = vadd.f32 %v1621_v8, %v124_v37 }
 0xe22   :  { %v1736_v41 = vmul.f32 %v771_v33, %v765_v40 }
 0xe24   :  { %v792_v42 = vadd.f32 %v790_v39, %v1736_v41 }
 0xe26   :  { %794 = vrot.lane.b32.xlu1 %v792_v42, %s1530_s17 }
 0xe28   :  { %v808_v43 = vpop.permute.xlu0 %807 }
 0xe29   :  { %810 = vst.msk [vmem:[#allocation5] sm:$0xff] %vm82_vm0, %v808_v43 }
 0xe30   :  { %v853_v44 = vld [vmem:[#allocation5] sm:$0xff] }
 0xe31   :  { %855 = vrot.lane.b32.xlu2 %v853_v44, %s1530_s17 }
 0xe8b   :  { %v856_v16 = vpop.permute.xlu2 %855 }
 0xe98   :  { %v795_v46 = vpop.permute.xlu1 %794 }
 0xe99   :  { %797 = vst.msk [vmem:[#allocation4] sm:$0xff] %vm82_vm0, %v795_v46 }
 0xea0   :  { %v813_v47 = vld [vmem:[#allocation4] sm:$0xff] }
 0xea1   :  { %v814_v48 = vpack.c.bf16 %v813_v47, %v813_v47 }
 0xea3   :  { %1392 = vmatmul.msk.bf16.vlgmr.msra.gmra.mxu1 %vm82_vm0, %v814_v48 }
 0xf20   :  { %v827_v52 = vpop.f32.mrf.mxu1 }
 0xf21   :  { %v831_v53 = vadd.f32 %v827_v52, %v123_v51 }
 0xf23   :  { %v1393_v54 = vmul.f32 -1.442695, %v831_v53 }
 0xf25   :  { %1474 = vpow2.f32 %v1393_v54 }
 0xf28   :  { %v829_v1 = vpop.f32.mrf.mxu1 }
 0xf2b   :  { %v1475_v55 = vpop.eup %1474 }
 0xf2c   :  { %v835_v56 = vadd.f32 1.0, %v1475_v55 }
 0xf2e   :  { %1476 = vrcp.f32 %v835_v56  ;;  %v847_v60 = vand.u32 2147483648, %v835_v56  ;;  %v845_v62 = vand.u32 2147483647, %v835_v56  ;;  %vm841_vm11 = vweird.f32 %v835_v56 }
 0xf30   :  { %v848_v0 = vor.u32 1.1754944e-38, %v847_v60  ;;  %vm846_vm13 = vcmp.eq.f32.partialorder %v845_v62, 8.507059e+37 }
 0xf34   :  { %v1477_v57 = vpop.eup %1476 }
 0xf35   :  { %v837_v58 = vmul.f32 %v1477_v57, %v835_v56  ;;  %vm842_vm10 = vweird.f32 %v1477_v57 }
 0xf36   :  { %vm843_vm12 = vmor %vm841_vm11, %vm842_vm10 }
 0xf37   :  { %v838_v59 = vsub.f32 1.0, %v837_v58 }
 0xf39   :  { %v839_v61 = vmul.f32 %v1477_v57, %v838_v59 }
 0xf3b   :  { %v840_v63 = vadd.f32 %v1477_v57, %v839_v61 }
 0xf3d   :  { %v844_v3 = vsel %vm843_vm12, %v1477_v57, %v840_v63  ;;  %v1399_v57 = vld [vmem:[%s1976_s5 + $0x38] sm:$0xff] }
 0xf3e   :  { %v849_v5 = vsel %vm846_vm13, %v848_v0, %v844_v3  ;;  %v998_v58 = vsub.f32 1.0, %v1399_v57 }
 0xf3f   :  { %v851_v6 = vmul.f32 2.0, %v849_v5  ;;  %v858_v17 = vmul.f32 %v856_v16, %v849_v5  ;;  %v1403_v16 = vld [vmem:[%s1976_s5 + $0x40] sm:$0xff] }
 0xf41   :  { %v1394_v7 = vadd.f32 -1.0, %v851_v6 }
 0xf43   :  { %860 = vrot.lane.b32.xlu1 %v1394_v7, %s1529_s16 }
 0xf4b   :  { %893 = vperm.xlu1 %1433, %v889_v10  }
 0xfb5   :  { %v861_v11 = vpop.permute.xlu1 %860 }
 0xfb6   :  { %v863_v12 = vmul.f32 %v861_v11, %v849_v5 }
 0xfb8   :  { %865 = vrot.lane.b32.xlu0 %v863_v12, %s1530_s17 }
 0xfbd   :  { %v894_v13 = vpop.permute.xlu1 %893 }
 0xfbe   :  { %v896_v14 = vmul.f32 %v894_v13, %v813_v47  ;;  %v909_v15 = vmul.f32 %v894_v13, %v853_v44 }
 0xfc0   :  { %898 = vrot.lane.b32.xlu1 %v896_v14, %s1532_s20  ;;  %879 = vperm.xlu0 %1435, %v1395_v9  }
 0xfc8   :  { %911 = vrot.lane.b32.xlu0 %v909_v15, %s1530_s17 }
0x102a   :  { %v866_v18 = vpop.permute.xlu0 %865 }
0x102b   :  { %v868_v19 = vadd.f32 %v866_v18, %v858_v17 }
0x102d   :  { %1478 = vtanh.f32 %v868_v19 }
0x1032   :  { %v880_v21 = vpop.permute.xlu0 %879  ;;  %v899_v29 = vpop.permute.xlu1 %898 }
0x1033   :  { %v1479_v22 = vpop.eup %1478  ;;  %v907_v23 = vmul.f32 %v880_v21, %v868_v19 }
0x1034   :  { %871 = vrot.lane.b32.xlu2 %v1479_v22, %s1529_s16  ;;  %v38_v22 = vld [vmem:[%s1975_s0 + $0x20] sm:$0xf] }
0x103a   :  { %v912_v24 = vpop.permute.xlu0 %911 }
0x103b   :  { %v914_v25 = vadd.f32 %v912_v24, %v907_v23  ;;  %v64_v23 = vunpack.c.l.b16 %v38_v22 }
0x103d   :  { %916 = vrot.lane.b32.xlu1 %v914_v25, %s1532_s20  ;;  %v69_v24 = vpack.c.b16 %v64_v23, %v64_v23 }
0x103f   :  { %1360 = vmatmul.msk.bf16.gmra.mxu0 %vm82_vm0, %v69_v24 }
0x108e   :  { %v872_v26 = vpop.permute.xlu2 %871 }
0x108f   :  { %v874_v27 = vmul.f32 %v872_v26, %v849_v5 }
0x1091   :  { %v1758_v28 = vmul.f32 %v880_v21, %v874_v27 }
0x1093   :  { %v901_v30 = vadd.f32 %v899_v29, %v1758_v28 }
0x1095   :  { %903 = vrot.lane.b32.xlu2 %v901_v30, %s1530_s17 }
0x10af   :  { %v917_v31 = vpop.permute.xlu1 %916 }
0x10b0   :  { %919 = vst.msk [vmem:[#allocation5] sm:$0xff] %vm82_vm0, %v917_v31 }
0x10b7   :  { %v962_v33 = vld [vmem:[#allocation5] sm:$0xff] }
0x10b8   :  { %964 = vrot.lane.b32.xlu0 %v962_v33, %s1530_s17 }
0x10ef   :  { %v904_v34 = vpop.permute.xlu2 %903 }
0x10f0   :  { %906 = vst.msk [vmem:[#allocation4] sm:$0xff] %vm82_vm0, %v904_v34 }
0x10f7   :  { %v922_v35 = vld [vmem:[#allocation4] sm:$0xff] }
0x10f8   :  { %v923_v36 = vpack.c.bf16 %v922_v35, %v922_v35 }
0x10fa   :  { %1396 = vmatmul.msk.bf16.vlgmr.msrb.gmra.mxu2 %vm82_vm0, %v923_v36 }
0x112a   :  { %v965_v0 = vpop.permute.xlu0 %964 }
0x117d   :  { %v936_v39 = vpop.f32.mrf.mxu2 }
0x117e   :  { %v940_v40 = vadd.f32 %v936_v39, %v125_v38 }
0x1180   :  { %v1397_v42 = vmul.f32 -1.442695, %v940_v40 }
0x1182   :  { %1480 = vpow2.f32 %v1397_v42 }
0x1185   :  { %v938_v43 = vpop.f32.mrf.mxu2 }
0x1188   :  { %v1481_v44 = vpop.eup %1480 }
0x1189   :  { %v944_v45 = vadd.f32 1.0, %v1481_v44 }
0x118b   :  { %1482 = vrcp.f32 %v944_v45  ;;  %v956_v50 = vand.u32 2147483648, %v944_v45  ;;  %v954_v52 = vand.u32 2147483647, %v944_v45  ;;  %vm950_vm15 = vweird.f32 %v944_v45 }
0x118d   :  { %v957_v54 = vor.u32 1.1754944e-38, %v956_v50  ;;  %vm955_vm2 = vcmp.eq.f32.partialorder %v954_v52, 8.507059e+37 }
0x1191   :  { %v1483_v46 = vpop.eup %1482 }
0x1192   :  { %v946_v47 = vmul.f32 %v1483_v46, %v944_v45  ;;  %vm951_vm14 = vweird.f32 %v1483_v46 }
0x1193   :  { %vm952_vm1 = vmor %vm950_vm15, %vm951_vm14 }
0x1194   :  { %v947_v48 = vsub.f32 1.0, %v946_v47 }
0x1196   :  { %v948_v51 = vmul.f32 %v1483_v46, %v947_v48 }
0x1198   :  { %v949_v53 = vadd.f32 %v1483_v46, %v948_v51 }
0x119a   :  { %v953_v8 = vsel %vm952_vm1, %v1483_v46, %v949_v53 }
0x119b   :  { %v958_v1 = vsel %vm955_vm2, %v957_v54, %v953_v8 }
0x119c   :  { %v960_v55 = vmul.f32 2.0, %v958_v1  ;;  %v967_v3 = vmul.f32 %v965_v0, %v958_v1 }
0x119e   :  { %v1398_v56 = vadd.f32 -1.0, %v960_v55 }
0x11a0   :  { %969 = vrot.lane.b32.xlu2 %v1398_v56, %s1529_s16 }
0x11a8   :  { %1002 = vperm.xlu2 %1434, %v998_v58   ;;  %v1426_v58 = vld [vmem:[%s1977_s6 + $0x8] sm:$0xff] }
0x11a9   :  { %1193 = vmatpush.bf16.msrb.mxu1 %v1426_v58  ;;  %1427 = vmatpush.bf16.msra.mxu2 %v1426_v58 }
0x11fa   :  { %v970_v59 = vpop.permute.xlu2 %969 }
0x11fb   :  { %v972_v60 = vmul.f32 %v970_v59, %v958_v1  ;;  %v1425_v59 = vld [vmem:[%s1977_s6] sm:$0xff] }
0x11fc   :  { %1194 = vmatpush.bf16.msrb.mxu1 %v1425_v59  ;;  %1428 = vmatpush.bf16.msra.mxu2 %v1425_v59 }
0x11fd   :  { %974 = vrot.lane.b32.xlu1 %v972_v60, %s1530_s17 }
0x1202   :  { %v1003_v61 = vpop.permute.xlu2 %1002 }
0x1203   :  { %v1005_v62 = vmul.f32 %v1003_v61, %v922_v35  ;;  %v1018_v63 = vmul.f32 %v1003_v61, %v962_v33  ;;  %v127_v33 = vpop.f32.mrf.mxu0  ;;  %v1528_v35 = vld [vmem:[%s1974_s2] ss:$0 sm:$0xff] }
0x1204   :  { %v128_v36 = vadd.f32 %v1528_v35, %v127_v33 }
0x1205   :  { %1007 = vrot.lane.b32.xlu2 %v1005_v62, %s1532_s20  ;;  %988 = vperm.xlu1 %1433, %v1399_v57   ;;  %v1107_v57 = vsub.f32 1.0, %v1403_v16 }
0x120b   :  { %v129_v34 = vpop.f32.mrf.mxu0 }
0x120d   :  { %1020 = vrot.lane.b32.xlu1 %v1018_v63, %s1530_s17 }
0x125f   :  { %v1008_v13 = vpop.permute.xlu2 %1007 }
0x126f   :  { %v975_v5 = vpop.permute.xlu1 %974 }
0x1270   :  { %v977_v6 = vadd.f32 %v975_v5, %v967_v3 }
0x1272   :  { %1484 = vtanh.f32 %v977_v6 }
0x1277   :  { %v989_v7 = vpop.permute.xlu1 %988 }
0x1278   :  { %v1485_v9 = vpop.eup %1484  ;;  %v1016_v10 = vmul.f32 %v989_v7, %v977_v6 }
0x1279   :  { %980 = vrot.lane.b32.xlu0 %v1485_v9, %s1529_s16 }
0x127f   :  { %v1021_v11 = vpop.permute.xlu1 %1020 }
0x1280   :  { %v1023_v12 = vadd.f32 %v1021_v11, %v1016_v10 }
0x1282   :  { %1025 = vrot.lane.b32.xlu2 %v1023_v12, %s1532_s20 }
0x12dc   :  { %v1026_v14 = vpop.permute.xlu2 %1025 }
0x12dd   :  { %1028 = vst.msk [vmem:[#allocation5] sm:$0xff] %vm82_vm0, %v1026_v14 }
0x12e4   :  { %v1777_v15 = vld [vmem:[#allocation5] sm:$0xff] }
0x12e5   :  { %1073 = vrot.lane.b32.xlu1 %v1777_v15, %s1530_s17 }
0x12eb   :  { %v981_v17 = vpop.permute.xlu0 %980 }
0x12ec   :  { %v983_v18 = vmul.f32 %v981_v17, %v958_v1 }
0x12ed   :  { %1097 = vperm.xlu1 %1433, %v1403_v16  }
0x12ee   :  { %v991_v19 = vmul.f32 %v989_v7, %v983_v18 }
0x12f0   :  { %v1010_v21 = vadd.f32 %v1008_v13, %v991_v19  ;;  %v1845_v13 = vld [vmem:[%s1978_s7] ss:$0 sm:$0xff] }
0x12f2   :  { %1012 = vrot.lane.b32.xlu0 %v1010_v21, %s1530_s17 }
0x12f5   :  { %231 = vrot.lane.b32.xlu1 %v1634_v49, %s1530_s17 }
0x12fd   :  { %993 = vrot.lane.b32.xlu1 %v991_v19, %s1530_s17 }
0x1357   :  { %v1074_v25 = vpop.permute.xlu1 %1073 }
0x135f   :  { %v1792_v26 = vpop.permute.xlu1 %1097 }
0x1364   :  { %v1013_v27 = vpop.permute.xlu0 %1012 }
0x1365   :  { %1015 = vst.msk [vmem:[#allocation4] sm:$0xff] %vm82_vm0, %v1013_v27 }
0x1367   :  { %v232_v29 = vpop.permute.xlu1 %231 }
0x1368   :  { %234 = vst.msk [vmem:[#allocation3] sm:$0xff] %vm82_vm0, %v232_v29 }
0x136c   :  { %v1796_v49 = vld [vmem:[#allocation4] sm:$0xff] }
0x136d   :  { %v1032_v30 = vpack.c.bf16 %v1796_v49, %v1796_v49 }
0x136f   :  { %1400 = vmatmul.msk.bf16.vlgmr.msrb.gmra.mxu3 %vm82_vm0, %v1032_v30  ;;  %v994_v31 = vpop.permute.xlu1 %993  ;;  %v1138_v0 = vld [vmem:[#allocation3] sm:$0xff] }
0x1370   :  { %997 = vst.msk [vmem:[#allocation3 + $0x38] sm:$0xff] %vm82_vm0, %v994_v31 }
0x1377   :  { %v1145_v21 = vld [vmem:[#allocation3 + $0x38] sm:$0xff] }
0x13f2   :  { %v1045_v37 = vpop.f32.mrf.mxu3 }
0x13f3   :  { %v1049_v38 = vadd.f32 %v1045_v37, %v128_v36 }
0x13f5   :  { %v1401_v39 = vmul.f32 -1.442695, %v1049_v38 }
0x13f7   :  { %1486 = vpow2.f32 %v1401_v39 }
0x13fa   :  { %v1047_v40 = vpop.f32.mrf.mxu3 }
0x13fd   :  { %v1487_v42 = vpop.eup %1486 }
0x13fe   :  { %v1053_v43 = vadd.f32 1.0, %v1487_v42 }
0x1400   :  { %1488 = vrcp.f32 %v1053_v43  ;;  %v1065_v47 = vand.u32 2147483648, %v1053_v43  ;;  %v1063_v50 = vand.u32 2147483647, %v1053_v43  ;;  %vm1059_vm4 = vweird.f32 %v1053_v43 }
0x1402   :  { %v1066_v52 = vor.u32 1.1754944e-38, %v1065_v47  ;;  %vm1064_vm6 = vcmp.eq.f32.partialorder %v1063_v50, 8.507059e+37 }
0x1406   :  { %v1489_v44 = vpop.eup %1488 }
0x1407   :  { %v1055_v45 = vmul.f32 %v1489_v44, %v1053_v43  ;;  %vm1060_vm3 = vweird.f32 %v1489_v44 }
0x1408   :  { %vm1061_vm5 = vmor %vm1059_vm4, %vm1060_vm3 }
0x1409   :  { %v1056_v46 = vsub.f32 1.0, %v1055_v45 }
0x140b   :  { %v1057_v48 = vmul.f32 %v1489_v44, %v1056_v46 }
0x140d   :  { %v1058_v51 = vadd.f32 %v1489_v44, %v1057_v48 }
0x140f   :  { %v1062_v53 = vsel %vm1061_vm5, %v1489_v44, %v1058_v51 }
0x1410   :  { %v1067_v54 = vsel %vm1064_vm6, %v1066_v52, %v1062_v53 }
0x1411   :  { %v1069_v8 = vmul.f32 2.0, %v1067_v54 }
0x1413   :  { %v1402_v1 = vadd.f32 -1.0, %v1069_v8 }
0x1415   :  { %1078 = vrot.lane.b32.xlu0 %v1402_v1, %s1529_s16 }
0x1487   :  { %v1079_v55 = vpop.permute.xlu0 %1078 }
0x1488   :  { %v1081_v56 = vmul.f32 %v1079_v55, %v1067_v54 }
0x148a   :  { %1083 = vrot.lane.b32.xlu2 %v1081_v56, %s1530_s17 }
0x1492   :  { %666 = vrot.lane.b32.xlu2 %v1720_v4, %s1530_s17  ;;  %v1076_v4 = vmul.f32 %v1074_v25, %v1067_v54 }
0x149a   :  { %339 = vrot.lane.b32.xlu2 %v1653_v32, %s1530_s17 }
0x14a2   :  { %448 = vrot.lane.b32.xlu2 %v1678_v20, %s1530_s17 }
0x14aa   :  { %1111 = vperm.xlu2 %1434, %v1107_v57  }
0x14e4   :  { %v1084_v60 = vpop.permute.xlu2 %1083 }
0x14e5   :  { %v1819_v32 = vadd.f32 %v1084_v60, %v1076_v4 }
0x14e7   :  { %1490 = vtanh.f32 %v1819_v32 }
0x14ec   :  { %v667_v20 = vpop.permute.xlu2 %666 }
0x14ed   :  { %v1491_v61 = vpop.eup %1490  ;;  %670 = vst.msk [vmem:[#allocation3 + $0x20] sm:$0xff] %vm82_vm0, %v667_v20 }
0x14ee   :  { %1089 = vrot.lane.b32.xlu0 %v1491_v61, %s1529_s16 }
0x14f4   :  { %v340_v62 = vpop.permute.xlu2 %339  ;;  %v1142_v11 = vld [vmem:[#allocation3 + $0x20] sm:$0xff] }
0x14f5   :  { %343 = vst.msk [vmem:[#allocation3 + $0x8] sm:$0xff] %vm82_vm0, %v340_v62 }
0x14f6   :  { %775 = vrot.lane.b32.xlu0 %v1736_v41, %s1530_s17 }
0x14fc   :  { %v449_v63 = vpop.permute.xlu2 %448  ;;  %v1139_v3 = vld [vmem:[#allocation3 + $0x8] sm:$0xff] }
0x14fd   :  { %452 = vst.msk [vmem:[#allocation3 + $0x10] sm:$0xff] %vm82_vm0, %v449_v63  ;;  %v1147_v5 = vpack.c.bf16 %v1139_v3, %v1138_v0 }
0x14fe   :  { %884 = vrot.lane.b32.xlu0 %v1758_v28, %s1530_s17 }
0x14ff   :  { %1412 = vmatmul.msk.bf16.vlgmr.msrb.gmra.mxu1 %vm82_vm0, %v1147_v5 }
0x1504   :  { %v1140_v18 = vld [vmem:[#allocation3 + $0x10] sm:$0xff] }
0x1506   :  { %557 = vrot.lane.b32.xlu0 %v1696_v2, %s1530_s17 }
0x1560   :  { %v1090_v6 = vpop.permute.xlu0 %1089 }
0x1561   :  { %v1092_v7 = vmul.f32 %v1090_v6, %v1067_v54  ;;  %v1112_v54 = vpop.permute.xlu2 %1111 }
0x1562   :  { %v1127_v8 = vmul.f32 %v1112_v54, %v1777_v15  ;;  %v1114_v1 = vmul.f32 %v1112_v54, %v1796_v49 }
0x1563   :  { %v1834_v9 = vmul.f32 %v1792_v26, %v1092_v7 }
0x1565   :  { %1102 = vrot.lane.b32.xlu1 %v1834_v9, %s1530_s17 }
0x1568   :  { %v776_v41 = vpop.permute.xlu0 %775 }
0x1569   :  { %779 = vst.msk [vmem:[#allocation3 + $0x28] sm:$0xff] %vm82_vm0, %v776_v41 }
0x1570   :  { %v885_v10 = vpop.permute.xlu0 %884  ;;  %v1143_v12 = vld [vmem:[#allocation3 + $0x28] sm:$0xff] }
0x1571   :  { %888 = vst.msk [vmem:[#allocation3 + $0x30] sm:$0xff] %vm82_vm0, %v885_v10  ;;  %v1149_v28 = vpack.c.bf16 %v1143_v12, %v1142_v11 }
0x1573   :  { %1414 = vmatmul.msk.bf16.vlgmr.msra.gmra.mxu2 %vm82_vm0, %v1149_v28 }
0x1578   :  { %v558_v2 = vpop.permute.xlu0 %557  ;;  %v1144_v17 = vld [vmem:[#allocation3 + $0x30] sm:$0xff] }
0x1579   :  { %561 = vst.msk [vmem:[#allocation3 + $0x18] sm:$0xff] %vm82_vm0, %v558_v2  ;;  %v1150_v23 = vpack.c.bf16 %v1145_v21, %v1144_v17 }
0x157c   :  { %v1196_v14 = vpop.f32.mrf.mxu1 }
0x157d   :  { %v1848_v16 = vadd.f32 %v1845_v13, %v1196_v14 }
0x157f   :  { %1220 = vmax.xlane.f32.xlu0 %v1848_v16 }
0x1580   :  { %v1141_v19 = vld [vmem:[#allocation3 + $0x18] sm:$0xff] }
0x1581   :  { %v1148_v22 = vpack.c.bf16 %v1141_v19, %v1140_v18 }
0x1583   :  { %1413 = vmatmul.msk.bf16.gmra.mxu1 %vm82_vm0, %v1148_v22  ;;  %1415 = vmatmul.msk.bf16.gmra.mxu2 %vm82_vm0, %v1150_v23 }
0x1584   :  { %v1198_v24 = vpop.f32.mrf.mxu1 }
0x1585   :  { %v1854_v25 = vadd.f32 %v1845_v13, %v1198_v24 }
0x158f   :  { %1222 = vmax.xlane.f32.xlu1 %v1854_v25 }
0x15d7   :  { %v1103_v27 = vpop.permute.xlu1 %1102 }
0x15d8   :  { %1106 = vst.msk [vmem:[#allocation3 + $0x40] sm:$0xff] %vm82_vm0, %v1103_v27 }
0x15df   :  { %v1146_v29 = vld [vmem:[#allocation3 + $0x40] sm:$0xff] }
0x15e0   :  { %v1151_v30 = vpack.c.bf16 %v1146_v29, %v1146_v29 }
0x15e2   :  { %1416 = vmatmul.msk.bf16.gmra.mxu2 %vm82_vm0, %v1151_v30 }
0x15f2   :  { %v1221_v33 = vpop.xlane.xlu0 %1220 }
0x15f3   :  { %v1238_v35 = vsub.f32 %v1848_v16, %v1221_v33 }
0x15f5   :  { %v1247_v36 = vmul.f32 1.442695, %v1238_v35 }
0x15f6   :  { %v1206_v31 = vpop.f32.mrf.mxu2 }
0x15f7   :  { %v1860_v34 = vadd.f32 %v1845_v13, %v1206_v31  ;;  %1492 = vpow2.f32 %v1247_v36 }
0x15f9   :  { %1228 = vmax.xlane.f32.xlu0 %v1860_v34 }
0x15fd   :  { %v1493_v46 = vpop.eup %1492 }
0x15fe   :  { %v1208_v37 = vpop.f32.mrf.mxu2 }
0x15ff   :  { %v1865_v38 = vadd.f32 %v1845_v13, %v1208_v37 }
0x1600   :  { %v1201_v39 = vpop.f32.mrf.mxu1 }
0x1601   :  { %v1868_v40 = vadd.f32 %v1845_v13, %v1201_v39  ;;  %1230 = vmax.xlane.f32.xlu1 %v1865_v38 }
0x1602   :  { %v1871_v42 = vpop.xlane.xlu1 %1222 }
0x1603   :  { %v1239_v43 = vsub.f32 %v1854_v25, %v1871_v42  ;;  %1224 = vmax.xlane.f32.xlu2 %v1868_v40 }
0x1605   :  { %v1249_v44 = vmul.f32 1.442695, %v1239_v43 }
0x1606   :  { %v1211_v45 = vpop.f32.mrf.mxu2 }
0x1607   :  { %1494 = vpow2.f32 %v1249_v44  ;;  %v1884_v53 = vadd.f32 %v1845_v13, %v1211_v45 }
0x1608   :  { %v1203_v47 = vpop.f32.mrf.mxu1 }
0x1609   :  { %v1877_v48 = vadd.f32 %v1845_v13, %v1203_v47  ;;  %1265 = vadd.xlane.f32.xlu1 %v1493_v46 }
0x160b   :  { %1226 = vmax.xlane.f32.xlu2 %v1877_v48 }
0x160d   :  { %v1495_v52 = vpop.eup %1494 }
0x160e   :  { %v1213_v50 = vpop.f32.mrf.mxu2 }
0x160f   :  { %v1881_v51 = vadd.f32 %v1845_v13, %v1213_v50 }
0x1611   :  { %1234 = vmax.xlane.f32.xlu0 %v1881_v51  ;;  %1267 = vadd.xlane.f32.xlu1 %v1495_v52 }
0x1613   :  { %1232 = vmax.xlane.f32.xlu2 %v1884_v53 }
0x1625   :  { %1129 = vrot.lane.b32.xlu0 %v1127_v8, %s1530_s17 }
0x162b   :  { %1116 = vrot.lane.b32.xlu2 %v1114_v1, %s1532_s20 }
0x1665   :  { %v1216_v55 = vpop.f32.mrf.mxu2 }
0x1666   :  { %v1918_v23 = vadd.f32 %v1845_v13, %v1216_v55  ;;  %v1125_v13 = vmul.f32 %v1792_v26, %v1819_v32 }
0x166c   :  { %v1892_v56 = vpop.xlane.xlu0 %1228 }
0x166d   :  { %v1242_v57 = vsub.f32 %v1860_v34, %v1892_v56  ;;  %v1218_v58 = vpop.f32.mrf.mxu2 }
0x166f   :  { %v1255_v59 = vmul.f32 1.442695, %v1242_v57 }
0x1671   :  { %1496 = vpow2.f32 %v1255_v59 }
0x1674   :  { %v1896_v4 = vpop.xlane.xlu1 %1230 }
0x1675   :  { %v1243_v61 = vsub.f32 %v1865_v38, %v1896_v4 }
0x1676   :  { %v1898_v60 = vpop.xlane.xlu2 %1224 }
0x1677   :  { %v1497_v15 = vpop.eup %1496  ;;  %v1240_v20 = vsub.f32 %v1868_v40, %v1898_v60  ;;  %v1257_v63 = vmul.f32 1.442695, %v1243_v61 }
0x1678   :  { %1273 = vadd.xlane.f32.xlu2 %v1497_v15 }
0x1679   :  { %v1251_v49 = vmul.f32 1.442695, %v1240_v20 }
0x167b   :  { %1498 = vpow2.f32 %v1251_v49 }
0x167c   :  { %v1266_v62 = vpop.xlane.xlu1 %1265 }
0x167d   :  { %1500 = vlog2.f32 %v1266_v62 }
0x167e   :  { %v1904_v0 = vpop.xlane.xlu2 %1226  ;;  %1502 = vpow2.f32 %v1257_v63 }
0x167f   :  { %v1241_v3 = vsub.f32 %v1877_v48, %v1904_v0 }
0x1681   :  { %v1499_v5 = vpop.eup %1498  ;;  %v1253_v6 = vmul.f32 1.442695, %v1241_v3 }
0x1682   :  { %1269 = vadd.xlane.f32.xlu1 %v1499_v5 }
0x1683   :  { %v1501_v7 = vpop.eup %1500  ;;  %1504 = vpow2.f32 %v1253_v6 }
0x1684   :  { %v1284_v41 = vmul.f32 0.6931472, %v1501_v7  ;;  %v1268_v10 = vpop.xlane.xlu1 %1267  ;;  %v1503_v12 = vpop.eup %1502 }
0x1685   :  { %1506 = vlog2.f32 %v1268_v10  ;;  %v1921_v24 = vpop.xlane.xlu0 %1234 }
0x1686   :  { %v1301_v11 = vadd.f32 %v1284_v41, %v1221_v33  ;;  %v1909_v2 = vpop.xlane.xlu2 %1232  ;;  %v1245_v27 = vsub.f32 %v1881_v51, %v1921_v24 }
0x1687   :  { %v1244_v18 = vsub.f32 %v1884_v53, %v1909_v2 }
0x1688   :  { %v1310_v28 = vsub.f32 %v1848_v16, %v1301_v11  ;;  %v1261_v29 = vmul.f32 1.442695, %v1245_v27 }
0x1689   :  { %v1505_v14 = vpop.eup %1504  ;;  %v1259_v22 = vmul.f32 1.442695, %v1244_v18 }
0x168a   :  { %1319 = vst [vmem:[%s1979_s8] sm:$0xff] %v1310_v28  ;;  %1275 = vadd.xlane.f32.xlu1 %v1503_v12  ;;  %1271 = vadd.xlane.f32.xlu0 %v1505_v14 }
0x168b   :  { %v1507_v17 = vpop.eup %1506  ;;  %1508 = vpow2.f32 %v1259_v22 }
0x168c   :  { %v1286_v19 = vmul.f32 0.6931472, %v1507_v17  ;;  %1510 = vpow2.f32 %v1261_v29 }
0x168e   :  { %v1302_v21 = vadd.f32 %v1286_v19, %v1871_v42  ;;  %v1117_v35 = vpop.permute.xlu2 %1116 }
0x168f   :  { %v1119_v5 = vadd.f32 %v1117_v35, %v1834_v9 }
0x1690   :  { %v1311_v16 = vsub.f32 %v1854_v25, %v1302_v21 }
0x1691   :  { %v1509_v30 = vpop.eup %1508 }
0x1692   :  { %1320 = vst [vmem:[%s1979_s8 + $0x8] sm:$0xff] %v1311_v16  ;;  %1236 = vmax.xlane.f32.xlu1 %v1918_v23  ;;  %v1511_v33 = vpop.eup %1510 }
0x1697   :  { %v1130_v31 = vpop.permute.xlu0 %1129 }
0x1698   :  { %v1132_v25 = vadd.f32 %v1130_v31, %v1125_v13 }
0x169a   :  { %1277 = vadd.xlane.f32.xlu1 %v1509_v30 }
0x169e   :  { %1134 = vrot.lane.b32.xlu0 %v1132_v25, %s1532_s20 }
0x16a2   :  { %1279 = vadd.xlane.f32.xlu1 %v1511_v33 }
0x16eb   :  { %v1274_v36 = vpop.xlane.xlu2 %1273 }
0x16ec   :  { %1512 = vlog2.f32 %v1274_v36 }
0x16f2   :  { %v1513_v37 = vpop.eup %1512 }
0x16f3   :  { %v1292_v39 = vmul.f32 0.6931472, %v1513_v37 }
0x16f5   :  { %v1305_v42 = vadd.f32 %v1292_v39, %v1892_v56  ;;  %v1270_v43 = vpop.xlane.xlu1 %1269 }
0x16f6   :  { %1514 = vlog2.f32 %v1270_v43 }
0x16f7   :  { %v1314_v44 = vsub.f32 %v1860_v34, %v1305_v42 }
0x16f9   :  { %1323 = vst [vmem:[%s1979_s8 + $0x20] sm:$0xff] %v1314_v44 }
0x16fc   :  { %v1515_v26 = vpop.eup %1514 }
0x16fd   :  { %v1288_v32 = vmul.f32 0.6931472, %v1515_v26  ;;  %v1276_v45 = vpop.xlane.xlu1 %1275  ;;  %v1272_v46 = vpop.xlane.xlu0 %1271 }
0x16fe   :  { %1516 = vlog2.f32 %v1276_v45 }
0x16ff   :  { %v1303_v47 = vadd.f32 %v1288_v32, %v1898_v60  ;;  %1518 = vlog2.f32 %v1272_v46 }
0x1701   :  { %v1312_v50 = vsub.f32 %v1868_v40, %v1303_v47 }
0x1703   :  { %1321 = vst [vmem:[%s1979_s8 + $0x10] sm:$0xff] %v1312_v50 }
0x1704   :  { %v1517_v52 = vpop.eup %1516 }
0x1705   :  { %v1519_v34 = vpop.eup %1518  ;;  %v1294_v54 = vmul.f32 0.6931472, %v1517_v52  ;;  %v1237_v8 = vpop.xlane.xlu1 %1236 }
0x1706   :  { %v1290_v1 = vmul.f32 0.6931472, %v1519_v34  ;;  %v1246_v55 = vsub.f32 %v1918_v23, %v1237_v8 }
0x1707   :  { %v1306_v56 = vadd.f32 %v1294_v54, %v1896_v4 }
0x1708   :  { %v1304_v57 = vadd.f32 %v1290_v1, %v1904_v0  ;;  %v1263_v58 = vmul.f32 1.442695, %v1246_v55 }
0x1709   :  { %v1315_v59 = vsub.f32 %v1865_v38, %v1306_v56 }
0x170a   :  { %v1313_v40 = vsub.f32 %v1877_v48, %v1304_v57  ;;  %1520 = vpow2.f32 %v1263_v58 }
0x170b   :  { %1324 = vst [vmem:[%s1979_s8 + $0x28] sm:$0xff] %v1315_v59 }
0x170c   :  { %1322 = vst [vmem:[%s1979_s8 + $0x18] sm:$0xff] %v1313_v40 }
0x170d   :  { %v1278_v60 = vpop.xlane.xlu1 %1277 }
0x170e   :  { %1522 = vlog2.f32 %v1278_v60 }
0x1710   :  { %v1521_v15 = vpop.eup %1520  ;;  %v1135_v4 = vpop.permute.xlu0 %1134 }
0x1711   :  { %1137 = vst.msk [vmem:[#allocation5] sm:$0xff] %vm82_vm0, %v1135_v4  ;;  %1281 = vadd.xlane.f32.xlu1 %v1521_v15 }
0x1714   :  { %v1523_v20 = vpop.eup %1522 }
0x1715   :  { %v1296_v38 = vmul.f32 0.6931472, %v1523_v20  ;;  %v1280_v49 = vpop.xlane.xlu1 %1279 }
0x1716   :  { %1524 = vlog2.f32 %v1280_v49 }
0x1717   :  { %v1307_v48 = vadd.f32 %v1296_v38, %v1909_v2 }
0x1719   :  { %v1316_v61 = vsub.f32 %v1884_v53, %v1307_v48 }
0x171b   :  { %1325 = vst [vmem:[%s1979_s8 + $0x30] sm:$0xff] %v1316_v61 }
0x171c   :  { %v1525_v62 = vpop.eup %1524 }
0x171d   :  { %v1298_v63 = vmul.f32 0.6931472, %v1525_v62 }
0x171f   :  { %v1308_v0 = vadd.f32 %v1298_v63, %v1921_v24 }
0x1721   :  { %v1317_v3 = vsub.f32 %v1881_v51, %v1308_v0 }
0x1723   :  { %1326 = vst [vmem:[%s1979_s8 + $0x38] sm:$0xff] %v1317_v3 }
0x172a   :  { %1121 = vrot.lane.b32.xlu1 %v1119_v5, %s1530_s17 }
0x1784   :  { %v1282_v6 = vpop.xlane.xlu1 %1281 }
0x1785   :  { %1526 = vlog2.f32 %v1282_v6 }
0x178b   :  { %v1527_v53 = vpop.eup %1526 }
0x178c   :  { %v1300_v7 = vmul.f32 0.6931472, %v1527_v53 }
0x178e   :  { %v1309_v41 = vadd.f32 %v1300_v7, %v1237_v8 }
0x1790   :  { %v1318_v10 = vsub.f32 %v1918_v23, %v1309_v41 }
0x1792   :  { %1327 = vst [vmem:[%s1979_s8 + $0x40] sm:$0xff] %v1318_v10 }
0x179c   :  { %v1122_v51 = vpop.permute.xlu1 %1121 }
0x179d   :  { %1124 = vst.msk [vmem:[#allocation4] sm:$0xff] %vm82_vm0, %v1122_v51 }

</bundles_post_ra>
